<compile_context>
chip_gen: v7x
topology: tpu7x:2x2x1
jax: 0.10.0
libtpu: 0.0.40
codegen_flags: <defaults>
</compile_context>

<pallas_src>
import functools

import jax
import jax.numpy as jnp
from jax.experimental import pallas as pl
from jax.experimental.pallas import tpu as pltpu

# ----------------------------- configuration ------------------------------
IMAGE_SIZE = 16
PATCH_SIZE = 4
CHANNELS = 3
DIM = 32
DEPTH = 2
HEADS = 4
DIM_HEAD = 8
MLP_DIM = 64
NUM_CLASSES = 10
POOL = "cls"

NUM_PATCHES = (IMAGE_SIZE // PATCH_SIZE) * (IMAGE_SIZE // PATCH_SIZE)   # 16
PATCH_DIM = PATCH_SIZE * PATCH_SIZE * 5 * CHANNELS                      # 240
INNER = HEADS * DIM_HEAD                                                # 32
SEQ = NUM_PATCHES + 1                                                   # 17
SEQ_PAD = ((SEQ + 7) // 8) * 8                                          # 24 (8-aligned per-image block)
LOGITS_PAD = 128                                                        # lane-dense logits
NEG_INF = -1e30


# --------------------------- in-kernel helpers -----------------------------
def _layernorm(x, g, b, eps=1e-5):
    mu = jnp.mean(x, axis=-1, keepdims=True)
    var = jnp.mean((x - mu) * (x - mu), axis=-1, keepdims=True)
    return (x - mu) * jax.lax.rsqrt(var + eps) * g + b


def _rmsnorm(x):
    # TODO(synk): FastSimpleRMSNorm source not provided; implementing the
    # parameter-free RMS norm x / sqrt(mean(x^2) + eps).
    ms = jnp.mean(x * x, axis=-1, keepdims=True)
    return x * jax.lax.rsqrt(ms + 1e-6)


def _lsa(x, wqkv, wo, bo, scale, addmask, batch):
    # TODO(synk): LSA source not provided; implementing the standard LSA
    # (vit-for-small-datasets): learnable temperature, diagonal self-mask,
    # bias-free qkv, output projection with bias.
    qkv = jnp.dot(x.astype(jnp.bfloat16), wqkv,
                  preferred_element_type=jnp.float32)       # (batch*SEQ_PAD, 3*INNER)
    outs = []
    for i in range(batch):
        qkv_i = qkv[i * SEQ_PAD:(i + 1) * SEQ_PAD, :]
        acc = None
        for h in range(HEADS):
            q = qkv_i[:, h * DIM_HEAD:(h + 1) * DIM_HEAD]
            k = qkv_i[:, INNER + h * DIM_HEAD:INNER + (h + 1) * DIM_HEAD]
            v = qkv_i[:, 2 * INNER + h * DIM_HEAD:2 * INNER + (h + 1) * DIM_HEAD]
            # q @ k^T (contract last dims, no explicit transpose).
            dots = jax.lax.dot_general(
                q.astype(jnp.bfloat16), k.astype(jnp.bfloat16),
                (((1,), (1,)), ((), ())),
                preferred_element_type=jnp.float32)
            dots = dots * scale + addmask
            dots = dots - jnp.max(dots, axis=-1, keepdims=True)
            p = jnp.exp(dots)
            p = p * pl.reciprocal(jnp.sum(p, axis=-1, keepdims=True), approx=True)
            hv = jnp.dot(p.astype(jnp.bfloat16), v.astype(jnp.bfloat16),
                         preferred_element_type=jnp.float32)            # (SEQ_PAD, dh)
            # Fold the output projection into the per-head loop (stays in vregs).
            ho = jnp.dot(hv.astype(jnp.bfloat16),
                         wo[h * DIM_HEAD:(h + 1) * DIM_HEAD, :],
                         preferred_element_type=jnp.float32)            # (SEQ_PAD, dim)
            acc = ho if acc is None else acc + ho
        outs.append(acc + bo)
    return jnp.concatenate(outs, axis=0)


def _sglu(x, wuv, wo):
    # u and v projections fused into one lane-dense (dim, 2*mlp) matmul.
    uv = jnp.dot(x.astype(jnp.bfloat16), wuv,
                 preferred_element_type=jnp.float32)        # (rows, 2*mlp)
    gated = uv[:, :MLP_DIM] * uv[:, MLP_DIM:]
    return jnp.dot(gated.astype(jnp.bfloat16), wo,
                   preferred_element_type=jnp.float32)


# ------------------------------ fused kernel -------------------------------
def _vit_kernel(patches_ref, spt_ln_ref, vec_ref, head_b_ref, scales_ref,
                wqkv_ref, wo_attn_ref, wuv_ref, wo_sglu_ref, spt_w_ref, head_w_ref,
                o_ref, *, batch, n_lsa, n_sglu, depth):
    # Static row offsets into the packed (R, dim) f32 vector buffer.
    emb_rows = batch * SEQ_PAD
    spt_b_row = emb_rows
    bo_row0 = emb_rows + 1
    hg_row = bo_row0 + n_lsa
    hb_row = hg_row + 1

    # --- SPT patch embedding: LayerNorm(patch_dim) -> Linear(patch_dim, dim),
    #     batched over all images' patches (batch folded into rows) ---
    pn = _layernorm(patches_ref[...], spt_ln_ref[0:1, :], spt_ln_ref[1:2, :])
    tok = (jnp.dot(pn.astype(jnp.bfloat16), spt_w_ref[...],
                   preferred_element_type=jnp.float32)
           + vec_ref[spt_b_row:spt_b_row + 1, :])           # (batch*num_patches, dim)

    # --- assemble (batch*SEQ_PAD, dim) tokens: per image block of SEQ_PAD rows,
    #     rows 0..15 = patch tokens (+pos), row 16 = cls (+pos, from emb),
    #     rows 17..23 = zero padding (keeps per-image slices 8-sublane aligned) ---
    zpad = jnp.zeros((SEQ_PAD - NUM_PATCHES, DIM), jnp.float32)
    pieces = []
    for i in range(batch):
        pieces.append(tok[i * NUM_PATCHES:(i + 1) * NUM_PATCHES, :])
        pieces.append(zpad)
    x = jnp.concatenate(pieces, axis=0) + vec_ref[0:emb_rows, :]

    # Additive attention mask: LSA diagonal self-mask + mask padding keys.
    rows = jax.lax.broadcasted_iota(jnp.int32, (SEQ_PAD, SEQ_PAD), 0)
    cols = jax.lax.broadcasted_iota(jnp.int32, (SEQ_PAD, SEQ_PAD), 1)
    addmask = jnp.where((rows == cols) | (cols >= SEQ),
                        NEG_INF, 0.0).astype(jnp.float32)

    def attn(l, xi):
        return _lsa(xi, wqkv_ref[l], wo_attn_ref[l],
                    vec_ref[bo_row0 + l:bo_row0 + l + 1, :],
                    scales_ref[l], addmask, batch)

    def ffn(l, xi):
        return _sglu(xi, wuv_ref[l], wo_sglu_ref[l])

    # --- Transformer (matches reference: final_attn first, each layer's shared
    #     (attn, ff) pair applied twice, final_ffn last) ---
    x = _rmsnorm(x)
    x = attn(0, x) + x
    for li in range(depth - 1):
        for _ in range(2):
            x = _rmsnorm(x)
            x = attn(1 + li, x) + x
            x = _rmsnorm(x)
            x = ffn(li, x) + x
    x = _rmsnorm(x)
    x = ffn(n_sglu - 1, x) + x

    # --- pool (cls sits at row NUM_PATCHES of each image block) + head ---
    pooled = []
    for i in range(batch):
        o = i * SEQ_PAD
        if POOL == "mean":
            pooled.append(jnp.mean(x[o:o + SEQ, :], axis=0, keepdims=True))
        else:
            pooled.append(x[o + NUM_PATCHES:o + NUM_PATCHES + 1, :])
    pooled = jnp.concatenate(pooled, axis=0)                # (batch, dim)
    hn = _layernorm(pooled, vec_ref[hg_row:hg_row + 1, :],
                    vec_ref[hb_row:hb_row + 1, :])
    o_ref[...] = (jnp.dot(hn.astype(jnp.bfloat16), head_w_ref[...],
                          preferred_element_type=jnp.float32)
                  + head_b_ref[...])                        # (batch, LOGITS_PAD)


# ------------------------------- plain-JAX glue -----------------------------
def spt_shift_concat(x):
    """x: (b, c, h, w) NCHW.  F.pad order is (w_left, w_right, h_top, h_bottom)."""
    shifts = ((1, -1, 0, 0), (-1, 1, 0, 0), (0, 0, 1, -1), (0, 0, -1, 1))
    shifted = []
    for (wl, wr, ht, hb) in shifts:
        shifted.append(
            jax.lax.pad(
                x, jnp.float32(0.0),
                ((0, 0, 0), (0, 0, 0), (ht, hb, 0), (wl, wr, 0)),
            )
        )
    return jnp.concatenate([x] + shifted, axis=1)   # (b, 5c, h, w)


def to_patches(x, p):
    """Rearrange 'b c (h p1) (w p2) -> b (h w) (p1 p2 c)'."""
    b, c, hh, ww = x.shape
    h, w = hh // p, ww // p
    x = x.reshape(b, c, h, p, w, p)
    x = x.transpose(0, 2, 4, 3, 5, 1)               # b h w p1 p2 c
    return x.reshape(b, h * w, p * p * c)


def pack_params(params, batch):
    """One-time parameter packing / casting (outside the per-call jit path)."""
    spt, head, t = params["spt"], params["head"], params["transformer"]
    lsa_list = [t["final_attn"]] + [ap for ap, _ in t["layers"]]
    sglu_list = [fp for _, fp in t["layers"]] + [t["final_ffn"]]

    bf16 = lambda a: a.astype(jnp.bfloat16)

    # Positional embedding rolled so the cls token sits at the END of each
    # per-image block (row NUM_PATCHES); pad rows get zeros.
    pos = params["pos_embedding"].reshape(SEQ, DIM).astype(jnp.float32)
    cls = params["cls_token"].reshape(1, DIM).astype(jnp.float32)
    block = jnp.concatenate(
        [pos[1:SEQ], cls + pos[0:1],
         jnp.zeros((SEQ_PAD - SEQ, DIM), jnp.float32)], axis=0)   # (SEQ_PAD, dim)
    emb = jnp.concatenate([block] * batch, axis=0)                # (batch*SEQ_PAD, dim)

    # All dim-wide f32 vectors packed into one buffer (static row slices in-kernel).
    vec_rows = [emb, spt["b"].reshape(1, DIM)]
    vec_rows += [p["bo"].reshape(1, DIM) for p in lsa_list]
    vec_rows += [head["ln_g"].reshape(1, DIM), head["ln_b"].reshape(1, DIM)]

    head_w = jnp.zeros((DIM, LOGITS_PAD), jnp.float32).at[:, :NUM_CLASSES].set(head["w"])
    head_b = jnp.zeros((1, LOGITS_PAD), jnp.float32).at[:, :NUM_CLASSES].set(
        head["b"].reshape(1, NUM_CLASSES))

    return {
        "spt_ln": jnp.stack([spt["ln_g"], spt["ln_b"]]).astype(jnp.float32),
        "vec": jnp.concatenate(vec_rows, axis=0).astype(jnp.float32),
        "head_b": head_b,
        # exp(log_temperature) precomputed; read in-kernel as SMEM scalars.
        "scales": jnp.exp(jnp.stack([p["temp"] for p in lsa_list])).astype(jnp.float32),
        "wqkv": bf16(jnp.stack([p["wqkv"] for p in lsa_list])),
        "wo_attn": bf16(jnp.stack([p["wo"] for p in lsa_list])),
        "wuv": bf16(jnp.stack([jnp.concatenate([p["wu"], p["wv"]], axis=1)
                               for p in sglu_list])),
        "wo_sglu": bf16(jnp.stack([p["wo"] for p in sglu_list])),
        "spt_w": bf16(spt["w"]),
        "head_w": bf16(head_w),
    }


def _full_spec(arr):
    return pl.BlockSpec(arr.shape, lambda i, nd=arr.ndim: (0,) * nd)


def vit_forward(img, packed):
    b = img.shape[0]
    n_lsa = packed["wqkv"].shape[0]
    n_sglu = packed["wuv"].shape[0]
    assert packed["vec"].shape[0] == b * SEQ_PAD + 1 + n_lsa + 2

    # SPT shift-pad concat + patch rearrange: pure layout glue, plain JAX.
    patches = to_patches(spt_shift_concat(img), PATCH_SIZE)      # (b, n, patch_dim)
    patches = patches.reshape(b * NUM_PATCHES, PATCH_DIM)        # batch folded into rows

    inputs = [patches, packed["spt_ln"], packed["vec"], packed["head_b"],
              packed["scales"], packed["wqkv"], packed["wo_attn"], packed["wuv"],
              packed["wo_sglu"], packed["spt_w"], packed["head_w"]]
    specs = [_full_spec(a) for a in inputs]
    specs[4] = pl.BlockSpec(memory_space=pltpu.MemorySpace.SMEM)   # scales (scalars)

    out = pl.pallas_call(
        functools.partial(_vit_kernel, batch=b, n_lsa=n_lsa, n_sglu=n_sglu,
                          depth=DEPTH),
        out_shape=jax.ShapeDtypeStruct((b, LOGITS_PAD), jnp.float32),
        grid=(1,),
        in_specs=specs,
        out_specs=pl.BlockSpec((b, LOGITS_PAD), lambda i: (0, 0)),
        compiler_params=pltpu.CompilerParams(
            dimension_semantics=("arbitrary",)),
    )(*inputs)
    return out[:, :NUM_CLASSES]


# --------------------------- deterministic params ---------------------------
def init_params(key):
    keys = iter(jax.random.split(key, 64))
    nrm = lambda shape, s=0.02: (s * jax.random.normal(next(keys), shape)).astype(
        jnp.float32
    )

    def lsa_params():
        return {
            "wqkv": nrm((DIM, 3 * INNER)),
            "temp": jnp.array(jnp.log(DIM_HEAD ** -0.5), jnp.float32),
            "wo": nrm((INNER, DIM)),
            "bo": jnp.zeros((DIM,), jnp.float32),
        }

    def sglu_params():
        return {
            "wu": nrm((DIM, MLP_DIM)),
            "wv": nrm((DIM, MLP_DIM)),
            "wo": nrm((MLP_DIM, DIM)),
        }

    params = {
        "spt": {
            "ln_g": jnp.ones((PATCH_DIM,), jnp.float32),
            "ln_b": jnp.zeros((PATCH_DIM,), jnp.float32),
            "w": nrm((PATCH_DIM, DIM)),
            "b": jnp.zeros((DIM,), jnp.float32),
        },
        "pos_embedding": nrm((1, NUM_PATCHES + 1, DIM), s=1.0),
        "cls_token": nrm((1, 1, DIM), s=1.0),
        "transformer": {
            "layers": [(lsa_params(), sglu_params()) for _ in range(DEPTH - 1)],
            "final_attn": lsa_params(),
            "final_ffn": sglu_params(),
        },
        "head": {
            "ln_g": jnp.ones((DIM,), jnp.float32),
            "ln_b": jnp.zeros((DIM,), jnp.float32),
            "w": nrm((DIM, NUM_CLASSES)),
            "b": jnp.zeros((NUM_CLASSES,), jnp.float32),
        },
    }
    return params


# ----------------------------------- main -----------------------------------
if __name__ == "__main__":
    key = jax.random.PRNGKey(0)
    pkey, xkey = jax.random.split(key)
    params = init_params(pkey)
    img = jax.random.normal(xkey, (2, CHANNELS, IMAGE_SIZE, IMAGE_SIZE), jnp.float32)

    packed = pack_params(params, img.shape[0])          # one-time packing/casting
    out = jax.jit(vit_forward)(img, packed)
    out = jax.block_until_ready(out)
    assert out.shape == (2, NUM_CLASSES), out.shape
    assert bool(jnp.all(jnp.isfinite(out)))
    print("KERNEL_OK")
</pallas_src>

<mosaic_0001>
module attributes {stable_mosaic.version = 11 : i64} {
  func.func @_vit_kernel(%arg0: i32, %arg1: memref<32x240xf32, #tpu.memory_space<vmem>>, %arg2: memref<2x240xf32, #tpu.memory_space<vmem>>, %arg3: memref<53x32xf32, #tpu.memory_space<vmem>>, %arg4: memref<1x128xf32, #tpu.memory_space<vmem>>, %arg5: memref<2xf32, #tpu.memory_space<smem>>, %arg6: memref<2x32x96xbf16, #tpu.memory_space<vmem>>, %arg7: memref<2x32x32xbf16, #tpu.memory_space<vmem>>, %arg8: memref<2x32x128xbf16, #tpu.memory_space<vmem>>, %arg9: memref<2x64x32xbf16, #tpu.memory_space<vmem>>, %arg10: memref<240x32xbf16, #tpu.memory_space<vmem>>, %arg11: memref<32x128xbf16, #tpu.memory_space<vmem>>, %arg12: memref<2x128xf32, #tpu.memory_space<vmem>>) attributes {dimension_semantics = [#tpu.dimension_semantics<arbitrary>], iteration_bounds = array<i64: 1>, scalar_prefetch = 0 : i64, scratch_operands = 0 : i64, tpu.core_type = #tpu.core_type<tc>, window_params = [{pipeline_mode = #tpu.pipeline_mode<synchronous>, transform_indices = @transform_0, window_bounds = array<i64: 32, 240>}, {pipeline_mode = #tpu.pipeline_mode<synchronous>, transform_indices = @transform_1, window_bounds = array<i64: 2, 240>}, {pipeline_mode = #tpu.pipeline_mode<synchronous>, transform_indices = @transform_2, window_bounds = array<i64: 53, 32>}, {pipeline_mode = #tpu.pipeline_mode<synchronous>, transform_indices = @transform_3, window_bounds = array<i64: 1, 128>}, {transform_indices = @transform_4, window_bounds = array<i64: 2>}, {pipeline_mode = #tpu.pipeline_mode<synchronous>, transform_indices = @transform_5, window_bounds = array<i64: 2, 32, 96>}, {pipeline_mode = #tpu.pipeline_mode<synchronous>, transform_indices = @transform_6, window_bounds = array<i64: 2, 32, 32>}, {pipeline_mode = #tpu.pipeline_mode<synchronous>, transform_indices = @transform_7, window_bounds = array<i64: 2, 32, 128>}, {pipeline_mode = #tpu.pipeline_mode<synchronous>, transform_indices = @transform_8, window_bounds = array<i64: 2, 64, 32>}, {pipeline_mode = #tpu.pipeline_mode<synchronous>, transform_indices = @transform_9, window_bounds = array<i64: 240, 32>}, {pipeline_mode = #tpu.pipeline_mode<synchronous>, transform_indices = @transform_10, window_bounds = array<i64: 32, 128>}, {pipeline_mode = #tpu.pipeline_mode<synchronous>, transform_indices = @transform_11, window_bounds = array<i64: 2, 128>}]} {
    %c0 = arith.constant 0 : index
    %c0_0 = arith.constant 0 : index
    %0 = vector.load %arg1[%c0, %c0_0] : memref<32x240xf32, #tpu.memory_space<vmem>>, vector<32x240xf32>
    %c0_1 = arith.constant 0 : index
    %c0_2 = arith.constant 0 : index
    %1 = vector.load %arg2[%c0_1, %c0_2] : memref<2x240xf32, #tpu.memory_space<vmem>>, vector<1x240xf32>
    %c1 = arith.constant 1 : index
    %c0_3 = arith.constant 0 : index
    %2 = vector.load %arg2[%c1, %c0_3] : memref<2x240xf32, #tpu.memory_space<vmem>>, vector<1x240xf32>
    %cst = arith.constant dense<0.000000e+00> : vector<32xf32>
    %3 = vector.multi_reduction <add>, %0, %cst [1] : vector<32x240xf32> to vector<32xf32>
    %4 = vector.shape_cast %3 : vector<32xf32> to vector<32x1xf32>
    %cst_4 = arith.constant 2.400000e+02 : f32
    %5 = vector.broadcast %cst_4 : f32 to vector<32x1xf32>
    %6 = arith.divf %4, %5 : vector<32x1xf32>
    %7 = vector.broadcast %6 : vector<32x1xf32> to vector<32x240xf32>
    %8 = arith.subf %0, %7 : vector<32x240xf32>
    %9 = vector.broadcast %6 : vector<32x1xf32> to vector<32x240xf32>
    %10 = arith.subf %0, %9 : vector<32x240xf32>
    %11 = arith.mulf %8, %10 : vector<32x240xf32>
    %cst_5 = arith.constant dense<0.000000e+00> : vector<32xf32>
    %12 = vector.multi_reduction <add>, %11, %cst_5 [1] : vector<32x240xf32> to vector<32xf32>
    %13 = vector.shape_cast %12 : vector<32xf32> to vector<32x1xf32>
    %cst_6 = arith.constant 2.400000e+02 : f32
    %14 = vector.broadcast %cst_6 : f32 to vector<32x1xf32>
    %15 = arith.divf %13, %14 : vector<32x1xf32>
    %16 = vector.broadcast %6 : vector<32x1xf32> to vector<32x240xf32>
    %17 = arith.subf %0, %16 : vector<32x240xf32>
    %cst_7 = arith.constant 9.99999974E-6 : f32
    %18 = vector.broadcast %cst_7 : f32 to vector<32x1xf32>
    %19 = arith.addf %15, %18 : vector<32x1xf32>
    %20 = math.rsqrt %19 : vector<32x1xf32>
    %21 = vector.broadcast %20 : vector<32x1xf32> to vector<32x240xf32>
    %22 = arith.mulf %17, %21 : vector<32x240xf32>
    %23 = vector.broadcast %1 : vector<1x240xf32> to vector<32x240xf32>
    %24 = arith.mulf %22, %23 : vector<32x240xf32>
    %25 = vector.broadcast %2 : vector<1x240xf32> to vector<32x240xf32>
    %26 = arith.addf %24, %25 : vector<32x240xf32>
    %27 = arith.truncf %26 : vector<32x240xf32> to vector<32x240xbf16>
    %c0_8 = arith.constant 0 : index
    %c0_9 = arith.constant 0 : index
    %28 = vector.load %arg10[%c0_8, %c0_9] : memref<240x32xbf16, #tpu.memory_space<vmem>>, vector<240x32xbf16>
    %cst_10 = arith.constant dense<0.000000e+00> : vector<32x32xf32>
    %29 = tpu.matmul %27, %28, %cst_10 {dimension_numbers = #tpu.dot_dimension_numbers<[1], [0], [0], [1], [0, 0, 1, 1], [], []>} : vector<32x240xbf16>, vector<240x32xbf16>, vector<32x32xf32> -> vector<32x32xf32>
    %c48 = arith.constant 48 : index
    %c0_11 = arith.constant 0 : index
    %30 = vector.load %arg3[%c48, %c0_11] : memref<53x32xf32, #tpu.memory_space<vmem>>, vector<1x32xf32>
    %31 = vector.broadcast %30 : vector<1x32xf32> to vector<32x32xf32>
    %32 = arith.addf %29, %31 : vector<32x32xf32>
    %cst_12 = arith.constant 0.000000e+00 : f32
    %33 = vector.broadcast %cst_12 : f32 to vector<8x32xf32>
    %34 = vector.extract_strided_slice %32 {offsets = [0, 0], sizes = [16, 32], strides = [1, 1]} : vector<32x32xf32> to vector<16x32xf32>
    %35 = vector.extract_strided_slice %32 {offsets = [16, 0], sizes = [16, 32], strides = [1, 1]} : vector<32x32xf32> to vector<16x32xf32>
    %36 = tpu.concatenate %34, %33, %35, %33 in 0 : vector<16x32xf32>, vector<8x32xf32>, vector<16x32xf32>, vector<8x32xf32> -> vector<48x32xf32>
    %c0_13 = arith.constant 0 : index
    %c0_14 = arith.constant 0 : index
    %37 = vector.load %arg3[%c0_13, %c0_14] : memref<53x32xf32, #tpu.memory_space<vmem>>, vector<48x32xf32>
    %38 = arith.addf %36, %37 : vector<48x32xf32>
    %39 = tpu.iota {dimensions = array<i32: 0>} : vector<24x24xi32>
    %40 = tpu.iota {dimensions = array<i32: 1>} : vector<24x24xi32>
    %41 = arith.cmpi eq, %39, %40 : vector<24x24xi32>
    %c17_i32 = arith.constant 17 : i32
    %42 = vector.broadcast %c17_i32 : i32 to vector<24x24xi32>
    %43 = arith.cmpi sge, %40, %42 : vector<24x24xi32>
    %44 = arith.ori %41, %43 : vector<24x24xi1>
    %cst_15 = arith.constant -1.000000e+30 : f32
    %cst_16 = arith.constant 0.000000e+00 : f32
    %45 = vector.broadcast %cst_15 : f32 to vector<24x24xf32>
    %46 = vector.broadcast %cst_16 : f32 to vector<24x24xf32>
    %47 = arith.select %44, %45, %46 : vector<24x24xi1>, vector<24x24xf32>
    %48 = arith.mulf %38, %38 : vector<48x32xf32>
    %cst_17 = arith.constant dense<0.000000e+00> : vector<48xf32>
    %49 = vector.multi_reduction <add>, %48, %cst_17 [1] : vector<48x32xf32> to vector<48xf32>
    %50 = vector.shape_cast %49 : vector<48xf32> to vector<48x1xf32>
    %cst_18 = arith.constant 3.200000e+01 : f32
    %51 = vector.broadcast %cst_18 : f32 to vector<48x1xf32>
    %52 = arith.divf %50, %51 : vector<48x1xf32>
    %cst_19 = arith.constant 9.99999997E-7 : f32
    %53 = vector.broadcast %cst_19 : f32 to vector<48x1xf32>
    %54 = arith.addf %52, %53 : vector<48x1xf32>
    %55 = math.rsqrt %54 : vector<48x1xf32>
    %56 = vector.broadcast %55 : vector<48x1xf32> to vector<48x32xf32>
    %57 = arith.mulf %38, %56 : vector<48x32xf32>
    %c0_20 = arith.constant 0 : index
    %c0_21 = arith.constant 0 : index
    %c0_22 = arith.constant 0 : index
    %58 = vector.load %arg6[%c0_20, %c0_21, %c0_22] : memref<2x32x96xbf16, #tpu.memory_space<vmem>>, vector<1x32x96xbf16>
    %59 = vector.shape_cast %58 : vector<1x32x96xbf16> to vector<32x96xbf16>
    %c0_23 = arith.constant 0 : index
    %c0_24 = arith.constant 0 : index
    %c0_25 = arith.constant 0 : index
    %60 = vector.load %arg7[%c0_23, %c0_24, %c0_25] : memref<2x32x32xbf16, #tpu.memory_space<vmem>>, vector<1x32x32xbf16>
    %61 = vector.shape_cast %60 : vector<1x32x32xbf16> to vector<32x32xbf16>
    %c49 = arith.constant 49 : index
    %c0_26 = arith.constant 0 : index
    %62 = vector.load %arg3[%c49, %c0_26] : memref<53x32xf32, #tpu.memory_space<vmem>>, vector<1x32xf32>
    %c0_27 = arith.constant 0 : index
    %63 = memref.load %arg5[%c0_27] : memref<2xf32, #tpu.memory_space<smem>>
    %64 = arith.truncf %57 : vector<48x32xf32> to vector<48x32xbf16>
    %cst_28 = arith.constant dense<0.000000e+00> : vector<48x96xf32>
    %65 = tpu.matmul %64, %59, %cst_28 {dimension_numbers = #tpu.dot_dimension_numbers<[1], [0], [0], [1], [0, 0, 1, 1], [], []>} : vector<48x32xbf16>, vector<32x96xbf16>, vector<48x96xf32> -> vector<48x96xf32>
    %66 = vector.extract_strided_slice %65 {offsets = [0, 0], sizes = [24, 96], strides = [1, 1]} : vector<48x96xf32> to vector<24x96xf32>
    %67 = vector.extract_strided_slice %66 {offsets = [0, 0], sizes = [24, 8], strides = [1, 1]} : vector<24x96xf32> to vector<24x8xf32>
    %68 = vector.extract_strided_slice %66 {offsets = [0, 32], sizes = [24, 8], strides = [1, 1]} : vector<24x96xf32> to vector<24x8xf32>
    %69 = vector.extract_strided_slice %66 {offsets = [0, 64], sizes = [24, 8], strides = [1, 1]} : vector<24x96xf32> to vector<24x8xf32>
    %70 = arith.truncf %67 : vector<24x8xf32> to vector<24x8xbf16>
    %71 = arith.truncf %68 : vector<24x8xf32> to vector<24x8xbf16>
    %cst_29 = arith.constant dense<0.000000e+00> : vector<24x24xf32>
    %72 = tpu.matmul %70, %71, %cst_29 {dimension_numbers = #tpu.dot_dimension_numbers<[1], [1], [0], [0], [0, 0, 1, 0], [], []>} : vector<24x8xbf16>, vector<24x8xbf16>, vector<24x24xf32> -> vector<24x24xf32>
    %73 = vector.broadcast %63 : f32 to vector<24x24xf32>
    %74 = arith.mulf %72, %73 : vector<24x24xf32>
    %75 = arith.addf %74, %47 : vector<24x24xf32>
    %cst_30 = arith.constant dense<0xFF800000> : vector<24xf32>
    %76 = vector.multi_reduction <maximumf>, %75, %cst_30 [1] : vector<24x24xf32> to vector<24xf32>
    %77 = vector.shape_cast %76 : vector<24xf32> to vector<24x1xf32>
    %78 = vector.broadcast %77 : vector<24x1xf32> to vector<24x24xf32>
    %79 = arith.subf %75, %78 : vector<24x24xf32>
    %80 = math.exp %79 : vector<24x24xf32>
    %cst_31 = arith.constant dense<0.000000e+00> : vector<24xf32>
    %81 = vector.multi_reduction <add>, %80, %cst_31 [1] : vector<24x24xf32> to vector<24xf32>
    %82 = vector.shape_cast %81 : vector<24xf32> to vector<24x1xf32>
    %83 = tpu.reciprocal %82 {approx = true} : vector<24x1xf32> -> vector<24x1xf32>
    %84 = vector.broadcast %83 : vector<24x1xf32> to vector<24x24xf32>
    %85 = arith.mulf %80, %84 : vector<24x24xf32>
    %86 = arith.truncf %85 : vector<24x24xf32> to vector<24x24xbf16>
    %87 = arith.truncf %69 : vector<24x8xf32> to vector<24x8xbf16>
    %cst_32 = arith.constant dense<0.000000e+00> : vector<24x8xf32>
    %88 = tpu.matmul %86, %87, %cst_32 {dimension_numbers = #tpu.dot_dimension_numbers<[1], [0], [0], [1], [0, 0, 1, 1], [], []>} : vector<24x24xbf16>, vector<24x8xbf16>, vector<24x8xf32> -> vector<24x8xf32>
    %89 = arith.truncf %88 : vector<24x8xf32> to vector<24x8xbf16>
    %90 = vector.extract_strided_slice %61 {offsets = [0, 0], sizes = [8, 32], strides = [1, 1]} : vector<32x32xbf16> to vector<8x32xbf16>
    %cst_33 = arith.constant dense<0.000000e+00> : vector<24x32xf32>
    %91 = tpu.matmul %89, %90, %cst_33 {dimension_numbers = #tpu.dot_dimension_numbers<[1], [0], [0], [1], [0, 0, 1, 1], [], []>} : vector<24x8xbf16>, vector<8x32xbf16>, vector<24x32xf32> -> vector<24x32xf32>
    %92 = vector.extract_strided_slice %66 {offsets = [0, 8], sizes = [24, 8], strides = [1, 1]} : vector<24x96xf32> to vector<24x8xf32>
    %93 = vector.extract_strided_slice %66 {offsets = [0, 40], sizes = [24, 8], strides = [1, 1]} : vector<24x96xf32> to vector<24x8xf32>
    %94 = vector.extract_strided_slice %66 {offsets = [0, 72], sizes = [24, 8], strides = [1, 1]} : vector<24x96xf32> to vector<24x8xf32>
    %95 = arith.truncf %92 : vector<24x8xf32> to vector<24x8xbf16>
    %96 = arith.truncf %93 : vector<24x8xf32> to vector<24x8xbf16>
    %cst_34 = arith.constant dense<0.000000e+00> : vector<24x24xf32>
    %97 = tpu.matmul %95, %96, %cst_34 {dimension_numbers = #tpu.dot_dimension_numbers<[1], [1], [0], [0], [0, 0, 1, 0], [], []>} : vector<24x8xbf16>, vector<24x8xbf16>, vector<24x24xf32> -> vector<24x24xf32>
    %98 = vector.broadcast %63 : f32 to vector<24x24xf32>
    %99 = arith.mulf %97, %98 : vector<24x24xf32>
    %100 = arith.addf %99, %47 : vector<24x24xf32>
    %cst_35 = arith.constant dense<0xFF800000> : vector<24xf32>
    %101 = vector.multi_reduction <maximumf>, %100, %cst_35 [1] : vector<24x24xf32> to vector<24xf32>
    %102 = vector.shape_cast %101 : vector<24xf32> to vector<24x1xf32>
    %103 = vector.broadcast %102 : vector<24x1xf32> to vector<24x24xf32>
    %104 = arith.subf %100, %103 : vector<24x24xf32>
    %105 = math.exp %104 : vector<24x24xf32>
    %cst_36 = arith.constant dense<0.000000e+00> : vector<24xf32>
    %106 = vector.multi_reduction <add>, %105, %cst_36 [1] : vector<24x24xf32> to vector<24xf32>
    %107 = vector.shape_cast %106 : vector<24xf32> to vector<24x1xf32>
    %108 = tpu.reciprocal %107 {approx = true} : vector<24x1xf32> -> vector<24x1xf32>
    %109 = vector.broadcast %108 : vector<24x1xf32> to vector<24x24xf32>
    %110 = arith.mulf %105, %109 : vector<24x24xf32>
    %111 = arith.truncf %110 : vector<24x24xf32> to vector<24x24xbf16>
    %112 = arith.truncf %94 : vector<24x8xf32> to vector<24x8xbf16>
    %cst_37 = arith.constant dense<0.000000e+00> : vector<24x8xf32>
    %113 = tpu.matmul %111, %112, %cst_37 {dimension_numbers = #tpu.dot_dimension_numbers<[1], [0], [0], [1], [0, 0, 1, 1], [], []>} : vector<24x24xbf16>, vector<24x8xbf16>, vector<24x8xf32> -> vector<24x8xf32>
    %114 = arith.truncf %113 : vector<24x8xf32> to vector<24x8xbf16>
    %115 = vector.extract_strided_slice %61 {offsets = [8, 0], sizes = [8, 32], strides = [1, 1]} : vector<32x32xbf16> to vector<8x32xbf16>
    %cst_38 = arith.constant dense<0.000000e+00> : vector<24x32xf32>
    %116 = tpu.matmul %114, %115, %cst_38 {dimension_numbers = #tpu.dot_dimension_numbers<[1], [0], [0], [1], [0, 0, 1, 1], [], []>} : vector<24x8xbf16>, vector<8x32xbf16>, vector<24x32xf32> -> vector<24x32xf32>
    %117 = arith.addf %91, %116 : vector<24x32xf32>
    %118 = vector.extract_strided_slice %66 {offsets = [0, 16], sizes = [24, 8], strides = [1, 1]} : vector<24x96xf32> to vector<24x8xf32>
    %119 = vector.extract_strided_slice %66 {offsets = [0, 48], sizes = [24, 8], strides = [1, 1]} : vector<24x96xf32> to vector<24x8xf32>
    %120 = vector.extract_strided_slice %66 {offsets = [0, 80], sizes = [24, 8], strides = [1, 1]} : vector<24x96xf32> to vector<24x8xf32>
    %121 = arith.truncf %118 : vector<24x8xf32> to vector<24x8xbf16>
    %122 = arith.truncf %119 : vector<24x8xf32> to vector<24x8xbf16>
    %cst_39 = arith.constant dense<0.000000e+00> : vector<24x24xf32>
    %123 = tpu.matmul %121, %122, %cst_39 {dimension_numbers = #tpu.dot_dimension_numbers<[1], [1], [0], [0], [0, 0, 1, 0], [], []>} : vector<24x8xbf16>, vector<24x8xbf16>, vector<24x24xf32> -> vector<24x24xf32>
    %124 = vector.broadcast %63 : f32 to vector<24x24xf32>
    %125 = arith.mulf %123, %124 : vector<24x24xf32>
    %126 = arith.addf %125, %47 : vector<24x24xf32>
    %cst_40 = arith.constant dense<0xFF800000> : vector<24xf32>
    %127 = vector.multi_reduction <maximumf>, %126, %cst_40 [1] : vector<24x24xf32> to vector<24xf32>
    %128 = vector.shape_cast %127 : vector<24xf32> to vector<24x1xf32>
    %129 = vector.broadcast %128 : vector<24x1xf32> to vector<24x24xf32>
    %130 = arith.subf %126, %129 : vector<24x24xf32>
    %131 = math.exp %130 : vector<24x24xf32>
    %cst_41 = arith.constant dense<0.000000e+00> : vector<24xf32>
    %132 = vector.multi_reduction <add>, %131, %cst_41 [1] : vector<24x24xf32> to vector<24xf32>
    %133 = vector.shape_cast %132 : vector<24xf32> to vector<24x1xf32>
    %134 = tpu.reciprocal %133 {approx = true} : vector<24x1xf32> -> vector<24x1xf32>
    %135 = vector.broadcast %134 : vector<24x1xf32> to vector<24x24xf32>
    %136 = arith.mulf %131, %135 : vector<24x24xf32>
    %137 = arith.truncf %136 : vector<24x24xf32> to vector<24x24xbf16>
    %138 = arith.truncf %120 : vector<24x8xf32> to vector<24x8xbf16>
    %cst_42 = arith.constant dense<0.000000e+00> : vector<24x8xf32>
    %139 = tpu.matmul %137, %138, %cst_42 {dimension_numbers = #tpu.dot_dimension_numbers<[1], [0], [0], [1], [0, 0, 1, 1], [], []>} : vector<24x24xbf16>, vector<24x8xbf16>, vector<24x8xf32> -> vector<24x8xf32>
    %140 = arith.truncf %139 : vector<24x8xf32> to vector<24x8xbf16>
    %141 = vector.extract_strided_slice %61 {offsets = [16, 0], sizes = [8, 32], strides = [1, 1]} : vector<32x32xbf16> to vector<8x32xbf16>
    %cst_43 = arith.constant dense<0.000000e+00> : vector<24x32xf32>
    %142 = tpu.matmul %140, %141, %cst_43 {dimension_numbers = #tpu.dot_dimension_numbers<[1], [0], [0], [1], [0, 0, 1, 1], [], []>} : vector<24x8xbf16>, vector<8x32xbf16>, vector<24x32xf32> -> vector<24x32xf32>
    %143 = arith.addf %117, %142 : vector<24x32xf32>
    %144 = vector.extract_strided_slice %66 {offsets = [0, 24], sizes = [24, 8], strides = [1, 1]} : vector<24x96xf32> to vector<24x8xf32>
    %145 = vector.extract_strided_slice %66 {offsets = [0, 56], sizes = [24, 8], strides = [1, 1]} : vector<24x96xf32> to vector<24x8xf32>
    %146 = vector.extract_strided_slice %66 {offsets = [0, 88], sizes = [24, 8], strides = [1, 1]} : vector<24x96xf32> to vector<24x8xf32>
    %147 = arith.truncf %144 : vector<24x8xf32> to vector<24x8xbf16>
    %148 = arith.truncf %145 : vector<24x8xf32> to vector<24x8xbf16>
    %cst_44 = arith.constant dense<0.000000e+00> : vector<24x24xf32>
    %149 = tpu.matmul %147, %148, %cst_44 {dimension_numbers = #tpu.dot_dimension_numbers<[1], [1], [0], [0], [0, 0, 1, 0], [], []>} : vector<24x8xbf16>, vector<24x8xbf16>, vector<24x24xf32> -> vector<24x24xf32>
    %150 = vector.broadcast %63 : f32 to vector<24x24xf32>
    %151 = arith.mulf %149, %150 : vector<24x24xf32>
    %152 = arith.addf %151, %47 : vector<24x24xf32>
    %cst_45 = arith.constant dense<0xFF800000> : vector<24xf32>
    %153 = vector.multi_reduction <maximumf>, %152, %cst_45 [1] : vector<24x24xf32> to vector<24xf32>
    %154 = vector.shape_cast %153 : vector<24xf32> to vector<24x1xf32>
    %155 = vector.broadcast %154 : vector<24x1xf32> to vector<24x24xf32>
    %156 = arith.subf %152, %155 : vector<24x24xf32>
    %157 = math.exp %156 : vector<24x24xf32>
    %cst_46 = arith.constant dense<0.000000e+00> : vector<24xf32>
    %158 = vector.multi_reduction <add>, %157, %cst_46 [1] : vector<24x24xf32> to vector<24xf32>
    %159 = vector.shape_cast %158 : vector<24xf32> to vector<24x1xf32>
    %160 = tpu.reciprocal %159 {approx = true} : vector<24x1xf32> -> vector<24x1xf32>
    %161 = vector.broadcast %160 : vector<24x1xf32> to vector<24x24xf32>
    %162 = arith.mulf %157, %161 : vector<24x24xf32>
    %163 = arith.truncf %162 : vector<24x24xf32> to vector<24x24xbf16>
    %164 = arith.truncf %146 : vector<24x8xf32> to vector<24x8xbf16>
    %cst_47 = arith.constant dense<0.000000e+00> : vector<24x8xf32>
    %165 = tpu.matmul %163, %164, %cst_47 {dimension_numbers = #tpu.dot_dimension_numbers<[1], [0], [0], [1], [0, 0, 1, 1], [], []>} : vector<24x24xbf16>, vector<24x8xbf16>, vector<24x8xf32> -> vector<24x8xf32>
    %166 = arith.truncf %165 : vector<24x8xf32> to vector<24x8xbf16>
    %167 = vector.extract_strided_slice %61 {offsets = [24, 0], sizes = [8, 32], strides = [1, 1]} : vector<32x32xbf16> to vector<8x32xbf16>
    %cst_48 = arith.constant dense<0.000000e+00> : vector<24x32xf32>
    %168 = tpu.matmul %166, %167, %cst_48 {dimension_numbers = #tpu.dot_dimension_numbers<[1], [0], [0], [1], [0, 0, 1, 1], [], []>} : vector<24x8xbf16>, vector<8x32xbf16>, vector<24x32xf32> -> vector<24x32xf32>
    %169 = arith.addf %143, %168 : vector<24x32xf32>
    %170 = vector.broadcast %62 : vector<1x32xf32> to vector<24x32xf32>
    %171 = arith.addf %169, %170 : vector<24x32xf32>
    %172 = vector.extract_strided_slice %65 {offsets = [24, 0], sizes = [24, 96], strides = [1, 1]} : vector<48x96xf32> to vector<24x96xf32>
    %173 = vector.extract_strided_slice %172 {offsets = [0, 0], sizes = [24, 8], strides = [1, 1]} : vector<24x96xf32> to vector<24x8xf32>
    %174 = vector.extract_strided_slice %172 {offsets = [0, 32], sizes = [24, 8], strides = [1, 1]} : vector<24x96xf32> to vector<24x8xf32>
    %175 = vector.extract_strided_slice %172 {offsets = [0, 64], sizes = [24, 8], strides = [1, 1]} : vector<24x96xf32> to vector<24x8xf32>
    %176 = arith.truncf %173 : vector<24x8xf32> to vector<24x8xbf16>
    %177 = arith.truncf %174 : vector<24x8xf32> to vector<24x8xbf16>
    %cst_49 = arith.constant dense<0.000000e+00> : vector<24x24xf32>
    %178 = tpu.matmul %176, %177, %cst_49 {dimension_numbers = #tpu.dot_dimension_numbers<[1], [1], [0], [0], [0, 0, 1, 0], [], []>} : vector<24x8xbf16>, vector<24x8xbf16>, vector<24x24xf32> -> vector<24x24xf32>
    %179 = vector.broadcast %63 : f32 to vector<24x24xf32>
    %180 = arith.mulf %178, %179 : vector<24x24xf32>
    %181 = arith.addf %180, %47 : vector<24x24xf32>
    %cst_50 = arith.constant dense<0xFF800000> : vector<24xf32>
    %182 = vector.multi_reduction <maximumf>, %181, %cst_50 [1] : vector<24x24xf32> to vector<24xf32>
    %183 = vector.shape_cast %182 : vector<24xf32> to vector<24x1xf32>
    %184 = vector.broadcast %183 : vector<24x1xf32> to vector<24x24xf32>
    %185 = arith.subf %181, %184 : vector<24x24xf32>
    %186 = math.exp %185 : vector<24x24xf32>
    %cst_51 = arith.constant dense<0.000000e+00> : vector<24xf32>
    %187 = vector.multi_reduction <add>, %186, %cst_51 [1] : vector<24x24xf32> to vector<24xf32>
    %188 = vector.shape_cast %187 : vector<24xf32> to vector<24x1xf32>
    %189 = tpu.reciprocal %188 {approx = true} : vector<24x1xf32> -> vector<24x1xf32>
    %190 = vector.broadcast %189 : vector<24x1xf32> to vector<24x24xf32>
    %191 = arith.mulf %186, %190 : vector<24x24xf32>
    %192 = arith.truncf %191 : vector<24x24xf32> to vector<24x24xbf16>
    %193 = arith.truncf %175 : vector<24x8xf32> to vector<24x8xbf16>
    %cst_52 = arith.constant dense<0.000000e+00> : vector<24x8xf32>
    %194 = tpu.matmul %192, %193, %cst_52 {dimension_numbers = #tpu.dot_dimension_numbers<[1], [0], [0], [1], [0, 0, 1, 1], [], []>} : vector<24x24xbf16>, vector<24x8xbf16>, vector<24x8xf32> -> vector<24x8xf32>
    %195 = arith.truncf %194 : vector<24x8xf32> to vector<24x8xbf16>
    %196 = vector.extract_strided_slice %61 {offsets = [0, 0], sizes = [8, 32], strides = [1, 1]} : vector<32x32xbf16> to vector<8x32xbf16>
    %cst_53 = arith.constant dense<0.000000e+00> : vector<24x32xf32>
    %197 = tpu.matmul %195, %196, %cst_53 {dimension_numbers = #tpu.dot_dimension_numbers<[1], [0], [0], [1], [0, 0, 1, 1], [], []>} : vector<24x8xbf16>, vector<8x32xbf16>, vector<24x32xf32> -> vector<24x32xf32>
    %198 = vector.extract_strided_slice %172 {offsets = [0, 8], sizes = [24, 8], strides = [1, 1]} : vector<24x96xf32> to vector<24x8xf32>
    %199 = vector.extract_strided_slice %172 {offsets = [0, 40], sizes = [24, 8], strides = [1, 1]} : vector<24x96xf32> to vector<24x8xf32>
    %200 = vector.extract_strided_slice %172 {offsets = [0, 72], sizes = [24, 8], strides = [1, 1]} : vector<24x96xf32> to vector<24x8xf32>
    %201 = arith.truncf %198 : vector<24x8xf32> to vector<24x8xbf16>
    %202 = arith.truncf %199 : vector<24x8xf32> to vector<24x8xbf16>
    %cst_54 = arith.constant dense<0.000000e+00> : vector<24x24xf32>
    %203 = tpu.matmul %201, %202, %cst_54 {dimension_numbers = #tpu.dot_dimension_numbers<[1], [1], [0], [0], [0, 0, 1, 0], [], []>} : vector<24x8xbf16>, vector<24x8xbf16>, vector<24x24xf32> -> vector<24x24xf32>
    %204 = vector.broadcast %63 : f32 to vector<24x24xf32>
    %205 = arith.mulf %203, %204 : vector<24x24xf32>
    %206 = arith.addf %205, %47 : vector<24x24xf32>
    %cst_55 = arith.constant dense<0xFF800000> : vector<24xf32>
    %207 = vector.multi_reduction <maximumf>, %206, %cst_55 [1] : vector<24x24xf32> to vector<24xf32>
    %208 = vector.shape_cast %207 : vector<24xf32> to vector<24x1xf32>
    %209 = vector.broadcast %208 : vector<24x1xf32> to vector<24x24xf32>
    %210 = arith.subf %206, %209 : vector<24x24xf32>
    %211 = math.exp %210 : vector<24x24xf32>
    %cst_56 = arith.constant dense<0.000000e+00> : vector<24xf32>
    %212 = vector.multi_reduction <add>, %211, %cst_56 [1] : vector<24x24xf32> to vector<24xf32>
    %213 = vector.shape_cast %212 : vector<24xf32> to vector<24x1xf32>
    %214 = tpu.reciprocal %213 {approx = true} : vector<24x1xf32> -> vector<24x1xf32>
    %215 = vector.broadcast %214 : vector<24x1xf32> to vector<24x24xf32>
    %216 = arith.mulf %211, %215 : vector<24x24xf32>
    %217 = arith.truncf %216 : vector<24x24xf32> to vector<24x24xbf16>
    %218 = arith.truncf %200 : vector<24x8xf32> to vector<24x8xbf16>
    %cst_57 = arith.constant dense<0.000000e+00> : vector<24x8xf32>
    %219 = tpu.matmul %217, %218, %cst_57 {dimension_numbers = #tpu.dot_dimension_numbers<[1], [0], [0], [1], [0, 0, 1, 1], [], []>} : vector<24x24xbf16>, vector<24x8xbf16>, vector<24x8xf32> -> vector<24x8xf32>
    %220 = arith.truncf %219 : vector<24x8xf32> to vector<24x8xbf16>
    %221 = vector.extract_strided_slice %61 {offsets = [8, 0], sizes = [8, 32], strides = [1, 1]} : vector<32x32xbf16> to vector<8x32xbf16>
    %cst_58 = arith.constant dense<0.000000e+00> : vector<24x32xf32>
    %222 = tpu.matmul %220, %221, %cst_58 {dimension_numbers = #tpu.dot_dimension_numbers<[1], [0], [0], [1], [0, 0, 1, 1], [], []>} : vector<24x8xbf16>, vector<8x32xbf16>, vector<24x32xf32> -> vector<24x32xf32>
    %223 = arith.addf %197, %222 : vector<24x32xf32>
    %224 = vector.extract_strided_slice %172 {offsets = [0, 16], sizes = [24, 8], strides = [1, 1]} : vector<24x96xf32> to vector<24x8xf32>
    %225 = vector.extract_strided_slice %172 {offsets = [0, 48], sizes = [24, 8], strides = [1, 1]} : vector<24x96xf32> to vector<24x8xf32>
    %226 = vector.extract_strided_slice %172 {offsets = [0, 80], sizes = [24, 8], strides = [1, 1]} : vector<24x96xf32> to vector<24x8xf32>
    %227 = arith.truncf %224 : vector<24x8xf32> to vector<24x8xbf16>
    %228 = arith.truncf %225 : vector<24x8xf32> to vector<24x8xbf16>
    %cst_59 = arith.constant dense<0.000000e+00> : vector<24x24xf32>
    %229 = tpu.matmul %227, %228, %cst_59 {dimension_numbers = #tpu.dot_dimension_numbers<[1], [1], [0], [0], [0, 0, 1, 0], [], []>} : vector<24x8xbf16>, vector<24x8xbf16>, vector<24x24xf32> -> vector<24x24xf32>
    %230 = vector.broadcast %63 : f32 to vector<24x24xf32>
    %231 = arith.mulf %229, %230 : vector<24x24xf32>
    %232 = arith.addf %231, %47 : vector<24x24xf32>
    %cst_60 = arith.constant dense<0xFF800000> : vector<24xf32>
    %233 = vector.multi_reduction <maximumf>, %232, %cst_60 [1] : vector<24x24xf32> to vector<24xf32>
    %234 = vector.shape_cast %233 : vector<24xf32> to vector<24x1xf32>
    %235 = vector.broadcast %234 : vector<24x1xf32> to vector<24x24xf32>
    %236 = arith.subf %232, %235 : vector<24x24xf32>
    %237 = math.exp %236 : vector<24x24xf32>
    %cst_61 = arith.constant dense<0.000000e+00> : vector<24xf32>
    %238 = vector.multi_reduction <add>, %237, %cst_61 [1] : vector<24x24xf32> to vector<24xf32>
    %239 = vector.shape_cast %238 : vector<24xf32> to vector<24x1xf32>
    %240 = tpu.reciprocal %239 {approx = true} : vector<24x1xf32> -> vector<24x1xf32>
    %241 = vector.broadcast %240 : vector<24x1xf32> to vector<24x24xf32>
    %242 = arith.mulf %237, %241 : vector<24x24xf32>
    %243 = arith.truncf %242 : vector<24x24xf32> to vector<24x24xbf16>
    %244 = arith.truncf %226 : vector<24x8xf32> to vector<24x8xbf16>
    %cst_62 = arith.constant dense<0.000000e+00> : vector<24x8xf32>
    %245 = tpu.matmul %243, %244, %cst_62 {dimension_numbers = #tpu.dot_dimension_numbers<[1], [0], [0], [1], [0, 0, 1, 1], [], []>} : vector<24x24xbf16>, vector<24x8xbf16>, vector<24x8xf32> -> vector<24x8xf32>
    %246 = arith.truncf %245 : vector<24x8xf32> to vector<24x8xbf16>
    %247 = vector.extract_strided_slice %61 {offsets = [16, 0], sizes = [8, 32], strides = [1, 1]} : vector<32x32xbf16> to vector<8x32xbf16>
    %cst_63 = arith.constant dense<0.000000e+00> : vector<24x32xf32>
    %248 = tpu.matmul %246, %247, %cst_63 {dimension_numbers = #tpu.dot_dimension_numbers<[1], [0], [0], [1], [0, 0, 1, 1], [], []>} : vector<24x8xbf16>, vector<8x32xbf16>, vector<24x32xf32> -> vector<24x32xf32>
    %249 = arith.addf %223, %248 : vector<24x32xf32>
    %250 = vector.extract_strided_slice %172 {offsets = [0, 24], sizes = [24, 8], strides = [1, 1]} : vector<24x96xf32> to vector<24x8xf32>
    %251 = vector.extract_strided_slice %172 {offsets = [0, 56], sizes = [24, 8], strides = [1, 1]} : vector<24x96xf32> to vector<24x8xf32>
    %252 = vector.extract_strided_slice %172 {offsets = [0, 88], sizes = [24, 8], strides = [1, 1]} : vector<24x96xf32> to vector<24x8xf32>
    %253 = arith.truncf %250 : vector<24x8xf32> to vector<24x8xbf16>
    %254 = arith.truncf %251 : vector<24x8xf32> to vector<24x8xbf16>
    %cst_64 = arith.constant dense<0.000000e+00> : vector<24x24xf32>
    %255 = tpu.matmul %253, %254, %cst_64 {dimension_numbers = #tpu.dot_dimension_numbers<[1], [1], [0], [0], [0, 0, 1, 0], [], []>} : vector<24x8xbf16>, vector<24x8xbf16>, vector<24x24xf32> -> vector<24x24xf32>
    %256 = vector.broadcast %63 : f32 to vector<24x24xf32>
    %257 = arith.mulf %255, %256 : vector<24x24xf32>
    %258 = arith.addf %257, %47 : vector<24x24xf32>
    %cst_65 = arith.constant dense<0xFF800000> : vector<24xf32>
    %259 = vector.multi_reduction <maximumf>, %258, %cst_65 [1] : vector<24x24xf32> to vector<24xf32>
    %260 = vector.shape_cast %259 : vector<24xf32> to vector<24x1xf32>
    %261 = vector.broadcast %260 : vector<24x1xf32> to vector<24x24xf32>
    %262 = arith.subf %258, %261 : vector<24x24xf32>
    %263 = math.exp %262 : vector<24x24xf32>
    %cst_66 = arith.constant dense<0.000000e+00> : vector<24xf32>
    %264 = vector.multi_reduction <add>, %263, %cst_66 [1] : vector<24x24xf32> to vector<24xf32>
    %265 = vector.shape_cast %264 : vector<24xf32> to vector<24x1xf32>
    %266 = tpu.reciprocal %265 {approx = true} : vector<24x1xf32> -> vector<24x1xf32>
    %267 = vector.broadcast %266 : vector<24x1xf32> to vector<24x24xf32>
    %268 = arith.mulf %263, %267 : vector<24x24xf32>
    %269 = arith.truncf %268 : vector<24x24xf32> to vector<24x24xbf16>
    %270 = arith.truncf %252 : vector<24x8xf32> to vector<24x8xbf16>
    %cst_67 = arith.constant dense<0.000000e+00> : vector<24x8xf32>
    %271 = tpu.matmul %269, %270, %cst_67 {dimension_numbers = #tpu.dot_dimension_numbers<[1], [0], [0], [1], [0, 0, 1, 1], [], []>} : vector<24x24xbf16>, vector<24x8xbf16>, vector<24x8xf32> -> vector<24x8xf32>
    %272 = arith.truncf %271 : vector<24x8xf32> to vector<24x8xbf16>
    %273 = vector.extract_strided_slice %61 {offsets = [24, 0], sizes = [8, 32], strides = [1, 1]} : vector<32x32xbf16> to vector<8x32xbf16>
    %cst_68 = arith.constant dense<0.000000e+00> : vector<24x32xf32>
    %274 = tpu.matmul %272, %273, %cst_68 {dimension_numbers = #tpu.dot_dimension_numbers<[1], [0], [0], [1], [0, 0, 1, 1], [], []>} : vector<24x8xbf16>, vector<8x32xbf16>, vector<24x32xf32> -> vector<24x32xf32>
    %275 = arith.addf %249, %274 : vector<24x32xf32>
    %276 = vector.broadcast %62 : vector<1x32xf32> to vector<24x32xf32>
    %277 = arith.addf %275, %276 : vector<24x32xf32>
    %278 = tpu.concatenate %171, %277 in 0 : vector<24x32xf32>, vector<24x32xf32> -> vector<48x32xf32>
    %279 = arith.addf %278, %57 : vector<48x32xf32>
    %280 = arith.mulf %279, %279 : vector<48x32xf32>
    %cst_69 = arith.constant dense<0.000000e+00> : vector<48xf32>
    %281 = vector.multi_reduction <add>, %280, %cst_69 [1] : vector<48x32xf32> to vector<48xf32>
    %282 = vector.shape_cast %281 : vector<48xf32> to vector<48x1xf32>
    %cst_70 = arith.constant 3.200000e+01 : f32
    %283 = vector.broadcast %cst_70 : f32 to vector<48x1xf32>
    %284 = arith.divf %282, %283 : vector<48x1xf32>
    %cst_71 = arith.constant 9.99999997E-7 : f32
    %285 = vector.broadcast %cst_71 : f32 to vector<48x1xf32>
    %286 = arith.addf %284, %285 : vector<48x1xf32>
    %287 = math.rsqrt %286 : vector<48x1xf32>
    %288 = vector.broadcast %287 : vector<48x1xf32> to vector<48x32xf32>
    %289 = arith.mulf %279, %288 : vector<48x32xf32>
    %c1_72 = arith.constant 1 : index
    %c0_73 = arith.constant 0 : index
    %c0_74 = arith.constant 0 : index
    %290 = vector.load %arg6[%c1_72, %c0_73, %c0_74] : memref<2x32x96xbf16, #tpu.memory_space<vmem>>, vector<1x32x96xbf16>
    %291 = vector.shape_cast %290 : vector<1x32x96xbf16> to vector<32x96xbf16>
    %c1_75 = arith.constant 1 : index
    %c0_76 = arith.constant 0 : index
    %c0_77 = arith.constant 0 : index
    %292 = vector.load %arg7[%c1_75, %c0_76, %c0_77] : memref<2x32x32xbf16, #tpu.memory_space<vmem>>, vector<1x32x32xbf16>
    %293 = vector.shape_cast %292 : vector<1x32x32xbf16> to vector<32x32xbf16>
    %c50 = arith.constant 50 : index
    %c0_78 = arith.constant 0 : index
    %294 = vector.load %arg3[%c50, %c0_78] : memref<53x32xf32, #tpu.memory_space<vmem>>, vector<1x32xf32>
    %c1_79 = arith.constant 1 : index
    %295 = memref.load %arg5[%c1_79] : memref<2xf32, #tpu.memory_space<smem>>
    %296 = arith.truncf %289 : vector<48x32xf32> to vector<48x32xbf16>
    %cst_80 = arith.constant dense<0.000000e+00> : vector<48x96xf32>
    %297 = tpu.matmul %296, %291, %cst_80 {dimension_numbers = #tpu.dot_dimension_numbers<[1], [0], [0], [1], [0, 0, 1, 1], [], []>} : vector<48x32xbf16>, vector<32x96xbf16>, vector<48x96xf32> -> vector<48x96xf32>
    %298 = vector.extract_strided_slice %297 {offsets = [0, 0], sizes = [24, 96], strides = [1, 1]} : vector<48x96xf32> to vector<24x96xf32>
    %299 = vector.extract_strided_slice %298 {offsets = [0, 0], sizes = [24, 8], strides = [1, 1]} : vector<24x96xf32> to vector<24x8xf32>
    %300 = vector.extract_strided_slice %298 {offsets = [0, 32], sizes = [24, 8], strides = [1, 1]} : vector<24x96xf32> to vector<24x8xf32>
    %301 = vector.extract_strided_slice %298 {offsets = [0, 64], sizes = [24, 8], strides = [1, 1]} : vector<24x96xf32> to vector<24x8xf32>
    %302 = arith.truncf %299 : vector<24x8xf32> to vector<24x8xbf16>
    %303 = arith.truncf %300 : vector<24x8xf32> to vector<24x8xbf16>
    %cst_81 = arith.constant dense<0.000000e+00> : vector<24x24xf32>
    %304 = tpu.matmul %302, %303, %cst_81 {dimension_numbers = #tpu.dot_dimension_numbers<[1], [1], [0], [0], [0, 0, 1, 0], [], []>} : vector<24x8xbf16>, vector<24x8xbf16>, vector<24x24xf32> -> vector<24x24xf32>
    %305 = vector.broadcast %295 : f32 to vector<24x24xf32>
    %306 = arith.mulf %304, %305 : vector<24x24xf32>
    %307 = arith.addf %306, %47 : vector<24x24xf32>
    %cst_82 = arith.constant dense<0xFF800000> : vector<24xf32>
    %308 = vector.multi_reduction <maximumf>, %307, %cst_82 [1] : vector<24x24xf32> to vector<24xf32>
    %309 = vector.shape_cast %308 : vector<24xf32> to vector<24x1xf32>
    %310 = vector.broadcast %309 : vector<24x1xf32> to vector<24x24xf32>
    %311 = arith.subf %307, %310 : vector<24x24xf32>
    %312 = math.exp %311 : vector<24x24xf32>
    %cst_83 = arith.constant dense<0.000000e+00> : vector<24xf32>
    %313 = vector.multi_reduction <add>, %312, %cst_83 [1] : vector<24x24xf32> to vector<24xf32>
    %314 = vector.shape_cast %313 : vector<24xf32> to vector<24x1xf32>
    %315 = tpu.reciprocal %314 {approx = true} : vector<24x1xf32> -> vector<24x1xf32>
    %316 = vector.broadcast %315 : vector<24x1xf32> to vector<24x24xf32>
    %317 = arith.mulf %312, %316 : vector<24x24xf32>
    %318 = arith.truncf %317 : vector<24x24xf32> to vector<24x24xbf16>
    %319 = arith.truncf %301 : vector<24x8xf32> to vector<24x8xbf16>
    %cst_84 = arith.constant dense<0.000000e+00> : vector<24x8xf32>
    %320 = tpu.matmul %318, %319, %cst_84 {dimension_numbers = #tpu.dot_dimension_numbers<[1], [0], [0], [1], [0, 0, 1, 1], [], []>} : vector<24x24xbf16>, vector<24x8xbf16>, vector<24x8xf32> -> vector<24x8xf32>
    %321 = arith.truncf %320 : vector<24x8xf32> to vector<24x8xbf16>
    %322 = vector.extract_strided_slice %293 {offsets = [0, 0], sizes = [8, 32], strides = [1, 1]} : vector<32x32xbf16> to vector<8x32xbf16>
    %cst_85 = arith.constant dense<0.000000e+00> : vector<24x32xf32>
    %323 = tpu.matmul %321, %322, %cst_85 {dimension_numbers = #tpu.dot_dimension_numbers<[1], [0], [0], [1], [0, 0, 1, 1], [], []>} : vector<24x8xbf16>, vector<8x32xbf16>, vector<24x32xf32> -> vector<24x32xf32>
    %324 = vector.extract_strided_slice %298 {offsets = [0, 8], sizes = [24, 8], strides = [1, 1]} : vector<24x96xf32> to vector<24x8xf32>
    %325 = vector.extract_strided_slice %298 {offsets = [0, 40], sizes = [24, 8], strides = [1, 1]} : vector<24x96xf32> to vector<24x8xf32>
    %326 = vector.extract_strided_slice %298 {offsets = [0, 72], sizes = [24, 8], strides = [1, 1]} : vector<24x96xf32> to vector<24x8xf32>
    %327 = arith.truncf %324 : vector<24x8xf32> to vector<24x8xbf16>
    %328 = arith.truncf %325 : vector<24x8xf32> to vector<24x8xbf16>
    %cst_86 = arith.constant dense<0.000000e+00> : vector<24x24xf32>
    %329 = tpu.matmul %327, %328, %cst_86 {dimension_numbers = #tpu.dot_dimension_numbers<[1], [1], [0], [0], [0, 0, 1, 0], [], []>} : vector<24x8xbf16>, vector<24x8xbf16>, vector<24x24xf32> -> vector<24x24xf32>
    %330 = vector.broadcast %295 : f32 to vector<24x24xf32>
    %331 = arith.mulf %329, %330 : vector<24x24xf32>
    %332 = arith.addf %331, %47 : vector<24x24xf32>
    %cst_87 = arith.constant dense<0xFF800000> : vector<24xf32>
    %333 = vector.multi_reduction <maximumf>, %332, %cst_87 [1] : vector<24x24xf32> to vector<24xf32>
    %334 = vector.shape_cast %333 : vector<24xf32> to vector<24x1xf32>
    %335 = vector.broadcast %334 : vector<24x1xf32> to vector<24x24xf32>
    %336 = arith.subf %332, %335 : vector<24x24xf32>
    %337 = math.exp %336 : vector<24x24xf32>
    %cst_88 = arith.constant dense<0.000000e+00> : vector<24xf32>
    %338 = vector.multi_reduction <add>, %337, %cst_88 [1] : vector<24x24xf32> to vector<24xf32>
    %339 = vector.shape_cast %338 : vector<24xf32> to vector<24x1xf32>
    %340 = tpu.reciprocal %339 {approx = true} : vector<24x1xf32> -> vector<24x1xf32>
    %341 = vector.broadcast %340 : vector<24x1xf32> to vector<24x24xf32>
    %342 = arith.mulf %337, %341 : vector<24x24xf32>
    %343 = arith.truncf %342 : vector<24x24xf32> to vector<24x24xbf16>
    %344 = arith.truncf %326 : vector<24x8xf32> to vector<24x8xbf16>
    %cst_89 = arith.constant dense<0.000000e+00> : vector<24x8xf32>
    %345 = tpu.matmul %343, %344, %cst_89 {dimension_numbers = #tpu.dot_dimension_numbers<[1], [0], [0], [1], [0, 0, 1, 1], [], []>} : vector<24x24xbf16>, vector<24x8xbf16>, vector<24x8xf32> -> vector<24x8xf32>
    %346 = arith.truncf %345 : vector<24x8xf32> to vector<24x8xbf16>
    %347 = vector.extract_strided_slice %293 {offsets = [8, 0], sizes = [8, 32], strides = [1, 1]} : vector<32x32xbf16> to vector<8x32xbf16>
    %cst_90 = arith.constant dense<0.000000e+00> : vector<24x32xf32>
    %348 = tpu.matmul %346, %347, %cst_90 {dimension_numbers = #tpu.dot_dimension_numbers<[1], [0], [0], [1], [0, 0, 1, 1], [], []>} : vector<24x8xbf16>, vector<8x32xbf16>, vector<24x32xf32> -> vector<24x32xf32>
    %349 = arith.addf %323, %348 : vector<24x32xf32>
    %350 = vector.extract_strided_slice %298 {offsets = [0, 16], sizes = [24, 8], strides = [1, 1]} : vector<24x96xf32> to vector<24x8xf32>
    %351 = vector.extract_strided_slice %298 {offsets = [0, 48], sizes = [24, 8], strides = [1, 1]} : vector<24x96xf32> to vector<24x8xf32>
    %352 = vector.extract_strided_slice %298 {offsets = [0, 80], sizes = [24, 8], strides = [1, 1]} : vector<24x96xf32> to vector<24x8xf32>
    %353 = arith.truncf %350 : vector<24x8xf32> to vector<24x8xbf16>
    %354 = arith.truncf %351 : vector<24x8xf32> to vector<24x8xbf16>
    %cst_91 = arith.constant dense<0.000000e+00> : vector<24x24xf32>
    %355 = tpu.matmul %353, %354, %cst_91 {dimension_numbers = #tpu.dot_dimension_numbers<[1], [1], [0], [0], [0, 0, 1, 0], [], []>} : vector<24x8xbf16>, vector<24x8xbf16>, vector<24x24xf32> -> vector<24x24xf32>
    %356 = vector.broadcast %295 : f32 to vector<24x24xf32>
    %357 = arith.mulf %355, %356 : vector<24x24xf32>
    %358 = arith.addf %357, %47 : vector<24x24xf32>
    %cst_92 = arith.constant dense<0xFF800000> : vector<24xf32>
    %359 = vector.multi_reduction <maximumf>, %358, %cst_92 [1] : vector<24x24xf32> to vector<24xf32>
    %360 = vector.shape_cast %359 : vector<24xf32> to vector<24x1xf32>
    %361 = vector.broadcast %360 : vector<24x1xf32> to vector<24x24xf32>
    %362 = arith.subf %358, %361 : vector<24x24xf32>
    %363 = math.exp %362 : vector<24x24xf32>
    %cst_93 = arith.constant dense<0.000000e+00> : vector<24xf32>
    %364 = vector.multi_reduction <add>, %363, %cst_93 [1] : vector<24x24xf32> to vector<24xf32>
    %365 = vector.shape_cast %364 : vector<24xf32> to vector<24x1xf32>
    %366 = tpu.reciprocal %365 {approx = true} : vector<24x1xf32> -> vector<24x1xf32>
    %367 = vector.broadcast %366 : vector<24x1xf32> to vector<24x24xf32>
    %368 = arith.mulf %363, %367 : vector<24x24xf32>
    %369 = arith.truncf %368 : vector<24x24xf32> to vector<24x24xbf16>
    %370 = arith.truncf %352 : vector<24x8xf32> to vector<24x8xbf16>
    %cst_94 = arith.constant dense<0.000000e+00> : vector<24x8xf32>
    %371 = tpu.matmul %369, %370, %cst_94 {dimension_numbers = #tpu.dot_dimension_numbers<[1], [0], [0], [1], [0, 0, 1, 1], [], []>} : vector<24x24xbf16>, vector<24x8xbf16>, vector<24x8xf32> -> vector<24x8xf32>
    %372 = arith.truncf %371 : vector<24x8xf32> to vector<24x8xbf16>
    %373 = vector.extract_strided_slice %293 {offsets = [16, 0], sizes = [8, 32], strides = [1, 1]} : vector<32x32xbf16> to vector<8x32xbf16>
    %cst_95 = arith.constant dense<0.000000e+00> : vector<24x32xf32>
    %374 = tpu.matmul %372, %373, %cst_95 {dimension_numbers = #tpu.dot_dimension_numbers<[1], [0], [0], [1], [0, 0, 1, 1], [], []>} : vector<24x8xbf16>, vector<8x32xbf16>, vector<24x32xf32> -> vector<24x32xf32>
    %375 = arith.addf %349, %374 : vector<24x32xf32>
    %376 = vector.extract_strided_slice %298 {offsets = [0, 24], sizes = [24, 8], strides = [1, 1]} : vector<24x96xf32> to vector<24x8xf32>
    %377 = vector.extract_strided_slice %298 {offsets = [0, 56], sizes = [24, 8], strides = [1, 1]} : vector<24x96xf32> to vector<24x8xf32>
    %378 = vector.extract_strided_slice %298 {offsets = [0, 88], sizes = [24, 8], strides = [1, 1]} : vector<24x96xf32> to vector<24x8xf32>
    %379 = arith.truncf %376 : vector<24x8xf32> to vector<24x8xbf16>
    %380 = arith.truncf %377 : vector<24x8xf32> to vector<24x8xbf16>
    %cst_96 = arith.constant dense<0.000000e+00> : vector<24x24xf32>
    %381 = tpu.matmul %379, %380, %cst_96 {dimension_numbers = #tpu.dot_dimension_numbers<[1], [1], [0], [0], [0, 0, 1, 0], [], []>} : vector<24x8xbf16>, vector<24x8xbf16>, vector<24x24xf32> -> vector<24x24xf32>
    %382 = vector.broadcast %295 : f32 to vector<24x24xf32>
    %383 = arith.mulf %381, %382 : vector<24x24xf32>
    %384 = arith.addf %383, %47 : vector<24x24xf32>
    %cst_97 = arith.constant dense<0xFF800000> : vector<24xf32>
    %385 = vector.multi_reduction <maximumf>, %384, %cst_97 [1] : vector<24x24xf32> to vector<24xf32>
    %386 = vector.shape_cast %385 : vector<24xf32> to vector<24x1xf32>
    %387 = vector.broadcast %386 : vector<24x1xf32> to vector<24x24xf32>
    %388 = arith.subf %384, %387 : vector<24x24xf32>
    %389 = math.exp %388 : vector<24x24xf32>
    %cst_98 = arith.constant dense<0.000000e+00> : vector<24xf32>
    %390 = vector.multi_reduction <add>, %389, %cst_98 [1] : vector<24x24xf32> to vector<24xf32>
    %391 = vector.shape_cast %390 : vector<24xf32> to vector<24x1xf32>
    %392 = tpu.reciprocal %391 {approx = true} : vector<24x1xf32> -> vector<24x1xf32>
    %393 = vector.broadcast %392 : vector<24x1xf32> to vector<24x24xf32>
    %394 = arith.mulf %389, %393 : vector<24x24xf32>
    %395 = arith.truncf %394 : vector<24x24xf32> to vector<24x24xbf16>
    %396 = arith.truncf %378 : vector<24x8xf32> to vector<24x8xbf16>
    %cst_99 = arith.constant dense<0.000000e+00> : vector<24x8xf32>
    %397 = tpu.matmul %395, %396, %cst_99 {dimension_numbers = #tpu.dot_dimension_numbers<[1], [0], [0], [1], [0, 0, 1, 1], [], []>} : vector<24x24xbf16>, vector<24x8xbf16>, vector<24x8xf32> -> vector<24x8xf32>
    %398 = arith.truncf %397 : vector<24x8xf32> to vector<24x8xbf16>
    %399 = vector.extract_strided_slice %293 {offsets = [24, 0], sizes = [8, 32], strides = [1, 1]} : vector<32x32xbf16> to vector<8x32xbf16>
    %cst_100 = arith.constant dense<0.000000e+00> : vector<24x32xf32>
    %400 = tpu.matmul %398, %399, %cst_100 {dimension_numbers = #tpu.dot_dimension_numbers<[1], [0], [0], [1], [0, 0, 1, 1], [], []>} : vector<24x8xbf16>, vector<8x32xbf16>, vector<24x32xf32> -> vector<24x32xf32>
    %401 = arith.addf %375, %400 : vector<24x32xf32>
    %402 = vector.broadcast %294 : vector<1x32xf32> to vector<24x32xf32>
    %403 = arith.addf %401, %402 : vector<24x32xf32>
    %404 = vector.extract_strided_slice %297 {offsets = [24, 0], sizes = [24, 96], strides = [1, 1]} : vector<48x96xf32> to vector<24x96xf32>
    %405 = vector.extract_strided_slice %404 {offsets = [0, 0], sizes = [24, 8], strides = [1, 1]} : vector<24x96xf32> to vector<24x8xf32>
    %406 = vector.extract_strided_slice %404 {offsets = [0, 32], sizes = [24, 8], strides = [1, 1]} : vector<24x96xf32> to vector<24x8xf32>
    %407 = vector.extract_strided_slice %404 {offsets = [0, 64], sizes = [24, 8], strides = [1, 1]} : vector<24x96xf32> to vector<24x8xf32>
    %408 = arith.truncf %405 : vector<24x8xf32> to vector<24x8xbf16>
    %409 = arith.truncf %406 : vector<24x8xf32> to vector<24x8xbf16>
    %cst_101 = arith.constant dense<0.000000e+00> : vector<24x24xf32>
    %410 = tpu.matmul %408, %409, %cst_101 {dimension_numbers = #tpu.dot_dimension_numbers<[1], [1], [0], [0], [0, 0, 1, 0], [], []>} : vector<24x8xbf16>, vector<24x8xbf16>, vector<24x24xf32> -> vector<24x24xf32>
    %411 = vector.broadcast %295 : f32 to vector<24x24xf32>
    %412 = arith.mulf %410, %411 : vector<24x24xf32>
    %413 = arith.addf %412, %47 : vector<24x24xf32>
    %cst_102 = arith.constant dense<0xFF800000> : vector<24xf32>
    %414 = vector.multi_reduction <maximumf>, %413, %cst_102 [1] : vector<24x24xf32> to vector<24xf32>
    %415 = vector.shape_cast %414 : vector<24xf32> to vector<24x1xf32>
    %416 = vector.broadcast %415 : vector<24x1xf32> to vector<24x24xf32>
    %417 = arith.subf %413, %416 : vector<24x24xf32>
    %418 = math.exp %417 : vector<24x24xf32>
    %cst_103 = arith.constant dense<0.000000e+00> : vector<24xf32>
    %419 = vector.multi_reduction <add>, %418, %cst_103 [1] : vector<24x24xf32> to vector<24xf32>
    %420 = vector.shape_cast %419 : vector<24xf32> to vector<24x1xf32>
    %421 = tpu.reciprocal %420 {approx = true} : vector<24x1xf32> -> vector<24x1xf32>
    %422 = vector.broadcast %421 : vector<24x1xf32> to vector<24x24xf32>
    %423 = arith.mulf %418, %422 : vector<24x24xf32>
    %424 = arith.truncf %423 : vector<24x24xf32> to vector<24x24xbf16>
    %425 = arith.truncf %407 : vector<24x8xf32> to vector<24x8xbf16>
    %cst_104 = arith.constant dense<0.000000e+00> : vector<24x8xf32>
    %426 = tpu.matmul %424, %425, %cst_104 {dimension_numbers = #tpu.dot_dimension_numbers<[1], [0], [0], [1], [0, 0, 1, 1], [], []>} : vector<24x24xbf16>, vector<24x8xbf16>, vector<24x8xf32> -> vector<24x8xf32>
    %427 = arith.truncf %426 : vector<24x8xf32> to vector<24x8xbf16>
    %428 = vector.extract_strided_slice %293 {offsets = [0, 0], sizes = [8, 32], strides = [1, 1]} : vector<32x32xbf16> to vector<8x32xbf16>
    %cst_105 = arith.constant dense<0.000000e+00> : vector<24x32xf32>
    %429 = tpu.matmul %427, %428, %cst_105 {dimension_numbers = #tpu.dot_dimension_numbers<[1], [0], [0], [1], [0, 0, 1, 1], [], []>} : vector<24x8xbf16>, vector<8x32xbf16>, vector<24x32xf32> -> vector<24x32xf32>
    %430 = vector.extract_strided_slice %404 {offsets = [0, 8], sizes = [24, 8], strides = [1, 1]} : vector<24x96xf32> to vector<24x8xf32>
    %431 = vector.extract_strided_slice %404 {offsets = [0, 40], sizes = [24, 8], strides = [1, 1]} : vector<24x96xf32> to vector<24x8xf32>
    %432 = vector.extract_strided_slice %404 {offsets = [0, 72], sizes = [24, 8], strides = [1, 1]} : vector<24x96xf32> to vector<24x8xf32>
    %433 = arith.truncf %430 : vector<24x8xf32> to vector<24x8xbf16>
    %434 = arith.truncf %431 : vector<24x8xf32> to vector<24x8xbf16>
    %cst_106 = arith.constant dense<0.000000e+00> : vector<24x24xf32>
    %435 = tpu.matmul %433, %434, %cst_106 {dimension_numbers = #tpu.dot_dimension_numbers<[1], [1], [0], [0], [0, 0, 1, 0], [], []>} : vector<24x8xbf16>, vector<24x8xbf16>, vector<24x24xf32> -> vector<24x24xf32>
    %436 = vector.broadcast %295 : f32 to vector<24x24xf32>
    %437 = arith.mulf %435, %436 : vector<24x24xf32>
    %438 = arith.addf %437, %47 : vector<24x24xf32>
    %cst_107 = arith.constant dense<0xFF800000> : vector<24xf32>
    %439 = vector.multi_reduction <maximumf>, %438, %cst_107 [1] : vector<24x24xf32> to vector<24xf32>
    %440 = vector.shape_cast %439 : vector<24xf32> to vector<24x1xf32>
    %441 = vector.broadcast %440 : vector<24x1xf32> to vector<24x24xf32>
    %442 = arith.subf %438, %441 : vector<24x24xf32>
    %443 = math.exp %442 : vector<24x24xf32>
    %cst_108 = arith.constant dense<0.000000e+00> : vector<24xf32>
    %444 = vector.multi_reduction <add>, %443, %cst_108 [1] : vector<24x24xf32> to vector<24xf32>
    %445 = vector.shape_cast %444 : vector<24xf32> to vector<24x1xf32>
    %446 = tpu.reciprocal %445 {approx = true} : vector<24x1xf32> -> vector<24x1xf32>
    %447 = vector.broadcast %446 : vector<24x1xf32> to vector<24x24xf32>
    %448 = arith.mulf %443, %447 : vector<24x24xf32>
    %449 = arith.truncf %448 : vector<24x24xf32> to vector<24x24xbf16>
    %450 = arith.truncf %432 : vector<24x8xf32> to vector<24x8xbf16>
    %cst_109 = arith.constant dense<0.000000e+00> : vector<24x8xf32>
    %451 = tpu.matmul %449, %450, %cst_109 {dimension_numbers = #tpu.dot_dimension_numbers<[1], [0], [0], [1], [0, 0, 1, 1], [], []>} : vector<24x24xbf16>, vector<24x8xbf16>, vector<24x8xf32> -> vector<24x8xf32>
    %452 = arith.truncf %451 : vector<24x8xf32> to vector<24x8xbf16>
    %453 = vector.extract_strided_slice %293 {offsets = [8, 0], sizes = [8, 32], strides = [1, 1]} : vector<32x32xbf16> to vector<8x32xbf16>
    %cst_110 = arith.constant dense<0.000000e+00> : vector<24x32xf32>
    %454 = tpu.matmul %452, %453, %cst_110 {dimension_numbers = #tpu.dot_dimension_numbers<[1], [0], [0], [1], [0, 0, 1, 1], [], []>} : vector<24x8xbf16>, vector<8x32xbf16>, vector<24x32xf32> -> vector<24x32xf32>
    %455 = arith.addf %429, %454 : vector<24x32xf32>
    %456 = vector.extract_strided_slice %404 {offsets = [0, 16], sizes = [24, 8], strides = [1, 1]} : vector<24x96xf32> to vector<24x8xf32>
    %457 = vector.extract_strided_slice %404 {offsets = [0, 48], sizes = [24, 8], strides = [1, 1]} : vector<24x96xf32> to vector<24x8xf32>
    %458 = vector.extract_strided_slice %404 {offsets = [0, 80], sizes = [24, 8], strides = [1, 1]} : vector<24x96xf32> to vector<24x8xf32>
    %459 = arith.truncf %456 : vector<24x8xf32> to vector<24x8xbf16>
    %460 = arith.truncf %457 : vector<24x8xf32> to vector<24x8xbf16>
    %cst_111 = arith.constant dense<0.000000e+00> : vector<24x24xf32>
    %461 = tpu.matmul %459, %460, %cst_111 {dimension_numbers = #tpu.dot_dimension_numbers<[1], [1], [0], [0], [0, 0, 1, 0], [], []>} : vector<24x8xbf16>, vector<24x8xbf16>, vector<24x24xf32> -> vector<24x24xf32>
    %462 = vector.broadcast %295 : f32 to vector<24x24xf32>
    %463 = arith.mulf %461, %462 : vector<24x24xf32>
    %464 = arith.addf %463, %47 : vector<24x24xf32>
    %cst_112 = arith.constant dense<0xFF800000> : vector<24xf32>
    %465 = vector.multi_reduction <maximumf>, %464, %cst_112 [1] : vector<24x24xf32> to vector<24xf32>
    %466 = vector.shape_cast %465 : vector<24xf32> to vector<24x1xf32>
    %467 = vector.broadcast %466 : vector<24x1xf32> to vector<24x24xf32>
    %468 = arith.subf %464, %467 : vector<24x24xf32>
    %469 = math.exp %468 : vector<24x24xf32>
    %cst_113 = arith.constant dense<0.000000e+00> : vector<24xf32>
    %470 = vector.multi_reduction <add>, %469, %cst_113 [1] : vector<24x24xf32> to vector<24xf32>
    %471 = vector.shape_cast %470 : vector<24xf32> to vector<24x1xf32>
    %472 = tpu.reciprocal %471 {approx = true} : vector<24x1xf32> -> vector<24x1xf32>
    %473 = vector.broadcast %472 : vector<24x1xf32> to vector<24x24xf32>
    %474 = arith.mulf %469, %473 : vector<24x24xf32>
    %475 = arith.truncf %474 : vector<24x24xf32> to vector<24x24xbf16>
    %476 = arith.truncf %458 : vector<24x8xf32> to vector<24x8xbf16>
    %cst_114 = arith.constant dense<0.000000e+00> : vector<24x8xf32>
    %477 = tpu.matmul %475, %476, %cst_114 {dimension_numbers = #tpu.dot_dimension_numbers<[1], [0], [0], [1], [0, 0, 1, 1], [], []>} : vector<24x24xbf16>, vector<24x8xbf16>, vector<24x8xf32> -> vector<24x8xf32>
    %478 = arith.truncf %477 : vector<24x8xf32> to vector<24x8xbf16>
    %479 = vector.extract_strided_slice %293 {offsets = [16, 0], sizes = [8, 32], strides = [1, 1]} : vector<32x32xbf16> to vector<8x32xbf16>
    %cst_115 = arith.constant dense<0.000000e+00> : vector<24x32xf32>
    %480 = tpu.matmul %478, %479, %cst_115 {dimension_numbers = #tpu.dot_dimension_numbers<[1], [0], [0], [1], [0, 0, 1, 1], [], []>} : vector<24x8xbf16>, vector<8x32xbf16>, vector<24x32xf32> -> vector<24x32xf32>
    %481 = arith.addf %455, %480 : vector<24x32xf32>
    %482 = vector.extract_strided_slice %404 {offsets = [0, 24], sizes = [24, 8], strides = [1, 1]} : vector<24x96xf32> to vector<24x8xf32>
    %483 = vector.extract_strided_slice %404 {offsets = [0, 56], sizes = [24, 8], strides = [1, 1]} : vector<24x96xf32> to vector<24x8xf32>
    %484 = vector.extract_strided_slice %404 {offsets = [0, 88], sizes = [24, 8], strides = [1, 1]} : vector<24x96xf32> to vector<24x8xf32>
    %485 = arith.truncf %482 : vector<24x8xf32> to vector<24x8xbf16>
    %486 = arith.truncf %483 : vector<24x8xf32> to vector<24x8xbf16>
    %cst_116 = arith.constant dense<0.000000e+00> : vector<24x24xf32>
    %487 = tpu.matmul %485, %486, %cst_116 {dimension_numbers = #tpu.dot_dimension_numbers<[1], [1], [0], [0], [0, 0, 1, 0], [], []>} : vector<24x8xbf16>, vector<24x8xbf16>, vector<24x24xf32> -> vector<24x24xf32>
    %488 = vector.broadcast %295 : f32 to vector<24x24xf32>
    %489 = arith.mulf %487, %488 : vector<24x24xf32>
    %490 = arith.addf %489, %47 : vector<24x24xf32>
    %cst_117 = arith.constant dense<0xFF800000> : vector<24xf32>
    %491 = vector.multi_reduction <maximumf>, %490, %cst_117 [1] : vector<24x24xf32> to vector<24xf32>
    %492 = vector.shape_cast %491 : vector<24xf32> to vector<24x1xf32>
    %493 = vector.broadcast %492 : vector<24x1xf32> to vector<24x24xf32>
    %494 = arith.subf %490, %493 : vector<24x24xf32>
    %495 = math.exp %494 : vector<24x24xf32>
    %cst_118 = arith.constant dense<0.000000e+00> : vector<24xf32>
    %496 = vector.multi_reduction <add>, %495, %cst_118 [1] : vector<24x24xf32> to vector<24xf32>
    %497 = vector.shape_cast %496 : vector<24xf32> to vector<24x1xf32>
    %498 = tpu.reciprocal %497 {approx = true} : vector<24x1xf32> -> vector<24x1xf32>
    %499 = vector.broadcast %498 : vector<24x1xf32> to vector<24x24xf32>
    %500 = arith.mulf %495, %499 : vector<24x24xf32>
    %501 = arith.truncf %500 : vector<24x24xf32> to vector<24x24xbf16>
    %502 = arith.truncf %484 : vector<24x8xf32> to vector<24x8xbf16>
    %cst_119 = arith.constant dense<0.000000e+00> : vector<24x8xf32>
    %503 = tpu.matmul %501, %502, %cst_119 {dimension_numbers = #tpu.dot_dimension_numbers<[1], [0], [0], [1], [0, 0, 1, 1], [], []>} : vector<24x24xbf16>, vector<24x8xbf16>, vector<24x8xf32> -> vector<24x8xf32>
    %504 = arith.truncf %503 : vector<24x8xf32> to vector<24x8xbf16>
    %505 = vector.extract_strided_slice %293 {offsets = [24, 0], sizes = [8, 32], strides = [1, 1]} : vector<32x32xbf16> to vector<8x32xbf16>
    %cst_120 = arith.constant dense<0.000000e+00> : vector<24x32xf32>
    %506 = tpu.matmul %504, %505, %cst_120 {dimension_numbers = #tpu.dot_dimension_numbers<[1], [0], [0], [1], [0, 0, 1, 1], [], []>} : vector<24x8xbf16>, vector<8x32xbf16>, vector<24x32xf32> -> vector<24x32xf32>
    %507 = arith.addf %481, %506 : vector<24x32xf32>
    %508 = vector.broadcast %294 : vector<1x32xf32> to vector<24x32xf32>
    %509 = arith.addf %507, %508 : vector<24x32xf32>
    %510 = tpu.concatenate %403, %509 in 0 : vector<24x32xf32>, vector<24x32xf32> -> vector<48x32xf32>
    %511 = arith.addf %510, %289 : vector<48x32xf32>
    %512 = arith.mulf %511, %511 : vector<48x32xf32>
    %cst_121 = arith.constant dense<0.000000e+00> : vector<48xf32>
    %513 = vector.multi_reduction <add>, %512, %cst_121 [1] : vector<48x32xf32> to vector<48xf32>
    %514 = vector.shape_cast %513 : vector<48xf32> to vector<48x1xf32>
    %cst_122 = arith.constant 3.200000e+01 : f32
    %515 = vector.broadcast %cst_122 : f32 to vector<48x1xf32>
    %516 = arith.divf %514, %515 : vector<48x1xf32>
    %cst_123 = arith.constant 9.99999997E-7 : f32
    %517 = vector.broadcast %cst_123 : f32 to vector<48x1xf32>
    %518 = arith.addf %516, %517 : vector<48x1xf32>
    %519 = math.rsqrt %518 : vector<48x1xf32>
    %520 = vector.broadcast %519 : vector<48x1xf32> to vector<48x32xf32>
    %521 = arith.mulf %511, %520 : vector<48x32xf32>
    %c0_124 = arith.constant 0 : index
    %c0_125 = arith.constant 0 : index
    %c0_126 = arith.constant 0 : index
    %522 = vector.load %arg8[%c0_124, %c0_125, %c0_126] : memref<2x32x128xbf16, #tpu.memory_space<vmem>>, vector<1x32x128xbf16>
    %523 = vector.shape_cast %522 : vector<1x32x128xbf16> to vector<32x128xbf16>
    %c0_127 = arith.constant 0 : index
    %c0_128 = arith.constant 0 : index
    %c0_129 = arith.constant 0 : index
    %524 = vector.load %arg9[%c0_127, %c0_128, %c0_129] : memref<2x64x32xbf16, #tpu.memory_space<vmem>>, vector<1x64x32xbf16>
    %525 = vector.shape_cast %524 : vector<1x64x32xbf16> to vector<64x32xbf16>
    %526 = arith.truncf %521 : vector<48x32xf32> to vector<48x32xbf16>
    %cst_130 = arith.constant dense<0.000000e+00> : vector<48x128xf32>
    %527 = tpu.matmul %526, %523, %cst_130 {dimension_numbers = #tpu.dot_dimension_numbers<[1], [0], [0], [1], [0, 0, 1, 1], [], []>} : vector<48x32xbf16>, vector<32x128xbf16>, vector<48x128xf32> -> vector<48x128xf32>
    %528 = vector.extract_strided_slice %527 {offsets = [0, 0], sizes = [48, 64], strides = [1, 1]} : vector<48x128xf32> to vector<48x64xf32>
    %529 = vector.extract_strided_slice %527 {offsets = [0, 64], sizes = [48, 64], strides = [1, 1]} : vector<48x128xf32> to vector<48x64xf32>
    %530 = arith.mulf %528, %529 : vector<48x64xf32>
    %531 = arith.truncf %530 : vector<48x64xf32> to vector<48x64xbf16>
    %cst_131 = arith.constant dense<0.000000e+00> : vector<48x32xf32>
    %532 = tpu.matmul %531, %525, %cst_131 {dimension_numbers = #tpu.dot_dimension_numbers<[1], [0], [0], [1], [0, 0, 1, 1], [], []>} : vector<48x64xbf16>, vector<64x32xbf16>, vector<48x32xf32> -> vector<48x32xf32>
    %533 = arith.addf %532, %521 : vector<48x32xf32>
    %534 = arith.mulf %533, %533 : vector<48x32xf32>
    %cst_132 = arith.constant dense<0.000000e+00> : vector<48xf32>
    %535 = vector.multi_reduction <add>, %534, %cst_132 [1] : vector<48x32xf32> to vector<48xf32>
    %536 = vector.shape_cast %535 : vector<48xf32> to vector<48x1xf32>
    %cst_133 = arith.constant 3.200000e+01 : f32
    %537 = vector.broadcast %cst_133 : f32 to vector<48x1xf32>
    %538 = arith.divf %536, %537 : vector<48x1xf32>
    %cst_134 = arith.constant 9.99999997E-7 : f32
    %539 = vector.broadcast %cst_134 : f32 to vector<48x1xf32>
    %540 = arith.addf %538, %539 : vector<48x1xf32>
    %541 = math.rsqrt %540 : vector<48x1xf32>
    %542 = vector.broadcast %541 : vector<48x1xf32> to vector<48x32xf32>
    %543 = arith.mulf %533, %542 : vector<48x32xf32>
    %c1_135 = arith.constant 1 : index
    %c0_136 = arith.constant 0 : index
    %c0_137 = arith.constant 0 : index
    %544 = vector.load %arg6[%c1_135, %c0_136, %c0_137] : memref<2x32x96xbf16, #tpu.memory_space<vmem>>, vector<1x32x96xbf16>
    %545 = vector.shape_cast %544 : vector<1x32x96xbf16> to vector<32x96xbf16>
    %c1_138 = arith.constant 1 : index
    %c0_139 = arith.constant 0 : index
    %c0_140 = arith.constant 0 : index
    %546 = vector.load %arg7[%c1_138, %c0_139, %c0_140] : memref<2x32x32xbf16, #tpu.memory_space<vmem>>, vector<1x32x32xbf16>
    %547 = vector.shape_cast %546 : vector<1x32x32xbf16> to vector<32x32xbf16>
    %c50_141 = arith.constant 50 : index
    %c0_142 = arith.constant 0 : index
    %548 = vector.load %arg3[%c50_141, %c0_142] : memref<53x32xf32, #tpu.memory_space<vmem>>, vector<1x32xf32>
    %c1_143 = arith.constant 1 : index
    %549 = memref.load %arg5[%c1_143] : memref<2xf32, #tpu.memory_space<smem>>
    %550 = arith.truncf %543 : vector<48x32xf32> to vector<48x32xbf16>
    %cst_144 = arith.constant dense<0.000000e+00> : vector<48x96xf32>
    %551 = tpu.matmul %550, %545, %cst_144 {dimension_numbers = #tpu.dot_dimension_numbers<[1], [0], [0], [1], [0, 0, 1, 1], [], []>} : vector<48x32xbf16>, vector<32x96xbf16>, vector<48x96xf32> -> vector<48x96xf32>
    %552 = vector.extract_strided_slice %551 {offsets = [0, 0], sizes = [24, 96], strides = [1, 1]} : vector<48x96xf32> to vector<24x96xf32>
    %553 = vector.extract_strided_slice %552 {offsets = [0, 0], sizes = [24, 8], strides = [1, 1]} : vector<24x96xf32> to vector<24x8xf32>
    %554 = vector.extract_strided_slice %552 {offsets = [0, 32], sizes = [24, 8], strides = [1, 1]} : vector<24x96xf32> to vector<24x8xf32>
    %555 = vector.extract_strided_slice %552 {offsets = [0, 64], sizes = [24, 8], strides = [1, 1]} : vector<24x96xf32> to vector<24x8xf32>
    %556 = arith.truncf %553 : vector<24x8xf32> to vector<24x8xbf16>
    %557 = arith.truncf %554 : vector<24x8xf32> to vector<24x8xbf16>
    %cst_145 = arith.constant dense<0.000000e+00> : vector<24x24xf32>
    %558 = tpu.matmul %556, %557, %cst_145 {dimension_numbers = #tpu.dot_dimension_numbers<[1], [1], [0], [0], [0, 0, 1, 0], [], []>} : vector<24x8xbf16>, vector<24x8xbf16>, vector<24x24xf32> -> vector<24x24xf32>
    %559 = vector.broadcast %549 : f32 to vector<24x24xf32>
    %560 = arith.mulf %558, %559 : vector<24x24xf32>
    %561 = arith.addf %560, %47 : vector<24x24xf32>
    %cst_146 = arith.constant dense<0xFF800000> : vector<24xf32>
    %562 = vector.multi_reduction <maximumf>, %561, %cst_146 [1] : vector<24x24xf32> to vector<24xf32>
    %563 = vector.shape_cast %562 : vector<24xf32> to vector<24x1xf32>
    %564 = vector.broadcast %563 : vector<24x1xf32> to vector<24x24xf32>
    %565 = arith.subf %561, %564 : vector<24x24xf32>
    %566 = math.exp %565 : vector<24x24xf32>
    %cst_147 = arith.constant dense<0.000000e+00> : vector<24xf32>
    %567 = vector.multi_reduction <add>, %566, %cst_147 [1] : vector<24x24xf32> to vector<24xf32>
    %568 = vector.shape_cast %567 : vector<24xf32> to vector<24x1xf32>
    %569 = tpu.reciprocal %568 {approx = true} : vector<24x1xf32> -> vector<24x1xf32>
    %570 = vector.broadcast %569 : vector<24x1xf32> to vector<24x24xf32>
    %571 = arith.mulf %566, %570 : vector<24x24xf32>
    %572 = arith.truncf %571 : vector<24x24xf32> to vector<24x24xbf16>
    %573 = arith.truncf %555 : vector<24x8xf32> to vector<24x8xbf16>
    %cst_148 = arith.constant dense<0.000000e+00> : vector<24x8xf32>
    %574 = tpu.matmul %572, %573, %cst_148 {dimension_numbers = #tpu.dot_dimension_numbers<[1], [0], [0], [1], [0, 0, 1, 1], [], []>} : vector<24x24xbf16>, vector<24x8xbf16>, vector<24x8xf32> -> vector<24x8xf32>
    %575 = arith.truncf %574 : vector<24x8xf32> to vector<24x8xbf16>
    %576 = vector.extract_strided_slice %547 {offsets = [0, 0], sizes = [8, 32], strides = [1, 1]} : vector<32x32xbf16> to vector<8x32xbf16>
    %cst_149 = arith.constant dense<0.000000e+00> : vector<24x32xf32>
    %577 = tpu.matmul %575, %576, %cst_149 {dimension_numbers = #tpu.dot_dimension_numbers<[1], [0], [0], [1], [0, 0, 1, 1], [], []>} : vector<24x8xbf16>, vector<8x32xbf16>, vector<24x32xf32> -> vector<24x32xf32>
    %578 = vector.extract_strided_slice %552 {offsets = [0, 8], sizes = [24, 8], strides = [1, 1]} : vector<24x96xf32> to vector<24x8xf32>
    %579 = vector.extract_strided_slice %552 {offsets = [0, 40], sizes = [24, 8], strides = [1, 1]} : vector<24x96xf32> to vector<24x8xf32>
    %580 = vector.extract_strided_slice %552 {offsets = [0, 72], sizes = [24, 8], strides = [1, 1]} : vector<24x96xf32> to vector<24x8xf32>
    %581 = arith.truncf %578 : vector<24x8xf32> to vector<24x8xbf16>
    %582 = arith.truncf %579 : vector<24x8xf32> to vector<24x8xbf16>
    %cst_150 = arith.constant dense<0.000000e+00> : vector<24x24xf32>
    %583 = tpu.matmul %581, %582, %cst_150 {dimension_numbers = #tpu.dot_dimension_numbers<[1], [1], [0], [0], [0, 0, 1, 0], [], []>} : vector<24x8xbf16>, vector<24x8xbf16>, vector<24x24xf32> -> vector<24x24xf32>
    %584 = vector.broadcast %549 : f32 to vector<24x24xf32>
    %585 = arith.mulf %583, %584 : vector<24x24xf32>
    %586 = arith.addf %585, %47 : vector<24x24xf32>
    %cst_151 = arith.constant dense<0xFF800000> : vector<24xf32>
    %587 = vector.multi_reduction <maximumf>, %586, %cst_151 [1] : vector<24x24xf32> to vector<24xf32>
    %588 = vector.shape_cast %587 : vector<24xf32> to vector<24x1xf32>
    %589 = vector.broadcast %588 : vector<24x1xf32> to vector<24x24xf32>
    %590 = arith.subf %586, %589 : vector<24x24xf32>
    %591 = math.exp %590 : vector<24x24xf32>
    %cst_152 = arith.constant dense<0.000000e+00> : vector<24xf32>
    %592 = vector.multi_reduction <add>, %591, %cst_152 [1] : vector<24x24xf32> to vector<24xf32>
    %593 = vector.shape_cast %592 : vector<24xf32> to vector<24x1xf32>
    %594 = tpu.reciprocal %593 {approx = true} : vector<24x1xf32> -> vector<24x1xf32>
    %595 = vector.broadcast %594 : vector<24x1xf32> to vector<24x24xf32>
    %596 = arith.mulf %591, %595 : vector<24x24xf32>
    %597 = arith.truncf %596 : vector<24x24xf32> to vector<24x24xbf16>
    %598 = arith.truncf %580 : vector<24x8xf32> to vector<24x8xbf16>
    %cst_153 = arith.constant dense<0.000000e+00> : vector<24x8xf32>
    %599 = tpu.matmul %597, %598, %cst_153 {dimension_numbers = #tpu.dot_dimension_numbers<[1], [0], [0], [1], [0, 0, 1, 1], [], []>} : vector<24x24xbf16>, vector<24x8xbf16>, vector<24x8xf32> -> vector<24x8xf32>
    %600 = arith.truncf %599 : vector<24x8xf32> to vector<24x8xbf16>
    %601 = vector.extract_strided_slice %547 {offsets = [8, 0], sizes = [8, 32], strides = [1, 1]} : vector<32x32xbf16> to vector<8x32xbf16>
    %cst_154 = arith.constant dense<0.000000e+00> : vector<24x32xf32>
    %602 = tpu.matmul %600, %601, %cst_154 {dimension_numbers = #tpu.dot_dimension_numbers<[1], [0], [0], [1], [0, 0, 1, 1], [], []>} : vector<24x8xbf16>, vector<8x32xbf16>, vector<24x32xf32> -> vector<24x32xf32>
    %603 = arith.addf %577, %602 : vector<24x32xf32>
    %604 = vector.extract_strided_slice %552 {offsets = [0, 16], sizes = [24, 8], strides = [1, 1]} : vector<24x96xf32> to vector<24x8xf32>
    %605 = vector.extract_strided_slice %552 {offsets = [0, 48], sizes = [24, 8], strides = [1, 1]} : vector<24x96xf32> to vector<24x8xf32>
    %606 = vector.extract_strided_slice %552 {offsets = [0, 80], sizes = [24, 8], strides = [1, 1]} : vector<24x96xf32> to vector<24x8xf32>
    %607 = arith.truncf %604 : vector<24x8xf32> to vector<24x8xbf16>
    %608 = arith.truncf %605 : vector<24x8xf32> to vector<24x8xbf16>
    %cst_155 = arith.constant dense<0.000000e+00> : vector<24x24xf32>
    %609 = tpu.matmul %607, %608, %cst_155 {dimension_numbers = #tpu.dot_dimension_numbers<[1], [1], [0], [0], [0, 0, 1, 0], [], []>} : vector<24x8xbf16>, vector<24x8xbf16>, vector<24x24xf32> -> vector<24x24xf32>
    %610 = vector.broadcast %549 : f32 to vector<24x24xf32>
    %611 = arith.mulf %609, %610 : vector<24x24xf32>
    %612 = arith.addf %611, %47 : vector<24x24xf32>
    %cst_156 = arith.constant dense<0xFF800000> : vector<24xf32>
    %613 = vector.multi_reduction <maximumf>, %612, %cst_156 [1] : vector<24x24xf32> to vector<24xf32>
    %614 = vector.shape_cast %613 : vector<24xf32> to vector<24x1xf32>
    %615 = vector.broadcast %614 : vector<24x1xf32> to vector<24x24xf32>
    %616 = arith.subf %612, %615 : vector<24x24xf32>
    %617 = math.exp %616 : vector<24x24xf32>
    %cst_157 = arith.constant dense<0.000000e+00> : vector<24xf32>
    %618 = vector.multi_reduction <add>, %617, %cst_157 [1] : vector<24x24xf32> to vector<24xf32>
    %619 = vector.shape_cast %618 : vector<24xf32> to vector<24x1xf32>
    %620 = tpu.reciprocal %619 {approx = true} : vector<24x1xf32> -> vector<24x1xf32>
    %621 = vector.broadcast %620 : vector<24x1xf32> to vector<24x24xf32>
    %622 = arith.mulf %617, %621 : vector<24x24xf32>
    %623 = arith.truncf %622 : vector<24x24xf32> to vector<24x24xbf16>
    %624 = arith.truncf %606 : vector<24x8xf32> to vector<24x8xbf16>
    %cst_158 = arith.constant dense<0.000000e+00> : vector<24x8xf32>
    %625 = tpu.matmul %623, %624, %cst_158 {dimension_numbers = #tpu.dot_dimension_numbers<[1], [0], [0], [1], [0, 0, 1, 1], [], []>} : vector<24x24xbf16>, vector<24x8xbf16>, vector<24x8xf32> -> vector<24x8xf32>
    %626 = arith.truncf %625 : vector<24x8xf32> to vector<24x8xbf16>
    %627 = vector.extract_strided_slice %547 {offsets = [16, 0], sizes = [8, 32], strides = [1, 1]} : vector<32x32xbf16> to vector<8x32xbf16>
    %cst_159 = arith.constant dense<0.000000e+00> : vector<24x32xf32>
    %628 = tpu.matmul %626, %627, %cst_159 {dimension_numbers = #tpu.dot_dimension_numbers<[1], [0], [0], [1], [0, 0, 1, 1], [], []>} : vector<24x8xbf16>, vector<8x32xbf16>, vector<24x32xf32> -> vector<24x32xf32>
    %629 = arith.addf %603, %628 : vector<24x32xf32>
    %630 = vector.extract_strided_slice %552 {offsets = [0, 24], sizes = [24, 8], strides = [1, 1]} : vector<24x96xf32> to vector<24x8xf32>
    %631 = vector.extract_strided_slice %552 {offsets = [0, 56], sizes = [24, 8], strides = [1, 1]} : vector<24x96xf32> to vector<24x8xf32>
    %632 = vector.extract_strided_slice %552 {offsets = [0, 88], sizes = [24, 8], strides = [1, 1]} : vector<24x96xf32> to vector<24x8xf32>
    %633 = arith.truncf %630 : vector<24x8xf32> to vector<24x8xbf16>
    %634 = arith.truncf %631 : vector<24x8xf32> to vector<24x8xbf16>
    %cst_160 = arith.constant dense<0.000000e+00> : vector<24x24xf32>
    %635 = tpu.matmul %633, %634, %cst_160 {dimension_numbers = #tpu.dot_dimension_numbers<[1], [1], [0], [0], [0, 0, 1, 0], [], []>} : vector<24x8xbf16>, vector<24x8xbf16>, vector<24x24xf32> -> vector<24x24xf32>
    %636 = vector.broadcast %549 : f32 to vector<24x24xf32>
    %637 = arith.mulf %635, %636 : vector<24x24xf32>
    %638 = arith.addf %637, %47 : vector<24x24xf32>
    %cst_161 = arith.constant dense<0xFF800000> : vector<24xf32>
    %639 = vector.multi_reduction <maximumf>, %638, %cst_161 [1] : vector<24x24xf32> to vector<24xf32>
    %640 = vector.shape_cast %639 : vector<24xf32> to vector<24x1xf32>
    %641 = vector.broadcast %640 : vector<24x1xf32> to vector<24x24xf32>
    %642 = arith.subf %638, %641 : vector<24x24xf32>
    %643 = math.exp %642 : vector<24x24xf32>
    %cst_162 = arith.constant dense<0.000000e+00> : vector<24xf32>
    %644 = vector.multi_reduction <add>, %643, %cst_162 [1] : vector<24x24xf32> to vector<24xf32>
    %645 = vector.shape_cast %644 : vector<24xf32> to vector<24x1xf32>
    %646 = tpu.reciprocal %645 {approx = true} : vector<24x1xf32> -> vector<24x1xf32>
    %647 = vector.broadcast %646 : vector<24x1xf32> to vector<24x24xf32>
    %648 = arith.mulf %643, %647 : vector<24x24xf32>
    %649 = arith.truncf %648 : vector<24x24xf32> to vector<24x24xbf16>
    %650 = arith.truncf %632 : vector<24x8xf32> to vector<24x8xbf16>
    %cst_163 = arith.constant dense<0.000000e+00> : vector<24x8xf32>
    %651 = tpu.matmul %649, %650, %cst_163 {dimension_numbers = #tpu.dot_dimension_numbers<[1], [0], [0], [1], [0, 0, 1, 1], [], []>} : vector<24x24xbf16>, vector<24x8xbf16>, vector<24x8xf32> -> vector<24x8xf32>
    %652 = arith.truncf %651 : vector<24x8xf32> to vector<24x8xbf16>
    %653 = vector.extract_strided_slice %547 {offsets = [24, 0], sizes = [8, 32], strides = [1, 1]} : vector<32x32xbf16> to vector<8x32xbf16>
    %cst_164 = arith.constant dense<0.000000e+00> : vector<24x32xf32>
    %654 = tpu.matmul %652, %653, %cst_164 {dimension_numbers = #tpu.dot_dimension_numbers<[1], [0], [0], [1], [0, 0, 1, 1], [], []>} : vector<24x8xbf16>, vector<8x32xbf16>, vector<24x32xf32> -> vector<24x32xf32>
    %655 = arith.addf %629, %654 : vector<24x32xf32>
    %656 = vector.broadcast %548 : vector<1x32xf32> to vector<24x32xf32>
    %657 = arith.addf %655, %656 : vector<24x32xf32>
    %658 = vector.extract_strided_slice %551 {offsets = [24, 0], sizes = [24, 96], strides = [1, 1]} : vector<48x96xf32> to vector<24x96xf32>
    %659 = vector.extract_strided_slice %658 {offsets = [0, 0], sizes = [24, 8], strides = [1, 1]} : vector<24x96xf32> to vector<24x8xf32>
    %660 = vector.extract_strided_slice %658 {offsets = [0, 32], sizes = [24, 8], strides = [1, 1]} : vector<24x96xf32> to vector<24x8xf32>
    %661 = vector.extract_strided_slice %658 {offsets = [0, 64], sizes = [24, 8], strides = [1, 1]} : vector<24x96xf32> to vector<24x8xf32>
    %662 = arith.truncf %659 : vector<24x8xf32> to vector<24x8xbf16>
    %663 = arith.truncf %660 : vector<24x8xf32> to vector<24x8xbf16>
    %cst_165 = arith.constant dense<0.000000e+00> : vector<24x24xf32>
    %664 = tpu.matmul %662, %663, %cst_165 {dimension_numbers = #tpu.dot_dimension_numbers<[1], [1], [0], [0], [0, 0, 1, 0], [], []>} : vector<24x8xbf16>, vector<24x8xbf16>, vector<24x24xf32> -> vector<24x24xf32>
    %665 = vector.broadcast %549 : f32 to vector<24x24xf32>
    %666 = arith.mulf %664, %665 : vector<24x24xf32>
    %667 = arith.addf %666, %47 : vector<24x24xf32>
    %cst_166 = arith.constant dense<0xFF800000> : vector<24xf32>
    %668 = vector.multi_reduction <maximumf>, %667, %cst_166 [1] : vector<24x24xf32> to vector<24xf32>
    %669 = vector.shape_cast %668 : vector<24xf32> to vector<24x1xf32>
    %670 = vector.broadcast %669 : vector<24x1xf32> to vector<24x24xf32>
    %671 = arith.subf %667, %670 : vector<24x24xf32>
    %672 = math.exp %671 : vector<24x24xf32>
    %cst_167 = arith.constant dense<0.000000e+00> : vector<24xf32>
    %673 = vector.multi_reduction <add>, %672, %cst_167 [1] : vector<24x24xf32> to vector<24xf32>
    %674 = vector.shape_cast %673 : vector<24xf32> to vector<24x1xf32>
    %675 = tpu.reciprocal %674 {approx = true} : vector<24x1xf32> -> vector<24x1xf32>
    %676 = vector.broadcast %675 : vector<24x1xf32> to vector<24x24xf32>
    %677 = arith.mulf %672, %676 : vector<24x24xf32>
    %678 = arith.truncf %677 : vector<24x24xf32> to vector<24x24xbf16>
    %679 = arith.truncf %661 : vector<24x8xf32> to vector<24x8xbf16>
    %cst_168 = arith.constant dense<0.000000e+00> : vector<24x8xf32>
    %680 = tpu.matmul %678, %679, %cst_168 {dimension_numbers = #tpu.dot_dimension_numbers<[1], [0], [0], [1], [0, 0, 1, 1], [], []>} : vector<24x24xbf16>, vector<24x8xbf16>, vector<24x8xf32> -> vector<24x8xf32>
    %681 = arith.truncf %680 : vector<24x8xf32> to vector<24x8xbf16>
    %682 = vector.extract_strided_slice %547 {offsets = [0, 0], sizes = [8, 32], strides = [1, 1]} : vector<32x32xbf16> to vector<8x32xbf16>
    %cst_169 = arith.constant dense<0.000000e+00> : vector<24x32xf32>
    %683 = tpu.matmul %681, %682, %cst_169 {dimension_numbers = #tpu.dot_dimension_numbers<[1], [0], [0], [1], [0, 0, 1, 1], [], []>} : vector<24x8xbf16>, vector<8x32xbf16>, vector<24x32xf32> -> vector<24x32xf32>
    %684 = vector.extract_strided_slice %658 {offsets = [0, 8], sizes = [24, 8], strides = [1, 1]} : vector<24x96xf32> to vector<24x8xf32>
    %685 = vector.extract_strided_slice %658 {offsets = [0, 40], sizes = [24, 8], strides = [1, 1]} : vector<24x96xf32> to vector<24x8xf32>
    %686 = vector.extract_strided_slice %658 {offsets = [0, 72], sizes = [24, 8], strides = [1, 1]} : vector<24x96xf32> to vector<24x8xf32>
    %687 = arith.truncf %684 : vector<24x8xf32> to vector<24x8xbf16>
    %688 = arith.truncf %685 : vector<24x8xf32> to vector<24x8xbf16>
    %cst_170 = arith.constant dense<0.000000e+00> : vector<24x24xf32>
    %689 = tpu.matmul %687, %688, %cst_170 {dimension_numbers = #tpu.dot_dimension_numbers<[1], [1], [0], [0], [0, 0, 1, 0], [], []>} : vector<24x8xbf16>, vector<24x8xbf16>, vector<24x24xf32> -> vector<24x24xf32>
    %690 = vector.broadcast %549 : f32 to vector<24x24xf32>
    %691 = arith.mulf %689, %690 : vector<24x24xf32>
    %692 = arith.addf %691, %47 : vector<24x24xf32>
    %cst_171 = arith.constant dense<0xFF800000> : vector<24xf32>
    %693 = vector.multi_reduction <maximumf>, %692, %cst_171 [1] : vector<24x24xf32> to vector<24xf32>
    %694 = vector.shape_cast %693 : vector<24xf32> to vector<24x1xf32>
    %695 = vector.broadcast %694 : vector<24x1xf32> to vector<24x24xf32>
    %696 = arith.subf %692, %695 : vector<24x24xf32>
    %697 = math.exp %696 : vector<24x24xf32>
    %cst_172 = arith.constant dense<0.000000e+00> : vector<24xf32>
    %698 = vector.multi_reduction <add>, %697, %cst_172 [1] : vector<24x24xf32> to vector<24xf32>
    %699 = vector.shape_cast %698 : vector<24xf32> to vector<24x1xf32>
    %700 = tpu.reciprocal %699 {approx = true} : vector<24x1xf32> -> vector<24x1xf32>
    %701 = vector.broadcast %700 : vector<24x1xf32> to vector<24x24xf32>
    %702 = arith.mulf %697, %701 : vector<24x24xf32>
    %703 = arith.truncf %702 : vector<24x24xf32> to vector<24x24xbf16>
    %704 = arith.truncf %686 : vector<24x8xf32> to vector<24x8xbf16>
    %cst_173 = arith.constant dense<0.000000e+00> : vector<24x8xf32>
    %705 = tpu.matmul %703, %704, %cst_173 {dimension_numbers = #tpu.dot_dimension_numbers<[1], [0], [0], [1], [0, 0, 1, 1], [], []>} : vector<24x24xbf16>, vector<24x8xbf16>, vector<24x8xf32> -> vector<24x8xf32>
    %706 = arith.truncf %705 : vector<24x8xf32> to vector<24x8xbf16>
    %707 = vector.extract_strided_slice %547 {offsets = [8, 0], sizes = [8, 32], strides = [1, 1]} : vector<32x32xbf16> to vector<8x32xbf16>
    %cst_174 = arith.constant dense<0.000000e+00> : vector<24x32xf32>
    %708 = tpu.matmul %706, %707, %cst_174 {dimension_numbers = #tpu.dot_dimension_numbers<[1], [0], [0], [1], [0, 0, 1, 1], [], []>} : vector<24x8xbf16>, vector<8x32xbf16>, vector<24x32xf32> -> vector<24x32xf32>
    %709 = arith.addf %683, %708 : vector<24x32xf32>
    %710 = vector.extract_strided_slice %658 {offsets = [0, 16], sizes = [24, 8], strides = [1, 1]} : vector<24x96xf32> to vector<24x8xf32>
    %711 = vector.extract_strided_slice %658 {offsets = [0, 48], sizes = [24, 8], strides = [1, 1]} : vector<24x96xf32> to vector<24x8xf32>
    %712 = vector.extract_strided_slice %658 {offsets = [0, 80], sizes = [24, 8], strides = [1, 1]} : vector<24x96xf32> to vector<24x8xf32>
    %713 = arith.truncf %710 : vector<24x8xf32> to vector<24x8xbf16>
    %714 = arith.truncf %711 : vector<24x8xf32> to vector<24x8xbf16>
    %cst_175 = arith.constant dense<0.000000e+00> : vector<24x24xf32>
    %715 = tpu.matmul %713, %714, %cst_175 {dimension_numbers = #tpu.dot_dimension_numbers<[1], [1], [0], [0], [0, 0, 1, 0], [], []>} : vector<24x8xbf16>, vector<24x8xbf16>, vector<24x24xf32> -> vector<24x24xf32>
    %716 = vector.broadcast %549 : f32 to vector<24x24xf32>
    %717 = arith.mulf %715, %716 : vector<24x24xf32>
    %718 = arith.addf %717, %47 : vector<24x24xf32>
    %cst_176 = arith.constant dense<0xFF800000> : vector<24xf32>
    %719 = vector.multi_reduction <maximumf>, %718, %cst_176 [1] : vector<24x24xf32> to vector<24xf32>
    %720 = vector.shape_cast %719 : vector<24xf32> to vector<24x1xf32>
    %721 = vector.broadcast %720 : vector<24x1xf32> to vector<24x24xf32>
    %722 = arith.subf %718, %721 : vector<24x24xf32>
    %723 = math.exp %722 : vector<24x24xf32>
    %cst_177 = arith.constant dense<0.000000e+00> : vector<24xf32>
    %724 = vector.multi_reduction <add>, %723, %cst_177 [1] : vector<24x24xf32> to vector<24xf32>
    %725 = vector.shape_cast %724 : vector<24xf32> to vector<24x1xf32>
    %726 = tpu.reciprocal %725 {approx = true} : vector<24x1xf32> -> vector<24x1xf32>
    %727 = vector.broadcast %726 : vector<24x1xf32> to vector<24x24xf32>
    %728 = arith.mulf %723, %727 : vector<24x24xf32>
    %729 = arith.truncf %728 : vector<24x24xf32> to vector<24x24xbf16>
    %730 = arith.truncf %712 : vector<24x8xf32> to vector<24x8xbf16>
    %cst_178 = arith.constant dense<0.000000e+00> : vector<24x8xf32>
    %731 = tpu.matmul %729, %730, %cst_178 {dimension_numbers = #tpu.dot_dimension_numbers<[1], [0], [0], [1], [0, 0, 1, 1], [], []>} : vector<24x24xbf16>, vector<24x8xbf16>, vector<24x8xf32> -> vector<24x8xf32>
    %732 = arith.truncf %731 : vector<24x8xf32> to vector<24x8xbf16>
    %733 = vector.extract_strided_slice %547 {offsets = [16, 0], sizes = [8, 32], strides = [1, 1]} : vector<32x32xbf16> to vector<8x32xbf16>
    %cst_179 = arith.constant dense<0.000000e+00> : vector<24x32xf32>
    %734 = tpu.matmul %732, %733, %cst_179 {dimension_numbers = #tpu.dot_dimension_numbers<[1], [0], [0], [1], [0, 0, 1, 1], [], []>} : vector<24x8xbf16>, vector<8x32xbf16>, vector<24x32xf32> -> vector<24x32xf32>
    %735 = arith.addf %709, %734 : vector<24x32xf32>
    %736 = vector.extract_strided_slice %658 {offsets = [0, 24], sizes = [24, 8], strides = [1, 1]} : vector<24x96xf32> to vector<24x8xf32>
    %737 = vector.extract_strided_slice %658 {offsets = [0, 56], sizes = [24, 8], strides = [1, 1]} : vector<24x96xf32> to vector<24x8xf32>
    %738 = vector.extract_strided_slice %658 {offsets = [0, 88], sizes = [24, 8], strides = [1, 1]} : vector<24x96xf32> to vector<24x8xf32>
    %739 = arith.truncf %736 : vector<24x8xf32> to vector<24x8xbf16>
    %740 = arith.truncf %737 : vector<24x8xf32> to vector<24x8xbf16>
    %cst_180 = arith.constant dense<0.000000e+00> : vector<24x24xf32>
    %741 = tpu.matmul %739, %740, %cst_180 {dimension_numbers = #tpu.dot_dimension_numbers<[1], [1], [0], [0], [0, 0, 1, 0], [], []>} : vector<24x8xbf16>, vector<24x8xbf16>, vector<24x24xf32> -> vector<24x24xf32>
    %742 = vector.broadcast %549 : f32 to vector<24x24xf32>
    %743 = arith.mulf %741, %742 : vector<24x24xf32>
    %744 = arith.addf %743, %47 : vector<24x24xf32>
    %cst_181 = arith.constant dense<0xFF800000> : vector<24xf32>
    %745 = vector.multi_reduction <maximumf>, %744, %cst_181 [1] : vector<24x24xf32> to vector<24xf32>
    %746 = vector.shape_cast %745 : vector<24xf32> to vector<24x1xf32>
    %747 = vector.broadcast %746 : vector<24x1xf32> to vector<24x24xf32>
    %748 = arith.subf %744, %747 : vector<24x24xf32>
    %749 = math.exp %748 : vector<24x24xf32>
    %cst_182 = arith.constant dense<0.000000e+00> : vector<24xf32>
    %750 = vector.multi_reduction <add>, %749, %cst_182 [1] : vector<24x24xf32> to vector<24xf32>
    %751 = vector.shape_cast %750 : vector<24xf32> to vector<24x1xf32>
    %752 = tpu.reciprocal %751 {approx = true} : vector<24x1xf32> -> vector<24x1xf32>
    %753 = vector.broadcast %752 : vector<24x1xf32> to vector<24x24xf32>
    %754 = arith.mulf %749, %753 : vector<24x24xf32>
    %755 = arith.truncf %754 : vector<24x24xf32> to vector<24x24xbf16>
    %756 = arith.truncf %738 : vector<24x8xf32> to vector<24x8xbf16>
    %cst_183 = arith.constant dense<0.000000e+00> : vector<24x8xf32>
    %757 = tpu.matmul %755, %756, %cst_183 {dimension_numbers = #tpu.dot_dimension_numbers<[1], [0], [0], [1], [0, 0, 1, 1], [], []>} : vector<24x24xbf16>, vector<24x8xbf16>, vector<24x8xf32> -> vector<24x8xf32>
    %758 = arith.truncf %757 : vector<24x8xf32> to vector<24x8xbf16>
    %759 = vector.extract_strided_slice %547 {offsets = [24, 0], sizes = [8, 32], strides = [1, 1]} : vector<32x32xbf16> to vector<8x32xbf16>
    %cst_184 = arith.constant dense<0.000000e+00> : vector<24x32xf32>
    %760 = tpu.matmul %758, %759, %cst_184 {dimension_numbers = #tpu.dot_dimension_numbers<[1], [0], [0], [1], [0, 0, 1, 1], [], []>} : vector<24x8xbf16>, vector<8x32xbf16>, vector<24x32xf32> -> vector<24x32xf32>
    %761 = arith.addf %735, %760 : vector<24x32xf32>
    %762 = vector.broadcast %548 : vector<1x32xf32> to vector<24x32xf32>
    %763 = arith.addf %761, %762 : vector<24x32xf32>
    %764 = tpu.concatenate %657, %763 in 0 : vector<24x32xf32>, vector<24x32xf32> -> vector<48x32xf32>
    %765 = arith.addf %764, %543 : vector<48x32xf32>
    %766 = arith.mulf %765, %765 : vector<48x32xf32>
    %cst_185 = arith.constant dense<0.000000e+00> : vector<48xf32>
    %767 = vector.multi_reduction <add>, %766, %cst_185 [1] : vector<48x32xf32> to vector<48xf32>
    %768 = vector.shape_cast %767 : vector<48xf32> to vector<48x1xf32>
    %cst_186 = arith.constant 3.200000e+01 : f32
    %769 = vector.broadcast %cst_186 : f32 to vector<48x1xf32>
    %770 = arith.divf %768, %769 : vector<48x1xf32>
    %cst_187 = arith.constant 9.99999997E-7 : f32
    %771 = vector.broadcast %cst_187 : f32 to vector<48x1xf32>
    %772 = arith.addf %770, %771 : vector<48x1xf32>
    %773 = math.rsqrt %772 : vector<48x1xf32>
    %774 = vector.broadcast %773 : vector<48x1xf32> to vector<48x32xf32>
    %775 = arith.mulf %765, %774 : vector<48x32xf32>
    %c0_188 = arith.constant 0 : index
    %c0_189 = arith.constant 0 : index
    %c0_190 = arith.constant 0 : index
    %776 = vector.load %arg8[%c0_188, %c0_189, %c0_190] : memref<2x32x128xbf16, #tpu.memory_space<vmem>>, vector<1x32x128xbf16>
    %777 = vector.shape_cast %776 : vector<1x32x128xbf16> to vector<32x128xbf16>
    %c0_191 = arith.constant 0 : index
    %c0_192 = arith.constant 0 : index
    %c0_193 = arith.constant 0 : index
    %778 = vector.load %arg9[%c0_191, %c0_192, %c0_193] : memref<2x64x32xbf16, #tpu.memory_space<vmem>>, vector<1x64x32xbf16>
    %779 = vector.shape_cast %778 : vector<1x64x32xbf16> to vector<64x32xbf16>
    %780 = arith.truncf %775 : vector<48x32xf32> to vector<48x32xbf16>
    %cst_194 = arith.constant dense<0.000000e+00> : vector<48x128xf32>
    %781 = tpu.matmul %780, %777, %cst_194 {dimension_numbers = #tpu.dot_dimension_numbers<[1], [0], [0], [1], [0, 0, 1, 1], [], []>} : vector<48x32xbf16>, vector<32x128xbf16>, vector<48x128xf32> -> vector<48x128xf32>
    %782 = vector.extract_strided_slice %781 {offsets = [0, 0], sizes = [48, 64], strides = [1, 1]} : vector<48x128xf32> to vector<48x64xf32>
    %783 = vector.extract_strided_slice %781 {offsets = [0, 64], sizes = [48, 64], strides = [1, 1]} : vector<48x128xf32> to vector<48x64xf32>
    %784 = arith.mulf %782, %783 : vector<48x64xf32>
    %785 = arith.truncf %784 : vector<48x64xf32> to vector<48x64xbf16>
    %cst_195 = arith.constant dense<0.000000e+00> : vector<48x32xf32>
    %786 = tpu.matmul %785, %779, %cst_195 {dimension_numbers = #tpu.dot_dimension_numbers<[1], [0], [0], [1], [0, 0, 1, 1], [], []>} : vector<48x64xbf16>, vector<64x32xbf16>, vector<48x32xf32> -> vector<48x32xf32>
    %787 = arith.addf %786, %775 : vector<48x32xf32>
    %788 = arith.mulf %787, %787 : vector<48x32xf32>
    %cst_196 = arith.constant dense<0.000000e+00> : vector<48xf32>
    %789 = vector.multi_reduction <add>, %788, %cst_196 [1] : vector<48x32xf32> to vector<48xf32>
    %790 = vector.shape_cast %789 : vector<48xf32> to vector<48x1xf32>
    %cst_197 = arith.constant 3.200000e+01 : f32
    %791 = vector.broadcast %cst_197 : f32 to vector<48x1xf32>
    %792 = arith.divf %790, %791 : vector<48x1xf32>
    %cst_198 = arith.constant 9.99999997E-7 : f32
    %793 = vector.broadcast %cst_198 : f32 to vector<48x1xf32>
    %794 = arith.addf %792, %793 : vector<48x1xf32>
    %795 = math.rsqrt %794 : vector<48x1xf32>
    %796 = vector.broadcast %795 : vector<48x1xf32> to vector<48x32xf32>
    %797 = arith.mulf %787, %796 : vector<48x32xf32>
    %c1_199 = arith.constant 1 : index
    %c0_200 = arith.constant 0 : index
    %c0_201 = arith.constant 0 : index
    %798 = vector.load %arg8[%c1_199, %c0_200, %c0_201] : memref<2x32x128xbf16, #tpu.memory_space<vmem>>, vector<1x32x128xbf16>
    %799 = vector.shape_cast %798 : vector<1x32x128xbf16> to vector<32x128xbf16>
    %c1_202 = arith.constant 1 : index
    %c0_203 = arith.constant 0 : index
    %c0_204 = arith.constant 0 : index
    %800 = vector.load %arg9[%c1_202, %c0_203, %c0_204] : memref<2x64x32xbf16, #tpu.memory_space<vmem>>, vector<1x64x32xbf16>
    %801 = vector.shape_cast %800 : vector<1x64x32xbf16> to vector<64x32xbf16>
    %802 = arith.truncf %797 : vector<48x32xf32> to vector<48x32xbf16>
    %cst_205 = arith.constant dense<0.000000e+00> : vector<48x128xf32>
    %803 = tpu.matmul %802, %799, %cst_205 {dimension_numbers = #tpu.dot_dimension_numbers<[1], [0], [0], [1], [0, 0, 1, 1], [], []>} : vector<48x32xbf16>, vector<32x128xbf16>, vector<48x128xf32> -> vector<48x128xf32>
    %804 = vector.extract_strided_slice %803 {offsets = [0, 0], sizes = [48, 64], strides = [1, 1]} : vector<48x128xf32> to vector<48x64xf32>
    %805 = vector.extract_strided_slice %803 {offsets = [0, 64], sizes = [48, 64], strides = [1, 1]} : vector<48x128xf32> to vector<48x64xf32>
    %806 = arith.mulf %804, %805 : vector<48x64xf32>
    %807 = arith.truncf %806 : vector<48x64xf32> to vector<48x64xbf16>
    %cst_206 = arith.constant dense<0.000000e+00> : vector<48x32xf32>
    %808 = tpu.matmul %807, %801, %cst_206 {dimension_numbers = #tpu.dot_dimension_numbers<[1], [0], [0], [1], [0, 0, 1, 1], [], []>} : vector<48x64xbf16>, vector<64x32xbf16>, vector<48x32xf32> -> vector<48x32xf32>
    %809 = arith.addf %808, %797 : vector<48x32xf32>
    %810 = vector.extract_strided_slice %809 {offsets = [16, 0], sizes = [1, 32], strides = [1, 1]} : vector<48x32xf32> to vector<1x32xf32>
    %811 = vector.extract_strided_slice %809 {offsets = [40, 0], sizes = [1, 32], strides = [1, 1]} : vector<48x32xf32> to vector<1x32xf32>
    %812 = tpu.concatenate %810, %811 in 0 : vector<1x32xf32>, vector<1x32xf32> -> vector<2x32xf32>
    %c51 = arith.constant 51 : index
    %c0_207 = arith.constant 0 : index
    %813 = vector.load %arg3[%c51, %c0_207] : memref<53x32xf32, #tpu.memory_space<vmem>>, vector<1x32xf32>
    %c52 = arith.constant 52 : index
    %c0_208 = arith.constant 0 : index
    %814 = vector.load %arg3[%c52, %c0_208] : memref<53x32xf32, #tpu.memory_space<vmem>>, vector<1x32xf32>
    %cst_209 = arith.constant dense<0.000000e+00> : vector<2xf32>
    %815 = vector.multi_reduction <add>, %812, %cst_209 [1] : vector<2x32xf32> to vector<2xf32>
    %816 = vector.shape_cast %815 : vector<2xf32> to vector<2x1xf32>
    %cst_210 = arith.constant 3.200000e+01 : f32
    %817 = vector.broadcast %cst_210 : f32 to vector<2x1xf32>
    %818 = arith.divf %816, %817 : vector<2x1xf32>
    %819 = vector.broadcast %818 : vector<2x1xf32> to vector<2x32xf32>
    %820 = arith.subf %812, %819 : vector<2x32xf32>
    %821 = vector.broadcast %818 : vector<2x1xf32> to vector<2x32xf32>
    %822 = arith.subf %812, %821 : vector<2x32xf32>
    %823 = arith.mulf %820, %822 : vector<2x32xf32>
    %cst_211 = arith.constant dense<0.000000e+00> : vector<2xf32>
    %824 = vector.multi_reduction <add>, %823, %cst_211 [1] : vector<2x32xf32> to vector<2xf32>
    %825 = vector.shape_cast %824 : vector<2xf32> to vector<2x1xf32>
    %cst_212 = arith.constant 3.200000e+01 : f32
    %826 = vector.broadcast %cst_212 : f32 to vector<2x1xf32>
    %827 = arith.divf %825, %826 : vector<2x1xf32>
    %828 = vector.broadcast %818 : vector<2x1xf32> to vector<2x32xf32>
    %829 = arith.subf %812, %828 : vector<2x32xf32>
    %cst_213 = arith.constant 9.99999974E-6 : f32
    %830 = vector.broadcast %cst_213 : f32 to vector<2x1xf32>
    %831 = arith.addf %827, %830 : vector<2x1xf32>
    %832 = math.rsqrt %831 : vector<2x1xf32>
    %833 = vector.broadcast %832 : vector<2x1xf32> to vector<2x32xf32>
    %834 = arith.mulf %829, %833 : vector<2x32xf32>
    %835 = vector.broadcast %813 : vector<1x32xf32> to vector<2x32xf32>
    %836 = arith.mulf %834, %835 : vector<2x32xf32>
    %837 = vector.broadcast %814 : vector<1x32xf32> to vector<2x32xf32>
    %838 = arith.addf %836, %837 : vector<2x32xf32>
    %839 = arith.truncf %838 : vector<2x32xf32> to vector<2x32xbf16>
    %c0_214 = arith.constant 0 : index
    %c0_215 = arith.constant 0 : index
    %840 = vector.load %arg11[%c0_214, %c0_215] : memref<32x128xbf16, #tpu.memory_space<vmem>>, vector<32x128xbf16>
    %cst_216 = arith.constant dense<0.000000e+00> : vector<2x128xf32>
    %841 = tpu.matmul %839, %840, %cst_216 {dimension_numbers = #tpu.dot_dimension_numbers<[1], [0], [0], [1], [0, 0, 1, 1], [], []>} : vector<2x32xbf16>, vector<32x128xbf16>, vector<2x128xf32> -> vector<2x128xf32>
    %c0_217 = arith.constant 0 : index
    %c0_218 = arith.constant 0 : index
    %842 = vector.load %arg4[%c0_217, %c0_218] : memref<1x128xf32, #tpu.memory_space<vmem>>, vector<1x128xf32>
    %843 = vector.broadcast %842 : vector<1x128xf32> to vector<2x128xf32>
    %844 = arith.addf %841, %843 : vector<2x128xf32>
    %c0_219 = arith.constant 0 : index
    %c0_220 = arith.constant 0 : index
    %845 = vector.load %arg12[%c0_219, %c0_220] : memref<2x128xf32, #tpu.memory_space<vmem>>, vector<2x128xf32>
    tpu.vector_store %arg12[%c0_219, %c0_220], %844 {strides = array<i32>} : memref<2x128xf32, #tpu.memory_space<vmem>>, vector<2x128xf32>,
    return
  }
  func.func @transform_0(%arg0: i32) -> (i32, i32) {
    %c0_i32 = arith.constant 0 : i32
    %c0_i32_0 = arith.constant 0 : i32
    %c0_i32_1 = arith.constant 0 : i32
    return %c0_i32, %c0_i32_0 : i32, i32
  }
  func.func @transform_1(%arg0: i32) -> (i32, i32) {
    %c0_i32 = arith.constant 0 : i32
    %c0_i32_0 = arith.constant 0 : i32
    %c0_i32_1 = arith.constant 0 : i32
    return %c0_i32, %c0_i32_0 : i32, i32
  }
  func.func @transform_2(%arg0: i32) -> (i32, i32) {
    %c0_i32 = arith.constant 0 : i32
    %c0_i32_0 = arith.constant 0 : i32
    %c0_i32_1 = arith.constant 0 : i32
    return %c0_i32, %c0_i32_0 : i32, i32
  }
  func.func @transform_3(%arg0: i32) -> (i32, i32) {
    %c0_i32 = arith.constant 0 : i32
    %c0_i32_0 = arith.constant 0 : i32
    %c0_i32_1 = arith.constant 0 : i32
    return %c0_i32, %c0_i32_0 : i32, i32
  }
  func.func @transform_4(%arg0: i32) -> i32 {
    %c0_i32 = arith.constant 0 : i32
    %c0_i32_0 = arith.constant 0 : i32
    return %c0_i32 : i32
  }
  func.func @transform_5(%arg0: i32) -> (i32, i32, i32) {
    %c0_i32 = arith.constant 0 : i32
    %c0_i32_0 = arith.constant 0 : i32
    %c0_i32_1 = arith.constant 0 : i32
    %c0_i32_2 = arith.constant 0 : i32
    return %c0_i32, %c0_i32_0, %c0_i32_1 : i32, i32, i32
  }
  func.func @transform_6(%arg0: i32) -> (i32, i32, i32) {
    %c0_i32 = arith.constant 0 : i32
    %c0_i32_0 = arith.constant 0 : i32
    %c0_i32_1 = arith.constant 0 : i32
    %c0_i32_2 = arith.constant 0 : i32
    return %c0_i32, %c0_i32_0, %c0_i32_1 : i32, i32, i32
  }
  func.func @transform_7(%arg0: i32) -> (i32, i32, i32) {
    %c0_i32 = arith.constant 0 : i32
    %c0_i32_0 = arith.constant 0 : i32
    %c0_i32_1 = arith.constant 0 : i32
    %c0_i32_2 = arith.constant 0 : i32
    return %c0_i32, %c0_i32_0, %c0_i32_1 : i32, i32, i32
  }
  func.func @transform_8(%arg0: i32) -> (i32, i32, i32) {
    %c0_i32 = arith.constant 0 : i32
    %c0_i32_0 = arith.constant 0 : i32
    %c0_i32_1 = arith.constant 0 : i32
    %c0_i32_2 = arith.constant 0 : i32
    return %c0_i32, %c0_i32_0, %c0_i32_1 : i32, i32, i32
  }
  func.func @transform_9(%arg0: i32) -> (i32, i32) {
    %c0_i32 = arith.constant 0 : i32
    %c0_i32_0 = arith.constant 0 : i32
    %c0_i32_1 = arith.constant 0 : i32
    return %c0_i32, %c0_i32_0 : i32, i32
  }
  func.func @transform_10(%arg0: i32) -> (i32, i32) {
    %c0_i32 = arith.constant 0 : i32
    %c0_i32_0 = arith.constant 0 : i32
    %c0_i32_1 = arith.constant 0 : i32
    return %c0_i32, %c0_i32_0 : i32, i32
  }
  func.func @transform_11(%arg0: i32) -> (i32, i32) {
    %c0_i32 = arith.constant 0 : i32
    %c0_i32_0 = arith.constant 0 : i32
    %c0_i32_1 = arith.constant 0 : i32
    return %c0_i32, %c0_i32_0 : i32, i32
  }
}

</mosaic_0001>

<bundles_post_ra>
// kernel: vit_forward.1
= control target key start
LH: loop header
LB: loop body
LE: loop exit
PB: predicated region body
PF: predicated region fallthrough
CT: control target
= control target key end

     0   :  { %16 = vsyncpa [#allocation4], 0  ;;  %s10914_s0 = inlined_call_operand.vmem [shape: f32[32,240], index: 0, kind: input, shape index: {}]   ;;  %s10915_s1 = inlined_call_operand.vmem [shape: f32[2,240], index: 1, kind: input, shape index: {}]   ;;  %s10916_s2 = inlined_call_operand.vmem [shape: f32[53,32], index: 2, kind: input, shape index: {}]   ;;  %s10917_s3 = inlined_call_operand.vmem [shape: f32[1,128], index: 3, kind: input, shape index: {}]   ;;  %s10918_s4 = inlined_call_operand.vmem [shape: f32[2], index: 4, kind: input, shape index: {}]   ;;  %s10919_s5 = inlined_call_operand.vmem [shape: bf16[2,32,96], index: 5, kind: input, shape index: {}]   ;;  %s10920_s6 = inlined_call_operand.vmem [shape: bf16[2,32,32], index: 6, kind: input, shape index: {}]   ;;  %s10921_s7 = inlined_call_operand.vmem [shape: bf16[2,32,128], index: 7, kind: input, shape index: {}]   ;;  %s10922_s8 = inlined_call_operand.vmem [shape: bf16[2,64,32], index: 8, kind: input, shape index: {}]   ;;  %s10923_s9 = inlined_call_operand.vmem [shape: bf16[240,32], index: 9, kind: input, shape index: {}]   ;;  %s10924_s10 = inlined_call_operand.vmem [shape: bf16[32,128], index: 10, kind: input, shape index: {}]   ;;  %s10925_s11 = inlined_call_operand.hbm [shape: f32[2,128], index: 11, kind: output, shape index: {}]  }
   0x1   :  { %17 = vsyncpa [#allocation3], 0  ;;  %s32_s19 = sshll.u32 %s10918_s4, 4  ;;  %s33_s19 = int_to_ptr.vmem [resolvable:$true] %s32_s19 }
   0x2   :  { %s8975_s20 = scalar_lea.vmem %s33_s19, 16  ;;  %p8980_p1 = scmp.lt.s32.totalorder %s33_s19, %s33_s19 }
   0x3   :  { %p8976_p0 = scmp.ne.s32.totalorder %s33_s19, %s8975_s20  ;;  %p8981_p2 = scmp.lt.s32.totalorder %s8975_s20, %s8975_s20 }
   0x5   :  { %p8982_p3 = por %p8981_p2, %p8980_p1 }
   0x7   :  { %p8983_p4 = pnand %p8982_p3, %p8976_p0 }
   0x9   :  { %8986 = shalt.err (!%p8983_p4)
}
   0xa   :  { %s9013_s21 = smov [#allocation2]  }
   0xb   :  { %35 = dma.vmem_to_smem %s33_s19, 16, %s9013_s21, [#allocation4]  }
   0xc   :  { %9009 = dma.done.wait [#allocation4], 16  }
   0xd   :  { %9010 = vsyncadd [#allocation4], 4294967280 }
   0xe   :  { %51 = sfence }
   0xf   :  { %v53_v0 = vld [vmem:[%s10914_s0] sm:$0xff]  ;;  %v54_v1 = vld [vmem:[%s10914_s0 + $0x8] sm:$0xff]  ;;  %vm64_vm0 = vcmask 916480   ;;  %v55_v5 = vld [vmem:[%s10914_s0 + $0x10] sm:$0xff]  ;;  %v9014_v17 = vmov 0   ;;  %v139_v63 = vlaneseq  ;;  %vm394_vm8 = vcmask 261120  }
  0x10   :  { %v57_v2 = vld [vmem:[%s10914_s0 + $0x20] sm:$0xff]  ;;  %v65_v3 = vsel %vm64_vm0, %v54_v1, 0.0  ;;  %v58_v4 = vld [vmem:[%s10914_s0 + $0x28] sm:$0xff]  ;;  %v56_v6 = vld [vmem:[%s10914_s0 + $0x18] sm:$0xff]  ;;  %311 = vmatprep.subr.bf16.mxu0 %v9014_v17  ;;  %vm9016_vm9 = vmmov 0   ;;  %vm537_vm10 = vcmask 64512  }
  0x11   :  { %v66_v7 = vadd.f32 %v65_v3, %v53_v0  ;;  %v73_v8 = vsel %vm64_vm0, %v58_v4, 0.0  ;;  %v69_v9 = vsel %vm64_vm0, %v56_v6, 0.0  ;;  %v59_v10 = vld [vmem:[%s10914_s0 + $0x30] sm:$0xff]  ;;  %v60_v11 = vld [vmem:[%s10914_s0 + $0x38] sm:$0xff]  ;;  %v8558_v16 = vld [vmem:[%s10923_s9] sm:$0xff]   ;;  %s9017_s25 = smov 96  }
  0x12   :  { %v74_v12 = vadd.f32 %v73_v8, %v57_v2  ;;  %v77_v13 = vsel %vm64_vm0, %v60_v11, 0.0  ;;  %v70_v14 = vadd.f32 %v69_v9, %v55_v5  ;;  %312 = vmatpush1.bf16.msra.mxu0 %v8558_v16  ;;  %v8559_v18 = vld [vmem:[%s10923_s9 + $0x8] sm:$0xff]   ;;  %v8560_v19 = vld [vmem:[%s10923_s9 + $0x10] sm:$0xff]   ;;  %v8561_v20 = vld [vmem:[%s10923_s9 + $0x18] sm:$0xff]   ;;  %vm605_vm11 = vcmask 195584   ;;  %s9018_s4 = smov 64  }
  0x13   :  { %67 = vadd.xlane.f32.xlu0 %v66_v7  ;;  %v78_v15 = vadd.f32 %v77_v13, %v59_v10  ;;  %313 = vmatprep.subr.bf16.mxu0 %v9014_v17  ;;  %v8562_v21 = vld [vmem:[%s10923_s9 + $0x20] sm:$0xff]   ;;  %v8563_v22 = vld [vmem:[%s10923_s9 + $0x28] sm:$0xff]   ;;  %v8564_v23 = vld [vmem:[%s10923_s9 + $0x30] sm:$0xff]   ;;  %s9019_s26 = smov 120   ;;  %s9020_s27 = smov 88   ;;  %vm652_vm12 = vcmask 1043456  }
  0x14   :  { %75 = vadd.xlane.f32.xlu1 %v74_v12  ;;  %v8565_v24 = vld [vmem:[%s10923_s9 + $0x38] sm:$0xff]   ;;  %v8566_v57 = vld [vmem:[%s10923_s9 + $0x40] sm:$0xff]   ;;  %v8567_v58 = vld [vmem:[%s10923_s9 + $0x48] sm:$0xff]   ;;  %s9021_s29 = smov 56   ;;  %s9022_s30 = smov 80   ;;  %vm4585_vm13 = vcmask 523264  }
  0x15   :  { %v8568_v59 = vld [vmem:[%s10923_s9 + $0x50] sm:$0xff]   ;;  %v8569_v60 = vld [vmem:[%s10923_s9 + $0x58] sm:$0xff]   ;;  %v8570_v61 = vld [vmem:[%s10923_s9 + $0x60] sm:$0xff]   ;;  %s9023_s12 = smov 112   ;;  %s9024_s13 = smov 72   ;;  %vm7090_vm14 = vcmask 1040384  }
  0x16   :  { %314 = vmatpush1.bf16.msra.mxu0 %v8559_v18  ;;  %v8571_v62 = vld [vmem:[%s10923_s9 + $0x68] sm:$0xff]   ;;  %s9025_s14 = smov 104   ;;  %s9026_s17 = smov 48   ;;  %vm7094_vm15 = vcmask 254976  }
  0x17   :  { %71 = vadd.xlane.f32.xlu0 %v70_v14  ;;  %315 = vmatprep.subr.bf16.mxu0 %v9014_v17  ;;  %s9027_s18 = smov 40   ;;  %s7282_s15 = sld [smem:[#allocation2 + $0x1]] }
  0x18   :  { %79 = vadd.xlane.f32.xlu1 %v78_v15  ;;  %s9028_s24 = smov [#allocation5]  }
  0x1a   :  { %316 = vmatpush1.bf16.msra.mxu0 %v8560_v19 }
  0x1b   :  { %317 = vmatprep.subr.bf16.mxu0 %v9014_v17 }
  0x1e   :  { %318 = vmatpush1.bf16.msra.mxu0 %v8561_v20 }
  0x1f   :  { %319 = vmatprep.subr.bf16.mxu0 %v9014_v17 }
  0x22   :  { %320 = vmatpush1.bf16.msra.mxu0 %v8562_v21 }
  0x23   :  { %321 = vmatprep.subr.bf16.mxu0 %v9014_v17 }
  0x26   :  { %322 = vmatpush1.bf16.msra.mxu0 %v8563_v22 }
  0x27   :  { %323 = vmatprep.subr.bf16.mxu0 %v9014_v17 }
  0x2a   :  { %324 = vmatpush1.bf16.msra.mxu0 %v8564_v23  ;;  %v61_v23 = vld [vmem:[%s10915_s1] ss:$2 sm:$0x3] }
  0x2b   :  { %325 = vmatprep.subr.bf16.mxu0 %v9014_v17 }
  0x2e   :  { %326 = vmatpush1.bf16.msra.mxu0 %v8565_v24 }
  0x2f   :  { %327 = vmatprep.subr.bf16.mxu0 %v9014_v17 }
  0x32   :  { %328 = vmatpush1.bf16.msra.mxu0 %v8566_v57 }
  0x33   :  { %329 = vmatprep.subr.bf16.mxu0 %v9014_v17 }
  0x36   :  { %330 = vmatpush1.bf16.msra.mxu0 %v8567_v58 }
  0x37   :  { %331 = vmatprep.subr.bf16.mxu0 %v9014_v17 }
  0x3a   :  { %332 = vmatpush1.bf16.msra.mxu0 %v8568_v59 }
  0x3b   :  { %333 = vmatprep.subr.bf16.mxu0 %v9014_v17 }
  0x3e   :  { %334 = vmatpush1.bf16.msra.mxu0 %v8569_v60 }
  0x3f   :  { %335 = vmatprep.subr.bf16.mxu0 %v9014_v17 }
  0x42   :  { %336 = vmatpush1.bf16.msra.mxu0 %v8570_v61 }
  0x43   :  { %337 = vmatprep.subr.bf16.mxu0 %v9014_v17 }
  0x46   :  { %338 = vmatpush1.bf16.msra.mxu0 %v8571_v62 }
  0x47   :  { %339 = vmatprep.subr.bf16.mxu0 %v9014_v17 }
  0xa0   :  { %v68_v25 = vpop.xlane.xlu0 %67 }
  0xa1   :  { %v82_v26 = vmul.f32 0.004166667, %v68_v25  ;;  %v76_v27 = vpop.xlane.xlu1 %75 }
  0xa2   :  { %v84_v28 = vmul.f32 0.004166667, %v76_v27  ;;  %v7201_v27 = vld [vmem:[%s10915_s1 + $0x1] ss:$2 sm:$0x3] }
  0xa3   :  { %v9153_v29 = vsub.f32 %v53_v0, %v82_v26  ;;  %v9155_v30 = vsub.f32 %v54_v1, %v82_v26  ;;  %v8572_v0 = vld [vmem:[%s10923_s9 + $0x70] sm:$0xff]   ;;  %v140_v1 = vshrl.u32 %v139_v63, 7  ;;  %s447_s9 = sld [smem:[#allocation2]] }
  0xa4   :  { %v9157_v31 = vsub.f32 %v57_v2, %v84_v28  ;;  %v9159_v32 = vsub.f32 %v58_v4, %v84_v28  ;;  %v72_v33 = vpop.xlane.xlu0 %71  ;;  %340 = vmatpush1.bf16.msra.mxu0 %v8572_v0  ;;  %v377_v4 = vand.u32 127, %v139_v63  ;;  %v360_v63 = vld [vmem:[%s10916_s2] sm:$0xff] }
  0xa5   :  { %v83_v34 = vmul.f32 0.004166667, %v72_v33  ;;  %v80_v35 = vpop.xlane.xlu1 %79  ;;  %v94_v36 = vmul.f32 %v9153_v29, %v9153_v29  ;;  %v95_v37 = vmul.f32 %v9155_v30, %v9155_v30  ;;  %v374_v2 = vadd.s32 8, %v140_v1 }
  0xa6   :  { %v85_v38 = vmul.f32 0.004166667, %v80_v35  ;;  %v98_v39 = vmul.f32 %v9157_v31, %v9157_v31  ;;  %v99_v40 = vmul.f32 %v9159_v32, %v9159_v32  ;;  %v375_v3 = vadd.s32 16, %v140_v1 }
  0xa7   :  { %v9169_v41 = vsub.f32 %v55_v5, %v83_v34  ;;  %v9171_v42 = vsub.f32 %v56_v6, %v83_v34  ;;  %v102_v43 = vsel %vm64_vm0, %v95_v37, 0.0  ;;  %v9015_v5 = vmov 0.0  }
  0xa8   :  { %v9174_v44 = vsub.f32 %v59_v10, %v85_v38  ;;  %v9176_v45 = vsub.f32 %v60_v11, %v85_v38  ;;  %v103_v46 = vadd.f32 %v102_v43, %v94_v36  ;;  %v110_v47 = vsel %vm64_vm0, %v99_v40, 0.0  ;;  %7754 = vmatprep.subr.bf16.mxu1 %v9015_v5  ;;  %7758 = vmatprep.mubr.msk.bf16.mxu1 %vm9016_vm9, %v9015_v5 }
  0xa9   :  { %v96_v48 = vmul.f32 %v9169_v41, %v9169_v41  ;;  %v97_v49 = vmul.f32 %v9171_v42, %v9171_v42  ;;  %v111_v50 = vadd.f32 %v110_v47, %v98_v39  ;;  %vm378_vm1 = vcmp.eq.s32.totalorder %v140_v1, %v377_v4 }
  0xaa   :  { %104 = vadd.xlane.f32.xlu0 %v103_v46  ;;  %v100_v51 = vmul.f32 %v9174_v44, %v9174_v44  ;;  %v101_v52 = vmul.f32 %v9176_v45, %v9176_v45  ;;  %vm379_vm2 = vcmp.eq.s32.totalorder %v374_v2, %v377_v4  ;;  %vm380_vm3 = vcmp.eq.s32.totalorder %v375_v3, %v377_v4  ;;  %v361_v3 = vld [vmem:[%s10916_s2 + $0x8] sm:$0xff] }
  0xab   :  { %v106_v53 = vsel %vm64_vm0, %v97_v49, 0.0  ;;  %vm381_vm4 = vcmp.ge.s32.totalorder %v377_v4, 17  ;;  %v141_v21 = vsub.s32 0, %v140_v1  ;;  %v145_v22 = vsub.s32 1, %v140_v1  ;;  %v9257_v4 = vld [vmem:[%s10916_s2 + $0x10] sm:$0xff] }
  0xac   :  { %v107_v54 = vadd.f32 %v106_v53, %v96_v48  ;;  %v114_v55 = vsel %vm64_vm0, %v101_v52, 0.0  ;;  %vm9217_vm5 = vmor %vm378_vm1, %vm381_vm4 }
  0xad   :  { %v115_v56 = vadd.f32 %v114_v55, %v100_v51  ;;  %vm9221_vm6 = vmor %vm379_vm2, %vm381_vm4  ;;  %v142_v25 = vrot.slane %v61_v23, %v141_v21  ;;  %v146_v26 = vrot.slane %v61_v23, %v145_v22  ;;  %v161_v36 = vrot.slane %v7201_v27, %v141_v21 }
  0xae   :  { %112 = vadd.xlane.f32.xlu0 %v111_v50  ;;  %108 = vadd.xlane.f32.xlu1 %v107_v54  ;;  %vm9225_vm7 = vmor %vm380_vm3, %vm381_vm4  ;;  %v165_v37 = vrot.slane %v7201_v27, %v145_v22 }
  0xaf   :  { %v9355_v6 = vsel %vm9225_vm7, -1e+30, %v9015_v5 }
  0xb2   :  { %116 = vadd.xlane.f32.xlu1 %v115_v56 }
 0x137   :  { %v105_v9 = vpop.xlane.xlu0 %104 }
 0x138   :  { %v118_v10 = vmul.f32 0.004166667, %v105_v9 }
 0x13a   :  { %v122_v11 = vadd.f32 1e-05, %v118_v10 }
 0x13b   :  { %v109_v12 = vpop.xlane.xlu1 %108  ;;  %v113_v13 = vpop.xlane.xlu0 %112 }
 0x13c   :  { %8591 = vrsqrt.f32 %v122_v11  ;;  %v119_v14 = vmul.f32 0.004166667, %v109_v12  ;;  %v120_v15 = vmul.f32 0.004166667, %v113_v13 }
 0x13e   :  { %v123_v16 = vadd.f32 1e-05, %v119_v14  ;;  %v124_v17 = vadd.f32 1e-05, %v120_v15  ;;  %v390_v14 = vmul.f32 %v9257_v4, %v9257_v4 }
 0x13f   :  { %v117_v18 = vpop.xlane.xlu1 %116 }
 0x140   :  { %8593 = vrsqrt.f32 %v123_v16  ;;  %v121_v19 = vmul.f32 0.004166667, %v117_v18  ;;  %v363_v18 = vld [vmem:[%s10916_s2 + $0x18] sm:$0xff]  ;;  %v401_v22 = vsel %vm394_vm8, %v390_v14, 0.0 }
 0x141   :  { %8595 = vrsqrt.f32 %v124_v17 }
 0x142   :  { %v125_v20 = vadd.f32 1e-05, %v121_v19 }
 0x144   :  { %8597 = vrsqrt.f32 %v125_v20 }
 0x146   :  { %v8592_v24 = vpop.eup %8591 }
 0x147   :  { %v131_v28 = vmul.f32 %v8592_v24, %v9155_v30  ;;  %v130_v33 = vmul.f32 %v8592_v24, %v9153_v29  ;;  %v364_v24 = vld [vmem:[%s10916_s2 + $0x20] sm:$0xff] }
 0x149   :  { %v150_v35 = vmul.f32 %v146_v26, %v131_v28  ;;  %v149_v38 = vmul.f32 %v142_v25, %v130_v33 }
 0x14a   :  { %v8594_v34 = vpop.eup %8593 }
 0x14b   :  { %v8596_v39 = vpop.eup %8595  ;;  %v133_v40 = vmul.f32 %v8594_v34, %v9171_v42  ;;  %v132_v43 = vmul.f32 %v8594_v34, %v9169_v41  ;;  %v169_v50 = vadd.f32 %v165_v37, %v150_v35  ;;  %v168_v51 = vadd.f32 %v161_v36, %v149_v38 }
 0x14c   :  { %v135_v46 = vmul.f32 %v8596_v39, %v9159_v32  ;;  %v134_v55 = vmul.f32 %v8596_v39, %v9157_v31  ;;  %v7202_v31 = vld [vmem:[%s10916_s2 + $0x30] ss:$0 sm:$0xff] }
 0x14d   :  { %v152_v47 = vmul.f32 %v146_v26, %v133_v40  ;;  %v151_v48 = vmul.f32 %v142_v25, %v132_v43  ;;  %v8573_v40 = vld [vmem:[%s10919_s5] sm:$0xff]   ;;  %v8574_v43 = vld [vmem:[%s10919_s5 + $0x8] sm:$0xff]  }
 0x14e   :  { %v8598_v49 = vpop.eup %8597  ;;  %v154_v30 = vmul.f32 %v146_v26, %v135_v46  ;;  %v153_v59 = vmul.f32 %v142_v25, %v134_v55  ;;  %7755 = vmatpush3.bf16.msra.mxu1 %v8573_v40  ;;  %v9347_v40 = vsel %vm9221_vm6, -1e+30, %v9015_v5 }
 0x14f   :  { %v171_v52 = vadd.f32 %v165_v37, %v152_v47  ;;  %v170_v29 = vadd.f32 %v161_v36, %v151_v48  ;;  %v137_v53 = vmul.f32 %v8598_v49, %v9176_v45  ;;  %v136_v54 = vmul.f32 %v8598_v49, %v9174_v44  ;;  %7756 = vmatprep.subr.bf16.mxu1 %v9015_v5 }
 0x150   :  { %v173_v32 = vadd.f32 %v165_v37, %v154_v30  ;;  %v172_v62 = vadd.f32 %v161_v36, %v153_v59 }
 0x151   :  { %v177_v56 = vpack.c.bf16 %v171_v52, %v169_v50  ;;  %v176_v42 = vpack.c.bf16 %v170_v29, %v168_v51  ;;  %v156_v57 = vmul.f32 %v146_v26, %v137_v53  ;;  %v155_v41 = vmul.f32 %v142_v25, %v136_v54  ;;  %v365_v25 = vld [vmem:[%s10916_s2 + $0x28] sm:$0xff] }
 0x152   :  { %v393_v35 = vmul.f32 %v365_v25, %v365_v25  ;;  %7757 = vmatpush3.bf16.msra.mxu1 %v8574_v43 }
 0x153   :  { %7218 = vmatprep.mubr.msk.bf16.mxu0 %vm64_vm0, %v177_v56  ;;  %v175_v58 = vadd.f32 %v165_v37, %v156_v57  ;;  %v174_v61 = vadd.f32 %v161_v36, %v155_v41 }
 0x154   :  { %344 = vmatmul.mubr.bf16.vlgmr.msra.gmra.mrb[0].mxu0 %v176_v42  ;;  %v410_v39 = vsel %vm394_vm8, %v393_v35, 0.0 }
 0x155   :  { %v179_v60 = vpack.c.bf16 %v175_v58, %v173_v32  ;;  %v178_v45 = vpack.c.bf16 %v174_v61, %v172_v62 }
 0x157   :  { %7219 = vmatprep.mubr.msk.bf16.mxu0 %vm64_vm0, %v179_v60 }
 0x15c   :  { %352 = vmatmul.mubr.bf16.gmra.mrb[4].mxu0 %v178_v45 }
 0x227   :  { %v345_v44 = vpop.f32.mrb[0].mxu0 }
 0x228   :  { %v346_v0 = vadd.f32 %v7202_v31, %v345_v44  ;;  %v347_v1 = vpop.f32.mrb[1].mxu0 }
 0x229   :  { %v348_v2 = vpop.f32.mrb[2].mxu0 }
 0x22a   :  { %v9259_v9 = vadd.f32 %v360_v63, %v346_v0  ;;  %v349_v10 = vadd.f32 %v7202_v31, %v348_v2  ;;  %v350_v11 = vpop.f32.mrb[3].mxu0 }
 0x22c   :  { %v367_v12 = vadd.f32 %v361_v3, %v349_v10  ;;  %v388_v13 = vmul.f32 %v9259_v9, %v9259_v9 }
 0x22e   :  { %v395_v15 = vsel %vm394_vm8, %v388_v13, 0.0  ;;  %v389_v16 = vmul.f32 %v367_v12, %v367_v12 }
 0x22f   :  { %396 = vadd.xlane.f32.xlu0 %v395_v15  ;;  %v353_v17 = vpop.f32.mrb[4].mxu0 }
 0x230   :  { %v354_v19 = vadd.f32 %v7202_v31, %v353_v17  ;;  %v355_v20 = vpop.f32.mrb[5].mxu0  ;;  %v398_v21 = vsel %vm394_vm8, %v389_v16, 0.0 }
 0x231   :  { %399 = vadd.xlane.f32.xlu1 %v398_v21  ;;  %v356_v23 = vpop.f32.mrb[6].mxu0 }
 0x232   :  { %v369_v26 = vadd.f32 %v363_v18, %v354_v19  ;;  %v357_v27 = vadd.f32 %v7202_v31, %v356_v23  ;;  %v358_v28 = vpop.f32.mrb[7].mxu0 }
 0x233   :  { %402 = vadd.xlane.f32.xlu0 %v401_v22 }
 0x234   :  { %v370_v33 = vadd.f32 %v364_v24, %v357_v27  ;;  %v391_v34 = vmul.f32 %v369_v26, %v369_v26 }
 0x236   :  { %v404_v36 = vsel %vm394_vm8, %v391_v34, 0.0  ;;  %v392_v37 = vmul.f32 %v370_v33, %v370_v33  ;;  %v9336_v34 = vstv %s447_s9  ;;  %s7192_s9 = sshll.u32 %s9028_s24, 4  ;;  %s7193_s9 = int_to_ptr.vmem [resolvable:$true] %s7192_s9 }
 0x237   :  { %405 = vadd.xlane.f32.xlu1 %v404_v36  ;;  %v9341_v36 = vsel %vm9217_vm5, -1e+30, %v9015_v5  ;;  %s8987_s1 = scalar_lea.vmem %s7193_s9, 32  ;;  %p8992_p6 = scmp.lt.s32.totalorder %s7193_s9, %s7193_s9 }
 0x238   :  { %v407_v38 = vsel %vm394_vm8, %v392_v37, 0.0  ;;  %p8988_p5 = scmp.ne.s32.totalorder %s7193_s9, %s8987_s1  ;;  %p8993_p7 = scmp.lt.s32.totalorder %s8987_s1, %s8987_s1 }
 0x239   :  { %408 = vadd.xlane.f32.xlu0 %v407_v38 }
 0x23a   :  { %p8994_p8 = por %p8993_p7, %p8992_p6 }
 0x23b   :  { %411 = vadd.xlane.f32.xlu1 %v410_v39 }
 0x23c   :  { %p8995_p9 = pnand %p8994_p8, %p8988_p5 }
 0x2bc   :  { %v397_v46 = vpop.xlane.xlu0 %396 }
 0x2bd   :  { %v414_v47 = vmul.f32 0.03125, %v397_v46 }
 0x2be   :  { %v400_v48 = vpop.xlane.xlu1 %399 }
 0x2bf   :  { %v420_v49 = vadd.f32 1e-06, %v414_v47  ;;  %v415_v50 = vmul.f32 0.03125, %v400_v48 }
 0x2c0   :  { %v403_v51 = vpop.xlane.xlu0 %402 }
 0x2c1   :  { %8599 = vrsqrt.f32 %v420_v49  ;;  %v421_v30 = vadd.f32 1e-06, %v415_v50  ;;  %v416_v52 = vmul.f32 0.03125, %v403_v51 }
 0x2c3   :  { %8601 = vrsqrt.f32 %v421_v30  ;;  %v422_v29 = vadd.f32 1e-06, %v416_v52 }
 0x2c4   :  { %v406_v53 = vpop.xlane.xlu1 %405 }
 0x2c5   :  { %v417_v54 = vmul.f32 0.03125, %v406_v53  ;;  %8603 = vrsqrt.f32 %v422_v29 }
 0x2c6   :  { %v409_v55 = vpop.xlane.xlu0 %408 }
 0x2c7   :  { %v423_v56 = vadd.f32 1e-06, %v417_v54  ;;  %v418_v57 = vmul.f32 0.03125, %v409_v55 }
 0x2c8   :  { %v412_v42 = vpop.xlane.xlu1 %411 }
 0x2c9   :  { %8605 = vrsqrt.f32 %v423_v56  ;;  %v419_v41 = vmul.f32 0.03125, %v412_v42  ;;  %v424_v60 = vadd.f32 1e-06, %v418_v57 }
 0x2cb   :  { %v8600_v32 = vpop.eup %8599  ;;  %v425_v58 = vadd.f32 1e-06, %v419_v41 }
 0x2cc   :  { %v9290_v61 = vmul.f32 %v8600_v32, %v9259_v9 }
 0x2cd   :  { %v8602_v59 = vpop.eup %8601  ;;  %8607 = vrsqrt.f32 %v425_v58 }
 0x2ce   :  { %v9292_v62 = vmul.f32 %v8602_v59, %v367_v12  ;;  %8609 = vrsqrt.f32 %v424_v60 }
 0x2cf   :  { %v8604_v31 = vpop.eup %8603 }
 0x2d0   :  { %v448_v45 = vpack.c.bf16 %v9292_v62, %v9290_v61  ;;  %v9300_v63 = vmul.f32 %v8604_v31, %v9257_v4 }
 0x2d2   :  { %7759 = vmatmul.mubr.msk.bf16.vlgmr.msra.gmra.mrb[0].mxu1 %vm394_vm8, %v448_v45 }
 0x2d3   :  { %v8606_v44 = vpop.eup %8605  ;;  %7762 = vmatprep.mubr.msk.bf16.mxu1 %vm9016_vm9, %v9015_v5 }
 0x2d4   :  { %v9302_v0 = vmul.f32 %v8606_v44, %v369_v26 }
 0x2d6   :  { %v449_v1 = vpack.c.bf16 %v9302_v0, %v9300_v63 }
 0x2d7   :  { %v8608_v2 = vpop.eup %8607 }
 0x2d8   :  { %v8610_v3 = vpop.eup %8609  ;;  %v9309_v9 = vmul.f32 %v8608_v2, %v365_v25 }
 0x2d9   :  { %v9311_v10 = vmul.f32 %v8610_v3, %v370_v33 }
 0x2da   :  { %7763 = vmatmul.mubr.msk.bf16.gmra.mrb[4].mxu1 %vm394_vm8, %v449_v1 }
 0x2db   :  { %7766 = vmatprep.mubr.msk.bf16.mxu1 %vm9016_vm9, %v9015_v5  ;;  %v450_v4 = vpack.c.bf16 %v9309_v9, %v9311_v10 }
 0x2e2   :  { %7767 = vmatmul.mubr.msk.bf16.gmra.mrb[8].mxu1 %vm394_vm8, %v450_v4 }
 0x3a5   :  { %v506_v11 = vpop.f32.mrb[0].mxu1 }
 0x3a6   :  { %v7760_v12 = vpop.f32.mrb[1].mxu1 }
 0x3a7   :  { %v509_v13 = vpop.f32.mrb[2].mxu1 }
 0x3a8   :  { %v9316_v14 = vpack.c.bf16 %v509_v13, %v506_v11  ;;  %v7761_v15 = vpop.f32.mrb[3].mxu1 }
 0x3aa   :  { %533 = vrot.lane.b32.xlu0 %v9316_v14, %s9017_s25  ;;  %7774 = vmatprep.mubr.msk.bf16.mxu1 %vm537_vm10, %v9316_v14 }
 0x3ad   :  { %v514_v16 = vpop.f32.mrb[4].mxu1 }
 0x3ae   :  { %v9322_v17 = vpack.c.bf16 %v514_v16, %v514_v16  ;;  %v7764_v18 = vpop.f32.mrb[5].mxu1 }
 0x3af   :  { %v517_v19 = vpop.f32.mrb[6].mxu1 }
 0x3b0   :  { %535 = vrot.lane.b32.xlu1 %v9322_v17, %s9017_s25  ;;  %v7765_v20 = vpop.f32.mrb[7].mxu1 }
 0x3b5   :  { %v522_v21 = vpop.f32.mrb[8].mxu1 }
 0x3b6   :  { %v9326_v22 = vpack.c.bf16 %v522_v21, %v517_v19  ;;  %v7768_v23 = vpop.f32.mrb[9].mxu1 }
 0x3b7   :  { %v9328_v24 = vpop.f32.mrb[10].mxu1 }
 0x3b8   :  { %v7769_v25 = vpop.f32.mrb[11].mxu1 }
 0x41c   :  { %v534_v26 = vpop.permute.xlu0 %533 }
 0x41d   :  { %8446 = vmatprep.subr.msk.bf16.mxu1 %vm537_vm10, %v534_v26  ;;  %v545_v27 = vsel %vm537_vm10, %v534_v26, 0 }
 0x41e   :  { %7771 = vmatpush3.bf16.xpose.msra.mxu1 %v545_v27 }
 0x422   :  { %v536_v28 = vpop.permute.xlu1 %535 }
 0x423   :  { %8447 = vmatprep.subr.msk.bf16.mxu1 %vm537_vm10, %v536_v28  ;;  %v548_v33 = vsel %vm537_vm10, %v536_v28, 0 }
 0x426   :  { %7773 = vmatpush3.bf16.xpose.msra.mxu1 %v548_v33  ;;  %v9390_v33 = vld [vmem:[%s10920_s6] sm:$0xf] }
 0x427   :  { %8453 = vmatprep.subr.msk.bf16.mxu0 %vm652_vm12, %v9390_v33 }
 0x42d   :  { %7775 = vmatmul.mubr.msk.bf16.vlgmr.msra.gmra.mrb[12].mxu1 %vm537_vm10, %v9322_v17 }
 0x500   :  { %v7776_v35 = vpop.f32.mrb[12].mxu1 }
 0x501   :  { %v584_v37 = vpop.f32.mrb[13].mxu1  ;;  %v601_v46 = vmul.f32 %v7776_v35, %v9336_v34  ;;  %v9396_v35 = vsel %vm652_vm12, %v9390_v33, 0 }
 0x502   :  { %v599_v38 = vmul.f32 %v9336_v34, %v584_v37  ;;  %v7777_v39 = vpop.f32.mrb[14].mxu1  ;;  %7809 = vmatpush3.bf16.msra.mxu0 %v9396_v35 }
 0x503   :  { %v587_v43 = vpop.f32.mrb[15].mxu1  ;;  %v604_v51 = vadd.f32 %v601_v46, %v9355_v6 }
 0x504   :  { %v600_v47 = vmul.f32 %v9336_v34, %v587_v43  ;;  %v602_v48 = vadd.f32 %v599_v38, %v9341_v36 }
 0x505   :  { %v612_v30 = vsel %vm605_vm11, %v604_v51, -inf }
 0x506   :  { %v606_v49 = vsel %vm605_vm11, %v602_v48, -inf  ;;  %v603_v50 = vadd.f32 %v600_v47, %v9347_v40 }
 0x507   :  { %607 = vmax.xlane.f32.xlu1 %v606_v49 }
 0x508   :  { %v609_v7 = vsel %vm605_vm11, %v603_v50, -inf }
 0x509   :  { %610 = vmax.xlane.f32.xlu0 %v609_v7 }
 0x50d   :  { %613 = vmax.xlane.f32.xlu0 %v612_v30 }
 0x594   :  { %v608_v52 = vpop.xlane.xlu1 %607 }
 0x595   :  { %v615_v54 = vsub.f32 %v602_v48, %v608_v52 }
 0x596   :  { %v611_v29 = vpop.xlane.xlu0 %610 }
 0x597   :  { %v616_v53 = vsub.f32 %v603_v50, %v611_v29  ;;  %v618_v42 = vmul.f32 1.442695, %v615_v54 }
 0x599   :  { %v620_v8 = vmul.f32 1.442695, %v616_v53 }
 0x59a   :  { %v614_v55 = vpop.xlane.xlu0 %613 }
 0x59b   :  { %8611 = vpow2.f32 %v620_v8  ;;  %v617_v56 = vsub.f32 %v604_v51, %v614_v55 }
 0x59d   :  { %v622_v57 = vmul.f32 1.442695, %v617_v56 }
 0x59f   :  { %8613 = vpow2.f32 %v622_v57 }
 0x5a0   :  { %8615 = vpow2.f32 %v618_v42 }
 0x5a5   :  { %v8612_v41 = vpop.eup %8611 }
 0x5a6   :  { %v627_v32 = vsel %vm605_vm11, %v8612_v41, 0.0 }
 0x5a7   :  { %628 = vadd.xlane.f32.xlu0 %v627_v32 }
 0x5a9   :  { %v8614_v58 = vpop.eup %8613 }
 0x5aa   :  { %v630_v59 = vsel %vm605_vm11, %v8614_v58, 0.0  ;;  %v8616_v60 = vpop.eup %8615 }
 0x5ab   :  { %631 = vadd.xlane.f32.xlu1 %v630_v59  ;;  %v624_v45 = vsel %vm605_vm11, %v8616_v60, 0.0 }
 0x5af   :  { %625 = vadd.xlane.f32.xlu1 %v624_v45 }
 0x5bd   :  { %641 = vrot.lane.b32.xlu0 %v9316_v14, %s9018_s4 }
 0x5c0   :  { %643 = vrot.lane.b32.xlu1 %v9322_v17, %s9018_s4 }
 0x5c1   :  { %706 = vrot.lane.b32.xlu0 %v9316_v14, %s9019_s26 }
 0x5c4   :  { %710 = vrot.lane.b32.xlu1 %v9316_v14, %s9020_s27 }
 0x5c8   :  { %712 = vrot.lane.b32.xlu1 %v9322_v17, %s9020_s27 }
 0x5cc   :  { %708 = vrot.lane.b32.xlu1 %v9322_v17, %s9019_s26 }
 0x634   :  { %v629_v31 = vpop.xlane.xlu0 %628 }
 0x638   :  { %v632_v44 = vpop.xlane.xlu1 %631  ;;  %v642_v1 = vpop.permute.xlu0 %641 }
 0x639   :  { %7778 = vmatprep.subr.bf16.mxu1 %v642_v1  ;;  %8617 = vrcp.f32 %v632_v44 }
 0x63a   :  { %7779 = vmatpush3.bf16.msra.mxu1 %v642_v1  ;;  %8619 = vrcp.f32 %v629_v31 }
 0x63c   :  { %v626_v2 = vpop.xlane.xlu1 %625  ;;  %v707_v23 = vpop.permute.xlu0 %706 }
 0x63d   :  { %8621 = vrcp.f32 %v626_v2 }
 0x640   :  { %v644_v3 = vpop.permute.xlu1 %643 }
 0x641   :  { %8448 = vmatprep.subr.msk.bf16.mxu1 %vm652_vm12, %v644_v3  ;;  %v654_v4 = vsel %vm652_vm12, %v644_v3, 0 }
 0x642   :  { %7781 = vmatpush3.bf16.msra.mxu1 %v654_v4 }
 0x643   :  { %v8618_v11 = vpop.eup %8617 }
 0x644   :  { %v711_v12 = vpop.permute.xlu1 %710  ;;  %v8620_v13 = vpop.eup %8619  ;;  %v638_v16 = vmul.f32 %v8618_v11, %v8614_v58 }
 0x645   :  { %8449 = vmatprep.subr.msk.bf16.mxu1 %vm537_vm10, %v711_v12  ;;  %v637_v19 = vmul.f32 %v8620_v13, %v8612_v41  ;;  %v721_v25 = vsel %vm537_vm10, %v711_v12, 0 }
 0x646   :  { %v640_v21 = vpack.c.bf16 %v638_v16, %v638_v16 }
 0x647   :  { %v8622_v15 = vpop.eup %8621 }
 0x648   :  { %v636_v18 = vmul.f32 %v8622_v15, %v8616_v60  ;;  %v713_v26 = vpop.permute.xlu1 %712 }
 0x649   :  { %v724_v27 = vsel %vm537_vm10, %v713_v26, 0 }
 0x64a   :  { %v639_v20 = vpack.c.bf16 %v637_v19, %v636_v18 }
 0x64c   :  { %7782 = vmatprep.mubr.msk.bf16.mxu1 %vm605_vm11, %v639_v20  ;;  %v709_v28 = vpop.permute.xlu1 %708 }
 0x64d   :  { %7783 = vmatmul.mubr.msk.bf16.vlgmr.msra.gmra.mrb[16].mxu1 %vm605_vm11, %v640_v21 }
 0x64e   :  { %7787 = vmatpush3.bf16.xpose.msra.mxu1 %v721_v25  ;;  %7790 = vmatprep.mubr.msk.bf16.mxu1 %vm537_vm10, %v707_v23  ;;  %v9443_v25 = vld [vmem:[%s10920_s6 + $0x4] sm:$0xf] }
 0x64f   :  { %8450 = vmatprep.subr.msk.bf16.mxu1 %vm537_vm10, %v713_v26 }
 0x656   :  { %7789 = vmatpush3.bf16.xpose.msra.mxu1 %v724_v27 }
 0x65d   :  { %7791 = vmatmul.mubr.msk.bf16.vlgmr.msra.gmra.mrb[20].mxu1 %vm537_vm10, %v709_v28 }
 0x720   :  { %v7784_v37 = vpop.f32.mrb[16].mxu1 }
 0x721   :  { %v690_v38 = vpop.f32.mrb[17].mxu1  ;;  %v705_v47 = vpack.c.bf16 %v7784_v37, %v7784_v37 }
 0x722   :  { %v7785_v39 = vpop.f32.mrb[18].mxu1 }
 0x723   :  { %v693_v43 = vpop.f32.mrb[19].mxu1 }
 0x724   :  { %v704_v46 = vpack.c.bf16 %v693_v43, %v690_v38 }
 0x726   :  { %7810 = vmatprep.mubr.msk.bf16.mxu0 %vm537_vm10, %v704_v46 }
 0x727   :  { %7811 = vmatmul.mubr.msk.bf16.vlgmr.msra.gmra.mrb[8].mxu0 %vm537_vm10, %v705_v47 }
 0x730   :  { %v7792_v48 = vpop.f32.mrb[20].mxu1 }
 0x731   :  { %v760_v49 = vpop.f32.mrb[21].mxu1  ;;  %v776_v50 = vmul.f32 %v7792_v48, %v9336_v34  ;;  %v9450_v48 = vsel %vm652_vm12, %v9443_v25, 0 }
 0x732   :  { %v774_v7 = vmul.f32 %v760_v49, %v9336_v34  ;;  %v7793_v51 = vpop.f32.mrb[22].mxu1 }
 0x733   :  { %v763_v30 = vpop.f32.mrb[23].mxu1  ;;  %v779_v8 = vadd.f32 %v776_v50, %v9355_v6 }
 0x734   :  { %v775_v52 = vmul.f32 %v763_v30, %v9336_v34  ;;  %v777_v29 = vadd.f32 %v774_v7, %v9341_v36 }
 0x735   :  { %v786_v56 = vsel %vm605_vm11, %v779_v8, -inf }
 0x736   :  { %v780_v53 = vsel %vm605_vm11, %v777_v29, -inf  ;;  %v778_v54 = vadd.f32 %v775_v52, %v9347_v40 }
 0x737   :  { %781 = vmax.xlane.f32.xlu0 %v780_v53 }
 0x738   :  { %v783_v55 = vsel %vm605_vm11, %v778_v54, -inf }
 0x739   :  { %784 = vmax.xlane.f32.xlu1 %v783_v55 }
 0x73b   :  { %787 = vmax.xlane.f32.xlu0 %v786_v56 }
 0x7c4   :  { %v782_v42 = vpop.xlane.xlu0 %781 }
 0x7c5   :  { %v789_v57 = vsub.f32 %v777_v29, %v782_v42 }
 0x7c6   :  { %v785_v41 = vpop.xlane.xlu1 %784 }
 0x7c7   :  { %v792_v32 = vmul.f32 1.442695, %v789_v57  ;;  %v790_v58 = vsub.f32 %v778_v54, %v785_v41 }
 0x7c8   :  { %v788_v59 = vpop.xlane.xlu0 %787 }
 0x7c9   :  { %8623 = vpow2.f32 %v792_v32  ;;  %v794_v60 = vmul.f32 1.442695, %v790_v58  ;;  %v791_v45 = vsub.f32 %v779_v8, %v788_v59 }
 0x7cb   :  { %8625 = vpow2.f32 %v794_v60  ;;  %v796_v31 = vmul.f32 1.442695, %v791_v45 }
 0x7cd   :  { %8627 = vpow2.f32 %v796_v31 }
 0x7d3   :  { %v8624_v44 = vpop.eup %8623 }
 0x7d4   :  { %v798_v1 = vsel %vm605_vm11, %v8624_v44, 0.0 }
 0x7d5   :  { %v8626_v2 = vpop.eup %8625  ;;  %799 = vadd.xlane.f32.xlu0 %v798_v1 }
 0x7d6   :  { %v801_v11 = vsel %vm605_vm11, %v8626_v2, 0.0 }
 0x7d7   :  { %v8628_v3 = vpop.eup %8627 }
 0x7d8   :  { %v804_v4 = vsel %vm605_vm11, %v8628_v3, 0.0 }
 0x7d9   :  { %805 = vadd.xlane.f32.xlu1 %v804_v4  ;;  %802 = vadd.xlane.f32.xlu0 %v801_v11 }
 0x7ea   :  { %817 = vrot.lane.b32.xlu1 %v9322_v17, %s9021_s29 }
 0x7ee   :  { %997 = vrot.lane.b32.xlu1 %v9316_v14, %s9022_s30 }
 0x7ef   :  { %815 = vrot.lane.b32.xlu0 %v9316_v14, %s9021_s29 }
 0x7f2   :  { %999 = vrot.lane.b32.xlu1 %v9322_v17, %s9022_s30 }
 0x7f3   :  { %993 = vrot.lane.b32.xlu0 %v9316_v14, %s9023_s12 }
 0x7f6   :  { %995 = vrot.lane.b32.xlu1 %v9322_v17, %s9023_s12 }
 0x7f7   :  { %1230 = vrot.lane.b32.xlu0 %v9316_v14, %s9024_s13 }
 0x7fa   :  { %1232 = vrot.lane.b32.xlu1 %v9322_v17, %s9024_s13  ;;  %v9429_v12 = vpop.f32.mrb[8].mxu0 }
 0x7fb   :  { %1226 = vrot.lane.b32.xlu0 %v9316_v14, %s9025_s14  ;;  %v9433_v13 = vpop.f32.mrb[9].mxu0 }
 0x7fc   :  { %v7813_v15 = vpop.f32.mrb[10].mxu0 }
 0x7fd   :  { %v9435_v16 = vpop.f32.mrb[11].mxu0 }
 0x7fe   :  { %1228 = vrot.lane.b32.xlu1 %v9322_v17, %s9025_s14 }
 0x862   :  { %v800_v18 = vpop.xlane.xlu0 %799 }
 0x863   :  { %8629 = vrcp.f32 %v800_v18 }
 0x866   :  { %v803_v19 = vpop.xlane.xlu0 %802  ;;  %v806_v20 = vpop.xlane.xlu1 %805 }
 0x867   :  { %8631 = vrcp.f32 %v803_v19 }
 0x868   :  { %8633 = vrcp.f32 %v806_v20 }
 0x86a   :  { %v816_v21 = vpop.permute.xlu0 %815  ;;  %v818_v23 = vpop.permute.xlu1 %817 }
 0x86b   :  { %7794 = vmatprep.subr.bf16.mxu1 %v816_v21  ;;  %v827_v27 = vsel %vm652_vm12, %v818_v23, 0 }
 0x86c   :  { %7795 = vmatpush3.bf16.msra.mxu1 %v816_v21 }
 0x86d   :  { %8451 = vmatprep.subr.msk.bf16.mxu1 %vm652_vm12, %v818_v23  ;;  %v8630_v26 = vpop.eup %8629 }
 0x86e   :  { %v810_v38 = vmul.f32 %v8630_v26, %v8624_v44  ;;  %v998_v49 = vpop.permute.xlu1 %997  ;;  %v994_v53 = vpop.permute.xlu0 %993 }
 0x86f   :  { %v1008_v54 = vsel %vm537_vm10, %v998_v49, 0 }
 0x870   :  { %7797 = vmatpush3.bf16.msra.mxu1 %v827_v27 }
 0x871   :  { %v8632_v28 = vpop.eup %8631  ;;  %8452 = vmatprep.subr.msk.bf16.mxu1 %vm652_vm12, %v9443_v25 }
 0x872   :  { %v8634_v37 = vpop.eup %8633  ;;  %v811_v39 = vmul.f32 %v8632_v28, %v8626_v2  ;;  %v1000_v8 = vpop.permute.xlu1 %999 }
 0x873   :  { %v812_v43 = vmul.f32 %v8634_v37, %v8628_v3  ;;  %v1011_v55 = vsel %vm537_vm10, %v1000_v8, 0  ;;  %v1231_v56 = vpop.permute.xlu0 %1230 }
 0x874   :  { %v813_v46 = vpack.c.bf16 %v811_v39, %v810_v38  ;;  %v1241_v41 = vsel %vm537_vm10, %v1231_v56, 0 }
 0x875   :  { %v814_v47 = vpack.c.bf16 %v812_v43, %v812_v43 }
 0x876   :  { %7798 = vmatprep.mubr.msk.bf16.mxu1 %vm605_vm11, %v813_v46  ;;  %v996_v42 = vpop.permute.xlu1 %995 }
 0x877   :  { %7799 = vmatmul.mubr.msk.bf16.vlgmr.msra.gmra.mrb[24].mxu1 %vm605_vm11, %v814_v47  ;;  %v1227_v57 = vpop.permute.xlu0 %1226 }
 0x878   :  { %7803 = vmatpush3.bf16.msra.mxu1 %v9450_v48 }
 0x879   :  { %8454 = vmatprep.subr.msk.bf16.mxu1 %vm537_vm10, %v998_v49 }
 0x87a   :  { %v1233_v32 = vpop.permute.xlu1 %1232 }
 0x87b   :  { %v1244_v58 = vsel %vm537_vm10, %v1233_v32, 0 }
 0x87e   :  { %v1229_v59 = vpop.permute.xlu1 %1228 }
 0x94a   :  { %v7800_v50 = vpop.f32.mrb[24].mxu1 }
 0x94b   :  { %v863_v7 = vpop.f32.mrb[25].mxu1  ;;  %v878_v29 = vpack.c.bf16 %v7800_v50, %v7800_v50 }
 0x94c   :  { %v7801_v51 = vpop.f32.mrb[26].mxu1 }
 0x94d   :  { %v866_v30 = vpop.f32.mrb[27].mxu1 }
 0x94e   :  { %v877_v52 = vpack.c.bf16 %v866_v30, %v863_v7 }
 0x950   :  { %7804 = vmatprep.mubr.msk.bf16.mxu1 %vm537_vm10, %v877_v52 }
 0x951   :  { %7805 = vmatmul.mubr.msk.bf16.vlgmr.msra.gmra.mrb[28].mxu1 %vm537_vm10, %v878_v29 }
 0x952   :  { %7815 = vmatpush3.bf16.xpose.msra.mxu1 %v1008_v54  ;;  %7818 = vmatprep.mubr.msk.bf16.mxu1 %vm537_vm10, %v994_v53 }
 0x953   :  { %8455 = vmatprep.subr.msk.bf16.mxu1 %vm537_vm10, %v1000_v8 }
 0x95a   :  { %7817 = vmatpush3.bf16.xpose.msra.mxu1 %v1011_v55 }
 0x95b   :  { %8458 = vmatprep.subr.msk.bf16.mxu1 %vm537_vm10, %v1231_v56 }
 0x961   :  { %7819 = vmatmul.mubr.msk.bf16.vlgmr.msra.gmra.mrb[32].mxu1 %vm537_vm10, %v996_v42  ;;  %v9500_v42 = vpack.c.bf16 %v9328_v24, %v9328_v24 }
 0x962   :  { %7837 = vmatpush3.bf16.xpose.msra.mxu1 %v1241_v41  ;;  %7840 = vmatprep.mubr.msk.bf16.mxu1 %vm537_vm10, %v1227_v57 }
 0x963   :  { %8459 = vmatprep.subr.msk.bf16.mxu1 %vm537_vm10, %v1233_v32 }
 0x96a   :  { %7839 = vmatpush3.bf16.xpose.msra.mxu1 %v1244_v58 }
 0x971   :  { %7841 = vmatmul.mubr.msk.bf16.vlgmr.msra.gmra.mrb[36].mxu1 %vm537_vm10, %v1229_v59 }
 0x972   :  { %7862 = vmatprep.mubr.msk.bf16.mxu1 %vm537_vm10, %v9326_v22 }
 0xa24   :  { %v7806_v60 = vpop.f32.mrb[28].mxu1 }
 0xa25   :  { %v9472_v45 = vadd.f32 %v9429_v12, %v7806_v60  ;;  %v922_v31 = vpop.f32.mrb[29].mxu1 }
 0xa26   :  { %v9475_v44 = vadd.f32 %v9433_v13, %v922_v31  ;;  %v7807_v1 = vpop.f32.mrb[30].mxu1 }
 0xa27   :  { %v925_v2 = vpop.f32.mrb[31].mxu1 }
 0xa28   :  { %v9478_v3 = vadd.f32 %v9435_v16, %v925_v2 }
 0xa34   :  { %v7820_v4 = vpop.f32.mrb[32].mxu1 }
 0xa35   :  { %v1047_v11 = vpop.f32.mrb[33].mxu1  ;;  %v1063_v15 = vmul.f32 %v7820_v4, %v9336_v34 }
 0xa36   :  { %v1061_v18 = vmul.f32 %v1047_v11, %v9336_v34  ;;  %v7821_v19 = vpop.f32.mrb[34].mxu1 }
 0xa37   :  { %v1050_v20 = vpop.f32.mrb[35].mxu1  ;;  %v1066_v26 = vadd.f32 %v1063_v15, %v9355_v6 }
 0xa38   :  { %v1062_v12 = vmul.f32 %v1050_v20, %v9336_v34  ;;  %v1064_v21 = vadd.f32 %v1061_v18, %v9341_v36 }
 0xa39   :  { %v1073_v27 = vsel %vm605_vm11, %v1066_v26, -inf }
 0xa3a   :  { %v1067_v13 = vsel %vm605_vm11, %v1064_v21, -inf  ;;  %v1065_v23 = vadd.f32 %v1062_v12, %v9347_v40 }
 0xa3b   :  { %1068 = vmax.xlane.f32.xlu0 %v1067_v13 }
 0xa3c   :  { %v1070_v16 = vsel %vm605_vm11, %v1065_v23, -inf }
 0xa3d   :  { %1071 = vmax.xlane.f32.xlu1 %v1070_v16 }
 0xa3f   :  { %1074 = vmax.xlane.f32.xlu0 %v1073_v27 }
 0xa44   :  { %v7842_v28 = vpop.f32.mrb[36].mxu1 }
 0xa45   :  { %v1280_v37 = vpop.f32.mrb[37].mxu1  ;;  %v1296_v41 = vmul.f32 %v7842_v28, %v9336_v34 }
 0xa46   :  { %v7843_v38 = vpop.f32.mrb[38].mxu1  ;;  %v1294_v57 = vmul.f32 %v1280_v37, %v9336_v34 }
 0xa47   :  { %v1283_v39 = vpop.f32.mrb[39].mxu1  ;;  %v1299_v60 = vadd.f32 %v1296_v41, %v9355_v6 }
 0xa48   :  { %v1297_v32 = vadd.f32 %v1294_v57, %v9341_v36  ;;  %v1295_v58 = vmul.f32 %v1283_v39, %v9336_v34  ;;  %v9531_v57 = vld [vmem:[%s10920_s6 + $0x8] sm:$0xf] }
 0xa49   :  { %v1306_v31 = vsel %vm605_vm11, %v1299_v60, -inf  ;;  %v9537_v41 = vsel %vm652_vm12, %v9531_v57, 0 }
 0xa4a   :  { %v1300_v59 = vsel %vm605_vm11, %v1297_v32, -inf  ;;  %v1298_v24 = vadd.f32 %v1295_v58, %v9347_v40 }
 0xa4c   :  { %v1303_v1 = vsel %vm605_vm11, %v1298_v24, -inf }
 0xac8   :  { %v1069_v43 = vpop.xlane.xlu0 %1068 }
 0xac9   :  { %v1076_v46 = vsub.f32 %v1064_v21, %v1069_v43 }
 0xaca   :  { %v1072_v47 = vpop.xlane.xlu1 %1071 }
 0xacb   :  { %v1079_v49 = vmul.f32 1.442695, %v1076_v46  ;;  %v1077_v50 = vsub.f32 %v1065_v23, %v1072_v47 }
 0xacc   :  { %v1075_v7 = vpop.xlane.xlu0 %1074 }
 0xacd   :  { %8635 = vpow2.f32 %v1079_v49  ;;  %v1081_v51 = vmul.f32 1.442695, %v1077_v50  ;;  %v1078_v30 = vsub.f32 %v1066_v26, %v1075_v7 }
 0xacf   :  { %8637 = vpow2.f32 %v1081_v51  ;;  %v1083_v52 = vmul.f32 1.442695, %v1078_v30 }
 0xad1   :  { %8639 = vpow2.f32 %v1083_v52 }
 0xad7   :  { %v8636_v29 = vpop.eup %8635 }
 0xad8   :  { %v1085_v53 = vsel %vm605_vm11, %v8636_v29, 0.0 }
 0xad9   :  { %v8638_v54 = vpop.eup %8637  ;;  %1086 = vadd.xlane.f32.xlu0 %v1085_v53 }
 0xada   :  { %v1088_v56 = vsel %vm605_vm11, %v8638_v54, 0.0 }
 0xadb   :  { %v8640_v8 = vpop.eup %8639 }
 0xadc   :  { %v1091_v55 = vsel %vm605_vm11, %v8640_v8, 0.0 }
 0xadd   :  { %1092 = vadd.xlane.f32.xlu1 %v1091_v55  ;;  %1089 = vadd.xlane.f32.xlu0 %v1088_v56 }
 0xaee   :  { %1104 = vrot.lane.b32.xlu1 %v9322_v17, %s9026_s17 }
 0xaf2   :  { %1470 = vrot.lane.b32.xlu1 %v9326_v22, %s9017_s25 }
 0xaf3   :  { %1102 = vrot.lane.b32.xlu0 %v9316_v14, %s9026_s17 }
 0xaf6   :  { %1472 = vrot.lane.b32.xlu1 %v9500_v42, %s9017_s25 }
 0xb12   :  { %1301 = vmax.xlane.f32.xlu0 %v1300_v59 }
 0xb16   :  { %1307 = vmax.xlane.f32.xlu0 %v1306_v31 }
 0xb1a   :  { %1304 = vmax.xlane.f32.xlu1 %v1303_v1 }
 0xb66   :  { %v1087_v2 = vpop.xlane.xlu0 %1086 }
 0xb67   :  { %8641 = vrcp.f32 %v1087_v2 }
 0xb6a   :  { %v1090_v4 = vpop.xlane.xlu0 %1089  ;;  %v1093_v11 = vpop.xlane.xlu1 %1092 }
 0xb6b   :  { %8643 = vrcp.f32 %v1090_v4 }
 0xb6c   :  { %8645 = vrcp.f32 %v1093_v11 }
 0xb6e   :  { %v1103_v15 = vpop.permute.xlu0 %1102  ;;  %v1105_v18 = vpop.permute.xlu1 %1104 }
 0xb6f   :  { %7822 = vmatprep.subr.bf16.mxu0 %v1103_v15  ;;  %v1114_v12 = vsel %vm652_vm12, %v1105_v18, 0 }
 0xb70   :  { %7823 = vmatpush3.bf16.msra.mxu0 %v1103_v15 }
 0xb71   :  { %8456 = vmatprep.subr.msk.bf16.mxu0 %vm652_vm12, %v1105_v18  ;;  %v8642_v20 = vpop.eup %8641 }
 0xb72   :  { %v1471_v19 = vpop.permute.xlu1 %1470  ;;  %v1097_v16 = vmul.f32 %v8642_v20, %v8636_v29 }
 0xb73   :  { %8462 = vmatprep.subr.msk.bf16.mxu1 %vm537_vm10, %v1471_v19  ;;  %v1481_v21 = vsel %vm537_vm10, %v1471_v19, 0 }
 0xb74   :  { %7825 = vmatpush3.bf16.msra.mxu0 %v1114_v12  ;;  %7859 = vmatpush3.bf16.xpose.msra.mxu1 %v1481_v21 }
 0xb75   :  { %v8644_v13 = vpop.eup %8643  ;;  %8457 = vmatprep.subr.msk.bf16.mxu0 %vm652_vm12, %v9531_v57 }
 0xb76   :  { %v8646_v23 = vpop.eup %8645  ;;  %v1473_v26 = vpop.permute.xlu1 %1472  ;;  %v1098_v27 = vmul.f32 %v8644_v13, %v8638_v54 }
 0xb77   :  { %8463 = vmatprep.subr.msk.bf16.mxu1 %vm537_vm10, %v1473_v26  ;;  %v1099_v28 = vmul.f32 %v8646_v23, %v8640_v8  ;;  %v1484_v39 = vsel %vm537_vm10, %v1473_v26, 0 }
 0xb78   :  { %v1100_v37 = vpack.c.bf16 %v1098_v27, %v1097_v16 }
 0xb79   :  { %v1101_v38 = vpack.c.bf16 %v1099_v28, %v1099_v28 }
 0xb7a   :  { %7826 = vmatprep.mubr.msk.bf16.mxu0 %vm605_vm11, %v1100_v37 }
 0xb7b   :  { %7827 = vmatmul.mubr.msk.bf16.vlgmr.msra.gmra.mrb[12].mxu0 %vm605_vm11, %v1101_v38 }
 0xb7c   :  { %7861 = vmatpush3.bf16.xpose.msra.mxu1 %v1484_v39  ;;  %7831 = vmatpush3.bf16.msra.mxu0 %v9537_v41 }
 0xb83   :  { %7863 = vmatmul.mubr.msk.bf16.vlgmr.msra.gmra.mrb[40].mxu1 %vm537_vm10, %v9500_v42 }
 0xb9f   :  { %v1302_v43 = vpop.xlane.xlu0 %1301 }
 0xba0   :  { %v1309_v46 = vsub.f32 %v1297_v32, %v1302_v43 }
 0xba2   :  { %v1312_v47 = vmul.f32 1.442695, %v1309_v46 }
 0xba3   :  { %v1308_v49 = vpop.xlane.xlu0 %1307 }
 0xba4   :  { %8647 = vpow2.f32 %v1312_v47  ;;  %v1311_v50 = vsub.f32 %v1299_v60, %v1308_v49 }
 0xba6   :  { %v1316_v7 = vmul.f32 1.442695, %v1311_v50 }
 0xba7   :  { %v1305_v51 = vpop.xlane.xlu1 %1304 }
 0xba8   :  { %8649 = vpow2.f32 %v1316_v7  ;;  %v1310_v30 = vsub.f32 %v1298_v24, %v1305_v51  ;;  %v9560_v51 = vld [vmem:[%s10920_s6 + $0xc] sm:$0xf] }
 0xbaa   :  { %v1314_v52 = vmul.f32 1.442695, %v1310_v30  ;;  %v9566_v30 = vsel %vm652_vm12, %v9560_v51, 0 }
 0xbac   :  { %8651 = vpow2.f32 %v1314_v52 }
 0xbae   :  { %v8648_v29 = vpop.eup %8647 }
 0xbaf   :  { %v1318_v53 = vsel %vm605_vm11, %v8648_v29, 0.0 }
 0xbb0   :  { %1319 = vadd.xlane.f32.xlu0 %v1318_v53 }
 0xbb2   :  { %v8650_v54 = vpop.eup %8649 }
 0xbb3   :  { %v1324_v8 = vsel %vm605_vm11, %v8650_v54, 0.0 }
 0xbb4   :  { %1325 = vadd.xlane.f32.xlu1 %v1324_v8 }
 0xbb6   :  { %v8652_v55 = vpop.eup %8651 }
 0xbb7   :  { %v1321_v56 = vsel %vm605_vm11, %v8652_v55, 0.0 }
 0xbb8   :  { %1322 = vadd.xlane.f32.xlu0 %v1321_v56 }
 0xbc5   :  { %1337 = vrot.lane.b32.xlu1 %v9322_v17, %s9027_s18 }
 0xbce   :  { %1335 = vrot.lane.b32.xlu0 %v9316_v14, %s9027_s18 }
 0xc3d   :  { %v1320_v32 = vpop.xlane.xlu0 %1319 }
 0xc3e   :  { %8653 = vrcp.f32 %v1320_v32 }
 0xc41   :  { %v1326_v58 = vpop.xlane.xlu1 %1325 }
 0xc45   :  { %v1323_v17 = vpop.xlane.xlu0 %1322  ;;  %v1338_v12 = vpop.permute.xlu1 %1337 }
 0xc46   :  { %8655 = vrcp.f32 %v1323_v17  ;;  %v1347_v27 = vsel %vm652_vm12, %v1338_v12, 0 }
 0xc47   :  { %8657 = vrcp.f32 %v1326_v58 }
 0xc48   :  { %v8654_v60 = vpop.eup %8653 }
 0xc49   :  { %v1336_v59 = vpop.permute.xlu0 %1335  ;;  %v1330_v11 = vmul.f32 %v8654_v60, %v8648_v29 }
 0xc4a   :  { %7844 = vmatprep.subr.bf16.mxu0 %v1336_v59 }
 0xc4e   :  { %v7828_v31 = vpop.f32.mrb[12].mxu0 }
 0xc4f   :  { %v1150_v24 = vpop.f32.mrb[13].mxu0  ;;  %v1165_v19 = vpack.c.bf16 %v7828_v31, %v7828_v31 }
 0xc50   :  { %v8656_v1 = vpop.eup %8655  ;;  %v7829_v2 = vpop.f32.mrb[14].mxu0 }
 0xc51   :  { %v1153_v4 = vpop.f32.mrb[15].mxu0  ;;  %v1331_v15 = vmul.f32 %v8656_v1, %v8652_v55  ;;  %v8658_v14 = vpop.eup %8657 }
 0xc52   :  { %v1164_v18 = vpack.c.bf16 %v1153_v4, %v1150_v24  ;;  %v1332_v23 = vmul.f32 %v8658_v14, %v8650_v54 }
 0xc53   :  { %v1333_v20 = vpack.c.bf16 %v1331_v15, %v1330_v11 }
 0xc54   :  { %7832 = vmatprep.mubr.msk.bf16.mxu0 %vm537_vm10, %v1164_v18  ;;  %v1334_v43 = vpack.c.bf16 %v1332_v23, %v1332_v23 }
 0xc55   :  { %7833 = vmatmul.mubr.msk.bf16.vlgmr.msra.gmra.mrb[16].mxu0 %vm537_vm10, %v1165_v19 }
 0xc56   :  { %7845 = vmatpush3.bf16.msra.mxu0 %v1336_v59  ;;  %7848 = vmatprep.mubr.msk.bf16.mxu0 %vm605_vm11, %v1333_v20  ;;  %v7864_v21 = vpop.f32.mrb[40].mxu1 }
 0xc57   :  { %8460 = vmatprep.subr.msk.bf16.mxu0 %vm652_vm12, %v1338_v12  ;;  %v1520_v13 = vpop.f32.mrb[41].mxu1  ;;  %v1536_v37 = vmul.f32 %v7864_v21, %v9336_v34 }
 0xc58   :  { %v1534_v26 = vmul.f32 %v1520_v13, %v9336_v34  ;;  %v7865_v16 = vpop.f32.mrb[42].mxu1 }
 0xc59   :  { %v1523_v28 = vpop.f32.mrb[43].mxu1  ;;  %v1539_v50 = vadd.f32 %v1536_v37, %v9355_v6 }
 0xc5a   :  { %7847 = vmatpush3.bf16.msra.mxu0 %v1347_v27  ;;  %v1535_v38 = vmul.f32 %v1523_v28, %v9336_v34  ;;  %v1537_v39 = vadd.f32 %v1534_v26, %v9341_v36 }
 0xc5b   :  { %v1546_v7 = vsel %vm605_vm11, %v1539_v50, -inf  ;;  %8461 = vmatprep.subr.msk.bf16.mxu0 %vm652_vm12, %v9560_v51 }
 0xc5c   :  { %v1540_v46 = vsel %vm605_vm11, %v1537_v39, -inf  ;;  %v1538_v47 = vadd.f32 %v1535_v38, %v9347_v40 }
 0xc5d   :  { %1541 = vmax.xlane.f32.xlu1 %v1540_v46  ;;  %7849 = vmatmul.mubr.msk.bf16.vlgmr.msra.gmra.mrb[20].mxu0 %vm605_vm11, %v1334_v43 }
 0xc5e   :  { %v1543_v49 = vsel %vm605_vm11, %v1538_v47, -inf  ;;  %7853 = vmatpush3.bf16.msra.mxu0 %v9566_v30 }
 0xc5f   :  { %1544 = vmax.xlane.f32.xlu0 %v1543_v49 }
 0xc63   :  { %1547 = vmax.xlane.f32.xlu0 %v1546_v7 }
 0xcea   :  { %v1542_v52 = vpop.xlane.xlu1 %1541 }
 0xceb   :  { %v1549_v54 = vsub.f32 %v1537_v39, %v1542_v52 }
 0xcec   :  { %v1545_v29 = vpop.xlane.xlu0 %1544 }
 0xced   :  { %v1550_v53 = vsub.f32 %v1538_v47, %v1545_v29  ;;  %v1552_v32 = vmul.f32 1.442695, %v1549_v54 }
 0xcef   :  { %v1554_v8 = vmul.f32 1.442695, %v1550_v53 }
 0xcf0   :  { %v1548_v55 = vpop.xlane.xlu0 %1547 }
 0xcf1   :  { %8659 = vpow2.f32 %v1554_v8  ;;  %v1551_v56 = vsub.f32 %v1539_v50, %v1548_v55 }
 0xcf3   :  { %v1556_v17 = vmul.f32 1.442695, %v1551_v56 }
 0xcf5   :  { %8661 = vpow2.f32 %v1556_v17 }
 0xcf6   :  { %8663 = vpow2.f32 %v1552_v32 }
 0xcfb   :  { %v8660_v58 = vpop.eup %8659 }
 0xcfc   :  { %v1561_v59 = vsel %vm605_vm11, %v8660_v58, 0.0 }
 0xcfd   :  { %1562 = vadd.xlane.f32.xlu0 %v1561_v59 }
 0xcff   :  { %v8662_v60 = vpop.eup %8661 }
 0xd00   :  { %v1564_v31 = vsel %vm605_vm11, %v8662_v60, 0.0  ;;  %v8664_v24 = vpop.eup %8663 }
 0xd01   :  { %1565 = vadd.xlane.f32.xlu1 %v1564_v31  ;;  %v1558_v1 = vsel %vm605_vm11, %v8664_v24, 0.0 }
 0xd05   :  { %1559 = vadd.xlane.f32.xlu1 %v1558_v1 }
 0xd13   :  { %1575 = vrot.lane.b32.xlu0 %v9326_v22, %s9018_s4 }
 0xd16   :  { %1577 = vrot.lane.b32.xlu1 %v9500_v42, %s9018_s4 }
 0xd17   :  { %1639 = vrot.lane.b32.xlu0 %v9326_v22, %s9019_s26 }
 0xd1a   :  { %1643 = vrot.lane.b32.xlu1 %v9326_v22, %s9020_s27 }
 0xd1e   :  { %1645 = vrot.lane.b32.xlu1 %v9500_v42, %s9020_s27 }
 0xd22   :  { %1641 = vrot.lane.b32.xlu1 %v9500_v42, %s9019_s26 }
 0xd28   :  { %v7834_v2 = vpop.f32.mrb[16].mxu0 }
 0xd29   :  { %v1225_v4 = vadd.f32 %v7834_v2, %v9472_v45  ;;  %v1209_v11 = vpop.f32.mrb[17].mxu0 }
 0xd2a   :  { %v1223_v15 = vadd.f32 %v1209_v11, %v9475_v44  ;;  %v7835_v18 = vpop.f32.mrb[18].mxu0 }
 0xd2b   :  { %v1212_v19 = vpop.f32.mrb[19].mxu0 }
 0xd2c   :  { %v1224_v20 = vadd.f32 %v1212_v19, %v9478_v3 }
 0xd30   :  { %v7850_v14 = vpop.f32.mrb[20].mxu0 }
 0xd31   :  { %v1383_v12 = vpop.f32.mrb[21].mxu0  ;;  %v1398_v26 = vpack.c.bf16 %v7850_v14, %v7850_v14 }
 0xd32   :  { %v7851_v21 = vpop.f32.mrb[22].mxu0 }
 0xd33   :  { %v1386_v13 = vpop.f32.mrb[23].mxu0 }
 0xd34   :  { %v1397_v23 = vpack.c.bf16 %v1386_v13, %v1383_v12 }
 0xd36   :  { %7854 = vmatprep.mubr.msk.bf16.mxu0 %vm537_vm10, %v1397_v23 }
 0xd37   :  { %7855 = vmatmul.mubr.msk.bf16.vlgmr.msra.gmra.mrb[24].mxu0 %vm537_vm10, %v1398_v26 }
 0xd8a   :  { %v1563_v16 = vpop.xlane.xlu0 %1562 }
 0xd8e   :  { %v1576_v27 = vpop.permute.xlu0 %1575  ;;  %v1566_v45 = vpop.xlane.xlu1 %1565 }
 0xd8f   :  { %7866 = vmatprep.subr.bf16.mxu0 %v1576_v27  ;;  %8665 = vrcp.f32 %v1566_v45 }
 0xd90   :  { %7867 = vmatpush3.bf16.msra.mxu0 %v1576_v27  ;;  %8667 = vrcp.f32 %v1563_v16 }
 0xd92   :  { %v1560_v44 = vpop.xlane.xlu1 %1559  ;;  %v1640_v52 = vpop.permute.xlu0 %1639 }
 0xd93   :  { %8669 = vrcp.f32 %v1560_v44 }
 0xd96   :  { %v1578_v3 = vpop.permute.xlu1 %1577 }
 0xd97   :  { %8464 = vmatprep.subr.msk.bf16.mxu0 %vm652_vm12, %v1578_v3  ;;  %v1587_v28 = vsel %vm652_vm12, %v1578_v3, 0 }
 0xd98   :  { %7869 = vmatpush3.bf16.msra.mxu0 %v1587_v28 }
 0xd99   :  { %v8666_v37 = vpop.eup %8665 }
 0xd9a   :  { %v1644_v38 = vpop.permute.xlu1 %1643  ;;  %v8668_v39 = vpop.eup %8667  ;;  %v1572_v46 = vmul.f32 %v8666_v37, %v8662_v60 }
 0xd9b   :  { %8465 = vmatprep.subr.msk.bf16.mxu0 %vm537_vm10, %v1644_v38  ;;  %v1571_v49 = vmul.f32 %v8668_v39, %v8660_v58  ;;  %v1654_v29 = vsel %vm537_vm10, %v1644_v38, 0 }
 0xd9c   :  { %v1574_v7 = vpack.c.bf16 %v1572_v46, %v1572_v46 }
 0xd9d   :  { %v8670_v43 = vpop.eup %8669 }
 0xd9e   :  { %v1570_v47 = vmul.f32 %v8670_v43, %v8664_v24  ;;  %v1646_v53 = vpop.permute.xlu1 %1645 }
 0xd9f   :  { %v1657_v54 = vsel %vm537_vm10, %v1646_v53, 0 }
 0xda0   :  { %v1573_v50 = vpack.c.bf16 %v1571_v49, %v1570_v47 }
 0xda2   :  { %7870 = vmatprep.mubr.msk.bf16.mxu0 %vm605_vm11, %v1573_v50  ;;  %v1642_v8 = vpop.permute.xlu1 %1641 }
 0xda3   :  { %7871 = vmatmul.mubr.msk.bf16.vlgmr.msra.gmra.mrb[28].mxu0 %vm605_vm11, %v1574_v7 }
 0xda4   :  { %7875 = vmatpush3.bf16.xpose.msra.mxu0 %v1654_v29  ;;  %7878 = vmatprep.mubr.msk.bf16.mxu0 %vm537_vm10, %v1640_v52 }
 0xda5   :  { %8466 = vmatprep.subr.msk.bf16.mxu0 %vm537_vm10, %v1646_v53 }
 0xdac   :  { %7877 = vmatpush3.bf16.xpose.msra.mxu0 %v1657_v54 }
 0xdad   :  { %8469 = vmatprep.subr.msk.bf16.mxu0 %vm652_vm12, %v9390_v33 }
 0xdb3   :  { %7879 = vmatmul.mubr.msk.bf16.vlgmr.msra.gmra.mrb[32].mxu0 %vm537_vm10, %v1642_v8 }
 0xdb4   :  { %7897 = vmatpush3.bf16.msra.mxu0 %v9396_v35 }
 0xe0a   :  { %v7856_v55 = vpop.f32.mrb[24].mxu0 }
 0xe0b   :  { %v9602_v56 = vadd.f32 %v7856_v55, %v1225_v4  ;;  %v1442_v32 = vpop.f32.mrb[25].mxu0 }
 0xe0c   :  { %v9604_v17 = vadd.f32 %v1442_v32, %v1223_v15  ;;  %v7857_v58 = vpop.f32.mrb[26].mxu0 }
 0xe0d   :  { %v1445_v59 = vpop.f32.mrb[27].mxu0 }
 0xe0e   :  { %v9606_v60 = vadd.f32 %v1445_v59, %v1224_v20 }
 0xe76   :  { %v7872_v31 = vpop.f32.mrb[28].mxu0 }
 0xe77   :  { %v1623_v24 = vpop.f32.mrb[29].mxu0  ;;  %v1638_v11 = vpack.c.bf16 %v7872_v31, %v7872_v31 }
 0xe78   :  { %v7873_v1 = vpop.f32.mrb[30].mxu0 }
 0xe79   :  { %v1626_v2 = vpop.f32.mrb[31].mxu0 }
 0xe7a   :  { %v1637_v33 = vpack.c.bf16 %v1626_v2, %v1623_v24 }
 0xe7c   :  { %7898 = vmatprep.mubr.msk.bf16.mxu0 %vm537_vm10, %v1637_v33 }
 0xe7d   :  { %7899 = vmatmul.mubr.msk.bf16.vlgmr.msra.gmra.mrb[36].mxu0 %vm537_vm10, %v1638_v11 }
 0xe86   :  { %v7880_v35 = vpop.f32.mrb[32].mxu0 }
 0xe87   :  { %v1693_v4 = vpop.f32.mrb[33].mxu0  ;;  %v1709_v18 = vmul.f32 %v7880_v35, %v9336_v34 }
 0xe88   :  { %v1707_v15 = vmul.f32 %v1693_v4, %v9336_v34  ;;  %v7881_v19 = vpop.f32.mrb[34].mxu0 }
 0xe89   :  { %v1696_v14 = vpop.f32.mrb[35].mxu0  ;;  %v1712_v23 = vadd.f32 %v1709_v18, %v9355_v6 }
 0xe8a   :  { %v1708_v20 = vmul.f32 %v1696_v14, %v9336_v34  ;;  %v1710_v12 = vadd.f32 %v1707_v15, %v9341_v36 }
 0xe8b   :  { %v1719_v16 = vsel %vm605_vm11, %v1712_v23, -inf }
 0xe8c   :  { %v1713_v21 = vsel %vm605_vm11, %v1710_v12, -inf  ;;  %v1711_v13 = vadd.f32 %v1708_v20, %v9347_v40 }
 0xe8d   :  { %1714 = vmax.xlane.f32.xlu0 %v1713_v21 }
 0xe8e   :  { %v1716_v26 = vsel %vm605_vm11, %v1711_v13, -inf }
 0xe8f   :  { %1717 = vmax.xlane.f32.xlu1 %v1716_v26 }
 0xe91   :  { %1720 = vmax.xlane.f32.xlu0 %v1719_v16 }
 0xf1a   :  { %v1715_v27 = vpop.xlane.xlu0 %1714 }
 0xf1b   :  { %v1722_v45 = vsub.f32 %v1710_v12, %v1715_v27 }
 0xf1c   :  { %v1718_v44 = vpop.xlane.xlu1 %1717 }
 0xf1d   :  { %v1725_v3 = vmul.f32 1.442695, %v1722_v45  ;;  %v1723_v28 = vsub.f32 %v1711_v13, %v1718_v44 }
 0xf1e   :  { %v1721_v37 = vpop.xlane.xlu0 %1720 }
 0xf1f   :  { %8671 = vpow2.f32 %v1725_v3  ;;  %v1727_v38 = vmul.f32 1.442695, %v1723_v28  ;;  %v1724_v39 = vsub.f32 %v1712_v23, %v1721_v37 }
 0xf21   :  { %8673 = vpow2.f32 %v1727_v38  ;;  %v1729_v43 = vmul.f32 1.442695, %v1724_v39 }
 0xf23   :  { %8675 = vpow2.f32 %v1729_v43 }
 0xf29   :  { %v8672_v46 = vpop.eup %8671 }
 0xf2a   :  { %v1731_v47 = vsel %vm605_vm11, %v8672_v46, 0.0 }
 0xf2b   :  { %v8674_v49 = vpop.eup %8673  ;;  %1732 = vadd.xlane.f32.xlu0 %v1731_v47 }
 0xf2c   :  { %v1734_v52 = vsel %vm605_vm11, %v8674_v49, 0.0 }
 0xf2d   :  { %v8676_v50 = vpop.eup %8675 }
 0xf2e   :  { %v1737_v7 = vsel %vm605_vm11, %v8676_v50, 0.0 }
 0xf2f   :  { %1738 = vadd.xlane.f32.xlu1 %v1737_v7  ;;  %1735 = vadd.xlane.f32.xlu0 %v1734_v52 }
 0xf40   :  { %1750 = vrot.lane.b32.xlu1 %v9500_v42, %s9021_s29 }
 0xf44   :  { %1924 = vrot.lane.b32.xlu1 %v9326_v22, %s9022_s30 }
 0xf45   :  { %1748 = vrot.lane.b32.xlu0 %v9326_v22, %s9021_s29 }
 0xf48   :  { %1926 = vrot.lane.b32.xlu1 %v9500_v42, %s9022_s30 }
 0xf49   :  { %1920 = vrot.lane.b32.xlu0 %v9326_v22, %s9023_s12 }
 0xf4c   :  { %1922 = vrot.lane.b32.xlu1 %v9500_v42, %s9023_s12 }
 0xf4d   :  { %2154 = vrot.lane.b32.xlu0 %v9326_v22, %s9024_s13 }
 0xf50   :  { %2156 = vrot.lane.b32.xlu1 %v9500_v42, %s9024_s13  ;;  %v9638_v29 = vpop.f32.mrb[36].mxu0 }
 0xf51   :  { %2150 = vrot.lane.b32.xlu0 %v9326_v22, %s9025_s14  ;;  %v9642_v53 = vpop.f32.mrb[37].mxu0 }
 0xf52   :  { %v7901_v54 = vpop.f32.mrb[38].mxu0 }
 0xf53   :  { %v9644_v8 = vpop.f32.mrb[39].mxu0 }
 0xf54   :  { %2152 = vrot.lane.b32.xlu1 %v9500_v42, %s9025_s14 }
 0xfb8   :  { %v1733_v55 = vpop.xlane.xlu0 %1732 }
 0xfb9   :  { %8677 = vrcp.f32 %v1733_v55 }
 0xfbc   :  { %v1736_v32 = vpop.xlane.xlu0 %1735  ;;  %v1739_v58 = vpop.xlane.xlu1 %1738 }
 0xfbd   :  { %8679 = vrcp.f32 %v1736_v32 }
 0xfbe   :  { %8681 = vrcp.f32 %v1739_v58 }
 0xfc0   :  { %v1749_v59 = vpop.permute.xlu0 %1748  ;;  %v1751_v31 = vpop.permute.xlu1 %1750 }
 0xfc1   :  { %7882 = vmatprep.subr.bf16.mxu1 %v1749_v59  ;;  %v1760_v1 = vsel %vm652_vm12, %v1751_v31, 0 }
 0xfc2   :  { %7883 = vmatpush3.bf16.msra.mxu1 %v1749_v59 }
 0xfc3   :  { %8467 = vmatprep.subr.msk.bf16.mxu1 %vm652_vm12, %v1751_v31  ;;  %v8678_v24 = vpop.eup %8677 }
 0xfc4   :  { %v1743_v11 = vmul.f32 %v8678_v24, %v8672_v46  ;;  %v1925_v19 = vpop.permute.xlu1 %1924  ;;  %v1921_v23 = vpop.permute.xlu0 %1920 }
 0xfc5   :  { %v1935_v26 = vsel %vm537_vm10, %v1925_v19, 0 }
 0xfc6   :  { %7885 = vmatpush3.bf16.msra.mxu1 %v1760_v1 }
 0xfc7   :  { %v8680_v2 = vpop.eup %8679  ;;  %8468 = vmatprep.subr.msk.bf16.mxu1 %vm652_vm12, %v9443_v25 }
 0xfc8   :  { %v8682_v33 = vpop.eup %8681  ;;  %v1744_v35 = vmul.f32 %v8680_v2, %v8674_v49  ;;  %v1927_v16 = vpop.permute.xlu1 %1926 }
 0xfc9   :  { %v1745_v4 = vmul.f32 %v8682_v33, %v8676_v50  ;;  %v2155_v27 = vpop.permute.xlu0 %2154 }
 0xfca   :  { %v1746_v18 = vpack.c.bf16 %v1744_v35, %v1743_v11  ;;  %v2165_v3 = vsel %vm537_vm10, %v2155_v27, 0 }
 0xfcb   :  { %v1747_v15 = vpack.c.bf16 %v1745_v4, %v1745_v4 }
 0xfcc   :  { %7886 = vmatprep.mubr.msk.bf16.mxu1 %vm605_vm11, %v1746_v18  ;;  %v1923_v45 = vpop.permute.xlu1 %1922 }
 0xfcd   :  { %7887 = vmatmul.mubr.msk.bf16.vlgmr.msra.gmra.mrb[44].mxu1 %vm605_vm11, %v1747_v15  ;;  %v2151_v44 = vpop.permute.xlu0 %2150 }
 0xfce   :  { %7891 = vmatpush3.bf16.msra.mxu1 %v9450_v48  ;;  %v1938_v48 = vsel %vm537_vm10, %v1927_v16, 0 }
 0xfcf   :  { %8470 = vmatprep.subr.msk.bf16.mxu1 %vm537_vm10, %v1925_v19 }
 0xfd0   :  { %v2157_v28 = vpop.permute.xlu1 %2156 }
 0xfd1   :  { %v2168_v37 = vsel %vm537_vm10, %v2157_v28, 0 }
 0xfd4   :  { %v2153_v38 = vpop.permute.xlu1 %2152 }
0x10a0   :  { %v7888_v14 = vpop.f32.mrb[44].mxu1 }
0x10a1   :  { %v1796_v20 = vpop.f32.mrb[45].mxu1  ;;  %v1811_v13 = vpack.c.bf16 %v7888_v14, %v7888_v14 }
0x10a2   :  { %v7889_v12 = vpop.f32.mrb[46].mxu1 }
0x10a3   :  { %v1799_v21 = vpop.f32.mrb[47].mxu1 }
0x10a4   :  { %v1810_v25 = vpack.c.bf16 %v1799_v21, %v1796_v20 }
0x10a6   :  { %7892 = vmatprep.mubr.msk.bf16.mxu1 %vm537_vm10, %v1810_v25 }
0x10a7   :  { %7893 = vmatmul.mubr.msk.bf16.vlgmr.msra.gmra.mrb[48].mxu1 %vm537_vm10, %v1811_v13 }
0x10a8   :  { %7903 = vmatpush3.bf16.xpose.msra.mxu1 %v1935_v26  ;;  %7906 = vmatprep.mubr.msk.bf16.mxu1 %vm537_vm10, %v1921_v23 }
0x10a9   :  { %8471 = vmatprep.subr.msk.bf16.mxu1 %vm537_vm10, %v1927_v16 }
0x10b0   :  { %7905 = vmatpush3.bf16.xpose.msra.mxu1 %v1938_v48 }
0x10b1   :  { %8474 = vmatprep.subr.msk.bf16.mxu1 %vm537_vm10, %v2155_v27 }
0x10b7   :  { %7907 = vmatmul.mubr.msk.bf16.vlgmr.msra.gmra.mrb[52].mxu1 %vm537_vm10, %v1923_v45 }
0x10b8   :  { %7925 = vmatpush3.bf16.xpose.msra.mxu1 %v2165_v3  ;;  %7928 = vmatprep.mubr.msk.bf16.mxu1 %vm537_vm10, %v2151_v44 }
0x10b9   :  { %8475 = vmatprep.subr.msk.bf16.mxu1 %vm537_vm10, %v2157_v28 }
0x10c0   :  { %7927 = vmatpush3.bf16.xpose.msra.mxu1 %v2168_v37 }
0x10c1   :  { %7946 = vmatprep.subr.bf16.mxu1 %v9015_v5 }
0x10c7   :  { %7929 = vmatmul.mubr.msk.bf16.vlgmr.msra.gmra.mrb[56].mxu1 %vm537_vm10, %v2153_v38 }
0x10c8   :  { %7950 = vmatprep.mubr.msk.bf16.mxu1 %vm9016_vm9, %v9015_v5 }
0x117a   :  { %v7894_v39 = vpop.f32.mrb[48].mxu1 }
0x117b   :  { %v9673_v43 = vadd.f32 %v9638_v29, %v7894_v39  ;;  %v1852_v46 = vpop.f32.mrb[49].mxu1 }
0x117c   :  { %v9676_v47 = vadd.f32 %v9642_v53, %v1852_v46  ;;  %v7895_v49 = vpop.f32.mrb[50].mxu1 }
0x117d   :  { %v1855_v50 = vpop.f32.mrb[51].mxu1 }
0x117e   :  { %v9679_v7 = vadd.f32 %v9644_v8, %v1855_v50 }
0x118a   :  { %v7908_v52 = vpop.f32.mrb[52].mxu1 }
0x118b   :  { %v1974_v54 = vpop.f32.mrb[53].mxu1  ;;  %v1990_v55 = vmul.f32 %v7908_v52, %v9336_v34 }
0x118c   :  { %v1988_v32 = vmul.f32 %v1974_v54, %v9336_v34  ;;  %v7909_v58 = vpop.f32.mrb[54].mxu1 }
0x118d   :  { %v1977_v59 = vpop.f32.mrb[55].mxu1  ;;  %v1993_v1 = vadd.f32 %v1990_v55, %v9355_v6 }
0x118e   :  { %v1989_v29 = vmul.f32 %v1977_v59, %v9336_v34  ;;  %v1991_v31 = vadd.f32 %v1988_v32, %v9341_v36 }
0x118f   :  { %v2000_v2 = vsel %vm605_vm11, %v1993_v1, -inf }
0x1190   :  { %v1994_v53 = vsel %vm605_vm11, %v1991_v31, -inf  ;;  %v1992_v24 = vadd.f32 %v1989_v29, %v9347_v40 }
0x1191   :  { %1995 = vmax.xlane.f32.xlu0 %v1994_v53 }
0x1192   :  { %v1997_v8 = vsel %vm605_vm11, %v1992_v24, -inf }
0x1193   :  { %1998 = vmax.xlane.f32.xlu1 %v1997_v8 }
0x1195   :  { %2001 = vmax.xlane.f32.xlu0 %v2000_v2 }
0x119a   :  { %v7930_v33 = vpop.f32.mrb[56].mxu1 }
0x119b   :  { %v2204_v11 = vpop.f32.mrb[57].mxu1  ;;  %v2220_v28 = vmul.f32 %v7930_v33, %v9336_v34 }
0x119c   :  { %v7931_v35 = vpop.f32.mrb[58].mxu1  ;;  %v2218_v44 = vmul.f32 %v2204_v11, %v9336_v34 }
0x119d   :  { %v2207_v4 = vpop.f32.mrb[59].mxu1  ;;  %v2223_v39 = vadd.f32 %v2220_v28, %v9355_v6 }
0x119e   :  { %v2219_v3 = vmul.f32 %v2207_v4, %v9336_v34  ;;  %v2221_v37 = vadd.f32 %v2218_v44, %v9341_v36 }
0x119f   :  { %v2230_v50 = vsel %vm605_vm11, %v2223_v39, -inf }
0x11a0   :  { %v2222_v38 = vadd.f32 %v2219_v3, %v9347_v40  ;;  %v2224_v46 = vsel %vm605_vm11, %v2221_v37, -inf }
0x11a2   :  { %v2227_v49 = vsel %vm605_vm11, %v2222_v38, -inf }
0x121e   :  { %v1996_v18 = vpop.xlane.xlu0 %1995 }
0x121f   :  { %v2003_v15 = vsub.f32 %v1991_v31, %v1996_v18 }
0x1220   :  { %v1999_v19 = vpop.xlane.xlu1 %1998 }
0x1221   :  { %v2006_v14 = vmul.f32 1.442695, %v2003_v15  ;;  %v2004_v20 = vsub.f32 %v1992_v24, %v1999_v19 }
0x1222   :  { %v2002_v12 = vpop.xlane.xlu0 %2001 }
0x1223   :  { %8683 = vpow2.f32 %v2006_v14  ;;  %v2008_v21 = vmul.f32 1.442695, %v2004_v20  ;;  %v2005_v25 = vsub.f32 %v1993_v1, %v2002_v12 }
0x1225   :  { %8685 = vpow2.f32 %v2008_v21  ;;  %v2010_v13 = vmul.f32 1.442695, %v2005_v25 }
0x1227   :  { %8687 = vpow2.f32 %v2010_v13 }
0x122d   :  { %v8684_v23 = vpop.eup %8683 }
0x122e   :  { %v2012_v26 = vsel %vm605_vm11, %v8684_v23, 0.0 }
0x122f   :  { %v8686_v16 = vpop.eup %8685  ;;  %2013 = vadd.xlane.f32.xlu0 %v2012_v26 }
0x1230   :  { %v2015_v45 = vsel %vm605_vm11, %v8686_v16, 0.0 }
0x1231   :  { %v8688_v48 = vpop.eup %8687 }
0x1232   :  { %v2018_v27 = vsel %vm605_vm11, %v8688_v48, 0.0 }
0x1233   :  { %2019 = vadd.xlane.f32.xlu1 %v2018_v27  ;;  %2016 = vadd.xlane.f32.xlu0 %v2015_v45 }
0x1244   :  { %2031 = vrot.lane.b32.xlu1 %v9500_v42, %s9026_s17 }
0x1249   :  { %2029 = vrot.lane.b32.xlu0 %v9326_v22, %s9026_s17 }
0x1268   :  { %2225 = vmax.xlane.f32.xlu1 %v2224_v46  ;;  %2228 = vmax.xlane.f32.xlu0 %v2227_v49 }
0x126c   :  { %2231 = vmax.xlane.f32.xlu0 %v2230_v50 }
0x12bc   :  { %v2014_v52 = vpop.xlane.xlu0 %2013 }
0x12bd   :  { %8689 = vrcp.f32 %v2014_v52 }
0x12c0   :  { %v2017_v54 = vpop.xlane.xlu0 %2016  ;;  %v2020_v55 = vpop.xlane.xlu1 %2019 }
0x12c1   :  { %8691 = vrcp.f32 %v2017_v54 }
0x12c2   :  { %8693 = vrcp.f32 %v2020_v55 }
0x12c4   :  { %v2030_v34 = vpop.permute.xlu0 %2029  ;;  %v2032_v32 = vpop.permute.xlu1 %2031 }
0x12c5   :  { %7910 = vmatprep.subr.bf16.mxu0 %v2030_v34  ;;  %v2041_v59 = vsel %vm652_vm12, %v2032_v32, 0 }
0x12c6   :  { %7911 = vmatpush3.bf16.msra.mxu0 %v2030_v34 }
0x12c7   :  { %8472 = vmatprep.subr.msk.bf16.mxu0 %vm652_vm12, %v2032_v32  ;;  %v8690_v58 = vpop.eup %8689 }
0x12c8   :  { %v2024_v53 = vmul.f32 %v8690_v58, %v8684_v23  ;;  %v9723_v23 = vld [vmem:[%s10916_s2 + $0x31] ss:$0 sm:$0xff] }
0x12c9   :  { %v1464_v26 = vadd.f32 %v9723_v23, %v9606_v60 }
0x12ca   :  { %7913 = vmatpush3.bf16.msra.mxu0 %v2041_v59 }
0x12cb   :  { %v8692_v29 = vpop.eup %8691  ;;  %8473 = vmatprep.subr.msk.bf16.mxu0 %vm652_vm12, %v9531_v57 }
0x12cc   :  { %v8694_v31 = vpop.eup %8693  ;;  %v2025_v24 = vmul.f32 %v8692_v29, %v8686_v16  ;;  %v1465_v16 = vadd.f32 %v9723_v23, %v9602_v56 }
0x12cd   :  { %v2026_v1 = vmul.f32 %v8694_v31, %v8688_v48  ;;  %v2384_v48 = vadd.f32 %v1464_v26, %v9292_v62 }
0x12ce   :  { %v2027_v8 = vpack.c.bf16 %v2025_v24, %v2024_v53  ;;  %v9731_v27 = vadd.f32 %v1465_v16, %v9300_v63  ;;  %v8575_v63 = vld [vmem:[%s10919_s5 + $0x10] sm:$0xff]  }
0x12cf   :  { %v2028_v2 = vpack.c.bf16 %v2026_v1, %v2026_v1  ;;  %7947 = vmatpush3.bf16.msra.mxu1 %v8575_v63 }
0x12d0   :  { %7914 = vmatprep.mubr.msk.bf16.mxu0 %vm605_vm11, %v2027_v8  ;;  %v2391_v3 = vmul.f32 %v9731_v27, %v9731_v27  ;;  %7948 = vmatprep.subr.bf16.mxu1 %v9015_v5 }
0x12d1   :  { %7915 = vmatmul.mubr.msk.bf16.vlgmr.msra.gmra.mrb[40].mxu0 %vm605_vm11, %v2028_v2 }
0x12d2   :  { %7919 = vmatpush3.bf16.msra.mxu0 %v9537_v41  ;;  %v2401_v60 = vsel %vm394_vm8, %v2391_v3, 0.0 }
0x12f5   :  { %v2229_v33 = vpop.xlane.xlu0 %2228  ;;  %v2226_v11 = vpop.xlane.xlu1 %2225 }
0x12f6   :  { %v2234_v35 = vsub.f32 %v2222_v38, %v2229_v33  ;;  %v2233_v18 = vsub.f32 %v2221_v37, %v2226_v11 }
0x12f8   :  { %v2238_v4 = vmul.f32 1.442695, %v2234_v35  ;;  %v2236_v19 = vmul.f32 1.442695, %v2233_v18 }
0x12f9   :  { %v2232_v15 = vpop.xlane.xlu0 %2231 }
0x12fa   :  { %8695 = vpow2.f32 %v2238_v4  ;;  %v2235_v57 = vsub.f32 %v2223_v39, %v2232_v15 }
0x12fc   :  { %v2240_v14 = vmul.f32 1.442695, %v2235_v57 }
0x12fe   :  { %8697 = vpow2.f32 %v2240_v14 }
0x12ff   :  { %8699 = vpow2.f32 %v2236_v19 }
0x1304   :  { %v8696_v20 = vpop.eup %8695 }
0x1305   :  { %v2245_v12 = vsel %vm605_vm11, %v8696_v20, 0.0 }
0x1306   :  { %2246 = vadd.xlane.f32.xlu0 %v2245_v12 }
0x1308   :  { %v8698_v21 = vpop.eup %8697 }
0x1309   :  { %v2248_v25 = vsel %vm605_vm11, %v8698_v21, 0.0  ;;  %v8700_v41 = vpop.eup %8699 }
0x130a   :  { %2249 = vadd.xlane.f32.xlu1 %v2248_v25  ;;  %v2242_v13 = vsel %vm605_vm11, %v8700_v41, 0.0 }
0x130e   :  { %2243 = vadd.xlane.f32.xlu1 %v2242_v13 }
0x131c   :  { %2259 = vrot.lane.b32.xlu0 %v9326_v22, %s9027_s18  ;;  %v1463_v22 = vadd.f32 %v9723_v23, %v9604_v17 }
0x131e   :  { %v2383_v45 = vadd.f32 %v1463_v22, %v9290_v61  ;;  %v8576_v61 = vld [vmem:[%s10919_s5 + $0x18] sm:$0xff]  }
0x131f   :  { %2261 = vrot.lane.b32.xlu1 %v9500_v42, %s9027_s18  ;;  %v2390_v42 = vmul.f32 %v2384_v48, %v2384_v48  ;;  %7949 = vmatpush3.bf16.msra.mxu1 %v8576_v61 }
0x1320   :  { %v2389_v56 = vmul.f32 %v2383_v45, %v2383_v45 }
0x1321   :  { %v2398_v44 = vsel %vm394_vm8, %v2390_v42, 0.0 }
0x1322   :  { %v2395_v62 = vsel %vm394_vm8, %v2389_v56, 0.0 }
0x133b   :  { %2399 = vadd.xlane.f32.xlu0 %v2398_v44 }
0x133f   :  { %2402 = vadd.xlane.f32.xlu0 %v2401_v60 }
0x1343   :  { %2396 = vadd.xlane.f32.xlu1 %v2395_v62 }
0x1393   :  { %v2247_v17 = vpop.xlane.xlu0 %2246 }
0x1394   :  { %8701 = vrcp.f32 %v2247_v17 }
0x1397   :  { %v2260_v28 = vpop.permute.xlu0 %2259  ;;  %v2250_v37 = vpop.xlane.xlu1 %2249 }
0x1398   :  { %7932 = vmatprep.subr.bf16.mxu0 %v2260_v28 }
0x139b   :  { %v2244_v38 = vpop.xlane.xlu1 %2243 }
0x139c   :  { %8703 = vrcp.f32 %v2244_v38 }
0x139d   :  { %8705 = vrcp.f32 %v2250_v37 }
0x139e   :  { %v8702_v39 = vpop.eup %8701 }
0x139f   :  { %v2255_v34 = vmul.f32 %v8702_v39, %v8696_v20  ;;  %v2262_v31 = vpop.permute.xlu1 %2261 }
0x13a0   :  { %v2271_v24 = vsel %vm652_vm12, %v2262_v31, 0 }
0x13a4   :  { %v7916_v46 = vpop.f32.mrb[40].mxu0 }
0x13a5   :  { %v2077_v49 = vpop.f32.mrb[41].mxu0  ;;  %v2092_v58 = vpack.c.bf16 %v7916_v46, %v7916_v46 }
0x13a6   :  { %v8704_v50 = vpop.eup %8703  ;;  %v7917_v52 = vpop.f32.mrb[42].mxu0 }
0x13a7   :  { %v2080_v54 = vpop.f32.mrb[43].mxu0  ;;  %v2254_v55 = vmul.f32 %v8704_v50, %v8700_v41  ;;  %v8706_v29 = vpop.eup %8705 }
0x13a8   :  { %v2091_v32 = vpack.c.bf16 %v2080_v54, %v2077_v49  ;;  %v2256_v53 = vmul.f32 %v8706_v29, %v8698_v21 }
0x13a9   :  { %v2257_v59 = vpack.c.bf16 %v2255_v34, %v2254_v55 }
0x13aa   :  { %7920 = vmatprep.mubr.msk.bf16.mxu0 %vm537_vm10, %v2091_v32  ;;  %v2258_v1 = vpack.c.bf16 %v2256_v53, %v2256_v53 }
0x13ab   :  { %7921 = vmatmul.mubr.msk.bf16.vlgmr.msra.gmra.mrb[44].mxu0 %vm537_vm10, %v2092_v58 }
0x13ac   :  { %7933 = vmatpush3.bf16.msra.mxu0 %v2260_v28  ;;  %7936 = vmatprep.mubr.msk.bf16.mxu0 %vm605_vm11, %v2257_v59 }
0x13ad   :  { %8476 = vmatprep.subr.msk.bf16.mxu0 %vm652_vm12, %v2262_v31 }
0x13b0   :  { %7935 = vmatpush3.bf16.msra.mxu0 %v2271_v24 }
0x13b1   :  { %8477 = vmatprep.subr.msk.bf16.mxu0 %vm652_vm12, %v9560_v51 }
0x13b3   :  { %7937 = vmatmul.mubr.msk.bf16.vlgmr.msra.gmra.mrb[48].mxu0 %vm605_vm11, %v2258_v1 }
0x13b4   :  { %7941 = vmatpush3.bf16.msra.mxu0 %v9566_v30 }
0x13c8   :  { %v2400_v8 = vpop.xlane.xlu0 %2399 }
0x13c9   :  { %v2414_v2 = vmul.f32 0.03125, %v2400_v8 }
0x13cb   :  { %v2420_v33 = vadd.f32 1e-06, %v2414_v2 }
0x13cd   :  { %8707 = vrsqrt.f32 %v2420_v33 }
0x13d0   :  { %v2397_v11 = vpop.xlane.xlu1 %2396 }
0x13d1   :  { %v2413_v35 = vmul.f32 0.03125, %v2397_v11 }
0x13d3   :  { %v2419_v4 = vadd.f32 1e-06, %v2413_v35 }
0x13d5   :  { %8709 = vrsqrt.f32 %v2419_v4 }
0x13d7   :  { %v8708_v18 = vpop.eup %8707 }
0x13d8   :  { %v9757_v57 = vmul.f32 %v8708_v18, %v2384_v48 }
0x13df   :  { %v8710_v15 = vpop.eup %8709 }
0x13e0   :  { %v9759_v19 = vmul.f32 %v8710_v15, %v2383_v45 }
0x13e2   :  { %v2449_v51 = vpack.c.bf16 %v9757_v57, %v9759_v19 }
0x13e4   :  { %7951 = vmatmul.mubr.msk.bf16.vlgmr.msra.gmra.mrb[60].mxu1 %vm394_vm8, %v2449_v51 }
0x13e5   :  { %7954 = vmatprep.mubr.msk.bf16.mxu1 %vm9016_vm9, %v9015_v5 }
0x147e   :  { %v7922_v30 = vpop.f32.mrb[44].mxu0 }
0x147f   :  { %v2149_v14 = vadd.f32 %v7922_v30, %v9673_v43  ;;  %v2133_v20 = vpop.f32.mrb[45].mxu0 }
0x1480   :  { %v2147_v12 = vadd.f32 %v2133_v20, %v9676_v47  ;;  %v7923_v21 = vpop.f32.mrb[46].mxu0 }
0x1481   :  { %v2136_v25 = vpop.f32.mrb[47].mxu0 }
0x1482   :  { %v2148_v41 = vadd.f32 %v2136_v25, %v9679_v7 }
0x1486   :  { %v7938_v13 = vpop.f32.mrb[48].mxu0 }
0x1487   :  { %v2307_v26 = vpop.f32.mrb[49].mxu0  ;;  %v2322_v42 = vpack.c.bf16 %v7938_v13, %v7938_v13 }
0x1488   :  { %v7939_v16 = vpop.f32.mrb[50].mxu0 }
0x1489   :  { %v2310_v48 = vpop.f32.mrb[51].mxu0 }
0x148a   :  { %v2321_v22 = vpack.c.bf16 %v2310_v48, %v2307_v26 }
0x148c   :  { %7942 = vmatprep.mubr.msk.bf16.mxu0 %vm537_vm10, %v2321_v22 }
0x148d   :  { %7943 = vmatmul.mubr.msk.bf16.vlgmr.msra.gmra.mrb[52].mxu0 %vm537_vm10, %v2322_v42 }
0x14b7   :  { %v2507_v45 = vpop.f32.mrb[60].mxu1 }
0x14b8   :  { %v7952_v44 = vpop.f32.mrb[61].mxu1 }
0x14b9   :  { %v2510_v43 = vpop.f32.mrb[62].mxu1 }
0x14ba   :  { %v9771_v3 = vpack.c.bf16 %v2510_v43, %v2507_v45  ;;  %v7953_v47 = vpop.f32.mrb[63].mxu1 }
0x14bc   :  { %7966 = vmatprep.mubr.msk.bf16.mxu0 %vm537_vm10, %v9771_v3 }
0x1560   :  { %v7944_v7 = vpop.f32.mrb[52].mxu0 }
0x1561   :  { %v2379_v60 = vadd.f32 %v7944_v7, %v2149_v14  ;;  %v2363_v56 = vpop.f32.mrb[53].mxu0 }
0x1562   :  { %v2377_v62 = vadd.f32 %v2363_v56, %v2147_v12  ;;  %v7945_v63 = vpop.f32.mrb[54].mxu0 }
0x1563   :  { %v2382_v61 = vadd.f32 %v9723_v23, %v2379_v60  ;;  %v2366_v17 = vpop.f32.mrb[55].mxu0  ;;  %v9831_v63 = vstv %s7282_s15 }
0x1564   :  { %v2380_v28 = vadd.f32 %v9723_v23, %v2377_v62  ;;  %v2378_v37 = vadd.f32 %v2366_v17, %v2148_v41 }
0x1565   :  { %v2388_v38 = vadd.f32 %v2382_v61, %v9309_v9 }
0x1566   :  { %v2386_v39 = vadd.f32 %v2380_v28, %v9302_v0  ;;  %v2381_v46 = vadd.f32 %v9723_v23, %v2378_v37  ;;  %v2403_v0 = vpop.xlane.xlu0 %2402 }
0x1567   :  { %v2394_v55 = vmul.f32 %v2388_v38, %v2388_v38  ;;  %v2415_v9 = vmul.f32 0.03125, %v2403_v0 }
0x1568   :  { %v2387_v49 = vadd.f32 %v2381_v46, %v9311_v10  ;;  %v2392_v50 = vmul.f32 %v2386_v39, %v2386_v39 }
0x1569   :  { %v2410_v32 = vsel %vm394_vm8, %v2394_v55, 0.0  ;;  %v2421_v10 = vadd.f32 1e-06, %v2415_v9 }
0x156a   :  { %v2404_v52 = vsel %vm394_vm8, %v2392_v50, 0.0  ;;  %v2393_v54 = vmul.f32 %v2387_v49, %v2387_v49 }
0x156b   :  { %2405 = vadd.xlane.f32.xlu1 %v2404_v52  ;;  %8711 = vrsqrt.f32 %v2421_v10 }
0x156c   :  { %v2407_v34 = vsel %vm394_vm8, %v2393_v54, 0.0 }
0x156d   :  { %2408 = vadd.xlane.f32.xlu0 %v2407_v34 }
0x156f   :  { %2411 = vadd.xlane.f32.xlu1 %v2410_v32 }
0x1575   :  { %v8712_v11 = vpop.eup %8711 }
0x1576   :  { %v9791_v4 = vmul.f32 %v8712_v11, %v9731_v27 }
0x1583   :  { %2534 = vrot.lane.b32.xlu0 %v9771_v3, %s9017_s25 }
0x1587   :  { %2704 = vrot.lane.b32.xlu0 %v9771_v3, %s9019_s26 }
0x15f8   :  { %v2406_v23 = vpop.xlane.xlu1 %2405 }
0x15f9   :  { %v2416_v58 = vmul.f32 0.03125, %v2406_v23 }
0x15fa   :  { %v2409_v59 = vpop.xlane.xlu0 %2408 }
0x15fb   :  { %v2422_v29 = vadd.f32 1e-06, %v2416_v58  ;;  %v2417_v31 = vmul.f32 0.03125, %v2409_v59 }
0x15fc   :  { %v2412_v53 = vpop.xlane.xlu1 %2411 }
0x15fd   :  { %8713 = vrsqrt.f32 %v2422_v29  ;;  %v2418_v24 = vmul.f32 0.03125, %v2412_v53  ;;  %v2423_v8 = vadd.f32 1e-06, %v2417_v31 }
0x15fe   :  { %v2535_v1 = vpop.permute.xlu0 %2534 }
0x15ff   :  { %v2424_v2 = vadd.f32 1e-06, %v2418_v24  ;;  %8478 = vmatprep.subr.msk.bf16.mxu0 %vm537_vm10, %v2535_v1  ;;  %v2545_v33 = vsel %vm537_vm10, %v2535_v1, 0 }
0x1600   :  { %7963 = vmatpush3.bf16.xpose.msra.mxu0 %v2545_v33 }
0x1601   :  { %8715 = vrsqrt.f32 %v2424_v2 }
0x1602   :  { %8717 = vrsqrt.f32 %v2423_v8  ;;  %v2705_v12 = vpop.permute.xlu0 %2704 }
0x1607   :  { %v8714_v35 = vpop.eup %8713 }
0x1608   :  { %v9793_v18 = vmul.f32 %v8714_v35, %v2386_v39 }
0x160a   :  { %v2450_v15 = vpack.c.bf16 %v9793_v18, %v9791_v4 }
0x160b   :  { %v8716_v51 = vpop.eup %8715 }
0x160c   :  { %7955 = vmatmul.mubr.msk.bf16.gmra.mrb[64].mxu1 %vm394_vm8, %v2450_v15  ;;  %v8718_v30 = vpop.eup %8717  ;;  %v9800_v14 = vmul.f32 %v8716_v51, %v2388_v38 }
0x160d   :  { %7958 = vmatprep.mubr.msk.bf16.mxu1 %vm9016_vm9, %v9015_v5  ;;  %v9802_v20 = vmul.f32 %v8718_v30, %v2387_v49 }
0x160f   :  { %v2451_v27 = vpack.c.bf16 %v9800_v14, %v9802_v20 }
0x1614   :  { %7959 = vmatmul.mubr.msk.bf16.gmra.mrb[68].mxu1 %vm394_vm8, %v2451_v27 }
0x1615   :  { %7982 = vmatprep.mubr.msk.bf16.mxu1 %vm537_vm10, %v2705_v12 }
0x16df   :  { %v2515_v21 = vpop.f32.mrb[64].mxu1 }
0x16e0   :  { %v9808_v25 = vpack.c.bf16 %v2515_v21, %v2515_v21  ;;  %v7956_v41 = vpop.f32.mrb[65].mxu1 }
0x16e1   :  { %v2518_v13 = vpop.f32.mrb[66].mxu1 }
0x16e2   :  { %2536 = vrot.lane.b32.xlu1 %v9808_v25, %s9017_s25  ;;  %v7957_v26 = vpop.f32.mrb[67].mxu1 }
0x16e6   :  { %2708 = vrot.lane.b32.xlu1 %v9771_v3, %s9020_s27 }
0x16e7   :  { %v2523_v16 = vpop.f32.mrb[68].mxu1 }
0x16e8   :  { %v9814_v48 = vpack.c.bf16 %v2523_v16, %v2518_v13  ;;  %v7960_v22 = vpop.f32.mrb[69].mxu1 }
0x16e9   :  { %v9816_v42 = vpop.f32.mrb[70].mxu1 }
0x16ea   :  { %2710 = vrot.lane.b32.xlu1 %v9808_v25, %s9020_s27  ;;  %v7961_v45 = vpop.f32.mrb[71].mxu1 }
0x16ee   :  { %2706 = vrot.lane.b32.xlu1 %v9808_v25, %s9019_s26 }
0x1754   :  { %v2537_v44 = vpop.permute.xlu1 %2536 }
0x1755   :  { %8479 = vmatprep.subr.msk.bf16.mxu0 %vm537_vm10, %v2537_v44  ;;  %v2548_v43 = vsel %vm537_vm10, %v2537_v44, 0 }
0x1756   :  { %7965 = vmatpush3.bf16.xpose.msra.mxu0 %v2548_v43 }
0x1758   :  { %v2709_v47 = vpop.permute.xlu1 %2708 }
0x1759   :  { %8481 = vmatprep.subr.msk.bf16.mxu1 %vm537_vm10, %v2709_v47  ;;  %v2719_v7 = vsel %vm537_vm10, %v2709_v47, 0 }
0x175a   :  { %7979 = vmatpush3.bf16.xpose.msra.mxu1 %v2719_v7 }
0x175c   :  { %v2711_v60 = vpop.permute.xlu1 %2710 }
0x175d   :  { %7967 = vmatmul.mubr.msk.bf16.vlgmr.msra.gmra.mrb[56].mxu0 %vm537_vm10, %v9808_v25  ;;  %8482 = vmatprep.subr.msk.bf16.mxu1 %vm537_vm10, %v2711_v60  ;;  %v2722_v56 = vsel %vm537_vm10, %v2711_v60, 0 }
0x1760   :  { %v2707_v62 = vpop.permute.xlu1 %2706 }
0x1762   :  { %7981 = vmatpush3.bf16.xpose.msra.mxu1 %v2722_v56 }
0x1769   :  { %7983 = vmatmul.mubr.msk.bf16.vlgmr.msra.gmra.mrb[72].mxu1 %vm537_vm10, %v2707_v62 }
0x1830   :  { %v7968_v61 = vpop.f32.mrb[56].mxu0 }
0x1831   :  { %v2584_v17 = vpop.f32.mrb[57].mxu0  ;;  %v2601_v28 = vmul.f32 %v7968_v61, %v9831_v63 }
0x1832   :  { %v2599_v37 = vmul.f32 %v9831_v63, %v2584_v17  ;;  %v7969_v38 = vpop.f32.mrb[58].mxu0 }
0x1833   :  { %v2587_v39 = vpop.f32.mrb[59].mxu0  ;;  %v2604_v50 = vadd.f32 %v2601_v28, %v9355_v6 }
0x1834   :  { %v2602_v46 = vadd.f32 %v2599_v37, %v9341_v36  ;;  %v2600_v49 = vmul.f32 %v9831_v63, %v2587_v39 }
0x1835   :  { %v2611_v34 = vsel %vm605_vm11, %v2604_v50, -inf }
0x1836   :  { %v2603_v52 = vadd.f32 %v2600_v49, %v9347_v40  ;;  %v2605_v54 = vsel %vm605_vm11, %v2602_v46, -inf  ;;  %v9869_v49 = vld [vmem:[%s10920_s6 + $0x14] sm:$0xf] }
0x1837   :  { %2606 = vmax.xlane.f32.xlu0 %v2605_v54  ;;  %8484 = vmatprep.subr.msk.bf16.mxu1 %vm652_vm12, %v9869_v49 }
0x1838   :  { %v2608_v55 = vsel %vm605_vm11, %v2603_v52, -inf }
0x1839   :  { %2609 = vmax.xlane.f32.xlu1 %v2608_v55 }
0x183b   :  { %2612 = vmax.xlane.f32.xlu0 %v2611_v34 }
0x183c   :  { %v7984_v32 = vpop.f32.mrb[72].mxu1 }
0x183d   :  { %v2774_v0 = vmul.f32 %v7984_v32, %v9831_v63  ;;  %v2758_v9 = vpop.f32.mrb[73].mxu1 }
0x183e   :  { %v2772_v10 = vmul.f32 %v2758_v9, %v9831_v63  ;;  %v7985_v23 = vpop.f32.mrb[74].mxu1 }
0x183f   :  { %v2777_v58 = vadd.f32 %v2774_v0, %v9355_v6  ;;  %v2761_v59 = vpop.f32.mrb[75].mxu1 }
0x1840   :  { %v2775_v29 = vadd.f32 %v2772_v10, %v9341_v36  ;;  %v2773_v31 = vmul.f32 %v2761_v59, %v9831_v63 }
0x1841   :  { %v2784_v53 = vsel %vm605_vm11, %v2777_v58, -inf }
0x1842   :  { %v2776_v24 = vadd.f32 %v2773_v31, %v9347_v40  ;;  %2785 = vmax.xlane.f32.xlu1 %v2784_v53  ;;  %v2778_v1 = vsel %vm605_vm11, %v2775_v29, -inf }
0x1843   :  { %2779 = vmax.xlane.f32.xlu0 %v2778_v1 }
0x1844   :  { %v2781_v8 = vsel %vm605_vm11, %v2776_v24, -inf }
0x1847   :  { %2782 = vmax.xlane.f32.xlu0 %v2781_v8 }
0x18c4   :  { %v2607_v2 = vpop.xlane.xlu0 %2606 }
0x18c5   :  { %v2614_v33 = vsub.f32 %v2602_v46, %v2607_v2 }
0x18c6   :  { %v2610_v51 = vpop.xlane.xlu1 %2609 }
0x18c7   :  { %v2617_v15 = vmul.f32 1.442695, %v2614_v33  ;;  %v2615_v13 = vsub.f32 %v2603_v52, %v2610_v51 }
0x18c8   :  { %v2613_v11 = vpop.xlane.xlu0 %2612 }
0x18c9   :  { %v2616_v35 = vsub.f32 %v2604_v50, %v2613_v11  ;;  %v2619_v44 = vmul.f32 1.442695, %v2615_v13  ;;  %v9877_v50 = vsel %vm652_vm12, %v9869_v49, 0 }
0x18ca   :  { %7995 = vmatpush3.bf16.msra.mxu1 %v9877_v50 }
0x18cb   :  { %v2621_v30 = vmul.f32 1.442695, %v2616_v35 }
0x18cd   :  { %8719 = vpow2.f32 %v2621_v30 }
0x18ce   :  { %8721 = vpow2.f32 %v2617_v15 }
0x18cf   :  { %v2786_v27 = vpop.xlane.xlu1 %2785 }
0x18d0   :  { %v2789_v12 = vsub.f32 %v2777_v58, %v2786_v27  ;;  %v2780_v21 = vpop.xlane.xlu0 %2779 }
0x18d1   :  { %v2787_v41 = vsub.f32 %v2775_v29, %v2780_v21 }
0x18d2   :  { %v2794_v26 = vmul.f32 1.442695, %v2789_v12 }
0x18d3   :  { %v2790_v16 = vmul.f32 1.442695, %v2787_v41 }
0x18d4   :  { %8723 = vpow2.f32 %v2794_v26  ;;  %v2783_v22 = vpop.xlane.xlu0 %2782  ;;  %v9917_v26 = vld [vmem:[%s10920_s6 + $0x10] sm:$0xf] }
0x18d5   :  { %v2788_v45 = vsub.f32 %v2776_v24, %v2783_v22  ;;  %8725 = vpow2.f32 %v2790_v16  ;;  %v9923_v16 = vsel %vm652_vm12, %v9917_v26, 0 }
0x18d7   :  { %v9851_v43 = vpop.eup %8719  ;;  %v2792_v47 = vmul.f32 1.442695, %v2788_v45 }
0x18d8   :  { %v2629_v7 = vsel %vm605_vm11, %v9851_v43, 0.0  ;;  %v9855_v60 = vpop.eup %8721 }
0x18d9   :  { %8727 = vpow2.f32 %v2792_v47  ;;  %2630 = vadd.xlane.f32.xlu0 %v2629_v7  ;;  %v2623_v56 = vsel %vm605_vm11, %v9855_v60, 0.0 }
0x18da   :  { %8729 = vpow2.f32 %v2619_v44 }
0x18dd   :  { %2624 = vadd.xlane.f32.xlu0 %v2623_v56 }
0x18de   :  { %v9859_v62 = vpop.eup %8723 }
0x18df   :  { %v2802_v61 = vsel %vm605_vm11, %v9859_v62, 0.0  ;;  %v8726_v17 = vpop.eup %8725 }
0x18e0   :  { %2803 = vadd.xlane.f32.xlu1 %v2802_v61  ;;  %v2796_v37 = vsel %vm605_vm11, %v8726_v17, 0.0 }
0x18e3   :  { %v8728_v28 = vpop.eup %8727 }
0x18e4   :  { %v8730_v38 = vpop.eup %8729  ;;  %2797 = vadd.xlane.f32.xlu1 %v2796_v37  ;;  %v2799_v39 = vsel %vm605_vm11, %v8728_v28, 0.0 }
0x18e5   :  { %2800 = vadd.xlane.f32.xlu0 %v2799_v39  ;;  %v2626_v46 = vsel %vm605_vm11, %v8730_v38, 0.0 }
0x18e8   :  { %2627 = vadd.xlane.f32.xlu1 %v2626_v46 }
0x18f9   :  { %2642 = vrot.lane.b32.xlu1 %v9808_v25, %s9018_s4 }
0x18fb   :  { %2640 = vrot.lane.b32.xlu0 %v9771_v3, %s9018_s4 }
0x18fd   :  { %2813 = vrot.lane.b32.xlu1 %v9771_v3, %s9021_s29 }
0x18ff   :  { %2995 = vrot.lane.b32.xlu0 %v9771_v3, %s9022_s30 }
0x1901   :  { %2815 = vrot.lane.b32.xlu1 %v9808_v25, %s9021_s29 }
0x1903   :  { %2991 = vrot.lane.b32.xlu0 %v9771_v3, %s9023_s12 }
0x1905   :  { %2997 = vrot.lane.b32.xlu1 %v9808_v25, %s9022_s30 }
0x1907   :  { %3228 = vrot.lane.b32.xlu0 %v9771_v3, %s9024_s13 }
0x1909   :  { %2993 = vrot.lane.b32.xlu1 %v9808_v25, %s9023_s12 }
0x190b   :  { %3224 = vrot.lane.b32.xlu0 %v9771_v3, %s9025_s14 }
0x190d   :  { %3230 = vrot.lane.b32.xlu1 %v9808_v25, %s9024_s13 }
0x1911   :  { %3226 = vrot.lane.b32.xlu1 %v9808_v25, %s9025_s14 }
0x1966   :  { %v2631_v52 = vpop.xlane.xlu0 %2630 }
0x1967   :  { %8731 = vrcp.f32 %v2631_v52 }
0x196a   :  { %v2625_v55 = vpop.xlane.xlu0 %2624 }
0x196b   :  { %8733 = vrcp.f32 %v2625_v55 }
0x196d   :  { %v2804_v54 = vpop.xlane.xlu1 %2803 }
0x1971   :  { %v2798_v34 = vpop.xlane.xlu1 %2797  ;;  %v8732_v59 = vpop.eup %8731 }
0x1972   :  { %v2801_v32 = vpop.xlane.xlu0 %2800  ;;  %8735 = vrcp.f32 %v2798_v34  ;;  %v2637_v8 = vmul.f32 %v8732_v59, %v9851_v43 }
0x1973   :  { %8737 = vrcp.f32 %v2801_v32 }
0x1974   :  { %v2639_v51 = vpack.c.bf16 %v2637_v8, %v2637_v8 }
0x1975   :  { %v2628_v0 = vpop.xlane.xlu1 %2627  ;;  %v8734_v29 = vpop.eup %8733 }
0x1976   :  { %8739 = vrcp.f32 %v2628_v0  ;;  %v2641_v9 = vpop.permute.xlu0 %2640  ;;  %v2635_v2 = vmul.f32 %v8734_v29, %v9855_v60 }
0x1977   :  { %7970 = vmatprep.subr.bf16.mxu0 %v2641_v9  ;;  %8741 = vrcp.f32 %v2804_v54 }
0x1978   :  { %7971 = vmatpush3.bf16.msra.mxu0 %v2641_v9 }
0x1979   :  { %v2643_v10 = vpop.permute.xlu1 %2642 }
0x197a   :  { %v2996_v23 = vpop.permute.xlu0 %2995  ;;  %8480 = vmatprep.subr.msk.bf16.mxu0 %vm652_vm12, %v2643_v10  ;;  %v2652_v58 = vsel %vm652_vm12, %v2643_v10, 0 }
0x197b   :  { %8486 = vmatprep.subr.msk.bf16.mxu1 %vm537_vm10, %v2996_v23 }
0x197c   :  { %7973 = vmatpush3.bf16.msra.mxu0 %v2652_v58  ;;  %v8736_v31 = vpop.eup %8735 }
0x197d   :  { %v2814_v53 = vpop.permute.xlu1 %2813  ;;  %v8738_v24 = vpop.eup %8737  ;;  %v2808_v11 = vmul.f32 %v8736_v31, %v8726_v17 }
0x197e   :  { %7986 = vmatprep.subr.bf16.mxu0 %v2814_v53  ;;  %v2809_v35 = vmul.f32 %v8738_v24, %v8728_v28  ;;  %v2992_v37 = vpop.permute.xlu0 %2991 }
0x1980   :  { %v8740_v1 = vpop.eup %8739  ;;  %v2811_v27 = vpack.c.bf16 %v2809_v35, %v2808_v11 }
0x1981   :  { %v2636_v33 = vmul.f32 %v8740_v1, %v8730_v38  ;;  %v8742_v30 = vpop.eup %8741  ;;  %v2816_v12 = vpop.permute.xlu1 %2815  ;;  %v3006_v38 = vsel %vm537_vm10, %v2996_v23, 0 }
0x1982   :  { %v2810_v21 = vmul.f32 %v8742_v30, %v9859_v62  ;;  %v2825_v41 = vsel %vm652_vm12, %v2816_v12, 0  ;;  %v3229_v52 = vpop.permute.xlu0 %3228 }
0x1983   :  { %v2638_v15 = vpack.c.bf16 %v2636_v33, %v2635_v2  ;;  %v3239_v34 = vsel %vm537_vm10, %v3229_v52, 0 }
0x1984   :  { %v2812_v13 = vpack.c.bf16 %v2810_v21, %v2810_v21 }
0x1985   :  { %7974 = vmatprep.mubr.msk.bf16.mxu0 %vm605_vm11, %v2638_v15  ;;  %v2998_v39 = vpop.permute.xlu1 %2997 }
0x1986   :  { %7975 = vmatmul.mubr.msk.bf16.vlgmr.msra.gmra.mrb[60].mxu0 %vm605_vm11, %v2639_v51  ;;  %v3009_v46 = vsel %vm537_vm10, %v2998_v39, 0  ;;  %v3225_v55 = vpop.permute.xlu0 %3224 }
0x1987   :  { %7987 = vmatpush3.bf16.msra.mxu0 %v2814_v53  ;;  %7990 = vmatprep.mubr.msk.bf16.mxu0 %vm605_vm11, %v2811_v27 }
0x1988   :  { %8483 = vmatprep.subr.msk.bf16.mxu0 %vm652_vm12, %v2816_v12 }
0x1989   :  { %v2994_v54 = vpop.permute.xlu1 %2993 }
0x198b   :  { %7989 = vmatpush3.bf16.msra.mxu0 %v2825_v41 }
0x198c   :  { %8485 = vmatprep.subr.msk.bf16.mxu0 %vm652_vm12, %v9917_v26 }
0x198d   :  { %v3231_v32 = vpop.permute.xlu1 %3230 }
0x198e   :  { %7991 = vmatmul.mubr.msk.bf16.vlgmr.msra.gmra.mrb[64].mxu0 %vm605_vm11, %v2812_v13  ;;  %v3242_v0 = vsel %vm537_vm10, %v3231_v32, 0 }
0x198f   :  { %8001 = vmatpush3.bf16.msra.mxu0 %v9923_v16 }
0x1991   :  { %v3227_v9 = vpop.permute.xlu1 %3226 }
0x1a59   :  { %v7976_v22 = vpop.f32.mrb[60].mxu0 }
0x1a5a   :  { %v2688_v45 = vpop.f32.mrb[61].mxu0  ;;  %v2703_v7 = vpack.c.bf16 %v7976_v22, %v7976_v22 }
0x1a5b   :  { %v7977_v44 = vpop.f32.mrb[62].mxu0 }
0x1a5c   :  { %v2691_v43 = vpop.f32.mrb[63].mxu0 }
0x1a5d   :  { %v2702_v47 = vpack.c.bf16 %v2691_v43, %v2688_v45 }
0x1a5f   :  { %8002 = vmatprep.mubr.msk.bf16.mxu0 %vm537_vm10, %v2702_v47 }
0x1a60   :  { %8003 = vmatmul.mubr.msk.bf16.vlgmr.msra.gmra.mrb[68].mxu0 %vm537_vm10, %v2703_v7 }
0x1a61   :  { %v7992_v60 = vpop.f32.mrb[64].mxu0 }
0x1a62   :  { %v2861_v56 = vpop.f32.mrb[65].mxu0  ;;  %v2876_v28 = vpack.c.bf16 %v7992_v60, %v7992_v60 }
0x1a63   :  { %v7993_v62 = vpop.f32.mrb[66].mxu0 }
0x1a64   :  { %v2864_v61 = vpop.f32.mrb[67].mxu0 }
0x1a65   :  { %v2875_v17 = vpack.c.bf16 %v2864_v61, %v2861_v56 }
0x1a67   :  { %7996 = vmatprep.mubr.msk.bf16.mxu1 %vm537_vm10, %v2875_v17 }
0x1a68   :  { %7997 = vmatmul.mubr.msk.bf16.vlgmr.msra.gmra.mrb[76].mxu1 %vm537_vm10, %v2876_v28 }
0x1a69   :  { %8007 = vmatpush3.bf16.xpose.msra.mxu1 %v3006_v38  ;;  %8010 = vmatprep.mubr.msk.bf16.mxu1 %vm537_vm10, %v2992_v37 }
0x1a6a   :  { %8487 = vmatprep.subr.msk.bf16.mxu1 %vm537_vm10, %v2998_v39 }
0x1a71   :  { %8009 = vmatpush3.bf16.xpose.msra.mxu1 %v3009_v46 }
0x1a72   :  { %8490 = vmatprep.subr.msk.bf16.mxu1 %vm537_vm10, %v3229_v52 }
0x1a78   :  { %8011 = vmatmul.mubr.msk.bf16.vlgmr.msra.gmra.mrb[80].mxu1 %vm537_vm10, %v2994_v54 }
0x1a79   :  { %8029 = vmatpush3.bf16.xpose.msra.mxu1 %v3239_v34  ;;  %8032 = vmatprep.mubr.msk.bf16.mxu1 %vm537_vm10, %v3225_v55 }
0x1a7a   :  { %8491 = vmatprep.subr.msk.bf16.mxu1 %vm537_vm10, %v3231_v32 }
0x1a81   :  { %8031 = vmatpush3.bf16.xpose.msra.mxu1 %v3242_v0  ;;  %v9969_v0 = vpack.c.bf16 %v9816_v42, %v9816_v42 }
0x1a88   :  { %8033 = vmatmul.mubr.msk.bf16.vlgmr.msra.gmra.mrb[84].mxu1 %vm537_vm10, %v3227_v9 }
0x1a89   :  { %8054 = vmatprep.mubr.msk.bf16.mxu1 %vm537_vm10, %v9814_v48 }
0x1b33   :  { %v8004_v10 = vpop.f32.mrb[68].mxu0 }
0x1b34   :  { %v2977_v23 = vpop.f32.mrb[69].mxu0 }
0x1b35   :  { %v8005_v58 = vpop.f32.mrb[70].mxu0 }
0x1b36   :  { %v2980_v59 = vpop.f32.mrb[71].mxu0 }
0x1b3b   :  { %v7998_v29 = vpop.f32.mrb[76].mxu1 }
0x1b3c   :  { %v9943_v31 = vadd.f32 %v8004_v10, %v7998_v29  ;;  %v2920_v53 = vpop.f32.mrb[77].mxu1 }
0x1b3d   :  { %v9945_v24 = vadd.f32 %v2977_v23, %v2920_v53  ;;  %v7999_v1 = vpop.f32.mrb[78].mxu1 }
0x1b3e   :  { %v2923_v8 = vpop.f32.mrb[79].mxu1 }
0x1b3f   :  { %v9947_v2 = vadd.f32 %v2980_v59, %v2923_v8 }
0x1b4b   :  { %v8012_v33 = vpop.f32.mrb[80].mxu1 }
0x1b4c   :  { %v3045_v11 = vpop.f32.mrb[81].mxu1  ;;  %v3061_v35 = vmul.f32 %v8012_v33, %v9831_v63 }
0x1b4d   :  { %v3059_v15 = vmul.f32 %v3045_v11, %v9831_v63  ;;  %v8013_v51 = vpop.f32.mrb[82].mxu1 }
0x1b4e   :  { %v3048_v30 = vpop.f32.mrb[83].mxu1  ;;  %v3064_v21 = vadd.f32 %v3061_v35, %v9355_v6 }
0x1b4f   :  { %v3062_v27 = vadd.f32 %v3059_v15, %v9341_v36  ;;  %v3060_v12 = vmul.f32 %v3048_v30, %v9831_v63 }
0x1b50   :  { %v3071_v45 = vsel %vm605_vm11, %v3064_v21, -inf }
0x1b51   :  { %v3063_v41 = vadd.f32 %v3060_v12, %v9347_v40  ;;  %v3065_v13 = vsel %vm605_vm11, %v3062_v27, -inf }
0x1b52   :  { %3066 = vmax.xlane.f32.xlu0 %v3065_v13 }
0x1b53   :  { %v3068_v22 = vsel %vm605_vm11, %v3063_v41, -inf }
0x1b54   :  { %3069 = vmax.xlane.f32.xlu1 %v3068_v22 }
0x1b56   :  { %3072 = vmax.xlane.f32.xlu0 %v3071_v45 }
0x1b5b   :  { %v8034_v44 = vpop.f32.mrb[84].mxu1 }
0x1b5c   :  { %v3278_v43 = vpop.f32.mrb[85].mxu1  ;;  %v3294_v10 = vmul.f32 %v8034_v44, %v9831_v63 }
0x1b5d   :  { %v8035_v47 = vpop.f32.mrb[86].mxu1  ;;  %v3292_v9 = vmul.f32 %v3278_v43, %v9831_v63 }
0x1b5e   :  { %v3281_v7 = vpop.f32.mrb[87].mxu1  ;;  %v3297_v58 = vadd.f32 %v3294_v10, %v9355_v6 }
0x1b5f   :  { %v3295_v23 = vadd.f32 %v3292_v9, %v9341_v36  ;;  %v3293_v59 = vmul.f32 %v3281_v7, %v9831_v63  ;;  %v10000_v9 = vld [vmem:[%s10920_s6 + $0x18] sm:$0xf] }
0x1b60   :  { %v3304_v42 = vsel %vm605_vm11, %v3297_v58, -inf  ;;  %v10006_v10 = vsel %vm652_vm12, %v10000_v9, 0 }
0x1b61   :  { %v3298_v29 = vsel %vm605_vm11, %v3295_v23, -inf  ;;  %v3296_v53 = vadd.f32 %v3293_v59, %v9347_v40 }
0x1b63   :  { %v3301_v1 = vsel %vm605_vm11, %v3296_v53, -inf }
0x1bdf   :  { %v3067_v60 = vpop.xlane.xlu0 %3066 }
0x1be0   :  { %v3074_v56 = vsub.f32 %v3062_v27, %v3067_v60 }
0x1be1   :  { %v3070_v62 = vpop.xlane.xlu1 %3069 }
0x1be2   :  { %v3077_v61 = vmul.f32 1.442695, %v3074_v56  ;;  %v3075_v17 = vsub.f32 %v3063_v41, %v3070_v62 }
0x1be3   :  { %v3073_v28 = vpop.xlane.xlu0 %3072 }
0x1be4   :  { %8743 = vpow2.f32 %v3077_v61  ;;  %v3079_v37 = vmul.f32 1.442695, %v3075_v17  ;;  %v3076_v38 = vsub.f32 %v3064_v21, %v3073_v28 }
0x1be6   :  { %8745 = vpow2.f32 %v3079_v37  ;;  %v3081_v39 = vmul.f32 1.442695, %v3076_v38 }
0x1be8   :  { %8747 = vpow2.f32 %v3081_v39 }
0x1bee   :  { %v8744_v46 = vpop.eup %8743 }
0x1bef   :  { %v3083_v52 = vsel %vm605_vm11, %v8744_v46, 0.0 }
0x1bf0   :  { %v8746_v54 = vpop.eup %8745  ;;  %3084 = vadd.xlane.f32.xlu0 %v3083_v52 }
0x1bf1   :  { %v3086_v32 = vsel %vm605_vm11, %v8746_v54, 0.0 }
0x1bf2   :  { %v8748_v55 = vpop.eup %8747 }
0x1bf3   :  { %v3089_v34 = vsel %vm605_vm11, %v8748_v55, 0.0 }
0x1bf4   :  { %3090 = vadd.xlane.f32.xlu1 %v3089_v34  ;;  %3087 = vadd.xlane.f32.xlu0 %v3086_v32 }
0x1c05   :  { %3102 = vrot.lane.b32.xlu1 %v9808_v25, %s9026_s17 }
0x1c09   :  { %3468 = vrot.lane.b32.xlu1 %v9814_v48, %s9017_s25 }
0x1c0a   :  { %3100 = vrot.lane.b32.xlu0 %v9771_v3, %s9026_s17 }
0x1c0d   :  { %3470 = vrot.lane.b32.xlu1 %v9969_v0, %s9017_s25 }
0x1c29   :  { %3299 = vmax.xlane.f32.xlu0 %v3298_v29 }
0x1c2d   :  { %3305 = vmax.xlane.f32.xlu0 %v3304_v42 }
0x1c31   :  { %3302 = vmax.xlane.f32.xlu1 %v3301_v1 }
0x1c7d   :  { %v3085_v8 = vpop.xlane.xlu0 %3084 }
0x1c7e   :  { %8749 = vrcp.f32 %v3085_v8 }
0x1c81   :  { %v3088_v33 = vpop.xlane.xlu0 %3087  ;;  %v3091_v11 = vpop.xlane.xlu1 %3090 }
0x1c82   :  { %8751 = vrcp.f32 %v3088_v33 }
0x1c83   :  { %8753 = vrcp.f32 %v3091_v11 }
0x1c85   :  { %v3101_v35 = vpop.permute.xlu0 %3100  ;;  %v3103_v15 = vpop.permute.xlu1 %3102 }
0x1c86   :  { %8014 = vmatprep.subr.bf16.mxu0 %v3101_v35  ;;  %v3112_v27 = vsel %vm652_vm12, %v3103_v15, 0 }
0x1c87   :  { %8015 = vmatpush3.bf16.msra.mxu0 %v3101_v35 }
0x1c88   :  { %8488 = vmatprep.subr.msk.bf16.mxu0 %vm652_vm12, %v3103_v15  ;;  %v8750_v30 = vpop.eup %8749 }
0x1c89   :  { %v3469_v51 = vpop.permute.xlu1 %3468  ;;  %v3095_v22 = vmul.f32 %v8750_v30, %v8744_v46 }
0x1c8a   :  { %8494 = vmatprep.subr.msk.bf16.mxu1 %vm537_vm10, %v3469_v51  ;;  %v3479_v12 = vsel %vm537_vm10, %v3469_v51, 0 }
0x1c8b   :  { %8017 = vmatpush3.bf16.msra.mxu0 %v3112_v27  ;;  %8051 = vmatpush3.bf16.xpose.msra.mxu1 %v3479_v12 }
0x1c8c   :  { %v8752_v21 = vpop.eup %8751  ;;  %8489 = vmatprep.subr.msk.bf16.mxu0 %vm652_vm12, %v10000_v9 }
0x1c8d   :  { %v8754_v41 = vpop.eup %8753  ;;  %v3471_v13 = vpop.permute.xlu1 %3470  ;;  %v3096_v45 = vmul.f32 %v8752_v21, %v8746_v54 }
0x1c8e   :  { %8495 = vmatprep.subr.msk.bf16.mxu1 %vm537_vm10, %v3471_v13  ;;  %v3097_v44 = vmul.f32 %v8754_v41, %v8748_v55  ;;  %v3482_v7 = vsel %vm537_vm10, %v3471_v13, 0 }
0x1c8f   :  { %v3098_v43 = vpack.c.bf16 %v3096_v45, %v3095_v22 }
0x1c90   :  { %v3099_v47 = vpack.c.bf16 %v3097_v44, %v3097_v44 }
0x1c91   :  { %8018 = vmatprep.mubr.msk.bf16.mxu0 %vm605_vm11, %v3098_v43 }
0x1c92   :  { %8019 = vmatmul.mubr.msk.bf16.vlgmr.msra.gmra.mrb[72].mxu0 %vm605_vm11, %v3099_v47 }
0x1c93   :  { %8053 = vmatpush3.bf16.xpose.msra.mxu1 %v3482_v7  ;;  %8023 = vmatpush3.bf16.msra.mxu0 %v10006_v10 }
0x1c9a   :  { %8055 = vmatmul.mubr.msk.bf16.vlgmr.msra.gmra.mrb[88].mxu1 %vm537_vm10, %v9969_v0 }
0x1cb6   :  { %v3300_v60 = vpop.xlane.xlu0 %3299 }
0x1cb7   :  { %v3307_v56 = vsub.f32 %v3295_v23, %v3300_v60 }
0x1cb9   :  { %v3310_v62 = vmul.f32 1.442695, %v3307_v56 }
0x1cba   :  { %v3306_v61 = vpop.xlane.xlu0 %3305 }
0x1cbb   :  { %8755 = vpow2.f32 %v3310_v62  ;;  %v3309_v17 = vsub.f32 %v3297_v58, %v3306_v61 }
0x1cbd   :  { %v3314_v28 = vmul.f32 1.442695, %v3309_v17 }
0x1cbe   :  { %v3303_v37 = vpop.xlane.xlu1 %3302 }
0x1cbf   :  { %8757 = vpow2.f32 %v3314_v28  ;;  %v3308_v38 = vsub.f32 %v3296_v53, %v3303_v37  ;;  %v10029_v37 = vld [vmem:[%s10920_s6 + $0x1c] sm:$0xf] }
0x1cc1   :  { %v3312_v39 = vmul.f32 1.442695, %v3308_v38  ;;  %v10035_v38 = vsel %vm652_vm12, %v10029_v37, 0 }
0x1cc3   :  { %8759 = vpow2.f32 %v3312_v39 }
0x1cc5   :  { %v8756_v46 = vpop.eup %8755 }
0x1cc6   :  { %v3316_v52 = vsel %vm605_vm11, %v8756_v46, 0.0 }
0x1cc7   :  { %3317 = vadd.xlane.f32.xlu0 %v3316_v52 }
0x1cc9   :  { %v8758_v54 = vpop.eup %8757 }
0x1cca   :  { %v3322_v55 = vsel %vm605_vm11, %v8758_v54, 0.0 }
0x1ccb   :  { %3323 = vadd.xlane.f32.xlu1 %v3322_v55 }
0x1ccd   :  { %v8760_v34 = vpop.eup %8759 }
0x1cce   :  { %v3319_v32 = vsel %vm605_vm11, %v8760_v34, 0.0 }
0x1ccf   :  { %3320 = vadd.xlane.f32.xlu0 %v3319_v32 }
0x1cdc   :  { %3335 = vrot.lane.b32.xlu1 %v9808_v25, %s9027_s18 }
0x1ce5   :  { %3333 = vrot.lane.b32.xlu0 %v9771_v3, %s9027_s18 }
0x1d54   :  { %v3318_v23 = vpop.xlane.xlu0 %3317 }
0x1d55   :  { %8761 = vrcp.f32 %v3318_v23 }
0x1d58   :  { %v3324_v58 = vpop.xlane.xlu1 %3323 }
0x1d5c   :  { %v3321_v25 = vpop.xlane.xlu0 %3320  ;;  %v3336_v27 = vpop.permute.xlu1 %3335 }
0x1d5d   :  { %8763 = vrcp.f32 %v3321_v25  ;;  %v3345_v45 = vsel %vm652_vm12, %v3336_v27, 0 }
0x1d5e   :  { %8765 = vrcp.f32 %v3324_v58 }
0x1d5f   :  { %v8762_v29 = vpop.eup %8761 }
0x1d60   :  { %v3334_v59 = vpop.permute.xlu0 %3333  ;;  %v3328_v11 = vmul.f32 %v8762_v29, %v8756_v46 }
0x1d61   :  { %8036 = vmatprep.subr.bf16.mxu0 %v3334_v59 }
0x1d65   :  { %v8020_v53 = vpop.f32.mrb[72].mxu0 }
0x1d66   :  { %v3148_v42 = vpop.f32.mrb[73].mxu0  ;;  %v3163_v51 = vpack.c.bf16 %v8020_v53, %v8020_v53 }
0x1d67   :  { %v8764_v1 = vpop.eup %8763  ;;  %v8021_v8 = vpop.f32.mrb[74].mxu0 }
0x1d68   :  { %v3151_v33 = vpop.f32.mrb[75].mxu0  ;;  %v3329_v35 = vmul.f32 %v8764_v1, %v8760_v34  ;;  %v8766_v3 = vpop.eup %8765 }
0x1d69   :  { %v3162_v15 = vpack.c.bf16 %v3151_v33, %v3148_v42  ;;  %v3330_v41 = vmul.f32 %v8766_v3, %v8758_v54 }
0x1d6a   :  { %v3331_v30 = vpack.c.bf16 %v3329_v35, %v3328_v11 }
0x1d6b   :  { %8024 = vmatprep.mubr.msk.bf16.mxu0 %vm537_vm10, %v3162_v15  ;;  %v3332_v60 = vpack.c.bf16 %v3330_v41, %v3330_v41 }
0x1d6c   :  { %8025 = vmatmul.mubr.msk.bf16.vlgmr.msra.gmra.mrb[76].mxu0 %vm537_vm10, %v3163_v51 }
0x1d6d   :  { %8037 = vmatpush3.bf16.msra.mxu0 %v3334_v59  ;;  %8040 = vmatprep.mubr.msk.bf16.mxu0 %vm605_vm11, %v3331_v30  ;;  %v8056_v12 = vpop.f32.mrb[88].mxu1 }
0x1d6e   :  { %8492 = vmatprep.subr.msk.bf16.mxu0 %vm652_vm12, %v3336_v27  ;;  %v3518_v21 = vpop.f32.mrb[89].mxu1  ;;  %v3534_v43 = vmul.f32 %v8056_v12, %v9831_v63 }
0x1d6f   :  { %v3532_v13 = vmul.f32 %v3518_v21, %v9831_v63  ;;  %v8057_v22 = vpop.f32.mrb[90].mxu1 }
0x1d70   :  { %v3521_v44 = vpop.f32.mrb[91].mxu1  ;;  %v3537_v61 = vadd.f32 %v3534_v43, %v9355_v6 }
0x1d71   :  { %v3535_v47 = vadd.f32 %v3532_v13, %v9341_v36  ;;  %8039 = vmatpush3.bf16.msra.mxu0 %v3345_v45  ;;  %v3533_v7 = vmul.f32 %v3521_v44, %v9831_v63 }
0x1d72   :  { %v3544_v28 = vsel %vm605_vm11, %v3537_v61, -inf  ;;  %8493 = vmatprep.subr.msk.bf16.mxu0 %vm652_vm12, %v10029_v37 }
0x1d73   :  { %v3536_v56 = vadd.f32 %v3533_v7, %v9347_v40  ;;  %v3538_v62 = vsel %vm605_vm11, %v3535_v47, -inf }
0x1d74   :  { %3539 = vmax.xlane.f32.xlu1 %v3538_v62  ;;  %8041 = vmatmul.mubr.msk.bf16.vlgmr.msra.gmra.mrb[80].mxu0 %vm605_vm11, %v3332_v60 }
0x1d75   :  { %v3541_v17 = vsel %vm605_vm11, %v3536_v56, -inf  ;;  %8045 = vmatpush3.bf16.msra.mxu0 %v10035_v38 }
0x1d76   :  { %3542 = vmax.xlane.f32.xlu0 %v3541_v17 }
0x1d7a   :  { %3545 = vmax.xlane.f32.xlu0 %v3544_v28 }
0x1e01   :  { %v3540_v39 = vpop.xlane.xlu1 %3539 }
0x1e02   :  { %v3547_v54 = vsub.f32 %v3535_v47, %v3540_v39 }
0x1e03   :  { %v3543_v46 = vpop.xlane.xlu0 %3542 }
0x1e04   :  { %v3548_v52 = vsub.f32 %v3536_v56, %v3543_v46  ;;  %v3550_v23 = vmul.f32 1.442695, %v3547_v54 }
0x1e06   :  { %v3552_v55 = vmul.f32 1.442695, %v3548_v52 }
0x1e07   :  { %v3546_v34 = vpop.xlane.xlu0 %3545 }
0x1e08   :  { %8767 = vpow2.f32 %v3552_v55  ;;  %v3549_v32 = vsub.f32 %v3537_v61, %v3546_v34 }
0x1e0a   :  { %v3554_v25 = vmul.f32 1.442695, %v3549_v32 }
0x1e0c   :  { %8769 = vpow2.f32 %v3554_v25 }
0x1e0d   :  { %8771 = vpow2.f32 %v3550_v23 }
0x1e12   :  { %v8768_v58 = vpop.eup %8767 }
0x1e13   :  { %v3559_v59 = vsel %vm605_vm11, %v8768_v58, 0.0 }
0x1e14   :  { %3560 = vadd.xlane.f32.xlu0 %v3559_v59 }
0x1e16   :  { %v8770_v29 = vpop.eup %8769 }
0x1e17   :  { %v3562_v53 = vsel %vm605_vm11, %v8770_v29, 0.0  ;;  %v8772_v42 = vpop.eup %8771 }
0x1e18   :  { %3563 = vadd.xlane.f32.xlu1 %v3562_v53  ;;  %v3556_v1 = vsel %vm605_vm11, %v8772_v42, 0.0 }
0x1e1c   :  { %3557 = vadd.xlane.f32.xlu1 %v3556_v1 }
0x1e2a   :  { %3573 = vrot.lane.b32.xlu0 %v9814_v48, %s9018_s4 }
0x1e2d   :  { %3575 = vrot.lane.b32.xlu1 %v9969_v0, %s9018_s4 }
0x1e2e   :  { %3637 = vrot.lane.b32.xlu0 %v9814_v48, %s9019_s26 }
0x1e31   :  { %3641 = vrot.lane.b32.xlu1 %v9814_v48, %s9020_s27 }
0x1e35   :  { %3643 = vrot.lane.b32.xlu1 %v9969_v0, %s9020_s27 }
0x1e39   :  { %3639 = vrot.lane.b32.xlu1 %v9969_v0, %s9019_s26 }
0x1e3f   :  { %v8026_v8 = vpop.f32.mrb[76].mxu0 }
0x1e40   :  { %v3223_v33 = vadd.f32 %v8026_v8, %v9943_v31  ;;  %v3207_v11 = vpop.f32.mrb[77].mxu0 }
0x1e41   :  { %v3221_v35 = vadd.f32 %v3207_v11, %v9945_v24  ;;  %v8027_v15 = vpop.f32.mrb[78].mxu0 }
0x1e42   :  { %v3210_v51 = vpop.f32.mrb[79].mxu0 }
0x1e43   :  { %v3222_v30 = vadd.f32 %v3210_v51, %v9947_v2 }
0x1e47   :  { %v8042_v3 = vpop.f32.mrb[80].mxu0 }
0x1e48   :  { %v3381_v27 = vpop.f32.mrb[81].mxu0  ;;  %v3396_v13 = vpack.c.bf16 %v8042_v3, %v8042_v3 }
0x1e49   :  { %v8043_v12 = vpop.f32.mrb[82].mxu0 }
0x1e4a   :  { %v3384_v21 = vpop.f32.mrb[83].mxu0 }
0x1e4b   :  { %v3395_v41 = vpack.c.bf16 %v3384_v21, %v3381_v27 }
0x1e4d   :  { %8046 = vmatprep.mubr.msk.bf16.mxu0 %vm537_vm10, %v3395_v41 }
0x1e4e   :  { %8047 = vmatmul.mubr.msk.bf16.vlgmr.msra.gmra.mrb[84].mxu0 %vm537_vm10, %v3396_v13 }
0x1ea1   :  { %v3561_v22 = vpop.xlane.xlu0 %3560 }
0x1ea5   :  { %v3574_v45 = vpop.permute.xlu0 %3573  ;;  %v3564_v31 = vpop.xlane.xlu1 %3563 }
0x1ea6   :  { %8058 = vmatprep.subr.bf16.mxu0 %v3574_v45  ;;  %8773 = vrcp.f32 %v3564_v31 }
0x1ea7   :  { %8059 = vmatpush3.bf16.msra.mxu0 %v3574_v45  ;;  %8775 = vrcp.f32 %v3561_v22 }
0x1ea9   :  { %v3558_v24 = vpop.xlane.xlu1 %3557  ;;  %v3638_v39 = vpop.permute.xlu0 %3637 }
0x1eaa   :  { %8777 = vrcp.f32 %v3558_v24 }
0x1ead   :  { %v3576_v2 = vpop.permute.xlu1 %3575 }
0x1eae   :  { %8496 = vmatprep.subr.msk.bf16.mxu0 %vm652_vm12, %v3576_v2  ;;  %v3585_v44 = vsel %vm652_vm12, %v3576_v2, 0 }
0x1eaf   :  { %8061 = vmatpush3.bf16.msra.mxu0 %v3585_v44 }
0x1eb0   :  { %v8774_v43 = vpop.eup %8773 }
0x1eb1   :  { %v3642_v47 = vpop.permute.xlu1 %3641  ;;  %v8776_v7 = vpop.eup %8775  ;;  %v3570_v56 = vmul.f32 %v8774_v43, %v8770_v29 }
0x1eb2   :  { %8497 = vmatprep.subr.msk.bf16.mxu0 %vm537_vm10, %v3642_v47  ;;  %v3569_v61 = vmul.f32 %v8776_v7, %v8768_v58  ;;  %v3652_v46 = vsel %vm537_vm10, %v3642_v47, 0 }
0x1eb3   :  { %v3572_v28 = vpack.c.bf16 %v3570_v56, %v3570_v56 }
0x1eb4   :  { %v8778_v60 = vpop.eup %8777 }
0x1eb5   :  { %v3568_v62 = vmul.f32 %v8778_v60, %v8772_v42  ;;  %v3644_v52 = vpop.permute.xlu1 %3643 }
0x1eb6   :  { %v3655_v54 = vsel %vm537_vm10, %v3644_v52, 0 }
0x1eb7   :  { %v3571_v17 = vpack.c.bf16 %v3569_v61, %v3568_v62 }
0x1eb9   :  { %8062 = vmatprep.mubr.msk.bf16.mxu0 %vm605_vm11, %v3571_v17  ;;  %v3640_v55 = vpop.permute.xlu1 %3639 }
0x1eba   :  { %8063 = vmatmul.mubr.msk.bf16.vlgmr.msra.gmra.mrb[88].mxu0 %vm605_vm11, %v3572_v28 }
0x1ebb   :  { %8067 = vmatpush3.bf16.xpose.msra.mxu0 %v3652_v46  ;;  %8070 = vmatprep.mubr.msk.bf16.mxu0 %vm537_vm10, %v3638_v39 }
0x1ebc   :  { %8498 = vmatprep.subr.msk.bf16.mxu0 %vm537_vm10, %v3644_v52 }
0x1ec3   :  { %8069 = vmatpush3.bf16.xpose.msra.mxu0 %v3655_v54 }
0x1ec4   :  { %8501 = vmatprep.subr.msk.bf16.mxu0 %vm652_vm12, %v9917_v26 }
0x1eca   :  { %8071 = vmatmul.mubr.msk.bf16.vlgmr.msra.gmra.mrb[92].mxu0 %vm537_vm10, %v3640_v55 }
0x1ecb   :  { %8089 = vmatpush3.bf16.msra.mxu0 %v9923_v16 }
0x1f21   :  { %v8048_v34 = vpop.f32.mrb[84].mxu0 }
0x1f22   :  { %v10071_v32 = vadd.f32 %v8048_v34, %v3223_v33  ;;  %v3440_v23 = vpop.f32.mrb[85].mxu0 }
0x1f23   :  { %v10073_v25 = vadd.f32 %v3440_v23, %v3221_v35  ;;  %v8049_v58 = vpop.f32.mrb[86].mxu0 }
0x1f24   :  { %v3443_v59 = vpop.f32.mrb[87].mxu0 }
0x1f25   :  { %v10075_v29 = vadd.f32 %v3443_v59, %v3222_v30 }
0x1f8d   :  { %v8064_v53 = vpop.f32.mrb[88].mxu0 }
0x1f8e   :  { %v3621_v42 = vpop.f32.mrb[89].mxu0  ;;  %v3636_v11 = vpack.c.bf16 %v8064_v53, %v8064_v53 }
0x1f8f   :  { %v8065_v1 = vpop.f32.mrb[90].mxu0 }
0x1f90   :  { %v3624_v8 = vpop.f32.mrb[91].mxu0 }
0x1f91   :  { %v3635_v26 = vpack.c.bf16 %v3624_v8, %v3621_v42 }
0x1f93   :  { %8090 = vmatprep.mubr.msk.bf16.mxu0 %vm537_vm10, %v3635_v26 }
0x1f94   :  { %8091 = vmatmul.mubr.msk.bf16.vlgmr.msra.gmra.mrb[96].mxu0 %vm537_vm10, %v3636_v11 }
0x1f9d   :  { %v8072_v15 = vpop.f32.mrb[92].mxu0 }
0x1f9e   :  { %v3691_v33 = vpop.f32.mrb[93].mxu0  ;;  %v3707_v51 = vmul.f32 %v8072_v15, %v9831_v63 }
0x1f9f   :  { %v3705_v35 = vmul.f32 %v3691_v33, %v9831_v63  ;;  %v8073_v3 = vpop.f32.mrb[94].mxu0 }
0x1fa0   :  { %v3694_v27 = vpop.f32.mrb[95].mxu0  ;;  %v3710_v21 = vadd.f32 %v3707_v51, %v9355_v6 }
0x1fa1   :  { %v3708_v30 = vadd.f32 %v3705_v35, %v9341_v36  ;;  %v3706_v12 = vmul.f32 %v3694_v27, %v9831_v63 }
0x1fa2   :  { %v3717_v45 = vsel %vm605_vm11, %v3710_v21, -inf }
0x1fa3   :  { %v3709_v41 = vadd.f32 %v3706_v12, %v9347_v40  ;;  %v3711_v13 = vsel %vm605_vm11, %v3708_v30, -inf }
0x1fa4   :  { %3712 = vmax.xlane.f32.xlu0 %v3711_v13 }
0x1fa5   :  { %v3714_v22 = vsel %vm605_vm11, %v3709_v41, -inf }
0x1fa6   :  { %3715 = vmax.xlane.f32.xlu1 %v3714_v22 }
0x1fa8   :  { %3718 = vmax.xlane.f32.xlu0 %v3717_v45 }
0x2031   :  { %v3713_v31 = vpop.xlane.xlu0 %3712 }
0x2032   :  { %v3720_v24 = vsub.f32 %v3708_v30, %v3713_v31 }
0x2033   :  { %v3716_v2 = vpop.xlane.xlu1 %3715 }
0x2034   :  { %v3723_v44 = vmul.f32 1.442695, %v3720_v24  ;;  %v3721_v43 = vsub.f32 %v3709_v41, %v3716_v2 }
0x2035   :  { %v3719_v47 = vpop.xlane.xlu0 %3718 }
0x2036   :  { %8779 = vpow2.f32 %v3723_v44  ;;  %v3725_v7 = vmul.f32 1.442695, %v3721_v43  ;;  %v3722_v60 = vsub.f32 %v3710_v21, %v3719_v47 }
0x2038   :  { %8781 = vpow2.f32 %v3725_v7  ;;  %v3727_v56 = vmul.f32 1.442695, %v3722_v60 }
0x203a   :  { %8783 = vpow2.f32 %v3727_v56 }
0x2040   :  { %v8780_v62 = vpop.eup %8779 }
0x2041   :  { %v3729_v61 = vsel %vm605_vm11, %v8780_v62, 0.0 }
0x2042   :  { %v8782_v17 = vpop.eup %8781  ;;  %3730 = vadd.xlane.f32.xlu0 %v3729_v61 }
0x2043   :  { %v3732_v46 = vsel %vm605_vm11, %v8782_v17, 0.0 }
0x2044   :  { %v8784_v28 = vpop.eup %8783 }
0x2045   :  { %v3735_v39 = vsel %vm605_vm11, %v8784_v28, 0.0 }
0x2046   :  { %3736 = vadd.xlane.f32.xlu1 %v3735_v39  ;;  %3733 = vadd.xlane.f32.xlu0 %v3732_v46 }
0x2057   :  { %3748 = vrot.lane.b32.xlu1 %v9969_v0, %s9021_s29 }
0x205b   :  { %3922 = vrot.lane.b32.xlu1 %v9814_v48, %s9022_s30 }
0x205c   :  { %3746 = vrot.lane.b32.xlu0 %v9814_v48, %s9021_s29 }
0x205f   :  { %3924 = vrot.lane.b32.xlu1 %v9969_v0, %s9022_s30 }
0x2060   :  { %3918 = vrot.lane.b32.xlu0 %v9814_v48, %s9023_s12 }
0x2063   :  { %3920 = vrot.lane.b32.xlu1 %v9969_v0, %s9023_s12 }
0x2064   :  { %4152 = vrot.lane.b32.xlu0 %v9814_v48, %s9024_s13 }
0x2067   :  { %4154 = vrot.lane.b32.xlu1 %v9969_v0, %s9024_s13  ;;  %v10107_v52 = vpop.f32.mrb[96].mxu0 }
0x2068   :  { %4148 = vrot.lane.b32.xlu0 %v9814_v48, %s9025_s14  ;;  %v10111_v54 = vpop.f32.mrb[97].mxu0 }
0x2069   :  { %v8093_v55 = vpop.f32.mrb[98].mxu0 }
0x206a   :  { %v10113_v34 = vpop.f32.mrb[99].mxu0 }
0x206b   :  { %4150 = vrot.lane.b32.xlu1 %v9969_v0, %s9025_s14 }
0x20cf   :  { %v3731_v23 = vpop.xlane.xlu0 %3730 }
0x20d0   :  { %8785 = vrcp.f32 %v3731_v23 }
0x20d3   :  { %v3734_v58 = vpop.xlane.xlu0 %3733  ;;  %v3737_v59 = vpop.xlane.xlu1 %3736 }
0x20d4   :  { %8787 = vrcp.f32 %v3734_v58 }
0x20d5   :  { %8789 = vrcp.f32 %v3737_v59 }
0x20d7   :  { %v3747_v53 = vpop.permute.xlu0 %3746  ;;  %v3749_v42 = vpop.permute.xlu1 %3748 }
0x20d8   :  { %8074 = vmatprep.subr.bf16.mxu1 %v3747_v53  ;;  %v3758_v8 = vsel %vm652_vm12, %v3749_v42, 0 }
0x20d9   :  { %8075 = vmatpush3.bf16.msra.mxu1 %v3747_v53 }
0x20da   :  { %8499 = vmatprep.subr.msk.bf16.mxu1 %vm652_vm12, %v3749_v42  ;;  %v8786_v1 = vpop.eup %8785 }
0x20db   :  { %v3741_v15 = vmul.f32 %v8786_v1, %v8780_v62  ;;  %v3923_v27 = vpop.permute.xlu1 %3922  ;;  %v3919_v22 = vpop.permute.xlu0 %3918 }
0x20dc   :  { %v3933_v45 = vsel %vm537_vm10, %v3923_v27, 0 }
0x20dd   :  { %8077 = vmatpush3.bf16.msra.mxu1 %v3758_v8 }
0x20de   :  { %v8788_v26 = vpop.eup %8787  ;;  %8500 = vmatprep.subr.msk.bf16.mxu1 %vm652_vm12, %v9869_v49 }
0x20df   :  { %v8790_v11 = vpop.eup %8789  ;;  %v3742_v33 = vmul.f32 %v8788_v26, %v8782_v17  ;;  %v3925_v31 = vpop.permute.xlu1 %3924 }
0x20e0   :  { %v3743_v51 = vmul.f32 %v8790_v11, %v8784_v28  ;;  %v3936_v24 = vsel %vm537_vm10, %v3925_v31, 0  ;;  %v4153_v2 = vpop.permute.xlu0 %4152 }
0x20e1   :  { %v3744_v35 = vpack.c.bf16 %v3742_v33, %v3741_v15  ;;  %v4163_v47 = vsel %vm537_vm10, %v4153_v2, 0 }
0x20e2   :  { %v3745_v3 = vpack.c.bf16 %v3743_v51, %v3743_v51 }
0x20e3   :  { %8078 = vmatprep.mubr.msk.bf16.mxu1 %vm605_vm11, %v3744_v35  ;;  %v3921_v44 = vpop.permute.xlu1 %3920 }
0x20e4   :  { %8079 = vmatmul.mubr.msk.bf16.vlgmr.msra.gmra.mrb[92].mxu1 %vm605_vm11, %v3745_v3  ;;  %v4149_v43 = vpop.permute.xlu0 %4148 }
0x20e5   :  { %8083 = vmatpush3.bf16.msra.mxu1 %v9877_v50 }
0x20e6   :  { %8502 = vmatprep.subr.msk.bf16.mxu1 %vm537_vm10, %v3923_v27 }
0x20e7   :  { %v4155_v7 = vpop.permute.xlu1 %4154 }
0x20e8   :  { %v4166_v60 = vsel %vm537_vm10, %v4155_v7, 0 }
0x20eb   :  { %v4151_v56 = vpop.permute.xlu1 %4150 }
0x21b7   :  { %v8080_v30 = vpop.f32.mrb[92].mxu1 }
0x21b8   :  { %v3794_v12 = vpop.f32.mrb[93].mxu1  ;;  %v3809_v13 = vpack.c.bf16 %v8080_v30, %v8080_v30 }
0x21b9   :  { %v8081_v21 = vpop.f32.mrb[94].mxu1 }
0x21ba   :  { %v3797_v41 = vpop.f32.mrb[95].mxu1 }
0x21bb   :  { %v3808_v49 = vpack.c.bf16 %v3797_v41, %v3794_v12 }
0x21bd   :  { %8084 = vmatprep.mubr.msk.bf16.mxu1 %vm537_vm10, %v3808_v49 }
0x21be   :  { %8085 = vmatmul.mubr.msk.bf16.vlgmr.msra.gmra.mrb[96].mxu1 %vm537_vm10, %v3809_v13 }
0x21bf   :  { %8095 = vmatpush3.bf16.xpose.msra.mxu1 %v3933_v45  ;;  %8098 = vmatprep.mubr.msk.bf16.mxu1 %vm537_vm10, %v3919_v22 }
0x21c0   :  { %8503 = vmatprep.subr.msk.bf16.mxu1 %vm537_vm10, %v3925_v31 }
0x21c7   :  { %8097 = vmatpush3.bf16.xpose.msra.mxu1 %v3936_v24 }
0x21c8   :  { %8506 = vmatprep.subr.msk.bf16.mxu1 %vm537_vm10, %v4153_v2 }
0x21ce   :  { %8099 = vmatmul.mubr.msk.bf16.vlgmr.msra.gmra.mrb[100].mxu1 %vm537_vm10, %v3921_v44 }
0x21cf   :  { %8117 = vmatpush3.bf16.xpose.msra.mxu1 %v4163_v47  ;;  %8120 = vmatprep.mubr.msk.bf16.mxu1 %vm537_vm10, %v4149_v43 }
0x21d0   :  { %8507 = vmatprep.subr.msk.bf16.mxu1 %vm537_vm10, %v4155_v7 }
0x21d7   :  { %8119 = vmatpush3.bf16.xpose.msra.mxu1 %v4166_v60 }
0x21d8   :  { %8138 = vmatprep.subr.bf16.mxu1 %v9015_v5 }
0x21de   :  { %8121 = vmatmul.mubr.msk.bf16.vlgmr.msra.gmra.mrb[104].mxu1 %vm537_vm10, %v4151_v56 }
0x21df   :  { %8142 = vmatprep.mubr.msk.bf16.mxu1 %vm9016_vm9, %v9015_v5 }
0x2291   :  { %v8086_v62 = vpop.f32.mrb[96].mxu1 }
0x2292   :  { %v10142_v61 = vadd.f32 %v10107_v52, %v8086_v62  ;;  %v3850_v17 = vpop.f32.mrb[97].mxu1 }
0x2293   :  { %v10145_v28 = vadd.f32 %v10111_v54, %v3850_v17  ;;  %v8087_v39 = vpop.f32.mrb[98].mxu1 }
0x2294   :  { %v3853_v46 = vpop.f32.mrb[99].mxu1 }
0x2295   :  { %v10148_v55 = vadd.f32 %v10113_v34, %v3853_v46 }
0x22a1   :  { %v8100_v23 = vpop.f32.mrb[100].mxu1 }
0x22a2   :  { %v3972_v58 = vpop.f32.mrb[101].mxu1  ;;  %v3988_v59 = vmul.f32 %v8100_v23, %v9831_v63 }
0x22a3   :  { %v3986_v53 = vmul.f32 %v3972_v58, %v9831_v63  ;;  %v8101_v42 = vpop.f32.mrb[102].mxu1 }
0x22a4   :  { %v3975_v1 = vpop.f32.mrb[103].mxu1  ;;  %v3991_v54 = vadd.f32 %v3988_v59, %v9355_v6 }
0x22a5   :  { %v3989_v52 = vadd.f32 %v3986_v53, %v9341_v36  ;;  %v3987_v8 = vmul.f32 %v3975_v1, %v9831_v63 }
0x22a6   :  { %v3998_v15 = vsel %vm605_vm11, %v3991_v54, -inf }
0x22a7   :  { %v3990_v26 = vadd.f32 %v3987_v8, %v9347_v40  ;;  %v3992_v11 = vsel %vm605_vm11, %v3989_v52, -inf }
0x22a8   :  { %3993 = vmax.xlane.f32.xlu0 %v3992_v11 }
0x22a9   :  { %v3995_v34 = vsel %vm605_vm11, %v3990_v26, -inf }
0x22aa   :  { %3996 = vmax.xlane.f32.xlu1 %v3995_v34 }
0x22ac   :  { %3999 = vmax.xlane.f32.xlu0 %v3998_v15 }
0x22b1   :  { %v8122_v33 = vpop.f32.mrb[104].mxu1 }
0x22b2   :  { %v4202_v51 = vpop.f32.mrb[105].mxu1  ;;  %v4218_v56 = vmul.f32 %v8122_v33, %v9831_v63 }
0x22b3   :  { %v8123_v35 = vpop.f32.mrb[106].mxu1  ;;  %v4216_v7 = vmul.f32 %v4202_v51, %v9831_v63 }
0x22b4   :  { %v4205_v3 = vpop.f32.mrb[107].mxu1  ;;  %v4221_v39 = vadd.f32 %v4218_v56, %v9355_v6 }
0x22b5   :  { %v4217_v60 = vmul.f32 %v4205_v3, %v9831_v63  ;;  %v4219_v62 = vadd.f32 %v4216_v7, %v9341_v36 }
0x22b6   :  { %v4228_v58 = vsel %vm605_vm11, %v4221_v39, -inf }
0x22b7   :  { %v4220_v17 = vadd.f32 %v4217_v60, %v9347_v40  ;;  %v4222_v46 = vsel %vm605_vm11, %v4219_v62, -inf }
0x22b9   :  { %v4225_v23 = vsel %vm605_vm11, %v4220_v17, -inf }
0x2335   :  { %v3994_v27 = vpop.xlane.xlu0 %3993 }
0x2336   :  { %v4001_v30 = vsub.f32 %v3989_v52, %v3994_v27 }
0x2337   :  { %v3997_v12 = vpop.xlane.xlu1 %3996 }
0x2338   :  { %v4004_v21 = vmul.f32 1.442695, %v4001_v30  ;;  %v4002_v41 = vsub.f32 %v3990_v26, %v3997_v12 }
0x2339   :  { %v4000_v49 = vpop.xlane.xlu0 %3999 }
0x233a   :  { %8791 = vpow2.f32 %v4004_v21  ;;  %v4006_v13 = vmul.f32 1.442695, %v4002_v41  ;;  %v4003_v22 = vsub.f32 %v3991_v54, %v4000_v49 }
0x233c   :  { %8793 = vpow2.f32 %v4006_v13  ;;  %v4008_v45 = vmul.f32 1.442695, %v4003_v22 }
0x233e   :  { %8795 = vpow2.f32 %v4008_v45 }
0x2344   :  { %v8792_v31 = vpop.eup %8791 }
0x2345   :  { %v4010_v24 = vsel %vm605_vm11, %v8792_v31, 0.0 }
0x2346   :  { %v8794_v2 = vpop.eup %8793  ;;  %4011 = vadd.xlane.f32.xlu0 %v4010_v24 }
0x2347   :  { %v4013_v47 = vsel %vm605_vm11, %v8794_v2, 0.0 }
0x2348   :  { %v8796_v44 = vpop.eup %8795 }
0x2349   :  { %v4016_v43 = vsel %vm605_vm11, %v8796_v44, 0.0 }
0x234a   :  { %4017 = vadd.xlane.f32.xlu1 %v4016_v43  ;;  %4014 = vadd.xlane.f32.xlu0 %v4013_v47  ;;  %v10192_v43 = vld [vmem:[%s10916_s2 + $0x32] ss:$0 sm:$0xff] }
0x234b   :  { %v3462_v47 = vadd.f32 %v10192_v43, %v10075_v29  ;;  %v3463_v7 = vadd.f32 %v10192_v43, %v10071_v32 }
0x234d   :  { %v10199_v60 = vadd.f32 %v3462_v47, %v9757_v57  ;;  %v10202_v56 = vadd.f32 %v3463_v7, %v9791_v4 }
0x234f   :  { %v4389_v29 = vmul.f32 %v10202_v56, %v10202_v56 }
0x2351   :  { %v4399_v57 = vsel %vm394_vm8, %v4389_v29, 0.0 }
0x235b   :  { %4029 = vrot.lane.b32.xlu1 %v9969_v0, %s9026_s17 }
0x2360   :  { %4027 = vrot.lane.b32.xlu0 %v9814_v48, %s9026_s17 }
0x237f   :  { %4223 = vmax.xlane.f32.xlu1 %v4222_v46  ;;  %4226 = vmax.xlane.f32.xlu0 %v4225_v23 }
0x2383   :  { %4229 = vmax.xlane.f32.xlu0 %v4228_v58 }
0x23d3   :  { %v4012_v59 = vpop.xlane.xlu0 %4011 }
0x23d4   :  { %8797 = vrcp.f32 %v4012_v59 }
0x23d7   :  { %v4015_v53 = vpop.xlane.xlu0 %4014  ;;  %v4018_v42 = vpop.xlane.xlu1 %4017 }
0x23d8   :  { %8799 = vrcp.f32 %v4015_v53 }
0x23d9   :  { %8801 = vrcp.f32 %v4018_v42 }
0x23db   :  { %v4028_v1 = vpop.permute.xlu0 %4027  ;;  %v4030_v52 = vpop.permute.xlu1 %4029 }
0x23dc   :  { %8102 = vmatprep.subr.bf16.mxu0 %v4028_v1  ;;  %v4039_v54 = vsel %vm652_vm12, %v4030_v52, 0 }
0x23dd   :  { %8103 = vmatpush3.bf16.msra.mxu0 %v4028_v1 }
0x23de   :  { %8504 = vmatprep.subr.msk.bf16.mxu0 %vm652_vm12, %v4030_v52  ;;  %v8798_v8 = vpop.eup %8797 }
0x23df   :  { %v4022_v34 = vmul.f32 %v8798_v8, %v8792_v31 }
0x23e1   :  { %8105 = vmatpush3.bf16.msra.mxu0 %v4039_v54 }
0x23e2   :  { %v8800_v26 = vpop.eup %8799  ;;  %8505 = vmatprep.subr.msk.bf16.mxu0 %vm652_vm12, %v10000_v9 }
0x23e3   :  { %v8802_v11 = vpop.eup %8801  ;;  %v4023_v15 = vmul.f32 %v8800_v26, %v8794_v2 }
0x23e4   :  { %v4024_v33 = vmul.f32 %v8802_v11, %v8796_v44 }
0x23e5   :  { %v4025_v51 = vpack.c.bf16 %v4023_v15, %v4022_v34 }
0x23e6   :  { %v4026_v35 = vpack.c.bf16 %v4024_v33, %v4024_v33 }
0x23e7   :  { %8106 = vmatprep.mubr.msk.bf16.mxu0 %vm605_vm11, %v4025_v51 }
0x23e8   :  { %8107 = vmatmul.mubr.msk.bf16.vlgmr.msra.gmra.mrb[100].mxu0 %vm605_vm11, %v4026_v35 }
0x23e9   :  { %8111 = vmatpush3.bf16.msra.mxu0 %v10006_v10 }
0x240c   :  { %v4227_v3 = vpop.xlane.xlu0 %4226  ;;  %v4224_v27 = vpop.xlane.xlu1 %4223 }
0x240d   :  { %v4232_v30 = vsub.f32 %v4220_v17, %v4227_v3  ;;  %v4231_v21 = vsub.f32 %v4219_v62, %v4224_v27 }
0x240f   :  { %v4236_v12 = vmul.f32 1.442695, %v4232_v30  ;;  %v4234_v49 = vmul.f32 1.442695, %v4231_v21 }
0x2410   :  { %v4230_v41 = vpop.xlane.xlu0 %4229 }
0x2411   :  { %8803 = vpow2.f32 %v4236_v12  ;;  %v4233_v9 = vsub.f32 %v4221_v39, %v4230_v41 }
0x2413   :  { %v4238_v13 = vmul.f32 1.442695, %v4233_v9 }
0x2415   :  { %8805 = vpow2.f32 %v4238_v13 }
0x2416   :  { %8807 = vpow2.f32 %v4234_v49 }
0x241b   :  { %v8804_v22 = vpop.eup %8803 }
0x241c   :  { %v4243_v45 = vsel %vm605_vm11, %v8804_v22, 0.0 }
0x241d   :  { %4244 = vadd.xlane.f32.xlu0 %v4243_v45 }
0x241f   :  { %v8806_v31 = vpop.eup %8805 }
0x2420   :  { %v4246_v24 = vsel %vm605_vm11, %v8806_v31, 0.0  ;;  %v8808_v2 = vpop.eup %8807 }
0x2421   :  { %4247 = vadd.xlane.f32.xlu1 %v4246_v24  ;;  %v4240_v44 = vsel %vm605_vm11, %v8808_v2, 0.0  ;;  %v8961_v24 = vld [vmem:[%s10919_s5 + $0x10] sm:$0xff]  }
0x2425   :  { %4241 = vadd.xlane.f32.xlu1 %v4240_v44 }
0x2433   :  { %4257 = vrot.lane.b32.xlu0 %v9814_v48, %s9027_s18  ;;  %v3461_v48 = vadd.f32 %v10192_v43, %v10073_v25  ;;  %v8577_v25 = vld [vmem:[%s10921_s7] sm:$0xff]  }
0x2434   :  { %8139 = vmatpush3.bf16.msra.mxu1 %v8577_v25 }
0x2435   :  { %v4381_v62 = vadd.f32 %v3461_v48, %v9759_v19  ;;  %8140 = vmatprep.subr.bf16.mxu1 %v9015_v5  ;;  %v8578_v19 = vld [vmem:[%s10921_s7 + $0x8] sm:$0xff]  }
0x2436   :  { %4259 = vrot.lane.b32.xlu1 %v9969_v0, %s9027_s18  ;;  %v4388_v0 = vmul.f32 %v10199_v60, %v10199_v60 }
0x2437   :  { %v4387_v32 = vmul.f32 %v4381_v62, %v4381_v62 }
0x2438   :  { %v4396_v17 = vsel %vm394_vm8, %v4388_v0, 0.0  ;;  %8141 = vmatpush3.bf16.msra.mxu1 %v8578_v19 }
0x2439   :  { %v4393_v4 = vsel %vm394_vm8, %v4387_v32, 0.0  ;;  %8174 = vmatprep.subr.bf16.mxu1 %v9015_v5 }
0x2452   :  { %4397 = vadd.xlane.f32.xlu0 %v4396_v17 }
0x2456   :  { %4400 = vadd.xlane.f32.xlu0 %v4399_v57 }
0x245a   :  { %4394 = vadd.xlane.f32.xlu1 %v4393_v4 }
0x24aa   :  { %v4245_v39 = vpop.xlane.xlu0 %4244 }
0x24ab   :  { %8809 = vrcp.f32 %v4245_v39 }
0x24ae   :  { %v4258_v46 = vpop.permute.xlu0 %4257  ;;  %v4248_v23 = vpop.xlane.xlu1 %4247 }
0x24af   :  { %8124 = vmatprep.subr.bf16.mxu0 %v4258_v46 }
0x24b2   :  { %v4242_v58 = vpop.xlane.xlu1 %4241 }
0x24b3   :  { %8811 = vrcp.f32 %v4242_v58 }
0x24b4   :  { %8813 = vrcp.f32 %v4248_v23 }
0x24b5   :  { %v8810_v59 = vpop.eup %8809 }
0x24b6   :  { %v4253_v26 = vmul.f32 %v8810_v59, %v8804_v22  ;;  %v4260_v51 = vpop.permute.xlu1 %4259 }
0x24b7   :  { %v4269_v3 = vsel %vm652_vm12, %v4260_v51, 0 }
0x24bb   :  { %v8108_v53 = vpop.f32.mrb[100].mxu0 }
0x24bc   :  { %v4075_v42 = vpop.f32.mrb[101].mxu0  ;;  %v4090_v34 = vpack.c.bf16 %v8108_v53, %v8108_v53 }
0x24bd   :  { %v8812_v1 = vpop.eup %8811  ;;  %v8109_v52 = vpop.f32.mrb[102].mxu0 }
0x24be   :  { %v4078_v8 = vpop.f32.mrb[103].mxu0  ;;  %v4252_v54 = vmul.f32 %v8812_v1, %v8808_v2  ;;  %v8814_v33 = vpop.eup %8813  ;;  %v8962_v2 = vld [vmem:[%s10919_s5 + $0x18] sm:$0xff]  }
0x24bf   :  { %v4089_v11 = vpack.c.bf16 %v4078_v8, %v4075_v42  ;;  %v4254_v35 = vmul.f32 %v8814_v33, %v8806_v31 }
0x24c0   :  { %v4255_v15 = vpack.c.bf16 %v4253_v26, %v4252_v54 }
0x24c1   :  { %8112 = vmatprep.mubr.msk.bf16.mxu0 %vm537_vm10, %v4089_v11  ;;  %v4256_v27 = vpack.c.bf16 %v4254_v35, %v4254_v35 }
0x24c2   :  { %8113 = vmatmul.mubr.msk.bf16.vlgmr.msra.gmra.mrb[104].mxu0 %vm537_vm10, %v4090_v34 }
0x24c3   :  { %8125 = vmatpush3.bf16.msra.mxu0 %v4258_v46  ;;  %8128 = vmatprep.mubr.msk.bf16.mxu0 %vm605_vm11, %v4255_v15 }
0x24c4   :  { %8508 = vmatprep.subr.msk.bf16.mxu0 %vm652_vm12, %v4260_v51 }
0x24c7   :  { %8127 = vmatpush3.bf16.msra.mxu0 %v4269_v3 }
0x24c8   :  { %8509 = vmatprep.subr.msk.bf16.mxu0 %vm652_vm12, %v10029_v37 }
0x24ca   :  { %8129 = vmatmul.mubr.msk.bf16.vlgmr.msra.gmra.mrb[108].mxu0 %vm605_vm11, %v4256_v27 }
0x24cb   :  { %8133 = vmatpush3.bf16.msra.mxu0 %v10035_v38 }
0x24cc   :  { %8154 = vmatprep.subr.bf16.mxu0 %v9015_v5 }
0x24df   :  { %v4398_v30 = vpop.xlane.xlu0 %4397 }
0x24e0   :  { %v4412_v12 = vmul.f32 0.03125, %v4398_v30 }
0x24e2   :  { %v4418_v21 = vadd.f32 1e-06, %v4412_v12 }
0x24e4   :  { %8815 = vrsqrt.f32 %v4418_v21 }
0x24e7   :  { %v4395_v41 = vpop.xlane.xlu1 %4394 }
0x24e8   :  { %v4411_v9 = vmul.f32 0.03125, %v4395_v41 }
0x24ea   :  { %v4417_v49 = vadd.f32 1e-06, %v4411_v9 }
0x24ec   :  { %8817 = vrsqrt.f32 %v4417_v49 }
0x24ee   :  { %v8816_v13 = vpop.eup %8815 }
0x24ef   :  { %v10233_v45 = vmul.f32 %v8816_v13, %v10199_v60 }
0x24f6   :  { %v8818_v22 = vpop.eup %8817 }
0x24f7   :  { %v10235_v37 = vmul.f32 %v8818_v22, %v4381_v62 }
0x24f9   :  { %v4447_v31 = vpack.c.bf16 %v10233_v45, %v10235_v37 }
0x24fb   :  { %8143 = vmatmul.mubr.msk.bf16.vlgmr.msra.gmra.mrb[108].mxu1 %vm394_vm8, %v4447_v31 }
0x24fc   :  { %8146 = vmatprep.mubr.msk.bf16.mxu1 %vm9016_vm9, %v9015_v5  ;;  %8175 = vmatpush3.bf16.msra.mxu1 %v8961_v24 }
0x24fd   :  { %8176 = vmatprep.subr.bf16.mxu1 %v9015_v5 }
0x2500   :  { %8177 = vmatpush3.bf16.msra.mxu1 %v8962_v2 }
0x2595   :  { %v8114_v44 = vpop.f32.mrb[104].mxu0 }
0x2596   :  { %v4147_v47 = vadd.f32 %v8114_v44, %v10142_v61  ;;  %v4131_v7 = vpop.f32.mrb[105].mxu0 }
0x2597   :  { %v4145_v60 = vadd.f32 %v4131_v7, %v10145_v28  ;;  %v8115_v48 = vpop.f32.mrb[106].mxu0 }
0x2598   :  { %v4134_v0 = vpop.f32.mrb[107].mxu0 }
0x2599   :  { %v4146_v62 = vadd.f32 %v4134_v0, %v10148_v55  ;;  %v8579_v55 = vld [vmem:[%s10922_s8] sm:$0xff]  }
0x259d   :  { %v8130_v17 = vpop.f32.mrb[108].mxu0 }
0x259e   :  { %v4305_v29 = vpop.f32.mrb[109].mxu0  ;;  %v4320_v25 = vpack.c.bf16 %v8130_v17, %v8130_v17 }
0x259f   :  { %v8131_v57 = vpop.f32.mrb[110].mxu0 }
0x25a0   :  { %v4308_v32 = vpop.f32.mrb[111].mxu0 }
0x25a1   :  { %v4319_v4 = vpack.c.bf16 %v4308_v32, %v4305_v29 }
0x25a3   :  { %8134 = vmatprep.mubr.msk.bf16.mxu0 %vm537_vm10, %v4319_v4 }
0x25a4   :  { %8135 = vmatmul.mubr.msk.bf16.vlgmr.msra.gmra.mrb[112].mxu0 %vm537_vm10, %v4320_v25 }
0x25a5   :  { %8162 = vmatprep.mubr.msk.bf16.mxu0 %vm9016_vm9, %v9015_v5  ;;  %8155 = vmatpush3.bf16.msra.mxu0 %v8579_v55 }
0x25a6   :  { %8156 = vmatprep.subr.bf16.mxu0 %v9015_v5 }
0x25ce   :  { %v4505_v61 = vpop.f32.mrb[108].mxu1 }
0x25cf   :  { %v8144_v19 = vpop.f32.mrb[109].mxu1 }
0x25d0   :  { %v4508_v28 = vpop.f32.mrb[110].mxu1 }
0x25d1   :  { %v8145_v39 = vpop.f32.mrb[111].mxu1 }
0x2677   :  { %v8136_v46 = vpop.f32.mrb[112].mxu0 }
0x2678   :  { %v4377_v23 = vadd.f32 %v8136_v46, %v4147_v47  ;;  %v4361_v58 = vpop.f32.mrb[113].mxu0 }
0x2679   :  { %v4375_v59 = vadd.f32 %v4361_v58, %v4145_v60  ;;  %v8137_v53 = vpop.f32.mrb[114].mxu0 }
0x267a   :  { %v4380_v42 = vadd.f32 %v10192_v43, %v4377_v23  ;;  %v4364_v1 = vpop.f32.mrb[115].mxu0 }
0x267b   :  { %v4378_v52 = vadd.f32 %v10192_v43, %v4375_v59  ;;  %v4376_v8 = vadd.f32 %v4364_v1, %v4146_v62 }
0x267c   :  { %v4386_v54 = vadd.f32 %v4380_v42, %v9800_v14  ;;  %v8581_v14 = vld [vmem:[%s10922_s8 + $0x10] sm:$0xff]  }
0x267d   :  { %v4384_v26 = vadd.f32 %v4378_v52, %v9793_v18  ;;  %v4379_v11 = vadd.f32 %v10192_v43, %v4376_v8  ;;  %v8580_v18 = vld [vmem:[%s10922_s8 + $0x8] sm:$0xff]   ;;  %v4401_v43 = vpop.xlane.xlu0 %4400 }
0x267e   :  { %v4392_v35 = vmul.f32 %v4386_v54, %v4386_v54  ;;  %8157 = vmatpush3.bf16.msra.mxu0 %v8580_v18  ;;  %v4413_v30 = vmul.f32 0.03125, %v4401_v43 }
0x267f   :  { %v4385_v34 = vadd.f32 %v4379_v11, %v9802_v20  ;;  %v4390_v15 = vmul.f32 %v4384_v26, %v4384_v26  ;;  %8158 = vmatprep.subr.bf16.mxu0 %v9015_v5  ;;  %v8582_v20 = vld [vmem:[%s10922_s8 + $0x18] sm:$0xff]  }
0x2680   :  { %v4408_v27 = vsel %vm394_vm8, %v4392_v35, 0.0  ;;  %v4419_v12 = vadd.f32 1e-06, %v4413_v30 }
0x2681   :  { %v4402_v33 = vsel %vm394_vm8, %v4390_v15, 0.0  ;;  %v4391_v51 = vmul.f32 %v4385_v34, %v4385_v34 }
0x2682   :  { %4403 = vadd.xlane.f32.xlu1 %v4402_v33  ;;  %8159 = vmatpush3.bf16.msra.mxu0 %v8581_v14  ;;  %8819 = vrsqrt.f32 %v4419_v12 }
0x2683   :  { %v4405_v3 = vsel %vm394_vm8, %v4391_v51, 0.0  ;;  %8160 = vmatprep.subr.bf16.mxu0 %v9015_v5 }
0x2684   :  { %4406 = vadd.xlane.f32.xlu0 %v4405_v3 }
0x2686   :  { %4409 = vadd.xlane.f32.xlu1 %v4408_v27  ;;  %8161 = vmatpush3.bf16.msra.mxu0 %v8582_v20 }
0x268c   :  { %v8820_v0 = vpop.eup %8819 }
0x268d   :  { %v10286_v17 = vmul.f32 %v8820_v0, %v10202_v56 }
0x2697   :  { %4536 = vrot.lane.b32.xlu1 %v4508_v28, %s9018_s4 }
0x269a   :  { %4534 = vrot.lane.b32.xlu0 %v4505_v61, %s9018_s4 }
0x270f   :  { %v4404_v21 = vpop.xlane.xlu1 %4403 }
0x2710   :  { %v4414_v41 = vmul.f32 0.03125, %v4404_v21 }
0x2711   :  { %v4407_v9 = vpop.xlane.xlu0 %4406 }
0x2712   :  { %v4420_v49 = vadd.f32 1e-06, %v4414_v41  ;;  %v4415_v13 = vmul.f32 0.03125, %v4407_v9 }
0x2713   :  { %v4410_v22 = vpop.xlane.xlu1 %4409 }
0x2714   :  { %8821 = vrsqrt.f32 %v4420_v49  ;;  %v4416_v31 = vmul.f32 0.03125, %v4410_v22  ;;  %v4421_v2 = vadd.f32 1e-06, %v4415_v13 }
0x2715   :  { %v4535_v24 = vpop.permute.xlu0 %4534 }
0x2716   :  { %v4422_v44 = vadd.f32 1e-06, %v4416_v31  ;;  %v4552_v7 = vmul.f32 %v4535_v24, %v4505_v61 }
0x2717   :  { %v4537_v47 = vpop.permute.xlu1 %4536 }
0x2718   :  { %8823 = vrsqrt.f32 %v4422_v44  ;;  %v4553_v60 = vmul.f32 %v4537_v47, %v4508_v28 }
0x2719   :  { %8825 = vrsqrt.f32 %v4421_v2 }
0x271a   :  { %v4558_v48 = vpack.c.bf16 %v4553_v60, %v4552_v7 }
0x271c   :  { %8163 = vmatmul.mubr.msk.bf16.vlgmr.msra.gmra.mrb[116].mxu0 %vm4585_vm13, %v4558_v48 }
0x271d   :  { %8166 = vmatprep.mubr.msk.bf16.mxu0 %vm9016_vm9, %v9015_v5 }
0x271e   :  { %v8822_v62 = vpop.eup %8821 }
0x271f   :  { %v10288_v29 = vmul.f32 %v8822_v62, %v4384_v26 }
0x2721   :  { %v4448_v57 = vpack.c.bf16 %v10288_v29, %v10286_v17 }
0x2722   :  { %v8824_v32 = vpop.eup %8823 }
0x2723   :  { %8147 = vmatmul.mubr.msk.bf16.gmra.mrb[112].mxu1 %vm394_vm8, %v4448_v57  ;;  %v8826_v4 = vpop.eup %8825  ;;  %v10295_v25 = vmul.f32 %v8824_v32, %v4386_v54 }
0x2724   :  { %8150 = vmatprep.mubr.msk.bf16.mxu1 %vm9016_vm9, %v9015_v5  ;;  %v10297_v61 = vmul.f32 %v8826_v4, %v4385_v34 }
0x2726   :  { %v4449_v56 = vpack.c.bf16 %v10295_v25, %v10297_v61 }
0x272b   :  { %8151 = vmatmul.mubr.msk.bf16.gmra.mrb[116].mxu1 %vm394_vm8, %v4449_v56 }
0x272c   :  { %8178 = vmatprep.mubr.msk.bf16.mxu1 %vm9016_vm9, %v9015_v5 }
0x27ef   :  { %v4629_v19 = vpop.f32.mrb[116].mxu0 }
0x27f0   :  { %v4630_v28 = vadd.f32 %v4629_v19, %v10235_v37  ;;  %v8164_v39 = vpop.f32.mrb[117].mxu0 }
0x27f1   :  { %v4632_v55 = vpop.f32.mrb[118].mxu0 }
0x27f2   :  { %v4652_v46 = vmul.f32 %v4630_v28, %v4630_v28  ;;  %v8165_v23 = vpop.f32.mrb[119].mxu0  ;;  %v4633_v37 = vadd.f32 %v4632_v55, %v10233_v45 }
0x27f4   :  { %v4658_v58 = vsel %vm394_vm8, %v4652_v46, 0.0  ;;  %v4653_v11 = vmul.f32 %v4633_v37, %v4633_v37 }
0x27f5   :  { %4659 = vadd.xlane.f32.xlu0 %v4658_v58 }
0x27f6   :  { %v4513_v59 = vpop.f32.mrb[112].mxu1  ;;  %v4661_v34 = vsel %vm394_vm8, %v4653_v11, 0.0 }
0x27f7   :  { %4538 = vrot.lane.b32.xlu1 %v4513_v59, %s9018_s4  ;;  %v8148_v53 = vpop.f32.mrb[113].mxu1 }
0x27f8   :  { %v4516_v42 = vpop.f32.mrb[114].mxu1 }
0x27f9   :  { %v8149_v1 = vpop.f32.mrb[115].mxu1 }
0x27fb   :  { %4540 = vrot.lane.b32.xlu1 %v4516_v42, %s9018_s4 }
0x27fe   :  { %v4521_v52 = vpop.f32.mrb[116].mxu1 }
0x27ff   :  { %v8152_v8 = vpop.f32.mrb[117].mxu1 }
0x2800   :  { %v4524_v54 = vpop.f32.mrb[118].mxu1 }
0x2801   :  { %v8153_v26 = vpop.f32.mrb[119].mxu1 }
0x280b   :  { %4542 = vrot.lane.b32.xlu0 %v4521_v52, %s9018_s4 }
0x281f   :  { %4662 = vadd.xlane.f32.xlu1 %v4661_v34 }
0x2830   :  { %4544 = vrot.lane.b32.xlu1 %v4524_v54, %s9018_s4 }
0x2869   :  { %v4539_v15 = vpop.permute.xlu1 %4538 }
0x286a   :  { %v4554_v51 = vmul.f32 %v4539_v15, %v4513_v59 }
0x286d   :  { %v4541_v33 = vpop.permute.xlu1 %4540 }
0x286e   :  { %v4555_v35 = vmul.f32 %v4541_v33, %v4516_v42 }
0x2870   :  { %v4559_v3 = vpack.c.bf16 %v4555_v35, %v4554_v51 }
0x2872   :  { %8167 = vmatmul.mubr.msk.bf16.gmra.mrb[120].mxu0 %vm4585_vm13, %v4559_v3 }
0x2873   :  { %8170 = vmatprep.mubr.msk.bf16.mxu0 %vm9016_vm9, %v9015_v5 }
0x2882   :  { %v4660_v27 = vpop.xlane.xlu0 %4659 }
0x2883   :  { %v4676_v18 = vmul.f32 0.03125, %v4660_v27 }
0x2885   :  { %v4682_v14 = vadd.f32 1e-06, %v4676_v18 }
0x2886   :  { %v4543_v43 = vpop.permute.xlu0 %4542 }
0x2887   :  { %8827 = vrsqrt.f32 %v4682_v14  ;;  %v4556_v21 = vmul.f32 %v4543_v43, %v4521_v52 }
0x2891   :  { %v8828_v49 = vpop.eup %8827 }
0x2892   :  { %v10316_v22 = vmul.f32 %v8828_v49, %v4630_v28 }
0x28ac   :  { %v4663_v45 = vpop.xlane.xlu1 %4662 }
0x28ad   :  { %v4677_v20 = vmul.f32 0.03125, %v4663_v45 }
0x28af   :  { %v4683_v30 = vadd.f32 1e-06, %v4677_v20 }
0x28b0   :  { %v4545_v12 = vpop.permute.xlu1 %4544 }
0x28b1   :  { %8829 = vrsqrt.f32 %v4683_v30  ;;  %v4557_v41 = vmul.f32 %v4545_v12, %v4524_v54 }
0x28b3   :  { %v4560_v9 = vpack.c.bf16 %v4557_v41, %v4556_v21 }
0x28b5   :  { %8171 = vmatmul.mubr.msk.bf16.gmra.mrb[124].mxu0 %vm4585_vm13, %v4560_v9 }
0x28bb   :  { %v8830_v13 = vpop.eup %8829 }
0x28bc   :  { %v10318_v31 = vmul.f32 %v8830_v13, %v4633_v37 }
0x28be   :  { %v4700_v24 = vpack.c.bf16 %v10318_v31, %v10316_v22 }
0x28c0   :  { %8179 = vmatmul.mubr.msk.bf16.vlgmr.msra.gmra.mrb[120].mxu1 %vm394_vm8, %v4700_v24 }
0x28c1   :  { %8182 = vmatprep.mubr.msk.bf16.mxu1 %vm9016_vm9, %v9015_v5 }
0x2945   :  { %v4637_v2 = vpop.f32.mrb[120].mxu0 }
0x2946   :  { %v4638_v44 = vadd.f32 %v4637_v2, %v10286_v17  ;;  %v8168_v47 = vpop.f32.mrb[121].mxu0 }
0x2947   :  { %v4640_v7 = vpop.f32.mrb[122].mxu0 }
0x2948   :  { %v4654_v60 = vmul.f32 %v4638_v44, %v4638_v44  ;;  %v4641_v48 = vadd.f32 %v4640_v7, %v10288_v29  ;;  %v8169_v0 = vpop.f32.mrb[123].mxu0 }
0x294a   :  { %v4655_v62 = vmul.f32 %v4641_v48, %v4641_v48  ;;  %v4664_v57 = vsel %vm394_vm8, %v4654_v60, 0.0 }
0x294b   :  { %4665 = vadd.xlane.f32.xlu0 %v4664_v57 }
0x294c   :  { %v4667_v32 = vsel %vm394_vm8, %v4655_v62, 0.0 }
0x294d   :  { %4668 = vadd.xlane.f32.xlu1 %v4667_v32 }
0x2988   :  { %v4645_v4 = vpop.f32.mrb[124].mxu0 }
0x2989   :  { %v4646_v56 = vadd.f32 %v4645_v4, %v10297_v61  ;;  %v8172_v19 = vpop.f32.mrb[125].mxu0 }
0x298a   :  { %v4648_v28 = vpop.f32.mrb[126].mxu0 }
0x298b   :  { %v4656_v39 = vmul.f32 %v4646_v56, %v4646_v56  ;;  %v4649_v17 = vadd.f32 %v4648_v28, %v10295_v25  ;;  %v8173_v55 = vpop.f32.mrb[127].mxu0  ;;  %v8963_v28 = vld [vmem:[%s10920_s6 + $0x14] sm:$0xf] }
0x298d   :  { %v4657_v46 = vmul.f32 %v4649_v17, %v4649_v17  ;;  %v4670_v29 = vsel %vm394_vm8, %v4656_v39, 0.0 }
0x298e   :  { %4671 = vadd.xlane.f32.xlu0 %v4670_v29 }
0x298f   :  { %v4673_v23 = vsel %vm394_vm8, %v4657_v46, 0.0 }
0x2992   :  { %4674 = vadd.xlane.f32.xlu0 %v4673_v23 }
0x2993   :  { %v4746_v58 = vpop.f32.mrb[120].mxu1 }
0x2994   :  { %v8180_v59 = vpop.f32.mrb[121].mxu1 }
0x2995   :  { %v4749_v53 = vpop.f32.mrb[122].mxu1 }
0x2996   :  { %v10333_v42 = vpack.c.bf16 %v4749_v53, %v4746_v58  ;;  %v8181_v1 = vpop.f32.mrb[123].mxu1 }
0x2998   :  { %8194 = vmatprep.mubr.msk.bf16.mxu0 %vm537_vm10, %v10333_v42 }
0x29a8   :  { %4773 = vrot.lane.b32.xlu0 %v10333_v42, %s9017_s25 }
0x29ac   :  { %4942 = vrot.lane.b32.xlu0 %v10333_v42, %s9019_s26 }
0x29d8   :  { %v4666_v25 = vpop.xlane.xlu0 %4665 }
0x29d9   :  { %v4678_v61 = vmul.f32 0.03125, %v4666_v25 }
0x29da   :  { %v4669_v52 = vpop.xlane.xlu1 %4668 }
0x29db   :  { %v4684_v8 = vadd.f32 1e-06, %v4678_v61  ;;  %v4679_v54 = vmul.f32 0.03125, %v4669_v52 }
0x29dd   :  { %8831 = vrsqrt.f32 %v4684_v8  ;;  %v4685_v26 = vadd.f32 1e-06, %v4679_v54 }
0x29df   :  { %8833 = vrsqrt.f32 %v4685_v26 }
0x29e7   :  { %v8832_v37 = vpop.eup %8831 }
0x29e8   :  { %v10341_v34 = vmul.f32 %v8832_v37, %v4638_v44 }
0x29e9   :  { %v8834_v11 = vpop.eup %8833 }
0x29ea   :  { %v10343_v15 = vmul.f32 %v8834_v11, %v4641_v48 }
0x29ec   :  { %v4701_v33 = vpack.c.bf16 %v10343_v15, %v10341_v34 }
0x29ee   :  { %8183 = vmatmul.mubr.msk.bf16.gmra.mrb[124].mxu1 %vm394_vm8, %v4701_v33 }
0x29ef   :  { %8186 = vmatprep.mubr.msk.bf16.mxu1 %vm9016_vm9, %v9015_v5 }
0x2a1b   :  { %v4672_v51 = vpop.xlane.xlu0 %4671 }
0x2a1c   :  { %v4680_v35 = vmul.f32 0.03125, %v4672_v51 }
0x2a1e   :  { %v4686_v3 = vadd.f32 1e-06, %v4680_v35 }
0x2a1f   :  { %v4675_v27 = vpop.xlane.xlu0 %4674 }
0x2a20   :  { %v4681_v18 = vmul.f32 0.03125, %v4675_v27  ;;  %8835 = vrsqrt.f32 %v4686_v3 }
0x2a22   :  { %v4687_v14 = vadd.f32 1e-06, %v4681_v18 }
0x2a23   :  { %v4774_v45 = vpop.permute.xlu0 %4773 }
0x2a24   :  { %8837 = vrsqrt.f32 %v4687_v14  ;;  %8510 = vmatprep.subr.msk.bf16.mxu0 %vm537_vm10, %v4774_v45  ;;  %v4784_v20 = vsel %vm537_vm10, %v4774_v45, 0 }
0x2a25   :  { %8191 = vmatpush3.bf16.xpose.msra.mxu0 %v4784_v20 }
0x2a27   :  { %v4943_v9 = vpop.permute.xlu0 %4942 }
0x2a2a   :  { %v8836_v43 = vpop.eup %8835 }
0x2a2b   :  { %v10352_v12 = vmul.f32 %v8836_v43, %v4646_v56 }
0x2a2e   :  { %v8838_v30 = vpop.eup %8837 }
0x2a2f   :  { %v10354_v21 = vmul.f32 %v8838_v30, %v4649_v17 }
0x2a31   :  { %v4702_v41 = vpack.c.bf16 %v10354_v21, %v10352_v12 }
0x2a33   :  { %8187 = vmatmul.mubr.msk.bf16.gmra.mrb[128].mxu1 %vm394_vm8, %v4702_v41 }
0x2a34   :  { %8210 = vmatprep.mubr.msk.bf16.mxu1 %vm537_vm10, %v4943_v9 }
0x2ac1   :  { %v4754_v49 = vpop.f32.mrb[124].mxu1 }
0x2ac2   :  { %v10360_v13 = vpack.c.bf16 %v4754_v49, %v4754_v49  ;;  %v8184_v24 = vpop.f32.mrb[125].mxu1 }
0x2ac3   :  { %v4757_v2 = vpop.f32.mrb[126].mxu1 }
0x2ac4   :  { %4775 = vrot.lane.b32.xlu1 %v10360_v13, %s9017_s25  ;;  %v8185_v44 = vpop.f32.mrb[127].mxu1 }
0x2ac8   :  { %4946 = vrot.lane.b32.xlu1 %v10333_v42, %s9020_s27 }
0x2acc   :  { %4948 = vrot.lane.b32.xlu1 %v10360_v13, %s9020_s27 }
0x2ad0   :  { %4944 = vrot.lane.b32.xlu1 %v10360_v13, %s9019_s26 }
0x2b06   :  { %v4762_v47 = vpop.f32.mrb[128].mxu1 }
0x2b07   :  { %v10370_v7 = vpack.c.bf16 %v4762_v47, %v4757_v2  ;;  %v8188_v60 = vpop.f32.mrb[129].mxu1 }
0x2b08   :  { %v10372_v48 = vpop.f32.mrb[130].mxu1 }
0x2b09   :  { %v8189_v0 = vpop.f32.mrb[131].mxu1 }
0x2b36   :  { %v4776_v62 = vpop.permute.xlu1 %4775 }
0x2b37   :  { %8511 = vmatprep.subr.msk.bf16.mxu0 %vm537_vm10, %v4776_v62  ;;  %v4787_v57 = vsel %vm537_vm10, %v4776_v62, 0 }
0x2b38   :  { %8193 = vmatpush3.bf16.xpose.msra.mxu0 %v4787_v57 }
0x2b3a   :  { %v4947_v32 = vpop.permute.xlu1 %4946 }
0x2b3b   :  { %8513 = vmatprep.subr.msk.bf16.mxu1 %vm537_vm10, %v4947_v32  ;;  %v4957_v4 = vsel %vm537_vm10, %v4947_v32, 0 }
0x2b3c   :  { %8207 = vmatpush3.bf16.xpose.msra.mxu1 %v4957_v4 }
0x2b3e   :  { %v4949_v56 = vpop.permute.xlu1 %4948 }
0x2b3f   :  { %8195 = vmatmul.mubr.msk.bf16.vlgmr.msra.gmra.mrb[128].mxu0 %vm537_vm10, %v10360_v13  ;;  %8514 = vmatprep.subr.msk.bf16.mxu1 %vm537_vm10, %v4949_v56  ;;  %v4960_v19 = vsel %vm537_vm10, %v4949_v56, 0 }
0x2b42   :  { %v4945_v39 = vpop.permute.xlu1 %4944 }
0x2b44   :  { %8209 = vmatpush3.bf16.xpose.msra.mxu1 %v4960_v19 }
0x2b45   :  { %8516 = vmatprep.subr.msk.bf16.mxu1 %vm652_vm12, %v8963_v28 }
0x2b4b   :  { %8211 = vmatmul.mubr.msk.bf16.vlgmr.msra.gmra.mrb[132].mxu1 %vm537_vm10, %v4945_v39 }
0x2b4c   :  { %8223 = vmatpush3.bf16.msra.mxu1 %v9877_v50 }
0x2c12   :  { %v8196_v17 = vpop.f32.mrb[128].mxu0 }
0x2c13   :  { %v4823_v55 = vpop.f32.mrb[129].mxu0  ;;  %v4839_v46 = vmul.f32 %v8196_v17, %v9831_v63 }
0x2c14   :  { %v4837_v29 = vmul.f32 %v4823_v55, %v9831_v63  ;;  %v8197_v23 = vpop.f32.mrb[130].mxu0 }
0x2c15   :  { %v4826_v58 = vpop.f32.mrb[131].mxu0  ;;  %v4842_v1 = vadd.f32 %v4839_v46, %v9355_v6 }
0x2c16   :  { %v4840_v59 = vadd.f32 %v4837_v29, %v9341_v36  ;;  %v4838_v53 = vmul.f32 %v4826_v58, %v9831_v63 }
0x2c17   :  { %v4849_v8 = vsel %vm605_vm11, %v4842_v1, -inf }
0x2c18   :  { %v4841_v25 = vadd.f32 %v4838_v53, %v9347_v40  ;;  %v4843_v61 = vsel %vm605_vm11, %v4840_v59, -inf }
0x2c19   :  { %4844 = vmax.xlane.f32.xlu0 %v4843_v61 }
0x2c1a   :  { %v4846_v52 = vsel %vm605_vm11, %v4841_v25, -inf }
0x2c1b   :  { %4847 = vmax.xlane.f32.xlu1 %v4846_v52 }
0x2c1d   :  { %4850 = vmax.xlane.f32.xlu0 %v4849_v8 }
0x2c1e   :  { %v8212_v54 = vpop.f32.mrb[132].mxu1 }
0x2c1f   :  { %v5012_v26 = vmul.f32 %v8212_v54, %v9831_v63  ;;  %v4996_v37 = vpop.f32.mrb[133].mxu1 }
0x2c20   :  { %v5010_v11 = vmul.f32 %v4996_v37, %v9831_v63  ;;  %v8213_v33 = vpop.f32.mrb[134].mxu1 }
0x2c21   :  { %v5015_v51 = vadd.f32 %v5012_v26, %v9355_v6  ;;  %v4999_v35 = vpop.f32.mrb[135].mxu1 }
0x2c22   :  { %v5013_v3 = vadd.f32 %v5010_v11, %v9341_v36  ;;  %v5011_v27 = vmul.f32 %v4999_v35, %v9831_v63 }
0x2c23   :  { %v5022_v18 = vsel %vm605_vm11, %v5015_v51, -inf }
0x2c24   :  { %v5014_v14 = vadd.f32 %v5011_v27, %v9347_v40  ;;  %5023 = vmax.xlane.f32.xlu1 %v5022_v18  ;;  %v5016_v45 = vsel %vm605_vm11, %v5013_v3, -inf }
0x2c25   :  { %5017 = vmax.xlane.f32.xlu0 %v5016_v45 }
0x2c26   :  { %v5019_v20 = vsel %vm605_vm11, %v5014_v14, -inf }
0x2c29   :  { %5020 = vmax.xlane.f32.xlu0 %v5019_v20 }
0x2ca6   :  { %v4845_v43 = vpop.xlane.xlu0 %4844 }
0x2ca7   :  { %v4852_v30 = vsub.f32 %v4840_v59, %v4845_v43 }
0x2ca8   :  { %v4848_v24 = vpop.xlane.xlu1 %4847 }
0x2ca9   :  { %v4855_v49 = vmul.f32 1.442695, %v4852_v30  ;;  %v4853_v62 = vsub.f32 %v4841_v25, %v4848_v24 }
0x2caa   :  { %v4851_v41 = vpop.xlane.xlu0 %4850 }
0x2cab   :  { %v4854_v9 = vsub.f32 %v4842_v1, %v4851_v41  ;;  %v4857_v19 = vmul.f32 1.442695, %v4853_v62 }
0x2cad   :  { %v4859_v2 = vmul.f32 1.442695, %v4854_v9 }
0x2caf   :  { %8839 = vpow2.f32 %v4859_v2 }
0x2cb0   :  { %8841 = vpow2.f32 %v4855_v49 }
0x2cb1   :  { %v5024_v44 = vpop.xlane.xlu1 %5023 }
0x2cb2   :  { %v5027_v47 = vsub.f32 %v5015_v51, %v5024_v44  ;;  %v5018_v60 = vpop.xlane.xlu0 %5017 }
0x2cb3   :  { %v5025_v0 = vsub.f32 %v5013_v3, %v5018_v60 }
0x2cb4   :  { %v5032_v57 = vmul.f32 1.442695, %v5027_v47 }
0x2cb5   :  { %v5028_v32 = vmul.f32 1.442695, %v5025_v0 }
0x2cb6   :  { %8843 = vpow2.f32 %v5032_v57  ;;  %v5021_v4 = vpop.xlane.xlu0 %5020 }
0x2cb7   :  { %v5026_v56 = vsub.f32 %v5014_v14, %v5021_v4  ;;  %8845 = vpow2.f32 %v5028_v32  ;;  %v10451_v4 = vld [vmem:[%s10920_s6 + $0x10] sm:$0xf] }
0x2cb9   :  { %v8840_v28 = vpop.eup %8839  ;;  %v5030_v39 = vmul.f32 1.442695, %v5026_v56 }
0x2cba   :  { %v4867_v17 = vsel %vm605_vm11, %v8840_v28, 0.0  ;;  %v8842_v55 = vpop.eup %8841 }
0x2cbb   :  { %8847 = vpow2.f32 %v5030_v39  ;;  %4868 = vadd.xlane.f32.xlu0 %v4867_v17  ;;  %v4861_v46 = vsel %vm605_vm11, %v8842_v55, 0.0 }
0x2cbc   :  { %8849 = vpow2.f32 %v4857_v19 }
0x2cbf   :  { %4862 = vadd.xlane.f32.xlu0 %v4861_v46 }
0x2cc0   :  { %v10408_v29 = vpop.eup %8843 }
0x2cc1   :  { %v5040_v23 = vsel %vm605_vm11, %v10408_v29, 0.0  ;;  %v8846_v58 = vpop.eup %8845 }
0x2cc2   :  { %5041 = vadd.xlane.f32.xlu1 %v5040_v23  ;;  %v5034_v53 = vsel %vm605_vm11, %v8846_v58, 0.0 }
0x2cc5   :  { %v8848_v59 = vpop.eup %8847 }
0x2cc6   :  { %v8850_v1 = vpop.eup %8849  ;;  %5035 = vadd.xlane.f32.xlu1 %v5034_v53  ;;  %v5037_v25 = vsel %vm605_vm11, %v8848_v59, 0.0 }
0x2cc7   :  { %5038 = vadd.xlane.f32.xlu0 %v5037_v25  ;;  %v4864_v61 = vsel %vm605_vm11, %v8850_v1, 0.0 }
0x2cca   :  { %4865 = vadd.xlane.f32.xlu1 %v4864_v61 }
0x2cdb   :  { %4880 = vrot.lane.b32.xlu1 %v10360_v13, %s9018_s4 }
0x2cdd   :  { %4878 = vrot.lane.b32.xlu0 %v10333_v42, %s9018_s4 }
0x2cdf   :  { %5051 = vrot.lane.b32.xlu1 %v10333_v42, %s9021_s29 }
0x2ce1   :  { %5227 = vrot.lane.b32.xlu0 %v10333_v42, %s9022_s30 }
0x2ce3   :  { %5053 = vrot.lane.b32.xlu1 %v10360_v13, %s9021_s29 }
0x2ce5   :  { %5223 = vrot.lane.b32.xlu0 %v10333_v42, %s9023_s12 }
0x2ce7   :  { %5229 = vrot.lane.b32.xlu1 %v10360_v13, %s9022_s30 }
0x2ce9   :  { %5457 = vrot.lane.b32.xlu0 %v10333_v42, %s9024_s13 }
0x2ceb   :  { %5225 = vrot.lane.b32.xlu1 %v10360_v13, %s9023_s12 }
0x2ced   :  { %5453 = vrot.lane.b32.xlu0 %v10333_v42, %s9025_s14 }
0x2cef   :  { %5459 = vrot.lane.b32.xlu1 %v10360_v13, %s9024_s13 }
0x2cf3   :  { %5455 = vrot.lane.b32.xlu1 %v10360_v13, %s9025_s14 }
0x2d48   :  { %v4869_v52 = vpop.xlane.xlu0 %4868 }
0x2d49   :  { %8851 = vrcp.f32 %v4869_v52 }
0x2d4c   :  { %v4863_v54 = vpop.xlane.xlu0 %4862 }
0x2d4d   :  { %8853 = vrcp.f32 %v4863_v54 }
0x2d4f   :  { %v5042_v8 = vpop.xlane.xlu1 %5041 }
0x2d53   :  { %v5036_v26 = vpop.xlane.xlu1 %5035  ;;  %v8852_v27 = vpop.eup %8851 }
0x2d54   :  { %v5039_v37 = vpop.xlane.xlu0 %5038  ;;  %8855 = vrcp.f32 %v5036_v26  ;;  %v4875_v30 = vmul.f32 %v8852_v27, %v8840_v28 }
0x2d55   :  { %8857 = vrcp.f32 %v5039_v37 }
0x2d56   :  { %v4877_v44 = vpack.c.bf16 %v4875_v30, %v4875_v30 }
0x2d57   :  { %v4866_v11 = vpop.xlane.xlu1 %4865  ;;  %v8854_v18 = vpop.eup %8853 }
0x2d58   :  { %8859 = vrcp.f32 %v4866_v11  ;;  %v4879_v33 = vpop.permute.xlu0 %4878  ;;  %v4873_v41 = vmul.f32 %v8854_v18, %v8842_v55 }
0x2d59   :  { %8198 = vmatprep.subr.bf16.mxu0 %v4879_v33  ;;  %8861 = vrcp.f32 %v5042_v8 }
0x2d5a   :  { %8199 = vmatpush3.bf16.msra.mxu0 %v4879_v33 }
0x2d5b   :  { %v4881_v51 = vpop.permute.xlu1 %4880 }
0x2d5c   :  { %8512 = vmatprep.subr.msk.bf16.mxu0 %vm652_vm12, %v4881_v51  ;;  %v5228_v35 = vpop.permute.xlu0 %5227  ;;  %v4890_v3 = vsel %vm652_vm12, %v4881_v51, 0 }
0x2d5d   :  { %8518 = vmatprep.subr.msk.bf16.mxu1 %vm537_vm10, %v5228_v35 }
0x2d5e   :  { %8201 = vmatpush3.bf16.msra.mxu0 %v4890_v3  ;;  %v8856_v14 = vpop.eup %8855 }
0x2d5f   :  { %v5052_v45 = vpop.permute.xlu1 %5051  ;;  %v8858_v20 = vpop.eup %8857  ;;  %v5046_v49 = vmul.f32 %v8856_v14, %v8846_v58 }
0x2d60   :  { %8214 = vmatprep.subr.bf16.mxu0 %v5052_v45  ;;  %v5047_v24 = vmul.f32 %v8858_v20, %v8848_v59  ;;  %v5224_v25 = vpop.permute.xlu0 %5223 }
0x2d62   :  { %v8860_v43 = vpop.eup %8859  ;;  %v5049_v60 = vpack.c.bf16 %v5047_v24, %v5046_v49 }
0x2d63   :  { %v4874_v9 = vmul.f32 %v8860_v43, %v8850_v1  ;;  %v8862_v47 = vpop.eup %8861  ;;  %v5054_v0 = vpop.permute.xlu1 %5053  ;;  %v5238_v1 = vsel %vm537_vm10, %v5228_v35, 0 }
0x2d64   :  { %v5048_v62 = vmul.f32 %v8862_v47, %v10408_v29  ;;  %v5063_v57 = vsel %vm652_vm12, %v5054_v0, 0  ;;  %v5458_v8 = vpop.permute.xlu0 %5457 }
0x2d65   :  { %v4876_v2 = vpack.c.bf16 %v4874_v9, %v4873_v41  ;;  %v5468_v26 = vsel %vm537_vm10, %v5458_v8, 0 }
0x2d66   :  { %v5050_v32 = vpack.c.bf16 %v5048_v62, %v5048_v62 }
0x2d67   :  { %8202 = vmatprep.mubr.msk.bf16.mxu0 %vm605_vm11, %v4876_v2  ;;  %v5230_v61 = vpop.permute.xlu1 %5229 }
0x2d68   :  { %8203 = vmatmul.mubr.msk.bf16.vlgmr.msra.gmra.mrb[132].mxu0 %vm605_vm11, %v4877_v44  ;;  %v5241_v52 = vsel %vm537_vm10, %v5230_v61, 0  ;;  %v5454_v37 = vpop.permute.xlu0 %5453 }
0x2d69   :  { %8215 = vmatpush3.bf16.msra.mxu0 %v5052_v45  ;;  %8218 = vmatprep.mubr.msk.bf16.mxu0 %vm605_vm11, %v5049_v60 }
0x2d6a   :  { %8515 = vmatprep.subr.msk.bf16.mxu0 %vm652_vm12, %v5054_v0 }
0x2d6b   :  { %v5226_v54 = vpop.permute.xlu1 %5225 }
0x2d6d   :  { %8217 = vmatpush3.bf16.msra.mxu0 %v5063_v57 }
0x2d6e   :  { %8517 = vmatprep.subr.msk.bf16.mxu0 %vm652_vm12, %v10451_v4 }
0x2d6f   :  { %v5460_v11 = vpop.permute.xlu1 %5459 }
0x2d70   :  { %8219 = vmatmul.mubr.msk.bf16.vlgmr.msra.gmra.mrb[136].mxu0 %vm605_vm11, %v5050_v32  ;;  %v5471_v33 = vsel %vm537_vm10, %v5460_v11, 0 }
0x2d71   :  { %8229 = vmatpush3.bf16.msra.mxu0 %v9923_v16 }
0x2d73   :  { %v5456_v51 = vpop.permute.xlu1 %5455 }
0x2e3b   :  { %v8204_v56 = vpop.f32.mrb[132].mxu0 }
0x2e3c   :  { %v4926_v19 = vpop.f32.mrb[133].mxu0  ;;  %v4941_v55 = vpack.c.bf16 %v8204_v56, %v8204_v56 }
0x2e3d   :  { %v8205_v28 = vpop.f32.mrb[134].mxu0 }
0x2e3e   :  { %v4929_v39 = vpop.f32.mrb[135].mxu0 }
0x2e3f   :  { %v4940_v17 = vpack.c.bf16 %v4929_v39, %v4926_v19 }
0x2e41   :  { %8230 = vmatprep.mubr.msk.bf16.mxu0 %vm537_vm10, %v4940_v17 }
0x2e42   :  { %8231 = vmatmul.mubr.msk.bf16.vlgmr.msra.gmra.mrb[140].mxu0 %vm537_vm10, %v4941_v55 }
0x2e43   :  { %v8220_v46 = vpop.f32.mrb[136].mxu0 }
0x2e44   :  { %v5099_v29 = vpop.f32.mrb[137].mxu0  ;;  %v5114_v53 = vpack.c.bf16 %v8220_v46, %v8220_v46 }
0x2e45   :  { %v8221_v23 = vpop.f32.mrb[138].mxu0 }
0x2e46   :  { %v5102_v58 = vpop.f32.mrb[139].mxu0 }
0x2e47   :  { %v5113_v59 = vpack.c.bf16 %v5102_v58, %v5099_v29 }
0x2e49   :  { %8224 = vmatprep.mubr.msk.bf16.mxu1 %vm537_vm10, %v5113_v59 }
0x2e4a   :  { %8225 = vmatmul.mubr.msk.bf16.vlgmr.msra.gmra.mrb[136].mxu1 %vm537_vm10, %v5114_v53 }
0x2e4b   :  { %8235 = vmatpush3.bf16.xpose.msra.mxu1 %v5238_v1  ;;  %8238 = vmatprep.mubr.msk.bf16.mxu1 %vm537_vm10, %v5224_v25 }
0x2e4c   :  { %8519 = vmatprep.subr.msk.bf16.mxu1 %vm537_vm10, %v5230_v61 }
0x2e53   :  { %8237 = vmatpush3.bf16.xpose.msra.mxu1 %v5241_v52 }
0x2e54   :  { %8522 = vmatprep.subr.msk.bf16.mxu1 %vm537_vm10, %v5458_v8 }
0x2e5a   :  { %8239 = vmatmul.mubr.msk.bf16.vlgmr.msra.gmra.mrb[140].mxu1 %vm537_vm10, %v5226_v54 }
0x2e5b   :  { %8257 = vmatpush3.bf16.xpose.msra.mxu1 %v5468_v26  ;;  %8260 = vmatprep.mubr.msk.bf16.mxu1 %vm537_vm10, %v5454_v37 }
0x2e5c   :  { %8523 = vmatprep.subr.msk.bf16.mxu1 %vm537_vm10, %v5460_v11 }
0x2e63   :  { %8259 = vmatpush3.bf16.xpose.msra.mxu1 %v5471_v33 }
0x2e6a   :  { %8261 = vmatmul.mubr.msk.bf16.vlgmr.msra.gmra.mrb[144].mxu1 %vm537_vm10, %v5456_v51  ;;  %v10500_v51 = vpack.c.bf16 %v10372_v48, %v10372_v48 }
0x2e6b   :  { %8282 = vmatprep.mubr.msk.bf16.mxu1 %vm537_vm10, %v10370_v7 }
0x2f15   :  { %v8232_v35 = vpop.f32.mrb[140].mxu0 }
0x2f16   :  { %v5209_v3 = vpop.f32.mrb[141].mxu0 }
0x2f17   :  { %v8233_v27 = vpop.f32.mrb[142].mxu0 }
0x2f18   :  { %v5212_v18 = vpop.f32.mrb[143].mxu0 }
0x2f1d   :  { %v8226_v14 = vpop.f32.mrb[136].mxu1 }
0x2f1e   :  { %v10474_v45 = vadd.f32 %v8232_v35, %v8226_v14  ;;  %v5155_v20 = vpop.f32.mrb[137].mxu1 }
0x2f1f   :  { %v10476_v43 = vadd.f32 %v5209_v3, %v5155_v20  ;;  %v8227_v30 = vpop.f32.mrb[138].mxu1 }
0x2f20   :  { %v5158_v41 = vpop.f32.mrb[139].mxu1 }
0x2f21   :  { %v10478_v9 = vadd.f32 %v5212_v18, %v5158_v41 }
0x2f2d   :  { %v8240_v49 = vpop.f32.mrb[140].mxu1 }
0x2f2e   :  { %v5277_v24 = vpop.f32.mrb[141].mxu1  ;;  %v5293_v2 = vmul.f32 %v8240_v49, %v9831_v63 }
0x2f2f   :  { %v5291_v44 = vmul.f32 %v5277_v24, %v9831_v63  ;;  %v8241_v47 = vpop.f32.mrb[142].mxu1 }
0x2f30   :  { %v5280_v60 = vpop.f32.mrb[143].mxu1  ;;  %v5296_v57 = vadd.f32 %v5293_v2, %v9355_v6 }
0x2f31   :  { %v5294_v0 = vadd.f32 %v5291_v44, %v9341_v36  ;;  %v5292_v62 = vmul.f32 %v5280_v60, %v9831_v63 }
0x2f32   :  { %v5303_v28 = vsel %vm605_vm11, %v5296_v57, -inf }
0x2f33   :  { %v5295_v32 = vadd.f32 %v5292_v62, %v9347_v40  ;;  %v5297_v56 = vsel %vm605_vm11, %v5294_v0, -inf }
0x2f34   :  { %5298 = vmax.xlane.f32.xlu0 %v5297_v56  ;;  %v10520_v56 = vld [vmem:[%s10920_s6 + $0x18] sm:$0xf] }
0x2f35   :  { %v5300_v19 = vsel %vm605_vm11, %v5295_v32, -inf }
0x2f36   :  { %5301 = vmax.xlane.f32.xlu1 %v5300_v19 }
0x2f38   :  { %5304 = vmax.xlane.f32.xlu0 %v5303_v28 }
0x2f3d   :  { %v8262_v39 = vpop.f32.mrb[144].mxu1 }
0x2f3e   :  { %v5507_v17 = vpop.f32.mrb[145].mxu1  ;;  %v5523_v3 = vmul.f32 %v8262_v39, %v9831_v63 }
0x2f3f   :  { %v8263_v55 = vpop.f32.mrb[146].mxu1  ;;  %v5521_v35 = vmul.f32 %v5507_v17, %v9831_v63 }
0x2f40   :  { %v5510_v46 = vpop.f32.mrb[147].mxu1  ;;  %v5526_v18 = vadd.f32 %v5523_v3, %v9355_v6 }
0x2f41   :  { %v5524_v27 = vadd.f32 %v5521_v35, %v9341_v36  ;;  %v5522_v14 = vmul.f32 %v5510_v46, %v9831_v63 }
0x2f42   :  { %v5533_v48 = vsel %vm605_vm11, %v5526_v18, -inf }
0x2f43   :  { %v5527_v20 = vsel %vm605_vm11, %v5524_v27, -inf  ;;  %v5525_v30 = vadd.f32 %v5522_v14, %v9347_v40 }
0x2f45   :  { %v5530_v41 = vsel %vm605_vm11, %v5525_v30, -inf }
0x2fc1   :  { %v5299_v29 = vpop.xlane.xlu0 %5298 }
0x2fc2   :  { %v5306_v23 = vsub.f32 %v5294_v0, %v5299_v29 }
0x2fc3   :  { %v5302_v58 = vpop.xlane.xlu1 %5301 }
0x2fc4   :  { %v5309_v59 = vmul.f32 1.442695, %v5306_v23  ;;  %v5307_v53 = vsub.f32 %v5295_v32, %v5302_v58 }
0x2fc5   :  { %v5305_v1 = vpop.xlane.xlu0 %5304 }
0x2fc6   :  { %8863 = vpow2.f32 %v5309_v59  ;;  %v5311_v25 = vmul.f32 1.442695, %v5307_v53  ;;  %v5308_v61 = vsub.f32 %v5296_v57, %v5305_v1 }
0x2fc8   :  { %8865 = vpow2.f32 %v5311_v25  ;;  %v5313_v52 = vmul.f32 1.442695, %v5308_v61 }
0x2fca   :  { %8867 = vpow2.f32 %v5313_v52 }
0x2fd0   :  { %v8864_v8 = vpop.eup %8863 }
0x2fd1   :  { %v5315_v54 = vsel %vm605_vm11, %v8864_v8, 0.0 }
0x2fd2   :  { %v8866_v26 = vpop.eup %8865  ;;  %5316 = vadd.xlane.f32.xlu0 %v5315_v54 }
0x2fd3   :  { %v5318_v11 = vsel %vm605_vm11, %v8866_v26, 0.0 }
0x2fd4   :  { %v8868_v37 = vpop.eup %8867 }
0x2fd5   :  { %v5321_v33 = vsel %vm605_vm11, %v8868_v37, 0.0 }
0x2fd6   :  { %5319 = vadd.xlane.f32.xlu0 %v5318_v11  ;;  %5322 = vadd.xlane.f32.xlu1 %v5321_v33 }
0x2fe7   :  { %5334 = vrot.lane.b32.xlu1 %v10360_v13, %s9026_s17 }
0x2feb   :  { %5690 = vrot.lane.b32.xlu1 %v10370_v7, %s9017_s25 }
0x2fec   :  { %5332 = vrot.lane.b32.xlu0 %v10333_v42, %s9026_s17 }
0x2fef   :  { %5692 = vrot.lane.b32.xlu1 %v10500_v51, %s9017_s25 }
0x300b   :  { %5528 = vmax.xlane.f32.xlu0 %v5527_v20 }
0x300f   :  { %5534 = vmax.xlane.f32.xlu0 %v5533_v48 }
0x3013   :  { %5531 = vmax.xlane.f32.xlu1 %v5530_v41 }
0x305f   :  { %v5317_v49 = vpop.xlane.xlu0 %5316 }
0x3060   :  { %8869 = vrcp.f32 %v5317_v49 }
0x3063   :  { %v5323_v24 = vpop.xlane.xlu1 %5322  ;;  %v5320_v2 = vpop.xlane.xlu0 %5319 }
0x3064   :  { %8871 = vrcp.f32 %v5323_v24 }
0x3065   :  { %8873 = vrcp.f32 %v5320_v2 }
0x3067   :  { %v5335_v44 = vpop.permute.xlu1 %5334  ;;  %v5333_v47 = vpop.permute.xlu0 %5332 }
0x3068   :  { %8242 = vmatprep.subr.bf16.mxu0 %v5333_v47  ;;  %v5344_v0 = vsel %vm652_vm12, %v5335_v44, 0 }
0x3069   :  { %8243 = vmatpush3.bf16.msra.mxu0 %v5333_v47 }
0x306a   :  { %8520 = vmatprep.subr.msk.bf16.mxu0 %vm652_vm12, %v5335_v44  ;;  %v8870_v57 = vpop.eup %8869 }
0x306b   :  { %v5691_v60 = vpop.permute.xlu1 %5690  ;;  %v5327_v17 = vmul.f32 %v8870_v57, %v8864_v8 }
0x306c   :  { %v5701_v62 = vsel %vm537_vm10, %v5691_v60, 0  ;;  %8526 = vmatprep.subr.msk.bf16.mxu1 %vm537_vm10, %v5691_v60 }
0x306d   :  { %8245 = vmatpush3.bf16.msra.mxu0 %v5344_v0  ;;  %8279 = vmatpush3.bf16.xpose.msra.mxu1 %v5701_v62 }
0x306e   :  { %v8872_v32 = vpop.eup %8871  ;;  %8521 = vmatprep.subr.msk.bf16.mxu0 %vm652_vm12, %v10520_v56 }
0x306f   :  { %v8874_v19 = vpop.eup %8873  ;;  %v5329_v28 = vmul.f32 %v8872_v32, %v8868_v37  ;;  %v5693_v39 = vpop.permute.xlu1 %5692 }
0x3070   :  { %8527 = vmatprep.subr.msk.bf16.mxu1 %vm537_vm10, %v5693_v39  ;;  %v5328_v55 = vmul.f32 %v8874_v19, %v8866_v26  ;;  %v5704_v23 = vsel %vm537_vm10, %v5693_v39, 0 }
0x3071   :  { %v5331_v46 = vpack.c.bf16 %v5329_v28, %v5329_v28 }
0x3072   :  { %v5330_v29 = vpack.c.bf16 %v5328_v55, %v5327_v17 }
0x3074   :  { %8246 = vmatprep.mubr.msk.bf16.mxu0 %vm605_vm11, %v5330_v29 }
0x3075   :  { %8247 = vmatmul.mubr.msk.bf16.vlgmr.msra.gmra.mrb[144].mxu0 %vm605_vm11, %v5331_v46  ;;  %8281 = vmatpush3.bf16.xpose.msra.mxu1 %v5704_v23 }
0x3076   :  { %8251 = vmatpush3.bf16.msra.mxu0 %v10006_v10 }
0x307c   :  { %8283 = vmatmul.mubr.msk.bf16.vlgmr.msra.gmra.mrb[148].mxu1 %vm537_vm10, %v10500_v51 }
0x3098   :  { %v5529_v58 = vpop.xlane.xlu0 %5528 }
0x3099   :  { %v5536_v59 = vsub.f32 %v5524_v27, %v5529_v58 }
0x309b   :  { %v5539_v53 = vmul.f32 1.442695, %v5536_v59 }
0x309c   :  { %v5535_v1 = vpop.xlane.xlu0 %5534 }
0x309d   :  { %8875 = vpow2.f32 %v5539_v53  ;;  %v5538_v25 = vsub.f32 %v5526_v18, %v5535_v1  ;;  %v10552_v1 = vld [vmem:[%s10920_s6 + $0x1c] sm:$0xf] }
0x309f   :  { %v5543_v61 = vmul.f32 1.442695, %v5538_v25 }
0x30a0   :  { %v5532_v52 = vpop.xlane.xlu1 %5531 }
0x30a1   :  { %8877 = vpow2.f32 %v5543_v61  ;;  %v5537_v8 = vsub.f32 %v5525_v30, %v5532_v52 }
0x30a3   :  { %v5541_v54 = vmul.f32 1.442695, %v5537_v8 }
0x30a5   :  { %8879 = vpow2.f32 %v5541_v54 }
0x30a7   :  { %v8876_v26 = vpop.eup %8875 }
0x30a8   :  { %v5545_v37 = vsel %vm605_vm11, %v8876_v26, 0.0 }
0x30a9   :  { %5546 = vadd.xlane.f32.xlu0 %v5545_v37 }
0x30ab   :  { %v8878_v11 = vpop.eup %8877 }
0x30ac   :  { %v5551_v33 = vsel %vm605_vm11, %v8878_v11, 0.0 }
0x30ad   :  { %5552 = vadd.xlane.f32.xlu1 %v5551_v33 }
0x30af   :  { %v8880_v35 = vpop.eup %8879 }
0x30b0   :  { %v5548_v3 = vsel %vm605_vm11, %v8880_v35, 0.0 }
0x30b1   :  { %5549 = vadd.xlane.f32.xlu0 %v5548_v3 }
0x30be   :  { %5564 = vrot.lane.b32.xlu1 %v10360_v13, %s9027_s18 }
0x30c7   :  { %5562 = vrot.lane.b32.xlu0 %v10333_v42, %s9027_s18 }
0x3136   :  { %v5547_v27 = vpop.xlane.xlu0 %5546 }
0x3137   :  { %8881 = vrcp.f32 %v5547_v27 }
0x313a   :  { %v5553_v14 = vpop.xlane.xlu1 %5552 }
0x313e   :  { %v5550_v18 = vpop.xlane.xlu0 %5549  ;;  %v5565_v57 = vpop.permute.xlu1 %5564 }
0x313f   :  { %8883 = vrcp.f32 %v5550_v18  ;;  %v5574_v55 = vsel %vm652_vm12, %v5565_v57, 0 }
0x3140   :  { %8885 = vrcp.f32 %v5553_v14 }
0x3141   :  { %v8882_v30 = vpop.eup %8881 }
0x3142   :  { %v5563_v20 = vpop.permute.xlu0 %5562  ;;  %v5557_v2 = vmul.f32 %v8882_v30, %v8876_v26 }
0x3143   :  { %8264 = vmatprep.subr.bf16.mxu0 %v5563_v20 }
0x3148   :  { %v8248_v48 = vpop.f32.mrb[144].mxu0 }
0x3149   :  { %v8884_v41 = vpop.eup %8883  ;;  %v5380_v49 = vpop.f32.mrb[145].mxu0  ;;  %v5395_v0 = vpack.c.bf16 %v8248_v48, %v8248_v48 }
0x314a   :  { %v8249_v24 = vpop.f32.mrb[146].mxu0  ;;  %v5558_v44 = vmul.f32 %v8884_v41, %v8880_v35  ;;  %v8886_v42 = vpop.eup %8885 }
0x314b   :  { %v5383_v47 = vpop.f32.mrb[147].mxu0  ;;  %v5559_v19 = vmul.f32 %v8886_v42, %v8878_v11 }
0x314c   :  { %v5394_v13 = vpack.c.bf16 %v5383_v47, %v5380_v49  ;;  %v5560_v60 = vpack.c.bf16 %v5558_v44, %v5557_v2 }
0x314d   :  { %v5561_v53 = vpack.c.bf16 %v5559_v19, %v5559_v19 }
0x314e   :  { %8252 = vmatprep.mubr.msk.bf16.mxu0 %vm537_vm10, %v5394_v13 }
0x314f   :  { %8253 = vmatmul.mubr.msk.bf16.vlgmr.msra.gmra.mrb[148].mxu0 %vm537_vm10, %v5395_v0  ;;  %v8284_v62 = vpop.f32.mrb[148].mxu1 }
0x3150   :  { %8265 = vmatpush3.bf16.msra.mxu0 %v5563_v20  ;;  %8268 = vmatprep.mubr.msk.bf16.mxu0 %vm605_vm11, %v5560_v60  ;;  %v5740_v32 = vpop.f32.mrb[149].mxu1  ;;  %v5756_v46 = vmul.f32 %v8284_v62, %v9831_v63 }
0x3151   :  { %8524 = vmatprep.subr.msk.bf16.mxu0 %vm652_vm12, %v5565_v57  ;;  %v5754_v28 = vmul.f32 %v5740_v32, %v9831_v63  ;;  %v8285_v39 = vpop.f32.mrb[150].mxu1 }
0x3152   :  { %v5743_v17 = vpop.f32.mrb[151].mxu1  ;;  %v5759_v25 = vadd.f32 %v5756_v46, %v9355_v6 }
0x3153   :  { %v5757_v29 = vadd.f32 %v5754_v28, %v9341_v36  ;;  %v5755_v23 = vmul.f32 %v5743_v17, %v9831_v63 }
0x3154   :  { %8267 = vmatpush3.bf16.msra.mxu0 %v5574_v55  ;;  %v5766_v52 = vsel %vm605_vm11, %v5759_v25, -inf }
0x3155   :  { %v5758_v58 = vadd.f32 %v5755_v23, %v9347_v40  ;;  %v5760_v59 = vsel %vm605_vm11, %v5757_v29, -inf  ;;  %8525 = vmatprep.subr.msk.bf16.mxu0 %vm652_vm12, %v10552_v1 }
0x3156   :  { %5761 = vmax.xlane.f32.xlu1 %v5760_v59 }
0x3157   :  { %8269 = vmatmul.mubr.msk.bf16.vlgmr.msra.gmra.mrb[152].mxu0 %vm605_vm11, %v5561_v53  ;;  %v5763_v61 = vsel %vm605_vm11, %v5758_v58, -inf }
0x3158   :  { %5764 = vmax.xlane.f32.xlu0 %v5763_v61  ;;  %8273 = vmatpush3.bf16.msra.mxu0 %v10035_v38 }
0x315c   :  { %5767 = vmax.xlane.f32.xlu0 %v5766_v52 }
0x31e3   :  { %v5762_v8 = vpop.xlane.xlu1 %5761 }
0x31e4   :  { %v5769_v37 = vsub.f32 %v5757_v29, %v5762_v8 }
0x31e5   :  { %v5765_v54 = vpop.xlane.xlu0 %5764 }
0x31e6   :  { %v5770_v26 = vsub.f32 %v5758_v58, %v5765_v54  ;;  %v5772_v3 = vmul.f32 1.442695, %v5769_v37 }
0x31e8   :  { %v5774_v11 = vmul.f32 1.442695, %v5770_v26 }
0x31e9   :  { %v5768_v33 = vpop.xlane.xlu0 %5767 }
0x31ea   :  { %8887 = vpow2.f32 %v5774_v11  ;;  %v5771_v35 = vsub.f32 %v5759_v25, %v5768_v33 }
0x31ec   :  { %v5776_v27 = vmul.f32 1.442695, %v5771_v35 }
0x31ee   :  { %8889 = vpow2.f32 %v5776_v27 }
0x31ef   :  { %8891 = vpow2.f32 %v5772_v3 }
0x31f4   :  { %v8888_v18 = vpop.eup %8887 }
0x31f5   :  { %v5781_v14 = vsel %vm605_vm11, %v8888_v18, 0.0 }
0x31f6   :  { %5782 = vadd.xlane.f32.xlu0 %v5781_v14 }
0x31f8   :  { %v8890_v20 = vpop.eup %8889 }
0x31f9   :  { %v5784_v30 = vsel %vm605_vm11, %v8890_v20, 0.0  ;;  %v8892_v48 = vpop.eup %8891 }
0x31fa   :  { %5785 = vadd.xlane.f32.xlu1 %v5784_v30  ;;  %v5778_v41 = vsel %vm605_vm11, %v8892_v48, 0.0 }
0x31fe   :  { %5779 = vadd.xlane.f32.xlu1 %v5778_v41 }
0x320c   :  { %5795 = vrot.lane.b32.xlu0 %v10370_v7, %s9018_s4 }
0x320f   :  { %5797 = vrot.lane.b32.xlu1 %v10500_v51, %s9018_s4 }
0x3210   :  { %5859 = vrot.lane.b32.xlu0 %v10370_v7, %s9019_s26 }
0x3213   :  { %5863 = vrot.lane.b32.xlu1 %v10370_v7, %s9020_s27 }
0x3217   :  { %5865 = vrot.lane.b32.xlu1 %v10500_v51, %s9020_s27 }
0x321b   :  { %5861 = vrot.lane.b32.xlu1 %v10500_v51, %s9019_s26 }
0x3222   :  { %v8254_v49 = vpop.f32.mrb[148].mxu0 }
0x3223   :  { %v5452_v24 = vadd.f32 %v8254_v49, %v10474_v45  ;;  %v5436_v2 = vpop.f32.mrb[149].mxu0 }
0x3224   :  { %v5450_v44 = vadd.f32 %v5436_v2, %v10476_v43  ;;  %v8255_v47 = vpop.f32.mrb[150].mxu0 }
0x3225   :  { %v5439_v13 = vpop.f32.mrb[151].mxu0 }
0x3226   :  { %v5451_v60 = vadd.f32 %v5439_v13, %v10478_v9 }
0x322a   :  { %v8270_v0 = vpop.f32.mrb[152].mxu0 }
0x322b   :  { %v5610_v42 = vpop.f32.mrb[153].mxu0  ;;  %v5625_v19 = vpack.c.bf16 %v8270_v0, %v8270_v0 }
0x322c   :  { %v8271_v62 = vpop.f32.mrb[154].mxu0 }
0x322d   :  { %v5613_v57 = vpop.f32.mrb[155].mxu0 }
0x322e   :  { %v5624_v32 = vpack.c.bf16 %v5613_v57, %v5610_v42 }
0x3230   :  { %8274 = vmatprep.mubr.msk.bf16.mxu0 %vm537_vm10, %v5624_v32 }
0x3231   :  { %8275 = vmatmul.mubr.msk.bf16.vlgmr.msra.gmra.mrb[156].mxu0 %vm537_vm10, %v5625_v19 }
0x3283   :  { %v5783_v28 = vpop.xlane.xlu0 %5782 }
0x3287   :  { %v5786_v39 = vpop.xlane.xlu1 %5785  ;;  %v5796_v45 = vpop.permute.xlu0 %5795 }
0x3288   :  { %8286 = vmatprep.subr.bf16.mxu0 %v5796_v45  ;;  %8893 = vrcp.f32 %v5786_v39 }
0x3289   :  { %8287 = vmatpush3.bf16.msra.mxu0 %v5796_v45  ;;  %8895 = vrcp.f32 %v5783_v28 }
0x328b   :  { %v5780_v43 = vpop.xlane.xlu1 %5779  ;;  %v5860_v52 = vpop.permute.xlu0 %5859 }
0x328c   :  { %8897 = vrcp.f32 %v5780_v43 }
0x328f   :  { %v5798_v9 = vpop.permute.xlu1 %5797 }
0x3290   :  { %v5807_v17 = vsel %vm652_vm12, %v5798_v9, 0  ;;  %8528 = vmatprep.subr.msk.bf16.mxu0 %vm652_vm12, %v5798_v9 }
0x3291   :  { %8289 = vmatpush3.bf16.msra.mxu0 %v5807_v17 }
0x3292   :  { %v8894_v55 = vpop.eup %8893 }
0x3293   :  { %v5864_v46 = vpop.permute.xlu1 %5863  ;;  %v8896_v29 = vpop.eup %8895  ;;  %v5792_v58 = vmul.f32 %v8894_v55, %v8890_v20 }
0x3294   :  { %8529 = vmatprep.subr.msk.bf16.mxu0 %vm537_vm10, %v5864_v46  ;;  %v5791_v53 = vmul.f32 %v8896_v29, %v8888_v18  ;;  %v5874_v8 = vsel %vm537_vm10, %v5864_v46, 0 }
0x3295   :  { %v5794_v61 = vpack.c.bf16 %v5792_v58, %v5792_v58 }
0x3296   :  { %v8898_v23 = vpop.eup %8897 }
0x3297   :  { %v5790_v59 = vmul.f32 %v8898_v23, %v8892_v48  ;;  %v5866_v54 = vpop.permute.xlu1 %5865 }
0x3298   :  { %v5877_v26 = vsel %vm537_vm10, %v5866_v54, 0 }
0x3299   :  { %v5793_v25 = vpack.c.bf16 %v5791_v53, %v5790_v59 }
0x329b   :  { %8290 = vmatprep.mubr.msk.bf16.mxu0 %vm605_vm11, %v5793_v25  ;;  %v5862_v37 = vpop.permute.xlu1 %5861 }
0x329c   :  { %8291 = vmatmul.mubr.msk.bf16.vlgmr.msra.gmra.mrb[160].mxu0 %vm605_vm11, %v5794_v61 }
0x329d   :  { %8295 = vmatpush3.bf16.xpose.msra.mxu0 %v5874_v8  ;;  %8298 = vmatprep.mubr.msk.bf16.mxu0 %vm537_vm10, %v5860_v52 }
0x329e   :  { %8530 = vmatprep.subr.msk.bf16.mxu0 %vm537_vm10, %v5866_v54 }
0x32a5   :  { %8297 = vmatpush3.bf16.xpose.msra.mxu0 %v5877_v26 }
0x32a6   :  { %8533 = vmatprep.subr.msk.bf16.mxu0 %vm652_vm12, %v10451_v4 }
0x32ac   :  { %8299 = vmatmul.mubr.msk.bf16.vlgmr.msra.gmra.mrb[164].mxu0 %vm537_vm10, %v5862_v37 }
0x32ad   :  { %8317 = vmatpush3.bf16.msra.mxu0 %v9923_v16 }
0x3304   :  { %v8276_v11 = vpop.f32.mrb[156].mxu0 }
0x3305   :  { %v10594_v33 = vadd.f32 %v8276_v11, %v5452_v24  ;;  %v5666_v35 = vpop.f32.mrb[157].mxu0 }
0x3306   :  { %v10596_v3 = vadd.f32 %v5666_v35, %v5450_v44  ;;  %v8277_v27 = vpop.f32.mrb[158].mxu0 }
0x3307   :  { %v5669_v18 = vpop.f32.mrb[159].mxu0 }
0x3308   :  { %v10598_v14 = vadd.f32 %v5669_v18, %v5451_v60 }
0x336f   :  { %v8292_v20 = vpop.f32.mrb[160].mxu0 }
0x3370   :  { %v5843_v30 = vpop.f32.mrb[161].mxu0  ;;  %v5858_v49 = vpack.c.bf16 %v8292_v20, %v8292_v20 }
0x3371   :  { %v8293_v48 = vpop.f32.mrb[162].mxu0 }
0x3372   :  { %v5846_v41 = vpop.f32.mrb[163].mxu0 }
0x3373   :  { %v5857_v4 = vpack.c.bf16 %v5846_v41, %v5843_v30  ;;  %v8967_v41 = vld [vmem:[%s10920_s6 + $0x14] sm:$0xf] }
0x3375   :  { %8318 = vmatprep.mubr.msk.bf16.mxu0 %vm537_vm10, %v5857_v4 }
0x3376   :  { %8319 = vmatmul.mubr.msk.bf16.vlgmr.msra.gmra.mrb[168].mxu0 %vm537_vm10, %v5858_v49 }
0x337f   :  { %v8300_v16 = vpop.f32.mrb[164].mxu0 }
0x3380   :  { %v5913_v24 = vpop.f32.mrb[165].mxu0  ;;  %v5929_v2 = vmul.f32 %v8300_v16, %v9831_v63 }
0x3381   :  { %v5927_v44 = vmul.f32 %v5913_v24, %v9831_v63  ;;  %v8301_v47 = vpop.f32.mrb[166].mxu0 }
0x3382   :  { %v5916_v13 = vpop.f32.mrb[167].mxu0  ;;  %v5932_v42 = vadd.f32 %v5929_v2, %v9355_v6 }
0x3383   :  { %v5930_v60 = vadd.f32 %v5927_v44, %v9341_v36  ;;  %v5928_v0 = vmul.f32 %v5916_v13, %v9831_v63 }
0x3384   :  { %v5939_v19 = vsel %vm605_vm11, %v5932_v42, -inf }
0x3385   :  { %v5931_v62 = vadd.f32 %v5928_v0, %v9347_v40  ;;  %v5933_v57 = vsel %vm605_vm11, %v5930_v60, -inf }
0x3386   :  { %5934 = vmax.xlane.f32.xlu0 %v5933_v57 }
0x3387   :  { %v5936_v32 = vsel %vm605_vm11, %v5931_v62, -inf }
0x3388   :  { %5937 = vmax.xlane.f32.xlu1 %v5936_v32 }
0x338a   :  { %5940 = vmax.xlane.f32.xlu0 %v5939_v19 }
0x3413   :  { %v5935_v28 = vpop.xlane.xlu0 %5934 }
0x3414   :  { %v5942_v39 = vsub.f32 %v5930_v60, %v5935_v28 }
0x3415   :  { %v5938_v45 = vpop.xlane.xlu1 %5937 }
0x3416   :  { %v5945_v43 = vmul.f32 1.442695, %v5942_v39  ;;  %v5943_v9 = vsub.f32 %v5931_v62, %v5938_v45 }
0x3417   :  { %v5941_v17 = vpop.xlane.xlu0 %5940 }
0x3418   :  { %8899 = vpow2.f32 %v5945_v43  ;;  %v5947_v55 = vmul.f32 1.442695, %v5943_v9  ;;  %v5944_v46 = vsub.f32 %v5932_v42, %v5941_v17 }
0x341a   :  { %8901 = vpow2.f32 %v5947_v55  ;;  %v5949_v29 = vmul.f32 1.442695, %v5944_v46 }
0x341c   :  { %8903 = vpow2.f32 %v5949_v29  ;;  %v8968_v29 = vld [vmem:[%s10921_s7] sm:$0xff]  }
0x3422   :  { %v8900_v23 = vpop.eup %8899 }
0x3423   :  { %v5951_v58 = vsel %vm605_vm11, %v8900_v23, 0.0 }
0x3424   :  { %v8902_v59 = vpop.eup %8901  ;;  %5952 = vadd.xlane.f32.xlu0 %v5951_v58 }
0x3425   :  { %v5954_v61 = vsel %vm605_vm11, %v8902_v59, 0.0 }
0x3426   :  { %v8904_v53 = vpop.eup %8903 }
0x3427   :  { %v5957_v25 = vsel %vm605_vm11, %v8904_v53, 0.0 }
0x3428   :  { %5958 = vadd.xlane.f32.xlu1 %v5957_v25  ;;  %5955 = vadd.xlane.f32.xlu0 %v5954_v61 }
0x3439   :  { %5970 = vrot.lane.b32.xlu1 %v10500_v51, %s9021_s29 }
0x343d   :  { %6144 = vrot.lane.b32.xlu1 %v10370_v7, %s9022_s30 }
0x343e   :  { %5968 = vrot.lane.b32.xlu0 %v10370_v7, %s9021_s29 }
0x3441   :  { %6146 = vrot.lane.b32.xlu1 %v10500_v51, %s9022_s30 }
0x3442   :  { %6140 = vrot.lane.b32.xlu0 %v10370_v7, %s9023_s12 }
0x3445   :  { %6142 = vrot.lane.b32.xlu1 %v10500_v51, %s9023_s12 }
0x3446   :  { %6374 = vrot.lane.b32.xlu0 %v10370_v7, %s9024_s13 }
0x3449   :  { %6376 = vrot.lane.b32.xlu1 %v10500_v51, %s9024_s13  ;;  %v10630_v52 = vpop.f32.mrb[168].mxu0 }
0x344a   :  { %6370 = vrot.lane.b32.xlu0 %v10370_v7, %s9025_s14  ;;  %v10634_v8 = vpop.f32.mrb[169].mxu0 }
0x344b   :  { %v8321_v54 = vpop.f32.mrb[170].mxu0 }
0x344c   :  { %v10636_v26 = vpop.f32.mrb[171].mxu0 }
0x344d   :  { %6372 = vrot.lane.b32.xlu1 %v10500_v51, %s9025_s14 }
0x34b1   :  { %v5953_v37 = vpop.xlane.xlu0 %5952 }
0x34b2   :  { %8905 = vrcp.f32 %v5953_v37 }
0x34b5   :  { %v5956_v11 = vpop.xlane.xlu0 %5955  ;;  %v5959_v35 = vpop.xlane.xlu1 %5958 }
0x34b6   :  { %8907 = vrcp.f32 %v5956_v11 }
0x34b7   :  { %8909 = vrcp.f32 %v5959_v35 }
0x34b9   :  { %v5969_v27 = vpop.permute.xlu0 %5968  ;;  %v5971_v18 = vpop.permute.xlu1 %5970 }
0x34ba   :  { %8302 = vmatprep.subr.bf16.mxu1 %v5969_v27  ;;  %v5980_v30 = vsel %vm652_vm12, %v5971_v18, 0 }
0x34bb   :  { %8303 = vmatpush3.bf16.msra.mxu1 %v5969_v27 }
0x34bc   :  { %8531 = vmatprep.subr.msk.bf16.mxu1 %vm652_vm12, %v5971_v18  ;;  %v8906_v20 = vpop.eup %8905 }
0x34bd   :  { %v5963_v49 = vmul.f32 %v8906_v20, %v8900_v23  ;;  %v6145_v47 = vpop.permute.xlu1 %6144  ;;  %v6141_v32 = vpop.permute.xlu0 %6140  ;;  %v8969_v23 = vld [vmem:[%s10921_s7 + $0x8] sm:$0xff]  }
0x34be   :  { %v6155_v19 = vsel %vm537_vm10, %v6145_v47, 0 }
0x34bf   :  { %8305 = vmatpush3.bf16.msra.mxu1 %v5980_v30 }
0x34c0   :  { %v8908_v48 = vpop.eup %8907  ;;  %8532 = vmatprep.subr.msk.bf16.mxu1 %vm652_vm12, %v8967_v41 }
0x34c1   :  { %v8910_v4 = vpop.eup %8909  ;;  %v5964_v16 = vmul.f32 %v8908_v48, %v8902_v59  ;;  %v6147_v28 = vpop.permute.xlu1 %6146 }
0x34c2   :  { %v5965_v24 = vmul.f32 %v8910_v4, %v8904_v53  ;;  %v6375_v39 = vpop.permute.xlu0 %6374 }
0x34c3   :  { %v5966_v2 = vpack.c.bf16 %v5964_v16, %v5963_v49  ;;  %v6385_v43 = vsel %vm537_vm10, %v6375_v39, 0 }
0x34c4   :  { %v5967_v44 = vpack.c.bf16 %v5965_v24, %v5965_v24 }
0x34c5   :  { %8306 = vmatprep.mubr.msk.bf16.mxu1 %vm605_vm11, %v5966_v2  ;;  %v6143_v45 = vpop.permute.xlu1 %6142 }
0x34c6   :  { %8307 = vmatmul.mubr.msk.bf16.vlgmr.msra.gmra.mrb[152].mxu1 %vm605_vm11, %v5967_v44  ;;  %v6371_v9 = vpop.permute.xlu0 %6370 }
0x34c7   :  { %8311 = vmatpush3.bf16.msra.mxu1 %v9877_v50  ;;  %v6158_v50 = vsel %vm537_vm10, %v6147_v28, 0 }
0x34c8   :  { %8534 = vmatprep.subr.msk.bf16.mxu1 %vm537_vm10, %v6145_v47 }
0x34c9   :  { %v6377_v17 = vpop.permute.xlu1 %6376 }
0x34ca   :  { %v6388_v55 = vsel %vm537_vm10, %v6377_v17, 0 }
0x34cd   :  { %v6373_v46 = vpop.permute.xlu1 %6372 }
0x3599   :  { %v8308_v13 = vpop.f32.mrb[152].mxu1 }
0x359a   :  { %v6016_v60 = vpop.f32.mrb[153].mxu1  ;;  %v6031_v57 = vpack.c.bf16 %v8308_v13, %v8308_v13 }
0x359b   :  { %v8309_v0 = vpop.f32.mrb[154].mxu1 }
0x359c   :  { %v6019_v42 = vpop.f32.mrb[155].mxu1 }
0x359d   :  { %v6030_v62 = vpack.c.bf16 %v6019_v42, %v6016_v60 }
0x359f   :  { %8312 = vmatprep.mubr.msk.bf16.mxu1 %vm537_vm10, %v6030_v62 }
0x35a0   :  { %8313 = vmatmul.mubr.msk.bf16.vlgmr.msra.gmra.mrb[156].mxu1 %vm537_vm10, %v6031_v57 }
0x35a1   :  { %8323 = vmatpush3.bf16.xpose.msra.mxu1 %v6155_v19  ;;  %8326 = vmatprep.mubr.msk.bf16.mxu1 %vm537_vm10, %v6141_v32 }
0x35a2   :  { %8535 = vmatprep.subr.msk.bf16.mxu1 %vm537_vm10, %v6147_v28 }
0x35a9   :  { %8325 = vmatpush3.bf16.xpose.msra.mxu1 %v6158_v50 }
0x35aa   :  { %8538 = vmatprep.subr.msk.bf16.mxu1 %vm537_vm10, %v6375_v39 }
0x35b0   :  { %8327 = vmatmul.mubr.msk.bf16.vlgmr.msra.gmra.mrb[160].mxu1 %vm537_vm10, %v6143_v45 }
0x35b1   :  { %8345 = vmatpush3.bf16.xpose.msra.mxu1 %v6385_v43  ;;  %8348 = vmatprep.mubr.msk.bf16.mxu1 %vm537_vm10, %v6371_v9 }
0x35b2   :  { %8539 = vmatprep.subr.msk.bf16.mxu1 %vm537_vm10, %v6377_v17 }
0x35b9   :  { %8347 = vmatpush3.bf16.xpose.msra.mxu1 %v6388_v55 }
0x35ba   :  { %8366 = vmatprep.subr.bf16.mxu1 %v9015_v5 }
0x35c0   :  { %8349 = vmatmul.mubr.msk.bf16.vlgmr.msra.gmra.mrb[164].mxu1 %vm537_vm10, %v6373_v46 }
0x35c1   :  { %8367 = vmatpush3.bf16.msra.mxu1 %v8968_v29  ;;  %8370 = vmatprep.mubr.msk.bf16.mxu1 %vm9016_vm9, %v9015_v5 }
0x35c2   :  { %8368 = vmatprep.subr.bf16.mxu1 %v9015_v5 }
0x35c5   :  { %8369 = vmatpush3.bf16.msra.mxu1 %v8969_v23 }
0x35c6   :  { %8402 = vmatprep.subr.bf16.mxu1 %v9015_v5 }
0x3673   :  { %v8314_v58 = vpop.f32.mrb[156].mxu1 }
0x3674   :  { %v10675_v59 = vadd.f32 %v10630_v52, %v8314_v58  ;;  %v6072_v53 = vpop.f32.mrb[157].mxu1 }
0x3675   :  { %v10678_v25 = vadd.f32 %v10634_v8, %v6072_v53  ;;  %v8315_v61 = vpop.f32.mrb[158].mxu1 }
0x3676   :  { %v6075_v54 = vpop.f32.mrb[159].mxu1 }
0x3677   :  { %v10681_v37 = vadd.f32 %v10636_v26, %v6075_v54 }
0x3683   :  { %v8328_v11 = vpop.f32.mrb[160].mxu1 }
0x3684   :  { %v6194_v35 = vpop.f32.mrb[161].mxu1  ;;  %v6210_v27 = vmul.f32 %v8328_v11, %v9831_v63 }
0x3685   :  { %v6208_v18 = vmul.f32 %v6194_v35, %v9831_v63  ;;  %v8329_v20 = vpop.f32.mrb[162].mxu1 }
0x3686   :  { %v6197_v30 = vpop.f32.mrb[163].mxu1  ;;  %v6213_v8 = vadd.f32 %v6210_v27, %v9355_v6 }
0x3687   :  { %v6211_v52 = vadd.f32 %v6208_v18, %v9341_v36  ;;  %v6209_v48 = vmul.f32 %v6197_v30, %v9831_v63 }
0x3688   :  { %v6220_v49 = vsel %vm605_vm11, %v6213_v8, -inf }
0x3689   :  { %v6212_v41 = vadd.f32 %v6209_v48, %v9347_v40  ;;  %v6214_v4 = vsel %vm605_vm11, %v6211_v52, -inf }
0x368a   :  { %6215 = vmax.xlane.f32.xlu0 %v6214_v4 }
0x368b   :  { %v6217_v26 = vsel %vm605_vm11, %v6212_v41, -inf }
0x368c   :  { %6218 = vmax.xlane.f32.xlu1 %v6217_v26 }
0x368e   :  { %6221 = vmax.xlane.f32.xlu0 %v6220_v49 }
0x3693   :  { %v8350_v16 = vpop.f32.mrb[164].mxu1 }
0x3694   :  { %v6424_v24 = vpop.f32.mrb[165].mxu1  ;;  %v6440_v46 = vmul.f32 %v8350_v16, %v9831_v63 }
0x3695   :  { %v8351_v2 = vpop.f32.mrb[166].mxu1  ;;  %v6438_v17 = vmul.f32 %v6424_v24, %v9831_v63 }
0x3696   :  { %v6427_v44 = vpop.f32.mrb[167].mxu1  ;;  %v6443_v58 = vadd.f32 %v6440_v46, %v9355_v6 }
0x3697   :  { %v6439_v55 = vmul.f32 %v6427_v44, %v9831_v63  ;;  %v6441_v29 = vadd.f32 %v6438_v17, %v9341_v36 }
0x3698   :  { %v6450_v54 = vsel %vm605_vm11, %v6443_v58, -inf }
0x3699   :  { %v6442_v23 = vadd.f32 %v6439_v55, %v9347_v40  ;;  %v6444_v53 = vsel %vm605_vm11, %v6441_v29, -inf }
0x369b   :  { %v6447_v61 = vsel %vm605_vm11, %v6442_v23, -inf }
0x3717   :  { %v6216_v47 = vpop.xlane.xlu0 %6215 }
0x3718   :  { %v6223_v13 = vsub.f32 %v6211_v52, %v6216_v47 }
0x3719   :  { %v6219_v60 = vpop.xlane.xlu1 %6218 }
0x371a   :  { %v6226_v0 = vmul.f32 1.442695, %v6223_v13  ;;  %v6224_v42 = vsub.f32 %v6212_v41, %v6219_v60 }
0x371b   :  { %v6222_v62 = vpop.xlane.xlu0 %6221 }
0x371c   :  { %8911 = vpow2.f32 %v6226_v0  ;;  %v6228_v57 = vmul.f32 1.442695, %v6224_v42  ;;  %v6225_v32 = vsub.f32 %v6213_v8, %v6222_v62 }
0x371e   :  { %8913 = vpow2.f32 %v6228_v57  ;;  %v6230_v19 = vmul.f32 1.442695, %v6225_v32  ;;  %v10725_v57 = vld [vmem:[%s10916_s2 + $0x32] ss:$0 sm:$0xff] }
0x371f   :  { %v5684_v32 = vadd.f32 %v10725_v57, %v10598_v14 }
0x3720   :  { %8915 = vpow2.f32 %v6230_v19  ;;  %v5685_v19 = vadd.f32 %v10725_v57, %v10594_v33 }
0x3726   :  { %v8912_v28 = vpop.eup %8911 }
0x3727   :  { %v6232_v50 = vsel %vm605_vm11, %v8912_v28, 0.0 }
0x3728   :  { %v8914_v39 = vpop.eup %8913  ;;  %6233 = vadd.xlane.f32.xlu0 %v6232_v50  ;;  %v10733_v50 = vadd.f32 %v5685_v19, %v10341_v34 }
0x3729   :  { %v6235_v9 = vsel %vm605_vm11, %v8914_v39, 0.0 }
0x372a   :  { %v8916_v45 = vpop.eup %8915 }
0x372b   :  { %v6238_v43 = vsel %vm605_vm11, %v8916_v45, 0.0 }
0x372c   :  { %6239 = vadd.xlane.f32.xlu1 %v6238_v43  ;;  %6236 = vadd.xlane.f32.xlu0 %v6235_v9  ;;  %v6611_v43 = vmul.f32 %v10733_v50, %v10733_v50 }
0x372e   :  { %v6621_v14 = vsel %vm394_vm8, %v6611_v43, 0.0 }
0x373d   :  { %6251 = vrot.lane.b32.xlu1 %v10500_v51, %s9026_s17 }
0x3742   :  { %6249 = vrot.lane.b32.xlu0 %v10370_v7, %s9026_s17 }
0x3761   :  { %6445 = vmax.xlane.f32.xlu1 %v6444_v53  ;;  %6448 = vmax.xlane.f32.xlu0 %v6447_v61 }
0x3765   :  { %6451 = vmax.xlane.f32.xlu0 %v6450_v54 }
0x37b5   :  { %v6234_v11 = vpop.xlane.xlu0 %6233 }
0x37b6   :  { %8917 = vrcp.f32 %v6234_v11 }
0x37b9   :  { %v6237_v35 = vpop.xlane.xlu0 %6236  ;;  %v6240_v27 = vpop.xlane.xlu1 %6239 }
0x37ba   :  { %8919 = vrcp.f32 %v6237_v35 }
0x37bb   :  { %8921 = vrcp.f32 %v6240_v27 }
0x37bd   :  { %v6250_v36 = vpop.permute.xlu0 %6249  ;;  %v6252_v40 = vpop.permute.xlu1 %6251 }
0x37be   :  { %8330 = vmatprep.subr.bf16.mxu0 %v6250_v36  ;;  %v6261_v63 = vsel %vm652_vm12, %v6252_v40, 0 }
0x37bf   :  { %8331 = vmatpush3.bf16.msra.mxu0 %v6250_v36 }
0x37c0   :  { %8536 = vmatprep.subr.msk.bf16.mxu0 %vm652_vm12, %v6252_v40  ;;  %v8918_v6 = vpop.eup %8917 }
0x37c1   :  { %v6244_v30 = vmul.f32 %v8918_v6, %v8912_v28  ;;  %v6604_v28 = vadd.f32 %v5684_v32, %v10318_v31  ;;  %v8974_v32 = vld [vmem:[%s10922_s8 + $0x18] sm:$0xff]  }
0x37c3   :  { %8333 = vmatpush3.bf16.msra.mxu0 %v6261_v63 }
0x37c4   :  { %v8920_v18 = vpop.eup %8919  ;;  %8537 = vmatprep.subr.msk.bf16.mxu0 %vm652_vm12, %v10520_v56 }
0x37c5   :  { %v8922_v20 = vpop.eup %8921  ;;  %v6245_v52 = vmul.f32 %v8920_v18, %v8914_v39 }
0x37c6   :  { %v6246_v48 = vmul.f32 %v8922_v20, %v8916_v45 }
0x37c7   :  { %v6247_v8 = vpack.c.bf16 %v6245_v52, %v6244_v30 }
0x37c8   :  { %v6248_v41 = vpack.c.bf16 %v6246_v48, %v6246_v48 }
0x37c9   :  { %8334 = vmatprep.mubr.msk.bf16.mxu0 %vm605_vm11, %v6247_v8 }
0x37ca   :  { %8335 = vmatmul.mubr.msk.bf16.vlgmr.msra.gmra.mrb[172].mxu0 %vm605_vm11, %v6248_v41 }
0x37cb   :  { %8339 = vmatpush3.bf16.msra.mxu0 %v10006_v10 }
0x37ee   :  { %v6449_v4 = vpop.xlane.xlu0 %6448  ;;  %v6446_v26 = vpop.xlane.xlu1 %6445 }
0x37ef   :  { %v6454_v49 = vsub.f32 %v6442_v23, %v6449_v4  ;;  %v6453_v24 = vsub.f32 %v6441_v29, %v6446_v26 }
0x37f1   :  { %v6458_v16 = vmul.f32 1.442695, %v6454_v49  ;;  %v6456_v44 = vmul.f32 1.442695, %v6453_v24 }
0x37f2   :  { %v6452_v2 = vpop.xlane.xlu0 %6451 }
0x37f3   :  { %8923 = vpow2.f32 %v6458_v16  ;;  %v6455_v56 = vsub.f32 %v6443_v58, %v6452_v2 }
0x37f5   :  { %v6460_v47 = vmul.f32 1.442695, %v6455_v56 }
0x37f7   :  { %8925 = vpow2.f32 %v6460_v47 }
0x37f8   :  { %8927 = vpow2.f32 %v6456_v44 }
0x37fd   :  { %v8924_v13 = vpop.eup %8923 }
0x37fe   :  { %v6465_v60 = vsel %vm605_vm11, %v8924_v13, 0.0 }
0x37ff   :  { %6466 = vadd.xlane.f32.xlu0 %v6465_v60 }
0x3801   :  { %v8926_v0 = vpop.eup %8925 }
0x3802   :  { %v6468_v42 = vsel %vm605_vm11, %v8926_v0, 0.0  ;;  %v8928_v10 = vpop.eup %8927 }
0x3803   :  { %6469 = vadd.xlane.f32.xlu1 %v6468_v42  ;;  %v6462_v62 = vsel %vm605_vm11, %v8928_v10, 0.0 }
0x3807   :  { %6463 = vadd.xlane.f32.xlu1 %v6462_v62 }
0x3815   :  { %6479 = vrot.lane.b32.xlu0 %v10370_v7, %s9027_s18  ;;  %v5683_v7 = vadd.f32 %v10725_v57, %v10596_v3 }
0x3817   :  { %v6603_v39 = vadd.f32 %v5683_v7, %v10316_v22 }
0x3818   :  { %6481 = vrot.lane.b32.xlu1 %v10500_v51, %s9027_s18  ;;  %v6610_v51 = vmul.f32 %v6604_v28, %v6604_v28 }
0x3819   :  { %v6609_v33 = vmul.f32 %v6603_v39, %v6603_v39 }
0x381a   :  { %v6618_v45 = vsel %vm394_vm8, %v6610_v51, 0.0 }
0x381b   :  { %v6615_v31 = vsel %vm394_vm8, %v6609_v33, 0.0 }
0x3834   :  { %6619 = vadd.xlane.f32.xlu0 %v6618_v45 }
0x3838   :  { %6622 = vadd.xlane.f32.xlu0 %v6621_v14 }
0x383c   :  { %6616 = vadd.xlane.f32.xlu1 %v6615_v31 }
0x388c   :  { %v6467_v34 = vpop.xlane.xlu0 %6466 }
0x388d   :  { %8929 = vrcp.f32 %v6467_v34 }
0x3890   :  { %v6480_v9 = vpop.permute.xlu0 %6479  ;;  %v6470_v17 = vpop.xlane.xlu1 %6469 }
0x3891   :  { %8352 = vmatprep.subr.bf16.mxu0 %v6480_v9 }
0x3894   :  { %v6464_v3 = vpop.xlane.xlu1 %6463 }
0x3895   :  { %8931 = vrcp.f32 %v6464_v3 }
0x3896   :  { %8933 = vrcp.f32 %v6470_v17 }
0x3897   :  { %v8930_v22 = vpop.eup %8929 }
0x3898   :  { %v6475_v61 = vmul.f32 %v8930_v22, %v8924_v13  ;;  %v6482_v36 = vpop.permute.xlu1 %6481 }
0x3899   :  { %v6491_v6 = vsel %vm652_vm12, %v6482_v36, 0 }
0x389d   :  { %v8336_v55 = vpop.f32.mrb[172].mxu0 }
0x389e   :  { %v6297_v46 = vpop.f32.mrb[173].mxu0  ;;  %v6312_v11 = vpack.c.bf16 %v8336_v55, %v8336_v55 }
0x389f   :  { %v8932_v29 = vpop.eup %8931  ;;  %v8337_v23 = vpop.f32.mrb[174].mxu0 }
0x38a0   :  { %v6300_v58 = vpop.f32.mrb[175].mxu0  ;;  %v6474_v53 = vmul.f32 %v8932_v29, %v8928_v10  ;;  %v8934_v27 = vpop.eup %8933 }
0x38a1   :  { %v6311_v54 = vpack.c.bf16 %v6300_v58, %v6297_v46  ;;  %v6476_v40 = vmul.f32 %v8934_v27, %v8926_v0 }
0x38a2   :  { %v6477_v35 = vpack.c.bf16 %v6475_v61, %v6474_v53 }
0x38a3   :  { %8340 = vmatprep.mubr.msk.bf16.mxu0 %vm537_vm10, %v6311_v54  ;;  %v6478_v63 = vpack.c.bf16 %v6476_v40, %v6476_v40 }
0x38a4   :  { %8341 = vmatmul.mubr.msk.bf16.vlgmr.msra.gmra.mrb[176].mxu0 %vm537_vm10, %v6312_v11 }
0x38a5   :  { %8353 = vmatpush3.bf16.msra.mxu0 %v6480_v9  ;;  %8356 = vmatprep.mubr.msk.bf16.mxu0 %vm605_vm11, %v6477_v35 }
0x38a6   :  { %8540 = vmatprep.subr.msk.bf16.mxu0 %vm652_vm12, %v6482_v36 }
0x38a9   :  { %8355 = vmatpush3.bf16.msra.mxu0 %v6491_v6 }
0x38aa   :  { %8541 = vmatprep.subr.msk.bf16.mxu0 %vm652_vm12, %v10552_v1 }
0x38ac   :  { %8357 = vmatmul.mubr.msk.bf16.vlgmr.msra.gmra.mrb[180].mxu0 %vm605_vm11, %v6478_v63 }
0x38ad   :  { %8361 = vmatpush3.bf16.msra.mxu0 %v10035_v38 }
0x38ae   :  { %8382 = vmatprep.subr.bf16.mxu0 %v9015_v5 }
0x38c1   :  { %v6620_v18 = vpop.xlane.xlu0 %6619 }
0x38c2   :  { %v6634_v20 = vmul.f32 0.03125, %v6620_v18 }
0x38c4   :  { %v6640_v30 = vadd.f32 1e-06, %v6634_v20 }
0x38c6   :  { %8935 = vrsqrt.f32 %v6640_v30 }
0x38c9   :  { %v6617_v52 = vpop.xlane.xlu1 %6616 }
0x38ca   :  { %v6633_v48 = vmul.f32 0.03125, %v6617_v52 }
0x38cc   :  { %v6639_v8 = vadd.f32 1e-06, %v6633_v48 }
0x38ce   :  { %8937 = vrsqrt.f32 %v6639_v8 }
0x38d0   :  { %v8936_v41 = vpop.eup %8935 }
0x38d1   :  { %v10753_v26 = vmul.f32 %v8936_v41, %v6604_v28 }
0x38d8   :  { %v8938_v4 = vpop.eup %8937 }
0x38d9   :  { %v10755_v49 = vmul.f32 %v8938_v4, %v6603_v39 }
0x38db   :  { %v6657_v1 = vpack.c.bf16 %v10753_v26, %v10755_v49 }
0x38dd   :  { %8371 = vmatmul.mubr.msk.bf16.vlgmr.msra.gmra.mrb[168].mxu1 %vm394_vm8, %v6657_v1 }
0x38de   :  { %8374 = vmatprep.mubr.msk.bf16.mxu1 %vm9016_vm9, %v9015_v5 }
0x3977   :  { %v8342_v38 = vpop.f32.mrb[176].mxu0 }
0x3978   :  { %v6369_v16 = vadd.f32 %v8342_v38, %v10675_v59  ;;  %v6353_v24 = vpop.f32.mrb[177].mxu0  ;;  %v8971_v59 = vld [vmem:[%s10922_s8] sm:$0xff]  }
0x3979   :  { %v6367_v2 = vadd.f32 %v6353_v24, %v10678_v25  ;;  %v8343_v56 = vpop.f32.mrb[178].mxu0  ;;  %v8972_v25 = vld [vmem:[%s10922_s8 + $0x8] sm:$0xff]  }
0x397a   :  { %v6356_v44 = vpop.f32.mrb[179].mxu0 }
0x397b   :  { %v6368_v47 = vadd.f32 %v6356_v44, %v10681_v37  ;;  %v8973_v37 = vld [vmem:[%s10922_s8 + $0x10] sm:$0xff]  }
0x397f   :  { %v8358_v13 = vpop.f32.mrb[180].mxu0 }
0x3980   :  { %v6527_v60 = vpop.f32.mrb[181].mxu0  ;;  %v6542_v62 = vpack.c.bf16 %v8358_v13, %v8358_v13 }
0x3981   :  { %v8359_v0 = vpop.f32.mrb[182].mxu0 }
0x3982   :  { %v6530_v42 = vpop.f32.mrb[183].mxu0 }
0x3983   :  { %v6541_v10 = vpack.c.bf16 %v6530_v42, %v6527_v60 }
0x3985   :  { %8362 = vmatprep.mubr.msk.bf16.mxu0 %vm537_vm10, %v6541_v10 }
0x3986   :  { %8363 = vmatmul.mubr.msk.bf16.vlgmr.msra.gmra.mrb[184].mxu0 %vm537_vm10, %v6542_v62 }
0x3987   :  { %8383 = vmatpush3.bf16.msra.mxu0 %v8971_v59  ;;  %8390 = vmatprep.mubr.msk.bf16.mxu0 %vm9016_vm9, %v9015_v5 }
0x3988   :  { %8384 = vmatprep.subr.bf16.mxu0 %v9015_v5 }
0x398b   :  { %8385 = vmatpush3.bf16.msra.mxu0 %v8972_v25 }
0x398c   :  { %8386 = vmatprep.subr.bf16.mxu0 %v9015_v5 }
0x398f   :  { %8387 = vmatpush3.bf16.msra.mxu0 %v8973_v37 }
0x3990   :  { %8388 = vmatprep.subr.bf16.mxu0 %v9015_v5 }
0x3993   :  { %8389 = vmatpush3.bf16.msra.mxu0 %v8974_v32 }
0x3994   :  { %8418 = vmatprep.subr.bf16.mxu0 %v9015_v5 }
0x39b0   :  { %v6703_v19 = vpop.f32.mrb[168].mxu1 }
0x39b1   :  { %v8372_v28 = vpop.f32.mrb[169].mxu1 }
0x39b2   :  { %v6706_v7 = vpop.f32.mrb[170].mxu1 }
0x39b3   :  { %v8373_v51 = vpop.f32.mrb[171].mxu1 }
0x3a59   :  { %v8364_v39 = vpop.f32.mrb[184].mxu0 }
0x3a5a   :  { %v6599_v45 = vadd.f32 %v8364_v39, %v6369_v16  ;;  %v6583_v43 = vpop.f32.mrb[185].mxu0 }
0x3a5b   :  { %v6597_v14 = vadd.f32 %v6583_v43, %v6367_v2  ;;  %v8365_v33 = vpop.f32.mrb[186].mxu0 }
0x3a5c   :  { %v6602_v31 = vadd.f32 %v10725_v57, %v6599_v45  ;;  %v6586_v34 = vpop.f32.mrb[187].mxu0 }
0x3a5d   :  { %v6600_v9 = vadd.f32 %v10725_v57, %v6597_v14  ;;  %v6598_v17 = vadd.f32 %v6586_v34, %v6368_v47  ;;  %v8583_v14 = vld [vmem:[%s10921_s7 + $0x10] sm:$0xff]  }
0x3a5e   :  { %v6608_v3 = vadd.f32 %v6602_v31, %v10354_v21  ;;  %8403 = vmatpush3.bf16.msra.mxu1 %v8583_v14 }
0x3a5f   :  { %v6606_v22 = vadd.f32 %v6600_v9, %v10343_v15  ;;  %v6601_v55 = vadd.f32 %v10725_v57, %v6598_v17  ;;  %v6623_v15 = vpop.xlane.xlu0 %6622  ;;  %8404 = vmatprep.subr.bf16.mxu1 %v9015_v5 }
0x3a60   :  { %v6614_v53 = vmul.f32 %v6608_v3, %v6608_v3  ;;  %v6635_v21 = vmul.f32 0.03125, %v6623_v15 }
0x3a61   :  { %v6607_v46 = vadd.f32 %v6601_v55, %v10352_v12  ;;  %v6612_v29 = vmul.f32 %v6606_v22, %v6606_v22 }
0x3a62   :  { %v6630_v54 = vsel %vm394_vm8, %v6614_v53, 0.0  ;;  %v6641_v57 = vadd.f32 1e-06, %v6635_v21 }
0x3a63   :  { %v6624_v23 = vsel %vm394_vm8, %v6612_v29, 0.0  ;;  %v6613_v58 = vmul.f32 %v6607_v46, %v6607_v46 }
0x3a64   :  { %6625 = vadd.xlane.f32.xlu1 %v6624_v23  ;;  %8939 = vrsqrt.f32 %v6641_v57 }
0x3a65   :  { %v6627_v61 = vsel %vm394_vm8, %v6613_v58, 0.0 }
0x3a66   :  { %6628 = vadd.xlane.f32.xlu0 %v6627_v61 }
0x3a68   :  { %6631 = vadd.xlane.f32.xlu1 %v6630_v54 }
0x3a6e   :  { %v8940_v41 = vpop.eup %8939 }
0x3a6f   :  { %v10800_v1 = vmul.f32 %v8940_v41, %v10733_v50 }
0x3a79   :  { %6734 = vrot.lane.b32.xlu1 %v6706_v7, %s9018_s4 }
0x3a7c   :  { %6732 = vrot.lane.b32.xlu0 %v6703_v19, %s9018_s4 }
0x3af1   :  { %v6626_v12 = vpop.xlane.xlu1 %6625 }
0x3af2   :  { %v6636_v11 = vmul.f32 0.03125, %v6626_v12 }
0x3af3   :  { %v6629_v35 = vpop.xlane.xlu0 %6628 }
0x3af4   :  { %v6642_v27 = vadd.f32 1e-06, %v6636_v11  ;;  %v6637_v36 = vmul.f32 0.03125, %v6629_v35 }
0x3af5   :  { %v6632_v40 = vpop.xlane.xlu1 %6631 }
0x3af6   :  { %8941 = vrsqrt.f32 %v6642_v27  ;;  %v6638_v6 = vmul.f32 0.03125, %v6632_v40  ;;  %v6643_v18 = vadd.f32 1e-06, %v6637_v36 }
0x3af7   :  { %v6733_v63 = vpop.permute.xlu0 %6732 }
0x3af8   :  { %v6644_v20 = vadd.f32 1e-06, %v6638_v6  ;;  %v6750_v52 = vmul.f32 %v6733_v63, %v6703_v19 }
0x3af9   :  { %v6735_v30 = vpop.permute.xlu1 %6734 }
0x3afa   :  { %8943 = vrsqrt.f32 %v6644_v20  ;;  %v6751_v48 = vmul.f32 %v6735_v30, %v6706_v7 }
0x3afb   :  { %8945 = vrsqrt.f32 %v6643_v18 }
0x3afc   :  { %v6756_v8 = vpack.c.bf16 %v6751_v48, %v6750_v52 }
0x3afe   :  { %8391 = vmatmul.mubr.msk.bf16.vlgmr.msra.gmra.mrb[188].mxu0 %vm4585_vm13, %v6756_v8 }
0x3aff   :  { %8394 = vmatprep.mubr.msk.bf16.mxu0 %vm9016_vm9, %v9015_v5 }
0x3b00   :  { %v8942_v4 = vpop.eup %8941 }
0x3b01   :  { %v10802_v38 = vmul.f32 %v8942_v4, %v6606_v22 }
0x3b03   :  { %v6658_v16 = vpack.c.bf16 %v10802_v38, %v10800_v1 }
0x3b04   :  { %v8944_v24 = vpop.eup %8943 }
0x3b05   :  { %8375 = vmatmul.mubr.msk.bf16.gmra.mrb[172].mxu1 %vm394_vm8, %v6658_v16  ;;  %v8946_v2 = vpop.eup %8945  ;;  %v10809_v56 = vmul.f32 %v8944_v24, %v6608_v3 }
0x3b06   :  { %8378 = vmatprep.mubr.msk.bf16.mxu1 %vm9016_vm9, %v9015_v5  ;;  %v10811_v44 = vmul.f32 %v8946_v2, %v6607_v46 }
0x3b08   :  { %v6659_v50 = vpack.c.bf16 %v10809_v56, %v10811_v44 }
0x3b0d   :  { %8379 = vmatmul.mubr.msk.bf16.gmra.mrb[176].mxu1 %vm394_vm8, %v6659_v50 }
0x3b0e   :  { %8406 = vmatprep.mubr.msk.bf16.mxu1 %vm9016_vm9, %v9015_v5 }
0x3bd1   :  { %v6802_v47 = vpop.f32.mrb[188].mxu0 }
0x3bd2   :  { %v8392_v13 = vpop.f32.mrb[189].mxu0  ;;  %v6803_v28 = vadd.f32 %v6802_v47, %v10755_v49  ;;  %v8584_v49 = vld [vmem:[%s10921_s7 + $0x18] sm:$0xff]   ;;  %v8586_v47 = vld [vmem:[%s10922_s8 + $0x28] sm:$0xff]  }
0x3bd3   :  { %v6805_v60 = vpop.f32.mrb[190].mxu0  ;;  %8405 = vmatpush3.bf16.msra.mxu1 %v8584_v49  ;;  %v8588_v13 = vld [vmem:[%s10922_s8 + $0x38] sm:$0xff]  }
0x3bd4   :  { %v8393_v0 = vpop.f32.mrb[191].mxu0  ;;  %v6825_v7 = vmul.f32 %v6803_v28, %v6803_v28  ;;  %v6806_v51 = vadd.f32 %v6805_v60, %v10753_v26  ;;  %8438 = vmatprep.subr.bf16.mxu1 %v9015_v5 }
0x3bd6   :  { %v6831_v39 = vsel %vm394_vm8, %v6825_v7, 0.0  ;;  %v6826_v45 = vmul.f32 %v6806_v51, %v6806_v51 }
0x3bd8   :  { %v6711_v42 = vpop.f32.mrb[172].mxu1  ;;  %v6834_v43 = vsel %vm394_vm8, %v6826_v45, 0.0 }
0x3bd9   :  { %6736 = vrot.lane.b32.xlu1 %v6711_v42, %s9018_s4  ;;  %v8376_v10 = vpop.f32.mrb[173].mxu1 }
0x3bda   :  { %v6714_v62 = vpop.f32.mrb[174].mxu1 }
0x3bdb   :  { %v8377_v59 = vpop.f32.mrb[175].mxu1 }
0x3bdd   :  { %6738 = vrot.lane.b32.xlu1 %v6714_v62, %s9018_s4 }
0x3be0   :  { %v6719_v25 = vpop.f32.mrb[176].mxu1 }
0x3be1   :  { %6740 = vrot.lane.b32.xlu0 %v6719_v25, %s9018_s4  ;;  %v8380_v37 = vpop.f32.mrb[177].mxu1 }
0x3be2   :  { %v6722_v32 = vpop.f32.mrb[178].mxu1 }
0x3be3   :  { %6742 = vrot.lane.b32.xlu1 %v6722_v32, %s9018_s4  ;;  %v8381_v19 = vpop.f32.mrb[179].mxu1 }
0x3c00   :  { %6832 = vadd.xlane.f32.xlu0 %v6831_v39 }
0x3c07   :  { %6835 = vadd.xlane.f32.xlu1 %v6834_v43 }
0x3c4b   :  { %v6737_v26 = vpop.permute.xlu1 %6736 }
0x3c4c   :  { %v6752_v31 = vmul.f32 %v6737_v26, %v6711_v42 }
0x3c4f   :  { %v6739_v33 = vpop.permute.xlu1 %6738 }
0x3c50   :  { %v6753_v34 = vmul.f32 %v6739_v33, %v6714_v62 }
0x3c52   :  { %v6757_v9 = vpack.c.bf16 %v6753_v34, %v6752_v31 }
0x3c53   :  { %v6741_v17 = vpop.permute.xlu0 %6740 }
0x3c54   :  { %8395 = vmatmul.mubr.msk.bf16.gmra.mrb[192].mxu0 %vm4585_vm13, %v6757_v9  ;;  %v6754_v22 = vmul.f32 %v6741_v17, %v6719_v25 }
0x3c55   :  { %v6743_v3 = vpop.permute.xlu1 %6742  ;;  %8398 = vmatprep.mubr.msk.bf16.mxu0 %vm9016_vm9, %v9015_v5 }
0x3c56   :  { %v6755_v55 = vmul.f32 %v6743_v3, %v6722_v32 }
0x3c58   :  { %v6758_v46 = vpack.c.bf16 %v6755_v55, %v6754_v22 }
0x3c5c   :  { %8399 = vmatmul.mubr.msk.bf16.gmra.mrb[196].mxu0 %vm4585_vm13, %v6758_v46 }
0x3c5d   :  { %8426 = vmatprep.mubr.msk.bf16.mxu0 %vm9016_vm9, %v9015_v5 }
0x3c8d   :  { %v6833_v29 = vpop.xlane.xlu0 %6832 }
0x3c8e   :  { %v6849_v23 = vmul.f32 0.03125, %v6833_v29 }
0x3c90   :  { %v6855_v58 = vadd.f32 1e-06, %v6849_v23 }
0x3c92   :  { %8947 = vrsqrt.f32 %v6855_v58 }
0x3c94   :  { %v6836_v53 = vpop.xlane.xlu1 %6835 }
0x3c95   :  { %v6850_v61 = vmul.f32 0.03125, %v6836_v53 }
0x3c97   :  { %v6856_v54 = vadd.f32 1e-06, %v6850_v61 }
0x3c99   :  { %8949 = vrsqrt.f32 %v6856_v54 }
0x3c9c   :  { %v8948_v15 = vpop.eup %8947 }
0x3c9d   :  { %v6867_v57 = vmul.f32 %v8948_v15, %v6803_v28 }
0x3ca3   :  { %v8950_v21 = vpop.eup %8949 }
0x3ca4   :  { %v6868_v12 = vmul.f32 %v8950_v21, %v6806_v51 }
0x3ca6   :  { %v6887_v11 = vpack.c.bf16 %v6868_v12, %v6867_v57 }
0x3ca8   :  { %8407 = vmatmul.mubr.msk.bf16.vlgmr.msra.gmra.mrb[180].mxu1 %vm394_vm8, %v6887_v11 }
0x3ca9   :  { %8410 = vmatprep.mubr.msk.bf16.mxu1 %vm9016_vm9, %v9015_v5 }
0x3d27   :  { %v6810_v35 = vpop.f32.mrb[192].mxu0 }
0x3d28   :  { %v6811_v27 = vadd.f32 %v6810_v35, %v10800_v1  ;;  %v8396_v36 = vpop.f32.mrb[193].mxu0 }
0x3d29   :  { %v6813_v40 = vpop.f32.mrb[194].mxu0 }
0x3d2a   :  { %v6827_v6 = vmul.f32 %v6811_v27, %v6811_v27  ;;  %v6814_v63 = vadd.f32 %v6813_v40, %v10802_v38  ;;  %v8397_v18 = vpop.f32.mrb[195].mxu0 }
0x3d2c   :  { %v6828_v20 = vmul.f32 %v6814_v63, %v6814_v63  ;;  %v6837_v30 = vsel %vm394_vm8, %v6827_v6, 0.0 }
0x3d2d   :  { %6838 = vadd.xlane.f32.xlu0 %v6837_v30 }
0x3d2e   :  { %v6840_v41 = vsel %vm394_vm8, %v6828_v20, 0.0 }
0x3d2f   :  { %v6818_v52 = vpop.f32.mrb[196].mxu0 }
0x3d30   :  { %v6819_v48 = vadd.f32 %v6818_v52, %v10811_v44  ;;  %v8400_v8 = vpop.f32.mrb[197].mxu0  ;;  %v8585_v44 = vld [vmem:[%s10922_s8 + $0x20] sm:$0xff]  }
0x3d31   :  { %6841 = vadd.xlane.f32.xlu0 %v6840_v41  ;;  %v6821_v4 = vpop.f32.mrb[198].mxu0  ;;  %8419 = vmatpush3.bf16.msra.mxu0 %v8585_v44 }
0x3d32   :  { %v6829_v16 = vmul.f32 %v6819_v48, %v6819_v48  ;;  %v6822_v1 = vadd.f32 %v6821_v4, %v10809_v56  ;;  %v8401_v24 = vpop.f32.mrb[199].mxu0  ;;  %8420 = vmatprep.subr.bf16.mxu0 %v9015_v5  ;;  %v8587_v56 = vld [vmem:[%s10922_s8 + $0x30] sm:$0xff]  }
0x3d34   :  { %v6830_v2 = vmul.f32 %v6822_v1, %v6822_v1  ;;  %v6843_v38 = vsel %vm394_vm8, %v6829_v16, 0.0 }
0x3d35   :  { %6844 = vadd.xlane.f32.xlu0 %v6843_v38  ;;  %8421 = vmatpush3.bf16.msra.mxu0 %v8586_v47 }
0x3d36   :  { %v6846_v50 = vsel %vm394_vm8, %v6830_v2, 0.0  ;;  %8422 = vmatprep.subr.bf16.mxu0 %v9015_v5 }
0x3d37   :  { %6847 = vadd.xlane.f32.xlu1 %v6846_v50 }
0x3d39   :  { %8423 = vmatpush3.bf16.msra.mxu0 %v8587_v56 }
0x3d3a   :  { %8424 = vmatprep.subr.bf16.mxu0 %v9015_v5 }
0x3d3d   :  { %8425 = vmatpush3.bf16.msra.mxu0 %v8588_v13 }
0x3d7b   :  { %v6945_v60 = vpop.f32.mrb[180].mxu1 }
0x3d7c   :  { %6974 = vrot.lane.b32.xlu0 %v6945_v60, %s9018_s4  ;;  %v8408_v0 = vpop.f32.mrb[181].mxu1 }
0x3d7d   :  { %v6948_v42 = vpop.f32.mrb[182].mxu1 }
0x3d7e   :  { %6976 = vrot.lane.b32.xlu1 %v6948_v42, %s9018_s4  ;;  %v8409_v10 = vpop.f32.mrb[183].mxu1 }
0x3dba   :  { %v6839_v62 = vpop.xlane.xlu0 %6838 }
0x3dbb   :  { %v6851_v59 = vmul.f32 0.03125, %v6839_v62 }
0x3dbd   :  { %v6857_v25 = vadd.f32 1e-06, %v6851_v59 }
0x3dbe   :  { %v6842_v37 = vpop.xlane.xlu0 %6841 }
0x3dbf   :  { %v6852_v32 = vmul.f32 0.03125, %v6842_v37  ;;  %8951 = vrsqrt.f32 %v6857_v25 }
0x3dc1   :  { %v6858_v19 = vadd.f32 1e-06, %v6852_v32  ;;  %v8589_v32 = vld [vmem:[%s10924_s10] sm:$0xff]  }
0x3dc2   :  { %v6845_v28 = vpop.xlane.xlu0 %6844  ;;  %8439 = vmatpush3.bf16.msra.mxu1 %v8589_v32 }
0x3dc3   :  { %8953 = vrsqrt.f32 %v6858_v19  ;;  %v6853_v7 = vmul.f32 0.03125, %v6845_v28  ;;  %8440 = vmatprep.subr.bf16.mxu1 %v9015_v5  ;;  %v8590_v19 = vld [vmem:[%s10924_s10 + $0x8] sm:$0xff]  }
0x3dc4   :  { %v6848_v51 = vpop.xlane.xlu1 %6847 }
0x3dc5   :  { %v6859_v39 = vadd.f32 1e-06, %v6853_v7  ;;  %v6854_v45 = vmul.f32 0.03125, %v6848_v51 }
0x3dc6   :  { %8441 = vmatpush3.bf16.msra.mxu1 %v8590_v19 }
0x3dc7   :  { %v6860_v43 = vadd.f32 1e-06, %v6854_v45  ;;  %8955 = vrsqrt.f32 %v6859_v39  ;;  %v7430_v45 = vld [vmem:[%s10916_s2 + $0x33] ss:$0 sm:$0xff] }
0x3dc9   :  { %8957 = vrsqrt.f32 %v6860_v43  ;;  %v8952_v14 = vpop.eup %8951 }
0x3dca   :  { %v6869_v26 = vmul.f32 %v8952_v14, %v6811_v27  ;;  %v7431_v14 = vld [vmem:[%s10916_s2 + $0x34] ss:$0 sm:$0xff] }
0x3dcd   :  { %v8954_v49 = vpop.eup %8953 }
0x3dce   :  { %v6870_v33 = vmul.f32 %v8954_v49, %v6814_v63 }
0x3dd0   :  { %v6888_v31 = vpack.c.bf16 %v6870_v33, %v6869_v26  ;;  %v7432_v33 = vld [vmem:[%s10917_s3] ss:$0 sm:$0xff] }
0x3dd1   :  { %v8956_v34 = vpop.eup %8955 }
0x3dd2   :  { %8411 = vmatmul.mubr.msk.bf16.gmra.mrb[184].mxu1 %vm394_vm8, %v6888_v31  ;;  %v6871_v3 = vmul.f32 %v8956_v34, %v6819_v48 }
0x3dd3   :  { %v8958_v9 = vpop.eup %8957  ;;  %8414 = vmatprep.mubr.msk.bf16.mxu1 %vm9016_vm9, %v9015_v5 }
0x3dd4   :  { %v6872_v17 = vmul.f32 %v8958_v9, %v6822_v1 }
0x3dd6   :  { %v6889_v22 = vpack.c.bf16 %v6872_v17, %v6871_v3 }
0x3dda   :  { %8415 = vmatmul.mubr.msk.bf16.gmra.mrb[188].mxu1 %vm394_vm8, %v6889_v22 }
0x3ddb   :  { %8442 = vmatprep.mubr.msk.bf16.mxu1 %vm9016_vm9, %v9015_v5 }
0x3dee   :  { %v6975_v55 = vpop.permute.xlu0 %6974 }
0x3def   :  { %v6992_v29 = vmul.f32 %v6975_v55, %v6945_v60 }
0x3df0   :  { %v6977_v46 = vpop.permute.xlu1 %6976 }
0x3df1   :  { %v6993_v23 = vmul.f32 %v6977_v46, %v6948_v42 }
0x3df3   :  { %v6998_v58 = vpack.c.bf16 %v6993_v23, %v6992_v29 }
0x3df5   :  { %8427 = vmatmul.mubr.msk.bf16.vlgmr.msra.gmra.mrb[200].mxu0 %vm4585_vm13, %v6998_v58 }
0x3df6   :  { %8430 = vmatprep.mubr.msk.bf16.mxu0 %vm9016_vm9, %v9015_v5 }
0x3ea5   :  { %v6953_v53 = vpop.f32.mrb[184].mxu1 }
0x3ea6   :  { %6978 = vrot.lane.b32.xlu1 %v6953_v53, %s9018_s4  ;;  %v8412_v61 = vpop.f32.mrb[185].mxu1 }
0x3ea7   :  { %v6956_v54 = vpop.f32.mrb[186].mxu1 }
0x3ea8   :  { %v8413_v15 = vpop.f32.mrb[187].mxu1 }
0x3eaa   :  { %6980 = vrot.lane.b32.xlu1 %v6956_v54, %s9018_s4 }
0x3ead   :  { %v6961_v21 = vpop.f32.mrb[188].mxu1 }
0x3eae   :  { %6982 = vrot.lane.b32.xlu0 %v6961_v21, %s9018_s4  ;;  %v8416_v57 = vpop.f32.mrb[189].mxu1 }
0x3eaf   :  { %v6964_v12 = vpop.f32.mrb[190].mxu1 }
0x3eb0   :  { %6984 = vrot.lane.b32.xlu1 %v6964_v12, %s9018_s4  ;;  %v8417_v11 = vpop.f32.mrb[191].mxu1 }
0x3ec8   :  { %v7068_v35 = vpop.f32.mrb[200].mxu0 }
0x3ec9   :  { %v8428_v27 = vpop.f32.mrb[201].mxu0 }
0x3eca   :  { %v7070_v36 = vpop.f32.mrb[202].mxu0 }
0x3ecb   :  { %v8429_v40 = vpop.f32.mrb[203].mxu0 }
0x3f18   :  { %v6979_v6 = vpop.permute.xlu1 %6978 }
0x3f19   :  { %v6994_v18 = vmul.f32 %v6979_v6, %v6953_v53 }
0x3f1c   :  { %v6981_v63 = vpop.permute.xlu1 %6980 }
0x3f1d   :  { %v6995_v20 = vmul.f32 %v6981_v63, %v6956_v54 }
0x3f1f   :  { %v6999_v30 = vpack.c.bf16 %v6995_v20, %v6994_v18 }
0x3f20   :  { %v6983_v52 = vpop.permute.xlu0 %6982 }
0x3f21   :  { %8431 = vmatmul.mubr.msk.bf16.gmra.mrb[204].mxu0 %vm4585_vm13, %v6999_v30  ;;  %v6996_v8 = vmul.f32 %v6983_v52, %v6961_v21 }
0x3f22   :  { %v6985_v48 = vpop.permute.xlu1 %6984  ;;  %8434 = vmatprep.mubr.msk.bf16.mxu0 %vm9016_vm9, %v9015_v5 }
0x3f23   :  { %v6997_v41 = vmul.f32 %v6985_v48, %v6964_v12 }
0x3f25   :  { %v7000_v4 = vpack.c.bf16 %v6997_v41, %v6996_v8 }
0x3f29   :  { %8435 = vmatmul.mubr.msk.bf16.gmra.mrb[208].mxu0 %vm4585_vm13, %v7000_v4 }
0x3ff4   :  { %v7074_v16 = vpop.f32.mrb[204].mxu0 }
0x3ff5   :  { %v8432_v1 = vpop.f32.mrb[205].mxu0  ;;  %v7075_v13 = vadd.f32 %v7074_v16, %v6869_v26 }
0x3ff6   :  { %v7077_v24 = vpop.f32.mrb[206].mxu0 }
0x3ff7   :  { %v8433_v2 = vpop.f32.mrb[207].mxu0 }
0x3ffc   :  { %v7081_v38 = vpop.f32.mrb[208].mxu0 }
0x3ffd   :  { %v8436_v50 = vpop.f32.mrb[209].mxu0 }
0x3ffe   :  { %v7083_v44 = vpop.f32.mrb[210].mxu0 }
0x3fff   :  { %v7084_v47 = vadd.f32 %v7083_v44, %v6872_v17  ;;  %v8437_v56 = vpop.f32.mrb[211].mxu0 }
0x4001   :  { %v7088_v60 = vrot.slane %v7084_v47, 7 }
0x4003   :  { %v7091_v0 = vsel %vm7090_vm14, %v7075_v13, %v7088_v60 }
0x4004   :  { %v7095_v42 = vsel %vm7094_vm15, %v7091_v0, 0.0 }
0x4005   :  { %7096 = vadd.xlane.f32.xlu0 %v7095_v42 }
0x4092   :  { %v7097_v10 = vpop.xlane.xlu0 %7096 }
0x4093   :  { %v7098_v62 = vmul.f32 0.03125, %v7097_v10 }
0x4095   :  { %v7099_v59 = vsub.f32 %v7091_v0, %v7098_v62 }
0x4097   :  { %v7100_v25 = vmul.f32 %v7099_v59, %v7099_v59 }
0x4099   :  { %v7101_v37 = vsel %vm7094_vm15, %v7100_v25, 0.0 }
0x409a   :  { %7102 = vadd.xlane.f32.xlu1 %v7101_v37 }
0x4127   :  { %v7103_v28 = vpop.xlane.xlu1 %7102 }
0x4128   :  { %v7104_v7 = vmul.f32 0.03125, %v7103_v28 }
0x412a   :  { %v7105_v51 = vadd.f32 1e-05, %v7104_v7 }
0x412c   :  { %8959 = vrsqrt.f32 %v7105_v51 }
0x4136   :  { %v8960_v39 = vpop.eup %8959 }
0x4137   :  { %v7107_v43 = vmul.f32 %v8960_v39, %v7099_v59 }
0x4139   :  { %v7112_v5 = vmul.f32 %v7430_v45, %v7107_v43 }
0x413b   :  { %v7117_v49 = vadd.f32 %v7431_v14, %v7112_v5 }
0x413d   :  { %v7118_v26 = vpack.c.bf16 %v7117_v49, %v7117_v49 }
0x413f   :  { %8443 = vmatmul.mubr.msk.bf16.vlgmr.msra.gmra.mrb[192].mxu1 %vm394_vm8, %v7118_v26 }
0x4212   :  { %v7179_v31 = vpop.f32.mrb[192].mxu1 }
0x4213   :  { %v7180_v34 = vadd.f32 %v7432_v33, %v7179_v31  ;;  %v8444_v9 = vpop.f32.mrb[193].mxu1 }
0x4214   :  { %v7182_v17 = vpop.f32.mrb[194].mxu1 }
0x4215   :  { %7185 = vst [vmem:[#allocation5] sm:$0x3] %v7180_v34  ;;  %v8445_v3 = vpop.f32.mrb[195].mxu1 }
0x4216   :  { %8998 = shalt.err (!%p8995_p9)
}
0x4217   :  { %s8999_s3 = scalar_lea.hbm %s10925_s11, 32 }
0x4218   :  { %p9000_p10 = scmp.ne.s32.totalorder %s10925_s11, %s8999_s3  ;;  %p9003_p11 = scmp.lt.u32.totalorder %s8999_s3, %s10925_s11 }
0x421a   :  { %p9005_p12 = pnand %p9003_p11, %p9000_p10 }
0x421c   :  { %9008 = shalt.err (!%p9005_p12)
}
0x421d   :  { %7195 = dma.vmem_to_hbm [thread:$0]  %s7193_s9, 32, %s10925_s11, [#allocation3]  }
0x421e   :  { %9011 = dma.done.wait [#allocation3], 32  }
0x421f   :  { %9012 = vsyncadd [#allocation3], 4294967264 }
0x4220   :  { %7199 = vsyncpa [#allocation3], 1 }
0x4221   :  { %7200 = vsyncpa [#allocation4], 1 }

</bundles_post_ra>
